<compile_context>
chip_gen: v7x
topology: tpu7x:2x2x1
jax: 0.10.0
libtpu: 0.0.40
codegen_flags: <defaults>
</compile_context>

<pallas_src>
import functools

import numpy as np
import jax
import jax.numpy as jnp
from jax.experimental import pallas as pl
from jax.experimental.pallas import tpu as pltpu

BN_EPS = 1e-3

_PARALLEL_1D = pltpu.CompilerParams(
    dimension_semantics=("parallel",),
    vmem_limit_bytes=48 * 1024 * 1024,
)


# ----------------------------- Pallas kernels ------------------------------ #

def _fused_1x1_kernel(x_ref, w_ref, b_ref, o_ref):
    # x_ref: (TM, Ci) f32   w_ref: (Ci, Ctot) bf16   b_ref: (1, Ctot) f32
    # o_ref: (TM, Ctot) bf16  -- single lane-dense output, split in wrapper.
    y = jnp.dot(x_ref[...].astype(jnp.bfloat16), w_ref[...],
                preferred_element_type=jnp.float32)
    y = jnp.maximum(y + b_ref[...], 0.0)
    o_ref[...] = y.astype(o_ref.dtype)


def _conv3x3_bn_relu_kernel(x_ref, w_ref, b_ref, o_ref, xp_ref):
    # x_ref: (1, H, W, Ci) bf16   w_ref: (3, 3, Ci, Co) bf16
    # b_ref: (1, Co) f32          o_ref: (1, H, W, Co) f32
    # xp_ref: (H+2, W+2, Ci) bf16 VMEM scratch (zero-padded halo).
    _, H, W, Ci = x_ref.shape
    Co = w_ref.shape[-1]
    xp_ref[...] = jnp.zeros_like(xp_ref)            # halo = 0
    xp_ref[1:H + 1, 1:W + 1, :] = x_ref[0]          # interior
    w = w_ref[...]                                  # (3, 3, Ci, Co), tiny
    acc = jnp.zeros((H * W, Co), jnp.float32) + b_ref[...]
    for dy in range(3):                             # per-tap accumulation
        for dx in range(3):
            tap = xp_ref[dy:dy + H, dx:dx + W, :].reshape(H * W, Ci)
            acc = acc + jnp.dot(tap, w[dy, dx],
                                preferred_element_type=jnp.float32)
    o_ref[...] = jnp.maximum(acc, 0.0).reshape(1, H, W, Co)


def _maxpool_proj_bn_relu_kernel(x_ref, w_ref, b_ref, o_ref, xp_ref):
    # Fused MaxPool2d(3,1,1) + 1x1 conv + BN + ReLU.
    # x_ref: (1, H, W, Ci) f32   w_ref: (Ci, Co) bf16   b_ref: (1, Co) f32
    # o_ref: (1, H, W, Co) f32   xp_ref: (H+2, W+2, Ci) f32 scratch (-inf halo)
    _, H, W, Ci = x_ref.shape
    Co = w_ref.shape[-1]
    xp_ref[...] = jnp.full_like(xp_ref, -jnp.inf)
    xp_ref[1:H + 1, 1:W + 1, :] = x_ref[0]
    pooled = xp_ref[1:H + 1, 1:W + 1, :]            # center tap (always valid)
    for dy in range(3):
        for dx in range(3):
            if dy == 1 and dx == 1:
                continue
            pooled = jnp.maximum(pooled, xp_ref[dy:dy + H, dx:dx + W, :])
    y = jnp.dot(pooled.astype(jnp.bfloat16).reshape(H * W, Ci), w_ref[...],
                preferred_element_type=jnp.float32)
    y = jnp.maximum(y + b_ref[...], 0.0)
    o_ref[...] = y.reshape(1, H, W, Co)


# ------------------------------ wrappers ----------------------------------- #

def _pick_tile_m(m, target):
    """Largest multiple-of-8 divisor of m that is <= target (None if none)."""
    t = min(target, m)
    t -= t % 8
    while t >= 8:
        if m % t == 0:
            return t
        t -= 8
    return None


def fused_conv1x1_bn_relu(x2d, w, bias, target_tile_m=512):
    """Three BN-folded 1x1 convs over the same input as one wide matmul.

    x2d: (M, Ci) f32 with M = N*H*W.  Returns one lane-dense (M, Ctot) bf16
    activation (split into the three branches by the caller).
    """
    M, Ci = x2d.shape
    Ctot = w.shape[1]
    # VMEM budget cap for the double-buffered input + output tiles.
    bytes_per_row = Ci * 4 + Ctot * 2
    cap = max(8, ((8 * 1024 * 1024) // max(bytes_per_row, 1)) // 8 * 8)
    target = max(8, min(target_tile_m, cap))

    tile_m = _pick_tile_m(M, target)
    if tile_m is None:
        # Ragged fallback: pad M up (rare; costs one extra HBM pass).
        tile_m = max(8, (min(target, M) // 8) * 8)
        m_pad = pl.cdiv(M, tile_m) * tile_m
        x2d = jnp.pad(x2d, ((0, m_pad - M), (0, 0)))
    else:
        m_pad = M

    y = pl.pallas_call(
        _fused_1x1_kernel,
        out_shape=jax.ShapeDtypeStruct((m_pad, Ctot), jnp.bfloat16),
        grid=(m_pad // tile_m,),
        in_specs=[pl.BlockSpec((tile_m, Ci), lambda i: (i, 0)),
                  pl.BlockSpec((Ci, Ctot), lambda i: (0, 0)),
                  pl.BlockSpec((1, Ctot), lambda i: (0, 0))],
        out_specs=pl.BlockSpec((tile_m, Ctot), lambda i: (i, 0)),
        compiler_params=_PARALLEL_1D,
    )(x2d, w, bias.reshape(1, Ctot))
    return y[:M] if m_pad != M else y


def conv3x3_bn_relu(x_nhwc, w, bias):
    # x_nhwc: (N, H, W, Ci) bf16; w: (3, 3, Ci, Co) bf16; bias: (Co,) f32
    N, H, W, Ci = x_nhwc.shape
    Co = w.shape[-1]
    return pl.pallas_call(
        _conv3x3_bn_relu_kernel,
        out_shape=jax.ShapeDtypeStruct((N, H, W, Co), jnp.float32),
        grid=(N,),
        in_specs=[pl.BlockSpec((1, H, W, Ci), lambda n: (n, 0, 0, 0)),
                  pl.BlockSpec((3, 3, Ci, Co), lambda n: (0, 0, 0, 0)),
                  pl.BlockSpec((1, Co), lambda n: (0, 0))],
        out_specs=pl.BlockSpec((1, H, W, Co), lambda n: (n, 0, 0, 0)),
        scratch_shapes=[pltpu.VMEM((H + 2, W + 2, Ci), jnp.bfloat16)],
        compiler_params=_PARALLEL_1D,
    )(x_nhwc, w, bias.reshape(1, Co))


def maxpool_proj_bn_relu(x_nhwc, w, bias):
    # x_nhwc: (N, H, W, Ci) f32; w: (Ci, Co) bf16; bias: (Co,) f32
    N, H, W, Ci = x_nhwc.shape
    Co = w.shape[-1]
    return pl.pallas_call(
        _maxpool_proj_bn_relu_kernel,
        out_shape=jax.ShapeDtypeStruct((N, H, W, Co), jnp.float32),
        grid=(N,),
        in_specs=[pl.BlockSpec((1, H, W, Ci), lambda n: (n, 0, 0, 0)),
                  pl.BlockSpec((Ci, Co), lambda n: (0, 0)),
                  pl.BlockSpec((1, Co), lambda n: (0, 0))],
        out_specs=pl.BlockSpec((1, H, W, Co), lambda n: (n, 0, 0, 0)),
        scratch_shapes=[pltpu.VMEM((H + 2, W + 2, Ci), jnp.float32)],
        compiler_params=_PARALLEL_1D,
    )(x_nhwc, w, bias.reshape(1, Co))


# ------------------------- parameter construction -------------------------- #

def make_basicconv_params(key, cin, cout, ksize):
    """Deterministic params for Conv2d(bias=False) + BatchNorm2d(eval)."""
    kw_, kg, kb, km, kv = jax.random.split(key, 5)
    # PyTorch conv weight layout: (Cout, Cin, kh, kw)
    w = 0.1 * jax.random.normal(kw_, (cout, cin, ksize, ksize), jnp.float32)
    gamma = jax.random.uniform(kg, (cout,), jnp.float32, 0.5, 1.5)
    beta = 0.1 * jax.random.normal(kb, (cout,), jnp.float32)
    rmean = 0.1 * jax.random.normal(km, (cout,), jnp.float32)
    rvar = jax.random.uniform(kv, (cout,), jnp.float32, 0.5, 1.5)
    scale = gamma / jnp.sqrt(rvar + BN_EPS)
    bias = beta - rmean * scale
    if ksize == 1:
        w_k = w[:, :, 0, 0].T * scale[None, :]                     # (Cin, Cout)
    else:
        # (Cout,Cin,3,3) -> (3,3,Cin,Cout); BN scale folded over Cout.
        w_k = jnp.transpose(w, (2, 3, 1, 0)) * scale[None, None, None, :]
    return {"w_torch": w, "w": w_k.astype(jnp.bfloat16),
            "scale": scale, "bias": bias}


def init_inception_params(key, in_channels, ch1x1, ch3x3red, ch3x3,
                          ch5x5red, ch5x5, pool_proj):
    keys = jax.random.split(key, 6)
    p = {
        "b1":      make_basicconv_params(keys[0], in_channels, ch1x1,    1),
        "b2_red":  make_basicconv_params(keys[1], in_channels, ch3x3red, 1),
        "b2_conv": make_basicconv_params(keys[2], ch3x3red,    ch3x3,    3),
        "b3_red":  make_basicconv_params(keys[3], in_channels, ch5x5red, 1),
        "b3_conv": make_basicconv_params(keys[4], ch5x5red,    ch5x5,    3),
        "b4_proj": make_basicconv_params(keys[5], in_channels, pool_proj, 1),
    }
    # Pre-fuse the three 1x1 convs that read the same input (one wide matmul).
    p["fused1x1"] = {
        "w": jnp.concatenate([p["b1"]["w"], p["b2_red"]["w"],
                              p["b3_red"]["w"]], axis=1),           # bf16
        "bias": jnp.concatenate([p["b1"]["bias"], p["b2_red"]["bias"],
                                 p["b3_red"]["bias"]]),              # f32
    }
    return p


# ------------------------------ Inception ---------------------------------- #

def inception_forward(x_nchw, params):
    """x_nchw: (N, Cin, H, W) float32 -> (N, Cout_total, H, W) float32."""
    N, Cin, H, W = x_nchw.shape
    x = jnp.transpose(x_nchw, (0, 2, 3, 1))        # NCHW -> NHWC
    x2d = x.reshape(N * H * W, Cin)

    c1 = params["b1"]["w"].shape[1]
    c2r = params["b2_red"]["w"].shape[1]
    c3r = params["b3_red"]["w"].shape[1]

    pf = params["fused1x1"]
    y = fused_conv1x1_bn_relu(x2d, pf["w"], pf["bias"])   # (M, Ctot) bf16
    b1 = y[:, :c1].reshape(N, H, W, c1)
    b2r = y[:, c1:c1 + c2r].reshape(N, H, W, c2r)
    b3r = y[:, c1 + c2r:].reshape(N, H, W, c3r)

    p = params["b2_conv"]
    b2 = conv3x3_bn_relu(b2r, p["w"], p["bias"])
    p = params["b3_conv"]
    b3 = conv3x3_bn_relu(b3r, p["w"], p["bias"])
    p = params["b4_proj"]
    b4 = maxpool_proj_bn_relu(x, p["w"], p["bias"])

    out = jnp.concatenate([b1.astype(jnp.float32), b2, b3, b4], axis=-1)
    return jnp.transpose(out, (0, 3, 1, 2))            # NHWC -> NCHW


# --------------------------- pure-JAX reference ----------------------------- #

def _ref_basicconv(x_nchw, p, ksize):
    pad = (ksize - 1) // 2
    y = jax.lax.conv_general_dilated(
        x_nchw, p["w_torch"], window_strides=(1, 1),
        padding=((pad, pad), (pad, pad)),
        dimension_numbers=("NCHW", "OIHW", "NCHW"))
    y = y * p["scale"][None, :, None, None] + p["bias"][None, :, None, None]
    return jnp.maximum(y, 0.0)


def _ref_maxpool(x_nchw):
    return jax.lax.reduce_window(
        x_nchw, -jnp.inf, jax.lax.max,
        window_dimensions=(1, 1, 3, 3), window_strides=(1, 1, 1, 1),
        padding=((0, 0), (0, 0), (1, 1), (1, 1)))


def inception_reference(x_nchw, params):
    b1 = _ref_basicconv(x_nchw, params["b1"], 1)
    b2 = _ref_basicconv(_ref_basicconv(x_nchw, params["b2_red"], 1),
                        params["b2_conv"], 3)
    b3 = _ref_basicconv(_ref_basicconv(x_nchw, params["b3_red"], 1),
                        params["b3_conv"], 3)
    b4 = _ref_basicconv(_ref_maxpool(x_nchw), params["b4_proj"], 1)
    return jnp.concatenate([b1, b2, b3, b4], axis=1)


# --------------------------------- main ------------------------------------ #

if __name__ == "__main__":
    key = jax.random.PRNGKey(0)
    k_x, k_p = jax.random.split(key)

    # small shapes: batch=2, in_channels=4, spatial=16x16
    N, Cin, H, W = 2, 4, 16, 16
    ch1x1, ch3x3red, ch3x3, ch5x5red, ch5x5, pool_proj = 4, 4, 8, 2, 4, 4

    x = jax.random.normal(k_x, (N, Cin, H, W), jnp.float32)
    params = init_inception_params(k_p, Cin, ch1x1, ch3x3red, ch3x3,
                                   ch5x5red, ch5x5, pool_proj)

    fwd = jax.jit(inception_forward)
    out = jax.block_until_ready(fwd(x, params))
    assert out.shape == (N, ch1x1 + ch3x3 + ch5x5 + pool_proj, H, W), out.shape

    ref = jax.block_until_ready(inception_reference(x, params))
    np.testing.assert_allclose(np.asarray(out), np.asarray(ref),
                               rtol=2e-2, atol=2e-2)

    print("KERNEL_OK")
</pallas_src>

<mosaic_0001>
module attributes {stable_mosaic.version = 11 : i64} {
  func.func @_fused_1x1_kernel(%arg0: i32, %arg1: memref<512x4xf32, #tpu.memory_space<vmem>>, %arg2: memref<4x10xbf16, #tpu.memory_space<vmem>>, %arg3: memref<1x10xf32, #tpu.memory_space<vmem>>, %arg4: memref<512x10xbf16, #tpu.memory_space<vmem>>) attributes {dimension_semantics = [#tpu.dimension_semantics<parallel>], iteration_bounds = array<i64: 1>, scalar_prefetch = 0 : i64, scratch_operands = 0 : i64, tpu.core_type = #tpu.core_type<tc>, window_params = [{transform_indices = @transform_0, window_bounds = array<i64: 512, 4>}, {pipeline_mode = #tpu.pipeline_mode<synchronous>, transform_indices = @transform_1, window_bounds = array<i64: 4, 10>}, {pipeline_mode = #tpu.pipeline_mode<synchronous>, transform_indices = @transform_2, window_bounds = array<i64: 1, 10>}, {transform_indices = @transform_3, window_bounds = array<i64: 512, 10>}]} {
    %c0 = arith.constant 0 : index
    %c0_0 = arith.constant 0 : index
    %0 = vector.load %arg1[%c0, %c0_0] : memref<512x4xf32, #tpu.memory_space<vmem>>, vector<512x4xf32>
    %1 = arith.truncf %0 : vector<512x4xf32> to vector<512x4xbf16>
    %c0_1 = arith.constant 0 : index
    %c0_2 = arith.constant 0 : index
    %2 = vector.load %arg2[%c0_1, %c0_2] : memref<4x10xbf16, #tpu.memory_space<vmem>>, vector<4x10xbf16>
    %cst = arith.constant dense<0.000000e+00> : vector<512x10xf32>
    %3 = tpu.matmul %1, %2, %cst {dimension_numbers = #tpu.dot_dimension_numbers<[1], [0], [0], [1], [0, 0, 1, 1], [], []>} : vector<512x4xbf16>, vector<4x10xbf16>, vector<512x10xf32> -> vector<512x10xf32>
    %c0_3 = arith.constant 0 : index
    %c0_4 = arith.constant 0 : index
    %4 = vector.load %arg3[%c0_3, %c0_4] : memref<1x10xf32, #tpu.memory_space<vmem>>, vector<1x10xf32>
    %5 = vector.broadcast %4 : vector<1x10xf32> to vector<512x10xf32>
    %6 = arith.addf %3, %5 : vector<512x10xf32>
    %cst_5 = arith.constant 0.000000e+00 : f32
    %7 = vector.broadcast %cst_5 : f32 to vector<512x10xf32>
    %8 = arith.maximumf %6, %7 : vector<512x10xf32>
    %9 = arith.truncf %8 : vector<512x10xf32> to vector<512x10xbf16>
    %c0_6 = arith.constant 0 : index
    %c0_7 = arith.constant 0 : index
    %10 = vector.load %arg4[%c0_6, %c0_7] : memref<512x10xbf16, #tpu.memory_space<vmem>>, vector<512x10xbf16>
    tpu.vector_store %arg4[%c0_6, %c0_7], %9 {strides = array<i32>} : memref<512x10xbf16, #tpu.memory_space<vmem>>, vector<512x10xbf16>,
    return
  }
  func.func @transform_0(%arg0: i32) -> (i32, i32) {
    %c0_i32 = arith.constant 0 : i32
    %c0_i32_0 = arith.constant 0 : i32
    return %arg0, %c0_i32 : i32, i32
  }
  func.func @transform_1(%arg0: i32) -> (i32, i32) {
    %c0_i32 = arith.constant 0 : i32
    %c0_i32_0 = arith.constant 0 : i32
    %c0_i32_1 = arith.constant 0 : i32
    return %c0_i32, %c0_i32_0 : i32, i32
  }
  func.func @transform_2(%arg0: i32) -> (i32, i32) {
    %c0_i32 = arith.constant 0 : i32
    %c0_i32_0 = arith.constant 0 : i32
    %c0_i32_1 = arith.constant 0 : i32
    return %c0_i32, %c0_i32_0 : i32, i32
  }
  func.func @transform_3(%arg0: i32) -> (i32, i32) {
    %c0_i32 = arith.constant 0 : i32
    %c0_i32_0 = arith.constant 0 : i32
    return %arg0, %c0_i32 : i32, i32
  }
}

module attributes {stable_mosaic.version = 11 : i64} {
  func.func @_conv3x3_bn_relu_kernel(%arg0: i32, %arg1: memref<1x16x16x2xbf16, #tpu.memory_space<vmem>>, %arg2: memref<3x3x2x4xbf16, #tpu.memory_space<vmem>>, %arg3: memref<1x4xf32, #tpu.memory_space<vmem>>, %arg4: memref<1x16x16x4xf32, #tpu.memory_space<vmem>>, %arg5: memref<18x18x2xbf16, #tpu.memory_space<vmem>>) attributes {dimension_semantics = [#tpu.dimension_semantics<parallel>], iteration_bounds = array<i64: 2>, scalar_prefetch = 0 : i64, scratch_operands = 1 : i64, tpu.core_type = #tpu.core_type<tc>, window_params = [{transform_indices = @transform_0, window_bounds = array<i64: 1, 16, 16, 2>}, {pipeline_mode = #tpu.pipeline_mode<synchronous>, transform_indices = @transform_1, window_bounds = array<i64: 3, 3, 2, 4>}, {pipeline_mode = #tpu.pipeline_mode<synchronous>, transform_indices = @transform_2, window_bounds = array<i64: 1, 4>}, {transform_indices = @transform_3, window_bounds = array<i64: 1, 16, 16, 4>}]} {
    %cst = arith.constant 0.000000e+00 : bf16
    %0 = vector.broadcast %cst : bf16 to vector<18x18x2xbf16>
    %c0 = arith.constant 0 : index
    %c0_0 = arith.constant 0 : index
    %c0_1 = arith.constant 0 : index
    %1 = vector.load %arg5[%c0, %c0_0, %c0_1] : memref<18x18x2xbf16, #tpu.memory_space<vmem>>, vector<18x18x2xbf16>
    tpu.vector_store %arg5[%c0, %c0_0, %c0_1], %0 {strides = array<i32>} : memref<18x18x2xbf16, #tpu.memory_space<vmem>>, vector<18x18x2xbf16>,
    %c0_2 = arith.constant 0 : index
    %c0_3 = arith.constant 0 : index
    %c0_4 = arith.constant 0 : index
    %c0_5 = arith.constant 0 : index
    %2 = vector.load %arg1[%c0_2, %c0_3, %c0_4, %c0_5] : memref<1x16x16x2xbf16, #tpu.memory_space<vmem>>, vector<1x16x16x2xbf16>
    %3 = vector.shape_cast %2 : vector<1x16x16x2xbf16> to vector<16x16x2xbf16>
    %c1 = arith.constant 1 : index
    %c1_6 = arith.constant 1 : index
    %c0_7 = arith.constant 0 : index
    %4 = vector.load %arg5[%c1, %c1_6, %c0_7] : memref<18x18x2xbf16, #tpu.memory_space<vmem>>, vector<16x16x2xbf16>
    tpu.vector_store %arg5[%c1, %c1_6, %c0_7], %3 {strides = array<i32>} : memref<18x18x2xbf16, #tpu.memory_space<vmem>>, vector<16x16x2xbf16>,
    %c0_8 = arith.constant 0 : index
    %c0_9 = arith.constant 0 : index
    %c0_10 = arith.constant 0 : index
    %c0_11 = arith.constant 0 : index
    %5 = vector.load %arg2[%c0_8, %c0_9, %c0_10, %c0_11] : memref<3x3x2x4xbf16, #tpu.memory_space<vmem>>, vector<3x3x2x4xbf16>
    %cst_12 = arith.constant 0.000000e+00 : f32
    %6 = vector.broadcast %cst_12 : f32 to vector<256x4xf32>
    %c0_13 = arith.constant 0 : index
    %c0_14 = arith.constant 0 : index
    %7 = vector.load %arg3[%c0_13, %c0_14] : memref<1x4xf32, #tpu.memory_space<vmem>>, vector<1x4xf32>
    %8 = vector.broadcast %7 : vector<1x4xf32> to vector<256x4xf32>
    %9 = arith.addf %6, %8 : vector<256x4xf32>
    %c0_15 = arith.constant 0 : index
    %c0_16 = arith.constant 0 : index
    %c0_17 = arith.constant 0 : index
    %10 = vector.load %arg5[%c0_15, %c0_16, %c0_17] : memref<18x18x2xbf16, #tpu.memory_space<vmem>>, vector<16x16x2xbf16>
    %11 = vector.shape_cast %10 : vector<16x16x2xbf16> to vector<256x2xbf16>
    %12 = vector.extract_strided_slice %5 {offsets = [0, 0, 0, 0], sizes = [1, 1, 2, 4], strides = [1, 1, 1, 1]} : vector<3x3x2x4xbf16> to vector<1x1x2x4xbf16>
    %13 = vector.shape_cast %12 : vector<1x1x2x4xbf16> to vector<2x4xbf16>
    %cst_18 = arith.constant dense<0.000000e+00> : vector<256x4xf32>
    %14 = tpu.matmul %11, %13, %cst_18 {dimension_numbers = #tpu.dot_dimension_numbers<[1], [0], [0], [1], [0, 0, 1, 1], [], []>} : vector<256x2xbf16>, vector<2x4xbf16>, vector<256x4xf32> -> vector<256x4xf32>
    %15 = arith.addf %9, %14 : vector<256x4xf32>
    %c0_19 = arith.constant 0 : index
    %c1_20 = arith.constant 1 : index
    %c0_21 = arith.constant 0 : index
    %16 = vector.load %arg5[%c0_19, %c1_20, %c0_21] : memref<18x18x2xbf16, #tpu.memory_space<vmem>>, vector<16x16x2xbf16>
    %17 = vector.shape_cast %16 : vector<16x16x2xbf16> to vector<256x2xbf16>
    %18 = vector.extract_strided_slice %5 {offsets = [0, 1, 0, 0], sizes = [1, 1, 2, 4], strides = [1, 1, 1, 1]} : vector<3x3x2x4xbf16> to vector<1x1x2x4xbf16>
    %19 = vector.shape_cast %18 : vector<1x1x2x4xbf16> to vector<2x4xbf16>
    %cst_22 = arith.constant dense<0.000000e+00> : vector<256x4xf32>
    %20 = tpu.matmul %17, %19, %cst_22 {dimension_numbers = #tpu.dot_dimension_numbers<[1], [0], [0], [1], [0, 0, 1, 1], [], []>} : vector<256x2xbf16>, vector<2x4xbf16>, vector<256x4xf32> -> vector<256x4xf32>
    %21 = arith.addf %15, %20 : vector<256x4xf32>
    %c0_23 = arith.constant 0 : index
    %c2 = arith.constant 2 : index
    %c0_24 = arith.constant 0 : index
    %22 = vector.load %arg5[%c0_23, %c2, %c0_24] : memref<18x18x2xbf16, #tpu.memory_space<vmem>>, vector<16x16x2xbf16>
    %23 = vector.shape_cast %22 : vector<16x16x2xbf16> to vector<256x2xbf16>
    %24 = vector.extract_strided_slice %5 {offsets = [0, 2, 0, 0], sizes = [1, 1, 2, 4], strides = [1, 1, 1, 1]} : vector<3x3x2x4xbf16> to vector<1x1x2x4xbf16>
    %25 = vector.shape_cast %24 : vector<1x1x2x4xbf16> to vector<2x4xbf16>
    %cst_25 = arith.constant dense<0.000000e+00> : vector<256x4xf32>
    %26 = tpu.matmul %23, %25, %cst_25 {dimension_numbers = #tpu.dot_dimension_numbers<[1], [0], [0], [1], [0, 0, 1, 1], [], []>} : vector<256x2xbf16>, vector<2x4xbf16>, vector<256x4xf32> -> vector<256x4xf32>
    %27 = arith.addf %21, %26 : vector<256x4xf32>
    %c1_26 = arith.constant 1 : index
    %c0_27 = arith.constant 0 : index
    %c0_28 = arith.constant 0 : index
    %28 = vector.load %arg5[%c1_26, %c0_27, %c0_28] : memref<18x18x2xbf16, #tpu.memory_space<vmem>>, vector<16x16x2xbf16>
    %29 = vector.shape_cast %28 : vector<16x16x2xbf16> to vector<256x2xbf16>
    %30 = vector.extract_strided_slice %5 {offsets = [1, 0, 0, 0], sizes = [1, 1, 2, 4], strides = [1, 1, 1, 1]} : vector<3x3x2x4xbf16> to vector<1x1x2x4xbf16>
    %31 = vector.shape_cast %30 : vector<1x1x2x4xbf16> to vector<2x4xbf16>
    %cst_29 = arith.constant dense<0.000000e+00> : vector<256x4xf32>
    %32 = tpu.matmul %29, %31, %cst_29 {dimension_numbers = #tpu.dot_dimension_numbers<[1], [0], [0], [1], [0, 0, 1, 1], [], []>} : vector<256x2xbf16>, vector<2x4xbf16>, vector<256x4xf32> -> vector<256x4xf32>
    %33 = arith.addf %27, %32 : vector<256x4xf32>
    %c1_30 = arith.constant 1 : index
    %c1_31 = arith.constant 1 : index
    %c0_32 = arith.constant 0 : index
    %34 = vector.load %arg5[%c1_30, %c1_31, %c0_32] : memref<18x18x2xbf16, #tpu.memory_space<vmem>>, vector<16x16x2xbf16>
    %35 = vector.shape_cast %34 : vector<16x16x2xbf16> to vector<256x2xbf16>
    %36 = vector.extract_strided_slice %5 {offsets = [1, 1, 0, 0], sizes = [1, 1, 2, 4], strides = [1, 1, 1, 1]} : vector<3x3x2x4xbf16> to vector<1x1x2x4xbf16>
    %37 = vector.shape_cast %36 : vector<1x1x2x4xbf16> to vector<2x4xbf16>
    %cst_33 = arith.constant dense<0.000000e+00> : vector<256x4xf32>
    %38 = tpu.matmul %35, %37, %cst_33 {dimension_numbers = #tpu.dot_dimension_numbers<[1], [0], [0], [1], [0, 0, 1, 1], [], []>} : vector<256x2xbf16>, vector<2x4xbf16>, vector<256x4xf32> -> vector<256x4xf32>
    %39 = arith.addf %33, %38 : vector<256x4xf32>
    %c1_34 = arith.constant 1 : index
    %c2_35 = arith.constant 2 : index
    %c0_36 = arith.constant 0 : index
    %40 = vector.load %arg5[%c1_34, %c2_35, %c0_36] : memref<18x18x2xbf16, #tpu.memory_space<vmem>>, vector<16x16x2xbf16>
    %41 = vector.shape_cast %40 : vector<16x16x2xbf16> to vector<256x2xbf16>
    %42 = vector.extract_strided_slice %5 {offsets = [1, 2, 0, 0], sizes = [1, 1, 2, 4], strides = [1, 1, 1, 1]} : vector<3x3x2x4xbf16> to vector<1x1x2x4xbf16>
    %43 = vector.shape_cast %42 : vector<1x1x2x4xbf16> to vector<2x4xbf16>
    %cst_37 = arith.constant dense<0.000000e+00> : vector<256x4xf32>
    %44 = tpu.matmul %41, %43, %cst_37 {dimension_numbers = #tpu.dot_dimension_numbers<[1], [0], [0], [1], [0, 0, 1, 1], [], []>} : vector<256x2xbf16>, vector<2x4xbf16>, vector<256x4xf32> -> vector<256x4xf32>
    %45 = arith.addf %39, %44 : vector<256x4xf32>
    %c2_38 = arith.constant 2 : index
    %c0_39 = arith.constant 0 : index
    %c0_40 = arith.constant 0 : index
    %46 = vector.load %arg5[%c2_38, %c0_39, %c0_40] : memref<18x18x2xbf16, #tpu.memory_space<vmem>>, vector<16x16x2xbf16>
    %47 = vector.shape_cast %46 : vector<16x16x2xbf16> to vector<256x2xbf16>
    %48 = vector.extract_strided_slice %5 {offsets = [2, 0, 0, 0], sizes = [1, 1, 2, 4], strides = [1, 1, 1, 1]} : vector<3x3x2x4xbf16> to vector<1x1x2x4xbf16>
    %49 = vector.shape_cast %48 : vector<1x1x2x4xbf16> to vector<2x4xbf16>
    %cst_41 = arith.constant dense<0.000000e+00> : vector<256x4xf32>
    %50 = tpu.matmul %47, %49, %cst_41 {dimension_numbers = #tpu.dot_dimension_numbers<[1], [0], [0], [1], [0, 0, 1, 1], [], []>} : vector<256x2xbf16>, vector<2x4xbf16>, vector<256x4xf32> -> vector<256x4xf32>
    %51 = arith.addf %45, %50 : vector<256x4xf32>
    %c2_42 = arith.constant 2 : index
    %c1_43 = arith.constant 1 : index
    %c0_44 = arith.constant 0 : index
    %52 = vector.load %arg5[%c2_42, %c1_43, %c0_44] : memref<18x18x2xbf16, #tpu.memory_space<vmem>>, vector<16x16x2xbf16>
    %53 = vector.shape_cast %52 : vector<16x16x2xbf16> to vector<256x2xbf16>
    %54 = vector.extract_strided_slice %5 {offsets = [2, 1, 0, 0], sizes = [1, 1, 2, 4], strides = [1, 1, 1, 1]} : vector<3x3x2x4xbf16> to vector<1x1x2x4xbf16>
    %55 = vector.shape_cast %54 : vector<1x1x2x4xbf16> to vector<2x4xbf16>
    %cst_45 = arith.constant dense<0.000000e+00> : vector<256x4xf32>
    %56 = tpu.matmul %53, %55, %cst_45 {dimension_numbers = #tpu.dot_dimension_numbers<[1], [0], [0], [1], [0, 0, 1, 1], [], []>} : vector<256x2xbf16>, vector<2x4xbf16>, vector<256x4xf32> -> vector<256x4xf32>
    %57 = arith.addf %51, %56 : vector<256x4xf32>
    %c2_46 = arith.constant 2 : index
    %c2_47 = arith.constant 2 : index
    %c0_48 = arith.constant 0 : index
    %58 = vector.load %arg5[%c2_46, %c2_47, %c0_48] : memref<18x18x2xbf16, #tpu.memory_space<vmem>>, vector<16x16x2xbf16>
    %59 = vector.shape_cast %58 : vector<16x16x2xbf16> to vector<256x2xbf16>
    %60 = vector.extract_strided_slice %5 {offsets = [2, 2, 0, 0], sizes = [1, 1, 2, 4], strides = [1, 1, 1, 1]} : vector<3x3x2x4xbf16> to vector<1x1x2x4xbf16>
    %61 = vector.shape_cast %60 : vector<1x1x2x4xbf16> to vector<2x4xbf16>
    %cst_49 = arith.constant dense<0.000000e+00> : vector<256x4xf32>
    %62 = tpu.matmul %59, %61, %cst_49 {dimension_numbers = #tpu.dot_dimension_numbers<[1], [0], [0], [1], [0, 0, 1, 1], [], []>} : vector<256x2xbf16>, vector<2x4xbf16>, vector<256x4xf32> -> vector<256x4xf32>
    %63 = arith.addf %57, %62 : vector<256x4xf32>
    %cst_50 = arith.constant 0.000000e+00 : f32
    %64 = vector.broadcast %cst_50 : f32 to vector<256x4xf32>
    %65 = arith.maximumf %63, %64 : vector<256x4xf32>
    %66 = vector.shape_cast %65 : vector<256x4xf32> to vector<1x16x16x4xf32>
    %c0_51 = arith.constant 0 : index
    %c0_52 = arith.constant 0 : index
    %c0_53 = arith.constant 0 : index
    %c0_54 = arith.constant 0 : index
    %67 = vector.load %arg4[%c0_51, %c0_52, %c0_53, %c0_54] : memref<1x16x16x4xf32, #tpu.memory_space<vmem>>, vector<1x16x16x4xf32>
    tpu.vector_store %arg4[%c0_51, %c0_52, %c0_53, %c0_54], %66 {strides = array<i32>} : memref<1x16x16x4xf32, #tpu.memory_space<vmem>>, vector<1x16x16x4xf32>,
    return
  }
  func.func @transform_0(%arg0: i32) -> (i32, i32, i32, i32) {
    %c0_i32 = arith.constant 0 : i32
    %c0_i32_0 = arith.constant 0 : i32
    %c0_i32_1 = arith.constant 0 : i32
    %c0_i32_2 = arith.constant 0 : i32
    return %arg0, %c0_i32, %c0_i32_0, %c0_i32_1 : i32, i32, i32, i32
  }
  func.func @transform_1(%arg0: i32) -> (i32, i32, i32, i32) {
    %c0_i32 = arith.constant 0 : i32
    %c0_i32_0 = arith.constant 0 : i32
    %c0_i32_1 = arith.constant 0 : i32
    %c0_i32_2 = arith.constant 0 : i32
    %c0_i32_3 = arith.constant 0 : i32
    return %c0_i32, %c0_i32_0, %c0_i32_1, %c0_i32_2 : i32, i32, i32, i32
  }
  func.func @transform_2(%arg0: i32) -> (i32, i32) {
    %c0_i32 = arith.constant 0 : i32
    %c0_i32_0 = arith.constant 0 : i32
    %c0_i32_1 = arith.constant 0 : i32
    return %c0_i32, %c0_i32_0 : i32, i32
  }
  func.func @transform_3(%arg0: i32) -> (i32, i32, i32, i32) {
    %c0_i32 = arith.constant 0 : i32
    %c0_i32_0 = arith.constant 0 : i32
    %c0_i32_1 = arith.constant 0 : i32
    %c0_i32_2 = arith.constant 0 : i32
    return %arg0, %c0_i32, %c0_i32_0, %c0_i32_1 : i32, i32, i32, i32
  }
}

module attributes {stable_mosaic.version = 11 : i64} {
  func.func @_maxpool_proj_bn_relu_kernel(%arg0: i32, %arg1: memref<1x16x16x4xf32, #tpu.memory_space<vmem>>, %arg2: memref<4x4xbf16, #tpu.memory_space<vmem>>, %arg3: memref<1x4xf32, #tpu.memory_space<vmem>>, %arg4: memref<1x16x16x4xf32, #tpu.memory_space<vmem>>, %arg5: memref<18x18x4xf32, #tpu.memory_space<vmem>>) attributes {dimension_semantics = [#tpu.dimension_semantics<parallel>], iteration_bounds = array<i64: 2>, scalar_prefetch = 0 : i64, scratch_operands = 1 : i64, tpu.core_type = #tpu.core_type<tc>, window_params = [{transform_indices = @transform_0, window_bounds = array<i64: 1, 16, 16, 4>}, {pipeline_mode = #tpu.pipeline_mode<synchronous>, transform_indices = @transform_1, window_bounds = array<i64: 4, 4>}, {pipeline_mode = #tpu.pipeline_mode<synchronous>, transform_indices = @transform_2, window_bounds = array<i64: 1, 4>}, {transform_indices = @transform_3, window_bounds = array<i64: 1, 16, 16, 4>}]} {
    %cst = arith.constant 0xFF800000 : f32
    %0 = vector.broadcast %cst : f32 to vector<18x18x4xf32>
    %c0 = arith.constant 0 : index
    %c0_0 = arith.constant 0 : index
    %c0_1 = arith.constant 0 : index
    %1 = vector.load %arg5[%c0, %c0_0, %c0_1] : memref<18x18x4xf32, #tpu.memory_space<vmem>>, vector<18x18x4xf32>
    tpu.vector_store %arg5[%c0, %c0_0, %c0_1], %0 {strides = array<i32>} : memref<18x18x4xf32, #tpu.memory_space<vmem>>, vector<18x18x4xf32>,
    %c0_2 = arith.constant 0 : index
    %c0_3 = arith.constant 0 : index
    %c0_4 = arith.constant 0 : index
    %c0_5 = arith.constant 0 : index
    %2 = vector.load %arg1[%c0_2, %c0_3, %c0_4, %c0_5] : memref<1x16x16x4xf32, #tpu.memory_space<vmem>>, vector<1x16x16x4xf32>
    %3 = vector.shape_cast %2 : vector<1x16x16x4xf32> to vector<16x16x4xf32>
    %c1 = arith.constant 1 : index
    %c1_6 = arith.constant 1 : index
    %c0_7 = arith.constant 0 : index
    %4 = vector.load %arg5[%c1, %c1_6, %c0_7] : memref<18x18x4xf32, #tpu.memory_space<vmem>>, vector<16x16x4xf32>
    tpu.vector_store %arg5[%c1, %c1_6, %c0_7], %3 {strides = array<i32>} : memref<18x18x4xf32, #tpu.memory_space<vmem>>, vector<16x16x4xf32>,
    %c1_8 = arith.constant 1 : index
    %c1_9 = arith.constant 1 : index
    %c0_10 = arith.constant 0 : index
    %5 = vector.load %arg5[%c1_8, %c1_9, %c0_10] : memref<18x18x4xf32, #tpu.memory_space<vmem>>, vector<16x16x4xf32>
    %c0_11 = arith.constant 0 : index
    %c0_12 = arith.constant 0 : index
    %c0_13 = arith.constant 0 : index
    %6 = vector.load %arg5[%c0_11, %c0_12, %c0_13] : memref<18x18x4xf32, #tpu.memory_space<vmem>>, vector<16x16x4xf32>
    %7 = arith.maximumf %5, %6 : vector<16x16x4xf32>
    %c0_14 = arith.constant 0 : index
    %c1_15 = arith.constant 1 : index
    %c0_16 = arith.constant 0 : index
    %8 = vector.load %arg5[%c0_14, %c1_15, %c0_16] : memref<18x18x4xf32, #tpu.memory_space<vmem>>, vector<16x16x4xf32>
    %9 = arith.maximumf %7, %8 : vector<16x16x4xf32>
    %c0_17 = arith.constant 0 : index
    %c2 = arith.constant 2 : index
    %c0_18 = arith.constant 0 : index
    %10 = vector.load %arg5[%c0_17, %c2, %c0_18] : memref<18x18x4xf32, #tpu.memory_space<vmem>>, vector<16x16x4xf32>
    %11 = arith.maximumf %9, %10 : vector<16x16x4xf32>
    %c1_19 = arith.constant 1 : index
    %c0_20 = arith.constant 0 : index
    %c0_21 = arith.constant 0 : index
    %12 = vector.load %arg5[%c1_19, %c0_20, %c0_21] : memref<18x18x4xf32, #tpu.memory_space<vmem>>, vector<16x16x4xf32>
    %13 = arith.maximumf %11, %12 : vector<16x16x4xf32>
    %c1_22 = arith.constant 1 : index
    %c2_23 = arith.constant 2 : index
    %c0_24 = arith.constant 0 : index
    %14 = vector.load %arg5[%c1_22, %c2_23, %c0_24] : memref<18x18x4xf32, #tpu.memory_space<vmem>>, vector<16x16x4xf32>
    %15 = arith.maximumf %13, %14 : vector<16x16x4xf32>
    %c2_25 = arith.constant 2 : index
    %c0_26 = arith.constant 0 : index
    %c0_27 = arith.constant 0 : index
    %16 = vector.load %arg5[%c2_25, %c0_26, %c0_27] : memref<18x18x4xf32, #tpu.memory_space<vmem>>, vector<16x16x4xf32>
    %17 = arith.maximumf %15, %16 : vector<16x16x4xf32>
    %c2_28 = arith.constant 2 : index
    %c1_29 = arith.constant 1 : index
    %c0_30 = arith.constant 0 : index
    %18 = vector.load %arg5[%c2_28, %c1_29, %c0_30] : memref<18x18x4xf32, #tpu.memory_space<vmem>>, vector<16x16x4xf32>
    %19 = arith.maximumf %17, %18 : vector<16x16x4xf32>
    %c2_31 = arith.constant 2 : index
    %c2_32 = arith.constant 2 : index
    %c0_33 = arith.constant 0 : index
    %20 = vector.load %arg5[%c2_31, %c2_32, %c0_33] : memref<18x18x4xf32, #tpu.memory_space<vmem>>, vector<16x16x4xf32>
    %21 = arith.maximumf %19, %20 : vector<16x16x4xf32>
    %22 = arith.truncf %21 : vector<16x16x4xf32> to vector<16x16x4xbf16>
    %23 = vector.shape_cast %22 : vector<16x16x4xbf16> to vector<256x4xbf16>
    %c0_34 = arith.constant 0 : index
    %c0_35 = arith.constant 0 : index
    %24 = vector.load %arg2[%c0_34, %c0_35] : memref<4x4xbf16, #tpu.memory_space<vmem>>, vector<4x4xbf16>
    %cst_36 = arith.constant dense<0.000000e+00> : vector<256x4xf32>
    %25 = tpu.matmul %23, %24, %cst_36 {dimension_numbers = #tpu.dot_dimension_numbers<[1], [0], [0], [1], [0, 0, 1, 1], [], []>} : vector<256x4xbf16>, vector<4x4xbf16>, vector<256x4xf32> -> vector<256x4xf32>
    %c0_37 = arith.constant 0 : index
    %c0_38 = arith.constant 0 : index
    %26 = vector.load %arg3[%c0_37, %c0_38] : memref<1x4xf32, #tpu.memory_space<vmem>>, vector<1x4xf32>
    %27 = vector.broadcast %26 : vector<1x4xf32> to vector<256x4xf32>
    %28 = arith.addf %25, %27 : vector<256x4xf32>
    %cst_39 = arith.constant 0.000000e+00 : f32
    %29 = vector.broadcast %cst_39 : f32 to vector<256x4xf32>
    %30 = arith.maximumf %28, %29 : vector<256x4xf32>
    %31 = vector.shape_cast %30 : vector<256x4xf32> to vector<1x16x16x4xf32>
    %c0_40 = arith.constant 0 : index
    %c0_41 = arith.constant 0 : index
    %c0_42 = arith.constant 0 : index
    %c0_43 = arith.constant 0 : index
    %32 = vector.load %arg4[%c0_40, %c0_41, %c0_42, %c0_43] : memref<1x16x16x4xf32, #tpu.memory_space<vmem>>, vector<1x16x16x4xf32>
    tpu.vector_store %arg4[%c0_40, %c0_41, %c0_42, %c0_43], %31 {strides = array<i32>} : memref<1x16x16x4xf32, #tpu.memory_space<vmem>>, vector<1x16x16x4xf32>,
    return
  }
  func.func @transform_0(%arg0: i32) -> (i32, i32, i32, i32) {
    %c0_i32 = arith.constant 0 : i32
    %c0_i32_0 = arith.constant 0 : i32
    %c0_i32_1 = arith.constant 0 : i32
    %c0_i32_2 = arith.constant 0 : i32
    return %arg0, %c0_i32, %c0_i32_0, %c0_i32_1 : i32, i32, i32, i32
  }
  func.func @transform_1(%arg0: i32) -> (i32, i32) {
    %c0_i32 = arith.constant 0 : i32
    %c0_i32_0 = arith.constant 0 : i32
    %c0_i32_1 = arith.constant 0 : i32
    return %c0_i32, %c0_i32_0 : i32, i32
  }
  func.func @transform_2(%arg0: i32) -> (i32, i32) {
    %c0_i32 = arith.constant 0 : i32
    %c0_i32_0 = arith.constant 0 : i32
    %c0_i32_1 = arith.constant 0 : i32
    return %c0_i32, %c0_i32_0 : i32, i32
  }
  func.func @transform_3(%arg0: i32) -> (i32, i32, i32, i32) {
    %c0_i32 = arith.constant 0 : i32
    %c0_i32_0 = arith.constant 0 : i32
    %c0_i32_1 = arith.constant 0 : i32
    %c0_i32_2 = arith.constant 0 : i32
    return %arg0, %c0_i32, %c0_i32_0, %c0_i32_1 : i32, i32, i32, i32
  }
}

module attributes {stable_mosaic.version = 11 : i64} {
  func.func @_conv3x3_bn_relu_kernel(%arg0: i32, %arg1: memref<1x16x16x4xbf16, #tpu.memory_space<vmem>>, %arg2: memref<3x3x4x8xbf16, #tpu.memory_space<vmem>>, %arg3: memref<1x8xf32, #tpu.memory_space<vmem>>, %arg4: memref<1x16x16x8xf32, #tpu.memory_space<vmem>>, %arg5: memref<18x18x4xbf16, #tpu.memory_space<vmem>>) attributes {dimension_semantics = [#tpu.dimension_semantics<parallel>], iteration_bounds = array<i64: 2>, scalar_prefetch = 0 : i64, scratch_operands = 1 : i64, tpu.core_type = #tpu.core_type<tc>, window_params = [{transform_indices = @transform_0, window_bounds = array<i64: 1, 16, 16, 4>}, {pipeline_mode = #tpu.pipeline_mode<synchronous>, transform_indices = @transform_1, window_bounds = array<i64: 3, 3, 4, 8>}, {pipeline_mode = #tpu.pipeline_mode<synchronous>, transform_indices = @transform_2, window_bounds = array<i64: 1, 8>}, {transform_indices = @transform_3, window_bounds = array<i64: 1, 16, 16, 8>}]} {
    %cst = arith.constant 0.000000e+00 : bf16
    %0 = vector.broadcast %cst : bf16 to vector<18x18x4xbf16>
    %c0 = arith.constant 0 : index
    %c0_0 = arith.constant 0 : index
    %c0_1 = arith.constant 0 : index
    %1 = vector.load %arg5[%c0, %c0_0, %c0_1] : memref<18x18x4xbf16, #tpu.memory_space<vmem>>, vector<18x18x4xbf16>
    tpu.vector_store %arg5[%c0, %c0_0, %c0_1], %0 {strides = array<i32>} : memref<18x18x4xbf16, #tpu.memory_space<vmem>>, vector<18x18x4xbf16>,
    %c0_2 = arith.constant 0 : index
    %c0_3 = arith.constant 0 : index
    %c0_4 = arith.constant 0 : index
    %c0_5 = arith.constant 0 : index
    %2 = vector.load %arg1[%c0_2, %c0_3, %c0_4, %c0_5] : memref<1x16x16x4xbf16, #tpu.memory_space<vmem>>, vector<1x16x16x4xbf16>
    %3 = vector.shape_cast %2 : vector<1x16x16x4xbf16> to vector<16x16x4xbf16>
    %c1 = arith.constant 1 : index
    %c1_6 = arith.constant 1 : index
    %c0_7 = arith.constant 0 : index
    %4 = vector.load %arg5[%c1, %c1_6, %c0_7] : memref<18x18x4xbf16, #tpu.memory_space<vmem>>, vector<16x16x4xbf16>
    tpu.vector_store %arg5[%c1, %c1_6, %c0_7], %3 {strides = array<i32>} : memref<18x18x4xbf16, #tpu.memory_space<vmem>>, vector<16x16x4xbf16>,
    %c0_8 = arith.constant 0 : index
    %c0_9 = arith.constant 0 : index
    %c0_10 = arith.constant 0 : index
    %c0_11 = arith.constant 0 : index
    %5 = vector.load %arg2[%c0_8, %c0_9, %c0_10, %c0_11] : memref<3x3x4x8xbf16, #tpu.memory_space<vmem>>, vector<3x3x4x8xbf16>
    %cst_12 = arith.constant 0.000000e+00 : f32
    %6 = vector.broadcast %cst_12 : f32 to vector<256x8xf32>
    %c0_13 = arith.constant 0 : index
    %c0_14 = arith.constant 0 : index
    %7 = vector.load %arg3[%c0_13, %c0_14] : memref<1x8xf32, #tpu.memory_space<vmem>>, vector<1x8xf32>
    %8 = vector.broadcast %7 : vector<1x8xf32> to vector<256x8xf32>
    %9 = arith.addf %6, %8 : vector<256x8xf32>
    %c0_15 = arith.constant 0 : index
    %c0_16 = arith.constant 0 : index
    %c0_17 = arith.constant 0 : index
    %10 = vector.load %arg5[%c0_15, %c0_16, %c0_17] : memref<18x18x4xbf16, #tpu.memory_space<vmem>>, vector<16x16x4xbf16>
    %11 = vector.shape_cast %10 : vector<16x16x4xbf16> to vector<256x4xbf16>
    %12 = vector.extract_strided_slice %5 {offsets = [0, 0, 0, 0], sizes = [1, 1, 4, 8], strides = [1, 1, 1, 1]} : vector<3x3x4x8xbf16> to vector<1x1x4x8xbf16>
    %13 = vector.shape_cast %12 : vector<1x1x4x8xbf16> to vector<4x8xbf16>
    %cst_18 = arith.constant dense<0.000000e+00> : vector<256x8xf32>
    %14 = tpu.matmul %11, %13, %cst_18 {dimension_numbers = #tpu.dot_dimension_numbers<[1], [0], [0], [1], [0, 0, 1, 1], [], []>} : vector<256x4xbf16>, vector<4x8xbf16>, vector<256x8xf32> -> vector<256x8xf32>
    %15 = arith.addf %9, %14 : vector<256x8xf32>
    %c0_19 = arith.constant 0 : index
    %c1_20 = arith.constant 1 : index
    %c0_21 = arith.constant 0 : index
    %16 = vector.load %arg5[%c0_19, %c1_20, %c0_21] : memref<18x18x4xbf16, #tpu.memory_space<vmem>>, vector<16x16x4xbf16>
    %17 = vector.shape_cast %16 : vector<16x16x4xbf16> to vector<256x4xbf16>
    %18 = vector.extract_strided_slice %5 {offsets = [0, 1, 0, 0], sizes = [1, 1, 4, 8], strides = [1, 1, 1, 1]} : vector<3x3x4x8xbf16> to vector<1x1x4x8xbf16>
    %19 = vector.shape_cast %18 : vector<1x1x4x8xbf16> to vector<4x8xbf16>
    %cst_22 = arith.constant dense<0.000000e+00> : vector<256x8xf32>
    %20 = tpu.matmul %17, %19, %cst_22 {dimension_numbers = #tpu.dot_dimension_numbers<[1], [0], [0], [1], [0, 0, 1, 1], [], []>} : vector<256x4xbf16>, vector<4x8xbf16>, vector<256x8xf32> -> vector<256x8xf32>
    %21 = arith.addf %15, %20 : vector<256x8xf32>
    %c0_23 = arith.constant 0 : index
    %c2 = arith.constant 2 : index
    %c0_24 = arith.constant 0 : index
    %22 = vector.load %arg5[%c0_23, %c2, %c0_24] : memref<18x18x4xbf16, #tpu.memory_space<vmem>>, vector<16x16x4xbf16>
    %23 = vector.shape_cast %22 : vector<16x16x4xbf16> to vector<256x4xbf16>
    %24 = vector.extract_strided_slice %5 {offsets = [0, 2, 0, 0], sizes = [1, 1, 4, 8], strides = [1, 1, 1, 1]} : vector<3x3x4x8xbf16> to vector<1x1x4x8xbf16>
    %25 = vector.shape_cast %24 : vector<1x1x4x8xbf16> to vector<4x8xbf16>
    %cst_25 = arith.constant dense<0.000000e+00> : vector<256x8xf32>
    %26 = tpu.matmul %23, %25, %cst_25 {dimension_numbers = #tpu.dot_dimension_numbers<[1], [0], [0], [1], [0, 0, 1, 1], [], []>} : vector<256x4xbf16>, vector<4x8xbf16>, vector<256x8xf32> -> vector<256x8xf32>
    %27 = arith.addf %21, %26 : vector<256x8xf32>
    %c1_26 = arith.constant 1 : index
    %c0_27 = arith.constant 0 : index
    %c0_28 = arith.constant 0 : index
    %28 = vector.load %arg5[%c1_26, %c0_27, %c0_28] : memref<18x18x4xbf16, #tpu.memory_space<vmem>>, vector<16x16x4xbf16>
    %29 = vector.shape_cast %28 : vector<16x16x4xbf16> to vector<256x4xbf16>
    %30 = vector.extract_strided_slice %5 {offsets = [1, 0, 0, 0], sizes = [1, 1, 4, 8], strides = [1, 1, 1, 1]} : vector<3x3x4x8xbf16> to vector<1x1x4x8xbf16>
    %31 = vector.shape_cast %30 : vector<1x1x4x8xbf16> to vector<4x8xbf16>
    %cst_29 = arith.constant dense<0.000000e+00> : vector<256x8xf32>
    %32 = tpu.matmul %29, %31, %cst_29 {dimension_numbers = #tpu.dot_dimension_numbers<[1], [0], [0], [1], [0, 0, 1, 1], [], []>} : vector<256x4xbf16>, vector<4x8xbf16>, vector<256x8xf32> -> vector<256x8xf32>
    %33 = arith.addf %27, %32 : vector<256x8xf32>
    %c1_30 = arith.constant 1 : index
    %c1_31 = arith.constant 1 : index
    %c0_32 = arith.constant 0 : index
    %34 = vector.load %arg5[%c1_30, %c1_31, %c0_32] : memref<18x18x4xbf16, #tpu.memory_space<vmem>>, vector<16x16x4xbf16>
    %35 = vector.shape_cast %34 : vector<16x16x4xbf16> to vector<256x4xbf16>
    %36 = vector.extract_strided_slice %5 {offsets = [1, 1, 0, 0], sizes = [1, 1, 4, 8], strides = [1, 1, 1, 1]} : vector<3x3x4x8xbf16> to vector<1x1x4x8xbf16>
    %37 = vector.shape_cast %36 : vector<1x1x4x8xbf16> to vector<4x8xbf16>
    %cst_33 = arith.constant dense<0.000000e+00> : vector<256x8xf32>
    %38 = tpu.matmul %35, %37, %cst_33 {dimension_numbers = #tpu.dot_dimension_numbers<[1], [0], [0], [1], [0, 0, 1, 1], [], []>} : vector<256x4xbf16>, vector<4x8xbf16>, vector<256x8xf32> -> vector<256x8xf32>
    %39 = arith.addf %33, %38 : vector<256x8xf32>
    %c1_34 = arith.constant 1 : index
    %c2_35 = arith.constant 2 : index
    %c0_36 = arith.constant 0 : index
    %40 = vector.load %arg5[%c1_34, %c2_35, %c0_36] : memref<18x18x4xbf16, #tpu.memory_space<vmem>>, vector<16x16x4xbf16>
    %41 = vector.shape_cast %40 : vector<16x16x4xbf16> to vector<256x4xbf16>
    %42 = vector.extract_strided_slice %5 {offsets = [1, 2, 0, 0], sizes = [1, 1, 4, 8], strides = [1, 1, 1, 1]} : vector<3x3x4x8xbf16> to vector<1x1x4x8xbf16>
    %43 = vector.shape_cast %42 : vector<1x1x4x8xbf16> to vector<4x8xbf16>
    %cst_37 = arith.constant dense<0.000000e+00> : vector<256x8xf32>
    %44 = tpu.matmul %41, %43, %cst_37 {dimension_numbers = #tpu.dot_dimension_numbers<[1], [0], [0], [1], [0, 0, 1, 1], [], []>} : vector<256x4xbf16>, vector<4x8xbf16>, vector<256x8xf32> -> vector<256x8xf32>
    %45 = arith.addf %39, %44 : vector<256x8xf32>
    %c2_38 = arith.constant 2 : index
    %c0_39 = arith.constant 0 : index
    %c0_40 = arith.constant 0 : index
    %46 = vector.load %arg5[%c2_38, %c0_39, %c0_40] : memref<18x18x4xbf16, #tpu.memory_space<vmem>>, vector<16x16x4xbf16>
    %47 = vector.shape_cast %46 : vector<16x16x4xbf16> to vector<256x4xbf16>
    %48 = vector.extract_strided_slice %5 {offsets = [2, 0, 0, 0], sizes = [1, 1, 4, 8], strides = [1, 1, 1, 1]} : vector<3x3x4x8xbf16> to vector<1x1x4x8xbf16>
    %49 = vector.shape_cast %48 : vector<1x1x4x8xbf16> to vector<4x8xbf16>
    %cst_41 = arith.constant dense<0.000000e+00> : vector<256x8xf32>
    %50 = tpu.matmul %47, %49, %cst_41 {dimension_numbers = #tpu.dot_dimension_numbers<[1], [0], [0], [1], [0, 0, 1, 1], [], []>} : vector<256x4xbf16>, vector<4x8xbf16>, vector<256x8xf32> -> vector<256x8xf32>
    %51 = arith.addf %45, %50 : vector<256x8xf32>
    %c2_42 = arith.constant 2 : index
    %c1_43 = arith.constant 1 : index
    %c0_44 = arith.constant 0 : index
    %52 = vector.load %arg5[%c2_42, %c1_43, %c0_44] : memref<18x18x4xbf16, #tpu.memory_space<vmem>>, vector<16x16x4xbf16>
    %53 = vector.shape_cast %52 : vector<16x16x4xbf16> to vector<256x4xbf16>
    %54 = vector.extract_strided_slice %5 {offsets = [2, 1, 0, 0], sizes = [1, 1, 4, 8], strides = [1, 1, 1, 1]} : vector<3x3x4x8xbf16> to vector<1x1x4x8xbf16>
    %55 = vector.shape_cast %54 : vector<1x1x4x8xbf16> to vector<4x8xbf16>
    %cst_45 = arith.constant dense<0.000000e+00> : vector<256x8xf32>
    %56 = tpu.matmul %53, %55, %cst_45 {dimension_numbers = #tpu.dot_dimension_numbers<[1], [0], [0], [1], [0, 0, 1, 1], [], []>} : vector<256x4xbf16>, vector<4x8xbf16>, vector<256x8xf32> -> vector<256x8xf32>
    %57 = arith.addf %51, %56 : vector<256x8xf32>
    %c2_46 = arith.constant 2 : index
    %c2_47 = arith.constant 2 : index
    %c0_48 = arith.constant 0 : index
    %58 = vector.load %arg5[%c2_46, %c2_47, %c0_48] : memref<18x18x4xbf16, #tpu.memory_space<vmem>>, vector<16x16x4xbf16>
    %59 = vector.shape_cast %58 : vector<16x16x4xbf16> to vector<256x4xbf16>
    %60 = vector.extract_strided_slice %5 {offsets = [2, 2, 0, 0], sizes = [1, 1, 4, 8], strides = [1, 1, 1, 1]} : vector<3x3x4x8xbf16> to vector<1x1x4x8xbf16>
    %61 = vector.shape_cast %60 : vector<1x1x4x8xbf16> to vector<4x8xbf16>
    %cst_49 = arith.constant dense<0.000000e+00> : vector<256x8xf32>
    %62 = tpu.matmul %59, %61, %cst_49 {dimension_numbers = #tpu.dot_dimension_numbers<[1], [0], [0], [1], [0, 0, 1, 1], [], []>} : vector<256x4xbf16>, vector<4x8xbf16>, vector<256x8xf32> -> vector<256x8xf32>
    %63 = arith.addf %57, %62 : vector<256x8xf32>
    %cst_50 = arith.constant 0.000000e+00 : f32
    %64 = vector.broadcast %cst_50 : f32 to vector<256x8xf32>
    %65 = arith.maximumf %63, %64 : vector<256x8xf32>
    %66 = vector.shape_cast %65 : vector<256x8xf32> to vector<1x16x16x8xf32>
    %c0_51 = arith.constant 0 : index
    %c0_52 = arith.constant 0 : index
    %c0_53 = arith.constant 0 : index
    %c0_54 = arith.constant 0 : index
    %67 = vector.load %arg4[%c0_51, %c0_52, %c0_53, %c0_54] : memref<1x16x16x8xf32, #tpu.memory_space<vmem>>, vector<1x16x16x8xf32>
    tpu.vector_store %arg4[%c0_51, %c0_52, %c0_53, %c0_54], %66 {strides = array<i32>} : memref<1x16x16x8xf32, #tpu.memory_space<vmem>>, vector<1x16x16x8xf32>,
    return
  }
  func.func @transform_0(%arg0: i32) -> (i32, i32, i32, i32) {
    %c0_i32 = arith.constant 0 : i32
    %c0_i32_0 = arith.constant 0 : i32
    %c0_i32_1 = arith.constant 0 : i32
    %c0_i32_2 = arith.constant 0 : i32
    return %arg0, %c0_i32, %c0_i32_0, %c0_i32_1 : i32, i32, i32, i32
  }
  func.func @transform_1(%arg0: i32) -> (i32, i32, i32, i32) {
    %c0_i32 = arith.constant 0 : i32
    %c0_i32_0 = arith.constant 0 : i32
    %c0_i32_1 = arith.constant 0 : i32
    %c0_i32_2 = arith.constant 0 : i32
    %c0_i32_3 = arith.constant 0 : i32
    return %c0_i32, %c0_i32_0, %c0_i32_1, %c0_i32_2 : i32, i32, i32, i32
  }
  func.func @transform_2(%arg0: i32) -> (i32, i32) {
    %c0_i32 = arith.constant 0 : i32
    %c0_i32_0 = arith.constant 0 : i32
    %c0_i32_1 = arith.constant 0 : i32
    return %c0_i32, %c0_i32_0 : i32, i32
  }
  func.func @transform_3(%arg0: i32) -> (i32, i32, i32, i32) {
    %c0_i32 = arith.constant 0 : i32
    %c0_i32_0 = arith.constant 0 : i32
    %c0_i32_1 = arith.constant 0 : i32
    %c0_i32_2 = arith.constant 0 : i32
    return %arg0, %c0_i32, %c0_i32_0, %c0_i32_1 : i32, i32, i32, i32
  }
}

</mosaic_0001>

<bundles_post_ra>
// kernel: inception_forward.4
= control target key start
LH: loop header
LB: loop body
LE: loop exit
PB: predicated region body
PF: predicated region fallthrough
CT: control target
= control target key end

     0   :  { %vm216_vm0 = vcmask 1041408   ;;  %vm119_vm1 = vcmask 31744   ;;  %vm829_vm2 = vcmask 76800   ;;  %s1734_s1 = inlined_call_operand.vmem [shape: bf16[4,10], index: 1, kind: input, shape index: {}]   ;;  %s1735_s0 = inlined_call_operand.vmem [shape: f32[512,4], index: 0, kind: input, shape index: {}]   ;;  %s1736_s2 = inlined_call_operand.vmem [shape: f32[1,10], index: 2, kind: input, shape index: {}]   ;;  %s1737_s3 = inlined_call_operand.vmem [shape: bf16[512,10], index: 3, kind: output, shape index: {}]  }
   0x1   :  { %v111_v0 = vld [vmem:[%s1734_s1] sm:$0x3]  ;;  %v16_v2 = vld [vmem:[%s1735_s0 + $0x8] sm:$0xff]  ;;  %v17_v7 = vld [vmem:[%s1735_s0 + $0x10] sm:$0xff] }
   0x2   :  { %v15_v1 = vld [vmem:[%s1735_s0] sm:$0xff]  ;;  %1160 = vmatprep.subr.msk.bf16.mxu0 %vm216_vm0, %v111_v0  ;;  %1161 = vmatprep.subr.msk.bf16.mxu1 %vm216_vm0, %v111_v0  ;;  %v218_v3 = vsel %vm216_vm0, %v111_v0, 0  ;;  %v48_v6 = vld [vmem:[%s1735_s0 + $0x108] sm:$0xff]  ;;  %v18_v9 = vld [vmem:[%s1735_s0 + $0x18] sm:$0xff] }
   0x3   :  { %v79_v4 = vpack.c.bf16 %v16_v2, %v15_v1  ;;  %v47_v5 = vld [vmem:[%s1735_s0 + $0x100] sm:$0xff]  ;;  %1093 = vmatpush3.bf16.msra.mxu0 %v218_v3  ;;  %1159 = vmatpush3.bf16.msra.mxu1 %v218_v3  ;;  %v49_v10 = vld [vmem:[%s1735_s0 + $0x110] sm:$0xff]  ;;  %v50_v11 = vld [vmem:[%s1735_s0 + $0x118] sm:$0xff]  ;;  %v80_v12 = vpack.c.bf16 %v18_v9, %v17_v7 }
   0x4   :  { %v95_v8 = vpack.c.bf16 %v48_v6, %v47_v5  ;;  %v96_v13 = vpack.c.bf16 %v50_v11, %v49_v10  ;;  %v19_v14 = vld [vmem:[%s1735_s0 + $0x20] sm:$0xff]  ;;  %v20_v15 = vld [vmem:[%s1735_s0 + $0x28] sm:$0xff]  ;;  %v21_v20 = vld [vmem:[%s1735_s0 + $0x30] sm:$0xff] }
   0x5   :  { %1094 = vmatprep.mubr.msk.bf16.mxu0 %vm119_vm1, %v79_v4  ;;  %v51_v16 = vld [vmem:[%s1735_s0 + $0x120] sm:$0xff]  ;;  %v81_v17 = vpack.c.bf16 %v20_v15, %v19_v14  ;;  %v52_v18 = vld [vmem:[%s1735_s0 + $0x128] sm:$0xff]  ;;  %v22_v21 = vld [vmem:[%s1735_s0 + $0x38] sm:$0xff] }
   0x6   :  { %1126 = vmatprep.mubr.msk.bf16.mxu1 %vm119_vm1, %v95_v8  ;;  %1095 = vmatmul.mubr.msk.bf16.vlgmr.msra.gmra.mrb[0].mxu0 %vm119_vm1, %v80_v12  ;;  %v97_v19 = vpack.c.bf16 %v52_v18, %v51_v16  ;;  %v53_v22 = vld [vmem:[%s1735_s0 + $0x130] sm:$0xff]  ;;  %v54_v23 = vld [vmem:[%s1735_s0 + $0x138] sm:$0xff]  ;;  %v23_v24 = vld [vmem:[%s1735_s0 + $0x40] sm:$0xff]  ;;  %v82_v28 = vpack.c.bf16 %v22_v21, %v21_v20 }
   0x7   :  { %1127 = vmatmul.mubr.msk.bf16.vlgmr.msra.gmra.mrb[0].mxu1 %vm119_vm1, %v96_v13  ;;  %1098 = vmatprep.mubr.msk.bf16.mxu0 %vm119_vm1, %v81_v17  ;;  %v24_v25 = vld [vmem:[%s1735_s0 + $0x48] sm:$0xff]  ;;  %v55_v26 = vld [vmem:[%s1735_s0 + $0x140] sm:$0xff]  ;;  %v98_v29 = vpack.c.bf16 %v54_v23, %v53_v22  ;;  %v25_v32 = vld [vmem:[%s1735_s0 + $0x50] sm:$0xff] }
   0x8   :  { %1130 = vmatprep.mubr.msk.bf16.mxu1 %vm119_vm1, %v97_v19  ;;  %v56_v27 = vld [vmem:[%s1735_s0 + $0x148] sm:$0xff]  ;;  %v83_v30 = vpack.c.bf16 %v24_v25, %v23_v24  ;;  %v26_v33 = vld [vmem:[%s1735_s0 + $0x58] sm:$0xff]  ;;  %v57_v34 = vld [vmem:[%s1735_s0 + $0x150] sm:$0xff] }
   0x9   :  { %v99_v31 = vpack.c.bf16 %v56_v27, %v55_v26  ;;  %v58_v35 = vld [vmem:[%s1735_s0 + $0x158] sm:$0xff]  ;;  %v27_v36 = vld [vmem:[%s1735_s0 + $0x60] sm:$0xff]  ;;  %v28_v37 = vld [vmem:[%s1735_s0 + $0x68] sm:$0xff]  ;;  %v84_v40 = vpack.c.bf16 %v26_v33, %v25_v32 }
   0xa   :  { %v59_v38 = vld [vmem:[%s1735_s0 + $0x160] sm:$0xff]  ;;  %v60_v39 = vld [vmem:[%s1735_s0 + $0x168] sm:$0xff]  ;;  %v100_v41 = vpack.c.bf16 %v58_v35, %v57_v34  ;;  %v85_v42 = vpack.c.bf16 %v28_v37, %v27_v36  ;;  %v29_v44 = vld [vmem:[%s1735_s0 + $0x70] sm:$0xff] }
   0xb   :  { %v101_v43 = vpack.c.bf16 %v60_v39, %v59_v38  ;;  %v30_v45 = vld [vmem:[%s1735_s0 + $0x78] sm:$0xff]  ;;  %v61_v46 = vld [vmem:[%s1735_s0 + $0x170] sm:$0xff]  ;;  %v31_v48 = vld [vmem:[%s1735_s0 + $0x80] sm:$0xff] }
   0xc   :  { %v62_v47 = vld [vmem:[%s1735_s0 + $0x178] sm:$0xff]  ;;  %v32_v49 = vld [vmem:[%s1735_s0 + $0x88] sm:$0xff]  ;;  %v63_v50 = vld [vmem:[%s1735_s0 + $0x180] sm:$0xff]  ;;  %v86_v52 = vpack.c.bf16 %v30_v45, %v29_v44 }
   0xd   :  { %v64_v51 = vld [vmem:[%s1735_s0 + $0x188] sm:$0xff]  ;;  %v102_v53 = vpack.c.bf16 %v62_v47, %v61_v46  ;;  %v87_v54 = vpack.c.bf16 %v32_v49, %v31_v48  ;;  %v33_v56 = vld [vmem:[%s1735_s0 + $0x90] sm:$0xff]  ;;  %v34_v57 = vld [vmem:[%s1735_s0 + $0x98] sm:$0xff] }
   0xe   :  { %1099 = vmatmul.mubr.msk.bf16.gmra.mrb[4].mxu0 %vm119_vm1, %v82_v28  ;;  %v103_v55 = vpack.c.bf16 %v64_v51, %v63_v50  ;;  %v65_v58 = vld [vmem:[%s1735_s0 + $0x190] sm:$0xff]  ;;  %v66_v59 = vld [vmem:[%s1735_s0 + $0x198] sm:$0xff]  ;;  %v35_v60 = vld [vmem:[%s1735_s0 + $0xa0] sm:$0xff]  ;;  %v88_v0 = vpack.c.bf16 %v34_v57, %v33_v56 }
   0xf   :  { %1131 = vmatmul.mubr.msk.bf16.gmra.mrb[4].mxu1 %vm119_vm1, %v98_v29  ;;  %1102 = vmatprep.mubr.msk.bf16.mxu0 %vm119_vm1, %v83_v30  ;;  %v36_v61 = vld [vmem:[%s1735_s0 + $0xa8] sm:$0xff]  ;;  %v67_v62 = vld [vmem:[%s1735_s0 + $0x1a0] sm:$0xff]  ;;  %v104_v1 = vpack.c.bf16 %v66_v59, %v65_v58  ;;  %v37_v4 = vld [vmem:[%s1735_s0 + $0xb0] sm:$0xff] }
  0x10   :  { %1134 = vmatprep.mubr.msk.bf16.mxu1 %vm119_vm1, %v99_v31  ;;  %v68_v63 = vld [vmem:[%s1735_s0 + $0x1a8] sm:$0xff]  ;;  %v89_v2 = vpack.c.bf16 %v36_v61, %v35_v60  ;;  %v38_v5 = vld [vmem:[%s1735_s0 + $0xb8] sm:$0xff]  ;;  %v69_v6 = vld [vmem:[%s1735_s0 + $0x1b0] sm:$0xff] }
  0x11   :  { %v105_v3 = vpack.c.bf16 %v68_v63, %v67_v62  ;;  %v70_v7 = vld [vmem:[%s1735_s0 + $0x1b8] sm:$0xff]  ;;  %v39_v8 = vld [vmem:[%s1735_s0 + $0xc0] sm:$0xff]  ;;  %v40_v9 = vld [vmem:[%s1735_s0 + $0xc8] sm:$0xff]  ;;  %v90_v12 = vpack.c.bf16 %v38_v5, %v37_v4 }
  0x12   :  { %v71_v10 = vld [vmem:[%s1735_s0 + $0x1c0] sm:$0xff]  ;;  %v72_v11 = vld [vmem:[%s1735_s0 + $0x1c8] sm:$0xff]  ;;  %v106_v13 = vpack.c.bf16 %v70_v7, %v69_v6  ;;  %v91_v14 = vpack.c.bf16 %v40_v9, %v39_v8  ;;  %v41_v16 = vld [vmem:[%s1735_s0 + $0xd0] sm:$0xff] }
  0x13   :  { %v107_v15 = vpack.c.bf16 %v72_v11, %v71_v10  ;;  %v42_v17 = vld [vmem:[%s1735_s0 + $0xd8] sm:$0xff]  ;;  %v73_v18 = vld [vmem:[%s1735_s0 + $0x1d0] sm:$0xff]  ;;  %v43_v20 = vld [vmem:[%s1735_s0 + $0xe0] sm:$0xff] }
  0x14   :  { %v74_v19 = vld [vmem:[%s1735_s0 + $0x1d8] sm:$0xff]  ;;  %v44_v21 = vld [vmem:[%s1735_s0 + $0xe8] sm:$0xff]  ;;  %v75_v22 = vld [vmem:[%s1735_s0 + $0x1e0] sm:$0xff]  ;;  %v92_v24 = vpack.c.bf16 %v42_v17, %v41_v16 }
  0x15   :  { %v76_v23 = vld [vmem:[%s1735_s0 + $0x1e8] sm:$0xff]  ;;  %v108_v25 = vpack.c.bf16 %v74_v19, %v73_v18  ;;  %v93_v26 = vpack.c.bf16 %v44_v21, %v43_v20  ;;  %v45_v28 = vld [vmem:[%s1735_s0 + $0xf0] sm:$0xff]  ;;  %v46_v29 = vld [vmem:[%s1735_s0 + $0xf8] sm:$0xff] }
  0x16   :  { %1103 = vmatmul.mubr.msk.bf16.gmra.mrb[8].mxu0 %vm119_vm1, %v84_v40  ;;  %v109_v27 = vpack.c.bf16 %v76_v23, %v75_v22  ;;  %v77_v30 = vld [vmem:[%s1735_s0 + $0x1f0] sm:$0xff]  ;;  %v78_v31 = vld [vmem:[%s1735_s0 + $0x1f8] sm:$0xff]  ;;  %v94_v32 = vpack.c.bf16 %v46_v29, %v45_v28  ;;  %v1412_v34 = vld [vmem:[%s1736_s2] ss:$0 sm:$0xff] }
  0x17   :  { %1135 = vmatmul.mubr.msk.bf16.gmra.mrb[8].mxu1 %vm119_vm1, %v100_v41  ;;  %1106 = vmatprep.mubr.msk.bf16.mxu0 %vm119_vm1, %v85_v42  ;;  %v110_v33 = vpack.c.bf16 %v78_v31, %v77_v30 }
  0x18   :  { %1138 = vmatprep.mubr.msk.bf16.mxu1 %vm119_vm1, %v101_v43 }
  0x1e   :  { %1107 = vmatmul.mubr.msk.bf16.gmra.mrb[12].mxu0 %vm119_vm1, %v86_v52 }
  0x1f   :  { %1139 = vmatmul.mubr.msk.bf16.gmra.mrb[12].mxu1 %vm119_vm1, %v102_v53  ;;  %1110 = vmatprep.mubr.msk.bf16.mxu0 %vm119_vm1, %v87_v54 }
  0x20   :  { %1142 = vmatprep.mubr.msk.bf16.mxu1 %vm119_vm1, %v103_v55 }
  0x26   :  { %1111 = vmatmul.mubr.msk.bf16.gmra.mrb[16].mxu0 %vm119_vm1, %v88_v0 }
  0x27   :  { %1143 = vmatmul.mubr.msk.bf16.gmra.mrb[16].mxu1 %vm119_vm1, %v104_v1  ;;  %1114 = vmatprep.mubr.msk.bf16.mxu0 %vm119_vm1, %v89_v2 }
  0x28   :  { %1146 = vmatprep.mubr.msk.bf16.mxu1 %vm119_vm1, %v105_v3 }
  0x2e   :  { %1115 = vmatmul.mubr.msk.bf16.gmra.mrb[20].mxu0 %vm119_vm1, %v90_v12 }
  0x2f   :  { %1147 = vmatmul.mubr.msk.bf16.gmra.mrb[20].mxu1 %vm119_vm1, %v106_v13  ;;  %1118 = vmatprep.mubr.msk.bf16.mxu0 %vm119_vm1, %v91_v14 }
  0x30   :  { %1150 = vmatprep.mubr.msk.bf16.mxu1 %vm119_vm1, %v107_v15 }
  0x36   :  { %1119 = vmatmul.mubr.msk.bf16.gmra.mrb[24].mxu0 %vm119_vm1, %v92_v24 }
  0x37   :  { %1151 = vmatmul.mubr.msk.bf16.gmra.mrb[24].mxu1 %vm119_vm1, %v108_v25  ;;  %1122 = vmatprep.mubr.msk.bf16.mxu0 %vm119_vm1, %v93_v26 }
  0x38   :  { %1154 = vmatprep.mubr.msk.bf16.mxu1 %vm119_vm1, %v109_v27 }
  0x3e   :  { %1123 = vmatmul.mubr.msk.bf16.gmra.mrb[28].mxu0 %vm119_vm1, %v94_v32 }
  0x3f   :  { %1155 = vmatmul.mubr.msk.bf16.gmra.mrb[28].mxu1 %vm119_vm1, %v110_v33 }
  0xd9   :  { %v1096_v35 = vpop.f32.mrb[0].mxu0 }
  0xda   :  { %v1128_v36 = vpop.f32.mrb[0].mxu1  ;;  %v263_v37 = vadd.f32 %v1096_v35, %v1412_v34  ;;  %v254_v39 = vpop.f32.mrb[1].mxu0 }
  0xdb   :  { %v391_v38 = vadd.f32 %v1128_v36, %v1412_v34  ;;  %v382_v40 = vpop.f32.mrb[1].mxu1  ;;  %v255_v41 = vadd.f32 %v1412_v34, %v254_v39  ;;  %v1097_v43 = vpop.f32.mrb[2].mxu0 }
  0xdc   :  { %v383_v42 = vadd.f32 %v1412_v34, %v382_v40  ;;  %v1129_v44 = vpop.f32.mrb[2].mxu1  ;;  %v511_v45 = vmax.f32 %v263_v37, 0.0  ;;  %v266_v47 = vadd.f32 %v1097_v43, %v1412_v34  ;;  %v257_v49 = vpop.f32.mrb[3].mxu0 }
  0xdd   :  { %v543_v46 = vmax.f32 %v391_v38, 0.0  ;;  %v394_v48 = vadd.f32 %v1129_v44, %v1412_v34  ;;  %v385_v50 = vpop.f32.mrb[3].mxu1  ;;  %v509_v51 = vmax.f32 %v255_v41, 0.0  ;;  %v258_v53 = vadd.f32 %v1412_v34, %v257_v49 }
  0xde   :  { %v541_v52 = vmax.f32 %v383_v42, 0.0  ;;  %v386_v54 = vadd.f32 %v1412_v34, %v385_v50  ;;  %v997_v55 = vpack.c.bf16 %v511_v45, %v511_v45  ;;  %v512_v57 = vmax.f32 %v266_v47, 0.0 }
  0xdf   :  { %v1029_v56 = vpack.c.bf16 %v543_v46, %v543_v46  ;;  %v544_v58 = vmax.f32 %v394_v48, 0.0  ;;  %v995_v59 = vpack.c.bf16 %v509_v51, %v509_v51  ;;  %v510_v61 = vmax.f32 %v258_v53, 0.0 }
  0xe0   :  { %v1027_v60 = vpack.c.bf16 %v541_v52, %v541_v52  ;;  %v542_v62 = vmax.f32 %v386_v54, 0.0  ;;  %832 = vst.msk [vmem:[%s1737_s3 + $0x8] sm:$0xf] %vm829_vm2, %v997_v55  ;;  %v998_v63 = vpack.c.bf16 %v512_v57, %v512_v57 }
  0xe1   :  { %864 = vst.msk [vmem:[%s1737_s3 + $0x88] sm:$0xf] %vm829_vm2, %v1029_v56  ;;  %v1030_v0 = vpack.c.bf16 %v544_v58, %v544_v58  ;;  %830 = vst.msk [vmem:[%s1737_s3] sm:$0xf] %vm829_vm2, %v995_v59  ;;  %v996_v1 = vpack.c.bf16 %v510_v61, %v510_v61  ;;  %v1100_v3 = vpop.f32.mrb[4].mxu0 }
  0xe2   :  { %862 = vst.msk [vmem:[%s1737_s3 + $0x80] sm:$0xf] %vm829_vm2, %v1027_v60  ;;  %v1028_v2 = vpack.c.bf16 %v542_v62, %v542_v62  ;;  %v1132_v4 = vpop.f32.mrb[4].mxu1  ;;  %833 = vst.msk [vmem:[%s1737_s3 + $0xc] sm:$0xf] %vm829_vm2, %v998_v63  ;;  %v279_v5 = vadd.f32 %v1100_v3, %v1412_v34  ;;  %v270_v7 = vpop.f32.mrb[5].mxu0 }
  0xe3   :  { %865 = vst.msk [vmem:[%s1737_s3 + $0x8c] sm:$0xf] %vm829_vm2, %v1030_v0  ;;  %v407_v6 = vadd.f32 %v1132_v4, %v1412_v34  ;;  %v398_v8 = vpop.f32.mrb[5].mxu1  ;;  %831 = vst.msk [vmem:[%s1737_s3 + $0x4] sm:$0xf] %vm829_vm2, %v996_v1  ;;  %v271_v9 = vadd.f32 %v1412_v34, %v270_v7  ;;  %v1101_v11 = vpop.f32.mrb[6].mxu0 }
  0xe4   :  { %863 = vst.msk [vmem:[%s1737_s3 + $0x84] sm:$0xf] %vm829_vm2, %v1028_v2  ;;  %v399_v10 = vadd.f32 %v1412_v34, %v398_v8  ;;  %v1133_v12 = vpop.f32.mrb[6].mxu1  ;;  %v515_v13 = vmax.f32 %v279_v5, 0.0  ;;  %v282_v15 = vadd.f32 %v1101_v11, %v1412_v34  ;;  %v273_v17 = vpop.f32.mrb[7].mxu0 }
  0xe5   :  { %v547_v14 = vmax.f32 %v407_v6, 0.0  ;;  %v410_v16 = vadd.f32 %v1133_v12, %v1412_v34  ;;  %v401_v18 = vpop.f32.mrb[7].mxu1  ;;  %v513_v19 = vmax.f32 %v271_v9, 0.0  ;;  %v274_v21 = vadd.f32 %v1412_v34, %v273_v17 }
  0xe6   :  { %v545_v20 = vmax.f32 %v399_v10, 0.0  ;;  %v402_v22 = vadd.f32 %v1412_v34, %v401_v18  ;;  %v1001_v23 = vpack.c.bf16 %v515_v13, %v515_v13  ;;  %v516_v25 = vmax.f32 %v282_v15, 0.0 }
  0xe7   :  { %v1033_v24 = vpack.c.bf16 %v547_v14, %v547_v14  ;;  %v548_v26 = vmax.f32 %v410_v16, 0.0  ;;  %v999_v27 = vpack.c.bf16 %v513_v19, %v513_v19  ;;  %v514_v29 = vmax.f32 %v274_v21, 0.0 }
  0xe8   :  { %v1031_v28 = vpack.c.bf16 %v545_v20, %v545_v20  ;;  %v546_v30 = vmax.f32 %v402_v22, 0.0  ;;  %836 = vst.msk [vmem:[%s1737_s3 + $0x18] sm:$0xf] %vm829_vm2, %v1001_v23  ;;  %v1002_v31 = vpack.c.bf16 %v516_v25, %v516_v25 }
  0xe9   :  { %868 = vst.msk [vmem:[%s1737_s3 + $0x98] sm:$0xf] %vm829_vm2, %v1033_v24  ;;  %v1034_v32 = vpack.c.bf16 %v548_v26, %v548_v26  ;;  %834 = vst.msk [vmem:[%s1737_s3 + $0x10] sm:$0xf] %vm829_vm2, %v999_v27  ;;  %v1000_v33 = vpack.c.bf16 %v514_v29, %v514_v29  ;;  %v1104_v36 = vpop.f32.mrb[8].mxu0 }
  0xea   :  { %866 = vst.msk [vmem:[%s1737_s3 + $0x90] sm:$0xf] %vm829_vm2, %v1031_v28  ;;  %v1032_v35 = vpack.c.bf16 %v546_v30, %v546_v30  ;;  %v1136_v37 = vpop.f32.mrb[8].mxu1  ;;  %837 = vst.msk [vmem:[%s1737_s3 + $0x1c] sm:$0xf] %vm829_vm2, %v1002_v31  ;;  %v295_v38 = vadd.f32 %v1104_v36, %v1412_v34  ;;  %v286_v40 = vpop.f32.mrb[9].mxu0 }
  0xeb   :  { %869 = vst.msk [vmem:[%s1737_s3 + $0x9c] sm:$0xf] %vm829_vm2, %v1034_v32  ;;  %v423_v39 = vadd.f32 %v1136_v37, %v1412_v34  ;;  %v414_v41 = vpop.f32.mrb[9].mxu1  ;;  %835 = vst.msk [vmem:[%s1737_s3 + $0x14] sm:$0xf] %vm829_vm2, %v1000_v33  ;;  %v287_v42 = vadd.f32 %v1412_v34, %v286_v40  ;;  %v1105_v44 = vpop.f32.mrb[10].mxu0 }
  0xec   :  { %867 = vst.msk [vmem:[%s1737_s3 + $0x94] sm:$0xf] %vm829_vm2, %v1032_v35  ;;  %v415_v43 = vadd.f32 %v1412_v34, %v414_v41  ;;  %v1137_v45 = vpop.f32.mrb[10].mxu1  ;;  %v519_v46 = vmax.f32 %v295_v38, 0.0  ;;  %v298_v48 = vadd.f32 %v1105_v44, %v1412_v34  ;;  %v289_v50 = vpop.f32.mrb[11].mxu0 }
  0xed   :  { %v551_v47 = vmax.f32 %v423_v39, 0.0  ;;  %v426_v49 = vadd.f32 %v1137_v45, %v1412_v34  ;;  %v417_v51 = vpop.f32.mrb[11].mxu1  ;;  %v517_v52 = vmax.f32 %v287_v42, 0.0  ;;  %v290_v54 = vadd.f32 %v1412_v34, %v289_v50 }
  0xee   :  { %v549_v53 = vmax.f32 %v415_v43, 0.0  ;;  %v418_v55 = vadd.f32 %v1412_v34, %v417_v51  ;;  %v1005_v56 = vpack.c.bf16 %v519_v46, %v519_v46  ;;  %v520_v58 = vmax.f32 %v298_v48, 0.0 }
  0xef   :  { %v1037_v57 = vpack.c.bf16 %v551_v47, %v551_v47  ;;  %v552_v59 = vmax.f32 %v426_v49, 0.0  ;;  %v1003_v60 = vpack.c.bf16 %v517_v52, %v517_v52  ;;  %v518_v62 = vmax.f32 %v290_v54, 0.0 }
  0xf0   :  { %v1035_v61 = vpack.c.bf16 %v549_v53, %v549_v53  ;;  %v550_v63 = vmax.f32 %v418_v55, 0.0  ;;  %840 = vst.msk [vmem:[%s1737_s3 + $0x28] sm:$0xf] %vm829_vm2, %v1005_v56  ;;  %v1006_v0 = vpack.c.bf16 %v520_v58, %v520_v58 }
  0xf1   :  { %872 = vst.msk [vmem:[%s1737_s3 + $0xa8] sm:$0xf] %vm829_vm2, %v1037_v57  ;;  %v1038_v1 = vpack.c.bf16 %v552_v59, %v552_v59  ;;  %838 = vst.msk [vmem:[%s1737_s3 + $0x20] sm:$0xf] %vm829_vm2, %v1003_v60  ;;  %v1004_v2 = vpack.c.bf16 %v518_v62, %v518_v62  ;;  %v1108_v4 = vpop.f32.mrb[12].mxu0 }
  0xf2   :  { %870 = vst.msk [vmem:[%s1737_s3 + $0xa0] sm:$0xf] %vm829_vm2, %v1035_v61  ;;  %v1036_v3 = vpack.c.bf16 %v550_v63, %v550_v63  ;;  %v1140_v5 = vpop.f32.mrb[12].mxu1  ;;  %841 = vst.msk [vmem:[%s1737_s3 + $0x2c] sm:$0xf] %vm829_vm2, %v1006_v0  ;;  %v311_v6 = vadd.f32 %v1108_v4, %v1412_v34  ;;  %v302_v8 = vpop.f32.mrb[13].mxu0 }
  0xf3   :  { %873 = vst.msk [vmem:[%s1737_s3 + $0xac] sm:$0xf] %vm829_vm2, %v1038_v1  ;;  %v439_v7 = vadd.f32 %v1140_v5, %v1412_v34  ;;  %v430_v9 = vpop.f32.mrb[13].mxu1  ;;  %839 = vst.msk [vmem:[%s1737_s3 + $0x24] sm:$0xf] %vm829_vm2, %v1004_v2  ;;  %v303_v10 = vadd.f32 %v1412_v34, %v302_v8  ;;  %v1109_v12 = vpop.f32.mrb[14].mxu0 }
  0xf4   :  { %871 = vst.msk [vmem:[%s1737_s3 + $0xa4] sm:$0xf] %vm829_vm2, %v1036_v3  ;;  %v431_v11 = vadd.f32 %v1412_v34, %v430_v9  ;;  %v1141_v13 = vpop.f32.mrb[14].mxu1  ;;  %v523_v14 = vmax.f32 %v311_v6, 0.0  ;;  %v314_v16 = vadd.f32 %v1109_v12, %v1412_v34  ;;  %v305_v18 = vpop.f32.mrb[15].mxu0 }
  0xf5   :  { %v555_v15 = vmax.f32 %v439_v7, 0.0  ;;  %v442_v17 = vadd.f32 %v1141_v13, %v1412_v34  ;;  %v433_v19 = vpop.f32.mrb[15].mxu1  ;;  %v521_v20 = vmax.f32 %v303_v10, 0.0  ;;  %v306_v22 = vadd.f32 %v1412_v34, %v305_v18 }
  0xf6   :  { %v553_v21 = vmax.f32 %v431_v11, 0.0  ;;  %v434_v23 = vadd.f32 %v1412_v34, %v433_v19  ;;  %v1009_v24 = vpack.c.bf16 %v523_v14, %v523_v14  ;;  %v524_v26 = vmax.f32 %v314_v16, 0.0 }
  0xf7   :  { %v1041_v25 = vpack.c.bf16 %v555_v15, %v555_v15  ;;  %v556_v27 = vmax.f32 %v442_v17, 0.0  ;;  %v1007_v28 = vpack.c.bf16 %v521_v20, %v521_v20  ;;  %v522_v30 = vmax.f32 %v306_v22, 0.0 }
  0xf8   :  { %v1039_v29 = vpack.c.bf16 %v553_v21, %v553_v21  ;;  %v554_v31 = vmax.f32 %v434_v23, 0.0  ;;  %844 = vst.msk [vmem:[%s1737_s3 + $0x38] sm:$0xf] %vm829_vm2, %v1009_v24  ;;  %v1010_v32 = vpack.c.bf16 %v524_v26, %v524_v26 }
  0xf9   :  { %876 = vst.msk [vmem:[%s1737_s3 + $0xb8] sm:$0xf] %vm829_vm2, %v1041_v25  ;;  %v1042_v33 = vpack.c.bf16 %v556_v27, %v556_v27  ;;  %842 = vst.msk [vmem:[%s1737_s3 + $0x30] sm:$0xf] %vm829_vm2, %v1007_v28  ;;  %v1008_v35 = vpack.c.bf16 %v522_v30, %v522_v30  ;;  %v1112_v37 = vpop.f32.mrb[16].mxu0 }
  0xfa   :  { %874 = vst.msk [vmem:[%s1737_s3 + $0xb0] sm:$0xf] %vm829_vm2, %v1039_v29  ;;  %v1040_v36 = vpack.c.bf16 %v554_v31, %v554_v31  ;;  %v1144_v38 = vpop.f32.mrb[16].mxu1  ;;  %845 = vst.msk [vmem:[%s1737_s3 + $0x3c] sm:$0xf] %vm829_vm2, %v1010_v32  ;;  %v327_v39 = vadd.f32 %v1112_v37, %v1412_v34  ;;  %v318_v41 = vpop.f32.mrb[17].mxu0 }
  0xfb   :  { %877 = vst.msk [vmem:[%s1737_s3 + $0xbc] sm:$0xf] %vm829_vm2, %v1042_v33  ;;  %v455_v40 = vadd.f32 %v1144_v38, %v1412_v34  ;;  %v446_v42 = vpop.f32.mrb[17].mxu1  ;;  %843 = vst.msk [vmem:[%s1737_s3 + $0x34] sm:$0xf] %vm829_vm2, %v1008_v35  ;;  %v319_v43 = vadd.f32 %v1412_v34, %v318_v41  ;;  %v1113_v45 = vpop.f32.mrb[18].mxu0 }
  0xfc   :  { %875 = vst.msk [vmem:[%s1737_s3 + $0xb4] sm:$0xf] %vm829_vm2, %v1040_v36  ;;  %v447_v44 = vadd.f32 %v1412_v34, %v446_v42  ;;  %v1145_v46 = vpop.f32.mrb[18].mxu1  ;;  %v527_v47 = vmax.f32 %v327_v39, 0.0  ;;  %v330_v49 = vadd.f32 %v1113_v45, %v1412_v34  ;;  %v321_v51 = vpop.f32.mrb[19].mxu0 }
  0xfd   :  { %v559_v48 = vmax.f32 %v455_v40, 0.0  ;;  %v458_v50 = vadd.f32 %v1145_v46, %v1412_v34  ;;  %v449_v52 = vpop.f32.mrb[19].mxu1  ;;  %v525_v53 = vmax.f32 %v319_v43, 0.0  ;;  %v322_v55 = vadd.f32 %v1412_v34, %v321_v51 }
  0xfe   :  { %v557_v54 = vmax.f32 %v447_v44, 0.0  ;;  %v450_v56 = vadd.f32 %v1412_v34, %v449_v52  ;;  %v1013_v57 = vpack.c.bf16 %v527_v47, %v527_v47  ;;  %v528_v59 = vmax.f32 %v330_v49, 0.0 }
  0xff   :  { %v1045_v58 = vpack.c.bf16 %v559_v48, %v559_v48  ;;  %v560_v60 = vmax.f32 %v458_v50, 0.0  ;;  %v1011_v61 = vpack.c.bf16 %v525_v53, %v525_v53  ;;  %v526_v63 = vmax.f32 %v322_v55, 0.0 }
 0x100   :  { %v1043_v62 = vpack.c.bf16 %v557_v54, %v557_v54  ;;  %v558_v0 = vmax.f32 %v450_v56, 0.0  ;;  %848 = vst.msk [vmem:[%s1737_s3 + $0x48] sm:$0xf] %vm829_vm2, %v1013_v57  ;;  %v1014_v1 = vpack.c.bf16 %v528_v59, %v528_v59 }
 0x101   :  { %880 = vst.msk [vmem:[%s1737_s3 + $0xc8] sm:$0xf] %vm829_vm2, %v1045_v58  ;;  %v1046_v2 = vpack.c.bf16 %v560_v60, %v560_v60  ;;  %846 = vst.msk [vmem:[%s1737_s3 + $0x40] sm:$0xf] %vm829_vm2, %v1011_v61  ;;  %v1012_v3 = vpack.c.bf16 %v526_v63, %v526_v63  ;;  %v1116_v5 = vpop.f32.mrb[20].mxu0 }
 0x102   :  { %878 = vst.msk [vmem:[%s1737_s3 + $0xc0] sm:$0xf] %vm829_vm2, %v1043_v62  ;;  %v1044_v4 = vpack.c.bf16 %v558_v0, %v558_v0  ;;  %v1148_v6 = vpop.f32.mrb[20].mxu1  ;;  %849 = vst.msk [vmem:[%s1737_s3 + $0x4c] sm:$0xf] %vm829_vm2, %v1014_v1  ;;  %v343_v7 = vadd.f32 %v1116_v5, %v1412_v34  ;;  %v334_v9 = vpop.f32.mrb[21].mxu0 }
 0x103   :  { %881 = vst.msk [vmem:[%s1737_s3 + $0xcc] sm:$0xf] %vm829_vm2, %v1046_v2  ;;  %v471_v8 = vadd.f32 %v1148_v6, %v1412_v34  ;;  %v462_v10 = vpop.f32.mrb[21].mxu1  ;;  %847 = vst.msk [vmem:[%s1737_s3 + $0x44] sm:$0xf] %vm829_vm2, %v1012_v3  ;;  %v335_v11 = vadd.f32 %v1412_v34, %v334_v9  ;;  %v1117_v13 = vpop.f32.mrb[22].mxu0 }
 0x104   :  { %879 = vst.msk [vmem:[%s1737_s3 + $0xc4] sm:$0xf] %vm829_vm2, %v1044_v4  ;;  %v463_v12 = vadd.f32 %v1412_v34, %v462_v10  ;;  %v1149_v14 = vpop.f32.mrb[22].mxu1  ;;  %v531_v15 = vmax.f32 %v343_v7, 0.0  ;;  %v346_v17 = vadd.f32 %v1117_v13, %v1412_v34  ;;  %v337_v19 = vpop.f32.mrb[23].mxu0 }
 0x105   :  { %v563_v16 = vmax.f32 %v471_v8, 0.0  ;;  %v474_v18 = vadd.f32 %v1149_v14, %v1412_v34  ;;  %v465_v20 = vpop.f32.mrb[23].mxu1  ;;  %v529_v21 = vmax.f32 %v335_v11, 0.0  ;;  %v338_v23 = vadd.f32 %v1412_v34, %v337_v19 }
 0x106   :  { %v561_v22 = vmax.f32 %v463_v12, 0.0  ;;  %v466_v24 = vadd.f32 %v1412_v34, %v465_v20  ;;  %v1017_v25 = vpack.c.bf16 %v531_v15, %v531_v15  ;;  %v532_v27 = vmax.f32 %v346_v17, 0.0 }
 0x107   :  { %v1049_v26 = vpack.c.bf16 %v563_v16, %v563_v16  ;;  %v564_v28 = vmax.f32 %v474_v18, 0.0  ;;  %v1015_v29 = vpack.c.bf16 %v529_v21, %v529_v21  ;;  %v530_v31 = vmax.f32 %v338_v23, 0.0 }
 0x108   :  { %v1047_v30 = vpack.c.bf16 %v561_v22, %v561_v22  ;;  %v562_v32 = vmax.f32 %v466_v24, 0.0  ;;  %852 = vst.msk [vmem:[%s1737_s3 + $0x58] sm:$0xf] %vm829_vm2, %v1017_v25  ;;  %v1018_v33 = vpack.c.bf16 %v532_v27, %v532_v27 }
 0x109   :  { %884 = vst.msk [vmem:[%s1737_s3 + $0xd8] sm:$0xf] %vm829_vm2, %v1049_v26  ;;  %v1050_v35 = vpack.c.bf16 %v564_v28, %v564_v28  ;;  %850 = vst.msk [vmem:[%s1737_s3 + $0x50] sm:$0xf] %vm829_vm2, %v1015_v29  ;;  %v1016_v36 = vpack.c.bf16 %v530_v31, %v530_v31  ;;  %v1120_v38 = vpop.f32.mrb[24].mxu0 }
 0x10a   :  { %882 = vst.msk [vmem:[%s1737_s3 + $0xd0] sm:$0xf] %vm829_vm2, %v1047_v30  ;;  %v1048_v37 = vpack.c.bf16 %v562_v32, %v562_v32  ;;  %v1152_v39 = vpop.f32.mrb[24].mxu1  ;;  %853 = vst.msk [vmem:[%s1737_s3 + $0x5c] sm:$0xf] %vm829_vm2, %v1018_v33  ;;  %v359_v40 = vadd.f32 %v1120_v38, %v1412_v34  ;;  %v350_v42 = vpop.f32.mrb[25].mxu0 }
 0x10b   :  { %885 = vst.msk [vmem:[%s1737_s3 + $0xdc] sm:$0xf] %vm829_vm2, %v1050_v35  ;;  %v487_v41 = vadd.f32 %v1152_v39, %v1412_v34  ;;  %v478_v43 = vpop.f32.mrb[25].mxu1  ;;  %851 = vst.msk [vmem:[%s1737_s3 + $0x54] sm:$0xf] %vm829_vm2, %v1016_v36  ;;  %v351_v44 = vadd.f32 %v1412_v34, %v350_v42  ;;  %v1121_v46 = vpop.f32.mrb[26].mxu0 }
 0x10c   :  { %883 = vst.msk [vmem:[%s1737_s3 + $0xd4] sm:$0xf] %vm829_vm2, %v1048_v37  ;;  %v479_v45 = vadd.f32 %v1412_v34, %v478_v43  ;;  %v1153_v47 = vpop.f32.mrb[26].mxu1  ;;  %v535_v48 = vmax.f32 %v359_v40, 0.0  ;;  %v362_v50 = vadd.f32 %v1121_v46, %v1412_v34  ;;  %v353_v52 = vpop.f32.mrb[27].mxu0 }
 0x10d   :  { %v567_v49 = vmax.f32 %v487_v41, 0.0  ;;  %v490_v51 = vadd.f32 %v1153_v47, %v1412_v34  ;;  %v481_v53 = vpop.f32.mrb[27].mxu1  ;;  %v533_v54 = vmax.f32 %v351_v44, 0.0  ;;  %v354_v56 = vadd.f32 %v1412_v34, %v353_v52 }
 0x10e   :  { %v565_v55 = vmax.f32 %v479_v45, 0.0  ;;  %v482_v57 = vadd.f32 %v1412_v34, %v481_v53  ;;  %v1021_v58 = vpack.c.bf16 %v535_v48, %v535_v48  ;;  %v536_v60 = vmax.f32 %v362_v50, 0.0 }
 0x10f   :  { %v1053_v59 = vpack.c.bf16 %v567_v49, %v567_v49  ;;  %v568_v61 = vmax.f32 %v490_v51, 0.0  ;;  %v1019_v62 = vpack.c.bf16 %v533_v54, %v533_v54  ;;  %v534_v0 = vmax.f32 %v354_v56, 0.0 }
 0x110   :  { %v1051_v63 = vpack.c.bf16 %v565_v55, %v565_v55  ;;  %v566_v1 = vmax.f32 %v482_v57, 0.0  ;;  %856 = vst.msk [vmem:[%s1737_s3 + $0x68] sm:$0xf] %vm829_vm2, %v1021_v58  ;;  %v1022_v2 = vpack.c.bf16 %v536_v60, %v536_v60 }
 0x111   :  { %888 = vst.msk [vmem:[%s1737_s3 + $0xe8] sm:$0xf] %vm829_vm2, %v1053_v59  ;;  %v1054_v3 = vpack.c.bf16 %v568_v61, %v568_v61  ;;  %854 = vst.msk [vmem:[%s1737_s3 + $0x60] sm:$0xf] %vm829_vm2, %v1019_v62  ;;  %v1020_v4 = vpack.c.bf16 %v534_v0, %v534_v0  ;;  %v1124_v6 = vpop.f32.mrb[28].mxu0 }
 0x112   :  { %886 = vst.msk [vmem:[%s1737_s3 + $0xe0] sm:$0xf] %vm829_vm2, %v1051_v63  ;;  %v1052_v5 = vpack.c.bf16 %v566_v1, %v566_v1  ;;  %v1156_v7 = vpop.f32.mrb[28].mxu1  ;;  %857 = vst.msk [vmem:[%s1737_s3 + $0x6c] sm:$0xf] %vm829_vm2, %v1022_v2  ;;  %v375_v8 = vadd.f32 %v1124_v6, %v1412_v34  ;;  %v366_v10 = vpop.f32.mrb[29].mxu0 }
 0x113   :  { %889 = vst.msk [vmem:[%s1737_s3 + $0xec] sm:$0xf] %vm829_vm2, %v1054_v3  ;;  %v503_v9 = vadd.f32 %v1156_v7, %v1412_v34  ;;  %v494_v11 = vpop.f32.mrb[29].mxu1  ;;  %855 = vst.msk [vmem:[%s1737_s3 + $0x64] sm:$0xf] %vm829_vm2, %v1020_v4  ;;  %v367_v12 = vadd.f32 %v1412_v34, %v366_v10  ;;  %v1125_v14 = vpop.f32.mrb[30].mxu0 }
 0x114   :  { %887 = vst.msk [vmem:[%s1737_s3 + $0xe4] sm:$0xf] %vm829_vm2, %v1052_v5  ;;  %v495_v13 = vadd.f32 %v1412_v34, %v494_v11  ;;  %v1157_v15 = vpop.f32.mrb[30].mxu1  ;;  %v539_v16 = vmax.f32 %v375_v8, 0.0  ;;  %v378_v18 = vadd.f32 %v1125_v14, %v1412_v34  ;;  %v369_v20 = vpop.f32.mrb[31].mxu0 }
 0x115   :  { %v571_v17 = vmax.f32 %v503_v9, 0.0  ;;  %v506_v19 = vadd.f32 %v1157_v15, %v1412_v34  ;;  %v497_v21 = vpop.f32.mrb[31].mxu1  ;;  %v537_v22 = vmax.f32 %v367_v12, 0.0  ;;  %v370_v24 = vadd.f32 %v1412_v34, %v369_v20 }
 0x116   :  { %v569_v23 = vmax.f32 %v495_v13, 0.0  ;;  %v498_v25 = vadd.f32 %v1412_v34, %v497_v21  ;;  %v1025_v26 = vpack.c.bf16 %v539_v16, %v539_v16  ;;  %v540_v28 = vmax.f32 %v378_v18, 0.0 }
 0x117   :  { %v1057_v27 = vpack.c.bf16 %v571_v17, %v571_v17  ;;  %v572_v29 = vmax.f32 %v506_v19, 0.0  ;;  %v1023_v30 = vpack.c.bf16 %v537_v22, %v537_v22  ;;  %v538_v32 = vmax.f32 %v370_v24, 0.0 }
 0x118   :  { %v1055_v31 = vpack.c.bf16 %v569_v23, %v569_v23  ;;  %v570_v33 = vmax.f32 %v498_v25, 0.0  ;;  %860 = vst.msk [vmem:[%s1737_s3 + $0x78] sm:$0xf] %vm829_vm2, %v1025_v26  ;;  %v1026_v35 = vpack.c.bf16 %v540_v28, %v540_v28 }
 0x119   :  { %892 = vst.msk [vmem:[%s1737_s3 + $0xf8] sm:$0xf] %vm829_vm2, %v1057_v27  ;;  %v1058_v34 = vpack.c.bf16 %v572_v29, %v572_v29  ;;  %858 = vst.msk [vmem:[%s1737_s3 + $0x70] sm:$0xf] %vm829_vm2, %v1023_v30  ;;  %v1024_v36 = vpack.c.bf16 %v538_v32, %v538_v32 }
 0x11a   :  { %890 = vst.msk [vmem:[%s1737_s3 + $0xf0] sm:$0xf] %vm829_vm2, %v1055_v31  ;;  %v1056_v37 = vpack.c.bf16 %v570_v33, %v570_v33  ;;  %861 = vst.msk [vmem:[%s1737_s3 + $0x7c] sm:$0xf] %vm829_vm2, %v1026_v35 }
 0x11b   :  { %893 = vst.msk [vmem:[%s1737_s3 + $0xfc] sm:$0xf] %vm829_vm2, %v1058_v34  ;;  %859 = vst.msk [vmem:[%s1737_s3 + $0x74] sm:$0xf] %vm829_vm2, %v1024_v36 }
 0x11c   :  { %891 = vst.msk [vmem:[%s1737_s3 + $0xf4] sm:$0xf] %vm829_vm2, %v1056_v37 }

// kernel: inception_forward.7
= control target key start
LH: loop header
LB: loop body
LE: loop exit
PB: predicated region body
PF: predicated region fallthrough
CT: control target
= control target key end

     0   :  { %s1317_s12 = smov 0   ;;  %s1889_s0 = inlined_call_operand.vmem [shape: f32[2,16,16,4], index: 0, kind: input, shape index: {}]   ;;  %s1890_s1 = inlined_call_operand.vmem [shape: bf16[4,4], index: 1, kind: input, shape index: {}]   ;;  %s1891_s2 = inlined_call_operand.vmem [shape: f32[1,4], index: 2, kind: input, shape index: {}]   ;;  %s1892_s3 = inlined_call_operand.vmem [shape: f32[2,16,16,4], index: 3, kind: output, shape index: {}]  }
   0x1 LB: > { %s1194_s13 = sadd.s32 4294967295, %s1294_s12   ;;  %p1198_p0 = scmp.ge.s32.totalorder %s1294_s12, 1  ;;  %s1294_s12 = sphi %s1317_s12, %s13_s12  }
   0x2   : > { %p137_p1 = scmp.lt.s32.totalorder %s1294_s12, 3 }
   0x4   : > { %p138_p2 = pnand %p1198_p0, %p137_p1 }
   0x5   : > { %v854_v0 = vld [vmem:[%s1890_s1] sm:$0x3] (!%p138_p2)  ;;  %vm910_vm0 = vcmask (!%p138_p2), 1041408   ;;  %p1330_p3 = scmp.lt.s32.totalorder (!%p138_p2), %s1194_s13, 1  ;;  %vm172_vm1 = vcmask (!%p138_p2), 31744   ;;  %v1296_v2 = vmov (!%p138_p2), -inf  }
   0x6   : > { %141 = sbr.rel (%p138_p2) target bundleno = 340 (0x154), region = 32  ;;  %1277 = vmatprep.subr.msk.bf16.mxu0 (!%p138_p2), %vm910_vm0, %v854_v0  ;;  %1278 = vmatprep.subr.msk.bf16.mxu1 (!%p138_p2), %vm910_vm0, %v854_v0  ;;  %v912_v1 = vsel (!%p138_p2), %vm910_vm0, %v854_v0, 0  ;;  %173 = vst.msk [vmem:[#allocation2] sm:$0xff] (!%p138_p2), %vm172_vm1, %v1296_v2  ;;  %174 = vst.msk [vmem:[#allocation2 + $0x8] sm:$0xff] (!%p138_p2), %vm172_vm1, %v1296_v2  ;;  %vm175_vm2 = vcmask (!%p138_p2), 25600  }
   0x7   : > { %177 = vst.msk [vmem:[#allocation2 + $0x18] sm:$0xff] (!%p138_p2), %vm172_vm1, %v1296_v2  ;;  %178 = vst.msk [vmem:[#allocation2 + $0x20] sm:$0xff] (!%p138_p2), %vm172_vm1, %v1296_v2  ;;  %1242 = vmatpush3.bf16.msra.mxu0 (!%p138_p2), %v912_v1  ;;  %1276 = vmatpush3.bf16.msra.mxu1 (!%p138_p2), %v912_v1 }
   0x8   : > { %180 = vst.msk [vmem:[#allocation2 + $0x30] sm:$0xff] (!%p138_p2), %vm172_vm1, %v1296_v2  ;;  %181 = vst.msk [vmem:[#allocation2 + $0x38] sm:$0xff] (!%p138_p2), %vm172_vm1, %v1296_v2 }
   0x9   : > { %183 = vst.msk [vmem:[#allocation2 + $0x48] sm:$0xff] (!%p138_p2), %vm172_vm1, %v1296_v2  ;;  %184 = vst.msk [vmem:[#allocation2 + $0x50] sm:$0xff] (!%p138_p2), %vm172_vm1, %v1296_v2 }
   0xa   : > { %186 = vst.msk [vmem:[#allocation2 + $0x60] sm:$0xff] (!%p138_p2), %vm172_vm1, %v1296_v2  ;;  %187 = vst.msk [vmem:[#allocation2 + $0x68] sm:$0xff] (!%p138_p2), %vm172_vm1, %v1296_v2 }
   0xb   : > { %189 = vst.msk [vmem:[#allocation2 + $0x78] sm:$0xff] (!%p138_p2), %vm172_vm1, %v1296_v2  ;;  %190 = vst.msk [vmem:[#allocation2 + $0x80] sm:$0xff] (!%p138_p2), %vm172_vm1, %v1296_v2 }
   0xc   : > { %192 = vst.msk [vmem:[#allocation2 + $0x90] sm:$0xff] (!%p138_p2), %vm172_vm1, %v1296_v2  ;;  %193 = vst.msk [vmem:[#allocation2 + $0x98] sm:$0xff] (!%p138_p2), %vm172_vm1, %v1296_v2 }
   0xd   : > { %195 = vst.msk [vmem:[#allocation2 + $0xa8] sm:$0xff] %vm172_vm1, %v1296_v2  ;;  %196 = vst.msk [vmem:[#allocation2 + $0xb0] sm:$0xff] %vm172_vm1, %v1296_v2  ;;  %s1895_s13 = smov (!%p1330_p3, %s1194_s13), 1  ;;  %v325_v9 = vld [vmem:[#allocation2] sm:$0xff]  ;;  %v326_v10 = vld [vmem:[#allocation2 + $0x8] sm:$0xff] }
   0xe   : > { %198 = vst.msk [vmem:[#allocation2 + $0xc0] sm:$0xff] %vm172_vm1, %v1296_v2  ;;  %199 = vst.msk [vmem:[#allocation2 + $0xc8] sm:$0xff] %vm172_vm1, %v1296_v2  ;;  %s1222_s17 = sshll.u32 %s1895_s13, 8  ;;  %v389_v17 = vld [vmem:[#allocation2 + $0x1] sm:$0xff] }
   0xf   : > { %201 = vst.msk [vmem:[#allocation2 + $0xd8] sm:$0xff] %vm172_vm1, %v1296_v2  ;;  %202 = vst.msk [vmem:[#allocation2 + $0xe0] sm:$0xff] %vm172_vm1, %v1296_v2  ;;  %s1400_s20 = scalar_lea.vmem %s1889_s0, %s1222_s17  ;;  %v453_v31 = vld [vmem:[#allocation2 + $0x2] sm:$0xff]  ;;  %s1789_s25 = scalar_lea.vmem %s1892_s3, %s1222_s17 }
  0x10   : > { %204 = vst.msk [vmem:[#allocation2 + $0xf0] sm:$0xff] %vm172_vm1, %v1296_v2  ;;  %205 = vst.msk [vmem:[#allocation2 + $0xf8] sm:$0xff] %vm172_vm1, %v1296_v2  ;;  %v228_v3 = vld [vmem:[%s1400_s20] sm:$0xff]  ;;  %v229_v4 = vld [vmem:[%s1400_s20 + $0x8] sm:$0xff] }
  0x11   : > { %207 = vst.msk [vmem:[#allocation2 + $0x108] sm:$0xff] %vm172_vm1, %v1296_v2  ;;  %208 = vst.msk [vmem:[#allocation2 + $0x110] sm:$0xff] %vm172_vm1, %v1296_v2  ;;  %v230_v5 = vld [vmem:[%s1400_s20 + $0x10] sm:$0xff]  ;;  %v231_v6 = vld [vmem:[%s1400_s20 + $0x18] sm:$0xff] }
  0x12   : > { %210 = vst.msk [vmem:[#allocation2 + $0x120] sm:$0xff] %vm172_vm1, %v1296_v2  ;;  %211 = vst.msk [vmem:[#allocation2 + $0x128] sm:$0xff] %vm172_vm1, %v1296_v2  ;;  %v242_v7 = vld [vmem:[%s1400_s20 + $0x70] sm:$0xff]  ;;  %v243_v8 = vld [vmem:[%s1400_s20 + $0x78] sm:$0xff] }
  0x13   : > { %213 = vst.msk [vmem:[#allocation2 + $0x138] sm:$0xff] %vm172_vm1, %v1296_v2  ;;  %214 = vst.msk [vmem:[#allocation2 + $0x140] sm:$0xff] %vm172_vm1, %v1296_v2  ;;  %v244_v11 = vld [vmem:[%s1400_s20 + $0x80] sm:$0xff]  ;;  %v245_v12 = vld [vmem:[%s1400_s20 + $0x88] sm:$0xff] }
  0x14   : > { %216 = vst.msk [vmem:[#allocation2 + $0x150] sm:$0xff] %vm172_vm1, %v1296_v2  ;;  %217 = vst.msk [vmem:[#allocation2 + $0x158] sm:$0xff] %vm172_vm1, %v1296_v2  ;;  %v246_v13 = vld [vmem:[%s1400_s20 + $0x90] sm:$0xff]  ;;  %v247_v14 = vld [vmem:[%s1400_s20 + $0x98] sm:$0xff] }
  0x15   : > { %219 = vst.msk [vmem:[#allocation2 + $0x168] sm:$0xff] %vm172_vm1, %v1296_v2  ;;  %220 = vst.msk [vmem:[#allocation2 + $0x170] sm:$0xff] %vm172_vm1, %v1296_v2  ;;  %v232_v15 = vld [vmem:[%s1400_s20 + $0x20] sm:$0xff]  ;;  %v233_v16 = vld [vmem:[%s1400_s20 + $0x28] sm:$0xff] }
  0x16   : > { %222 = vst.msk [vmem:[#allocation2 + $0x180] sm:$0xff] %vm172_vm1, %v1296_v2  ;;  %223 = vst.msk [vmem:[#allocation2 + $0x188] sm:$0xff] %vm172_vm1, %v1296_v2  ;;  %v248_v19 = vld [vmem:[%s1400_s20 + $0xa0] sm:$0xff]  ;;  %v249_v20 = vld [vmem:[%s1400_s20 + $0xa8] sm:$0xff] }
  0x17   : > { %225 = vst.msk [vmem:[#allocation2 + $0x198] sm:$0xff] %vm172_vm1, %v1296_v2  ;;  %226 = vst.msk [vmem:[#allocation2 + $0x1a0] sm:$0xff] %vm172_vm1, %v1296_v2  ;;  %v234_v21 = vld [vmem:[%s1400_s20 + $0x30] sm:$0xff]  ;;  %v235_v22 = vld [vmem:[%s1400_s20 + $0x38] sm:$0xff] }
  0x18   : > { %176 = vst.msk [vmem:[#allocation2 + $0x10] sm:$0x3] %vm175_vm2, %v1296_v2  ;;  %179 = vst.msk [vmem:[#allocation2 + $0x28] sm:$0x3] %vm175_vm2, %v1296_v2  ;;  %v250_v23 = vld [vmem:[%s1400_s20 + $0xb0] sm:$0xff]  ;;  %v251_v24 = vld [vmem:[%s1400_s20 + $0xb8] sm:$0xff] }
  0x19   : > { %182 = vst.msk [vmem:[#allocation2 + $0x40] sm:$0x3] %vm175_vm2, %v1296_v2  ;;  %185 = vst.msk [vmem:[#allocation2 + $0x58] sm:$0x3] %vm175_vm2, %v1296_v2 }
  0x1a   : > { %188 = vst.msk [vmem:[#allocation2 + $0x70] sm:$0x3] %vm175_vm2, %v1296_v2  ;;  %191 = vst.msk [vmem:[#allocation2 + $0x88] sm:$0x3] %vm175_vm2, %v1296_v2 }
  0x1b   : > { %194 = vst.msk [vmem:[#allocation2 + $0xa0] sm:$0x3] %vm175_vm2, %v1296_v2  ;;  %197 = vst.msk [vmem:[#allocation2 + $0xb8] sm:$0x3] %vm175_vm2, %v1296_v2 }
  0x1c   : > { %200 = vst.msk [vmem:[#allocation2 + $0xd0] sm:$0x3] %vm175_vm2, %v1296_v2  ;;  %203 = vst.msk [vmem:[#allocation2 + $0xe8] sm:$0x3] %vm175_vm2, %v1296_v2 }
  0x1d   : > { %206 = vst.msk [vmem:[#allocation2 + $0x100] sm:$0x3] %vm175_vm2, %v1296_v2  ;;  %209 = vst.msk [vmem:[#allocation2 + $0x118] sm:$0x3] %vm175_vm2, %v1296_v2 }
  0x1e   : > { %212 = vst.msk [vmem:[#allocation2 + $0x130] sm:$0x3] %vm175_vm2, %v1296_v2  ;;  %215 = vst.msk [vmem:[#allocation2 + $0x148] sm:$0x3] %vm175_vm2, %v1296_v2 }
  0x1f   : > { %218 = vst.msk [vmem:[#allocation2 + $0x160] sm:$0x3] %vm175_vm2, %v1296_v2  ;;  %221 = vst.msk [vmem:[#allocation2 + $0x178] sm:$0x3] %vm175_vm2, %v1296_v2  ;;  %v390_v18 = vld [vmem:[#allocation2 + $0x9] sm:$0xff] }
  0x20   : > { %224 = vst.msk [vmem:[#allocation2 + $0x190] sm:$0x3] %vm175_vm2, %v1296_v2  ;;  %227 = vst.msk [vmem:[#allocation2 + $0x1a8] sm:$0x3] %vm175_vm2, %v1296_v2  ;;  %v454_v32 = vld [vmem:[#allocation2 + $0xa] sm:$0xff] }
  0x21   : > { %261 = vst.msk [vmem:[#allocation2 + $0x19] sm:$0xff] %vm172_vm1, %v228_v3  ;;  %262 = vst.msk [vmem:[#allocation2 + $0x21] sm:$0xff] %vm172_vm1, %v229_v4 }
  0x22   : > { %263 = vst.msk [vmem:[#allocation2 + $0x31] sm:$0xff] %vm172_vm1, %v230_v5  ;;  %264 = vst.msk [vmem:[#allocation2 + $0x39] sm:$0xff] %vm172_vm1, %v231_v6 }
  0x23   : > { %275 = vst.msk [vmem:[#allocation2 + $0xc1] sm:$0xff] %vm172_vm1, %v242_v7  ;;  %276 = vst.msk [vmem:[#allocation2 + $0xc9] sm:$0xff] %vm172_vm1, %v243_v8 }
  0x24   : > { %277 = vst.msk [vmem:[#allocation2 + $0xd9] sm:$0xff] %vm172_vm1, %v244_v11  ;;  %278 = vst.msk [vmem:[#allocation2 + $0xe1] sm:$0xff] %vm172_vm1, %v245_v12 }
  0x25   : > { %279 = vst.msk [vmem:[#allocation2 + $0xf1] sm:$0xff] %vm172_vm1, %v246_v13  ;;  %280 = vst.msk [vmem:[#allocation2 + $0xf9] sm:$0xff] %vm172_vm1, %v247_v14 }
  0x26   : > { %265 = vst.msk [vmem:[#allocation2 + $0x49] sm:$0xff] %vm172_vm1, %v232_v15  ;;  %266 = vst.msk [vmem:[#allocation2 + $0x51] sm:$0xff] %vm172_vm1, %v233_v16 }
  0x27   : > { %281 = vst.msk [vmem:[#allocation2 + $0x109] sm:$0xff] %vm172_vm1, %v248_v19  ;;  %282 = vst.msk [vmem:[#allocation2 + $0x111] sm:$0xff] %vm172_vm1, %v249_v20 }
  0x28   : > { %267 = vst.msk [vmem:[#allocation2 + $0x61] sm:$0xff] %vm172_vm1, %v234_v21  ;;  %v293_v25 = vld [vmem:[#allocation2 + $0x19] sm:$0xff]  ;;  %v294_v26 = vld [vmem:[#allocation2 + $0x21] sm:$0xff]  ;;  %268 = vst.msk [vmem:[#allocation2 + $0x69] sm:$0xff] %vm172_vm1, %v235_v22 }
  0x29   : > { %v517_v27 = vld [vmem:[#allocation2 + $0x18] sm:$0xff]  ;;  %283 = vst.msk [vmem:[#allocation2 + $0x121] sm:$0xff] %vm172_vm1, %v250_v23  ;;  %284 = vst.msk [vmem:[#allocation2 + $0x129] sm:$0xff] %vm172_vm1, %v251_v24  ;;  %v357_v28 = vmax.f32 %v293_v25, %v325_v9  ;;  %v358_v29 = vmax.f32 %v294_v26, %v326_v10  ;;  %v518_v30 = vld [vmem:[#allocation2 + $0x20] sm:$0xff] }
  0x2a   : > { %v1438_v33 = vld [vmem:[#allocation2 + $0x31] sm:$0xff]  ;;  %v581_v36 = vld [vmem:[#allocation2 + $0x1a] sm:$0xff]  ;;  %v582_v37 = vld [vmem:[#allocation2 + $0x22] sm:$0xff] }
  0x2b   : > { %v421_v34 = vmax.f32 %v357_v28, %v389_v17  ;;  %v422_v35 = vmax.f32 %v358_v29, %v390_v18  ;;  %v1440_v38 = vld [vmem:[#allocation2 + $0x39] sm:$0xff]  ;;  %v359_v39 = vmax.f32 %v1438_v33, %v517_v27  ;;  %v310_v41 = vld [vmem:[#allocation2 + $0xe1] sm:$0xff]  ;;  %v1451_v49 = vld [vmem:[#allocation2 + $0xc9] sm:$0xff] }
  0x2c   : > { %v309_v40 = vld [vmem:[#allocation2 + $0xd9] sm:$0xff]  ;;  %v360_v43 = vmax.f32 %v1440_v38, %v518_v30  ;;  %v1446_v46 = vld [vmem:[#allocation2 + $0xc8] sm:$0xff]  ;;  %v1453_v51 = vld [vmem:[#allocation2 + $0x30] sm:$0xff] }
  0x2d   : > { %v1443_v42 = vld [vmem:[#allocation2 + $0xc0] sm:$0xff]  ;;  %v485_v44 = vmax.f32 %v421_v34, %v453_v31  ;;  %v486_v45 = vmax.f32 %v422_v35, %v454_v32  ;;  %v423_v50 = vmax.f32 %v359_v39, %v293_v25  ;;  %v1455_v52 = vld [vmem:[#allocation2 + $0x38] sm:$0xff]  ;;  %v374_v53 = vmax.f32 %v310_v41, %v1446_v46  ;;  %v1461_v59 = vld [vmem:[#allocation2 + $0xca] sm:$0xff] }
  0x2e   : > { %v373_v47 = vmax.f32 %v309_v40, %v1443_v42  ;;  %v1449_v48 = vld [vmem:[#allocation2 + $0xc1] sm:$0xff]  ;;  %v424_v55 = vmax.f32 %v360_v43, %v294_v26  ;;  %v533_v60 = vld [vmem:[#allocation2 + $0xd8] sm:$0xff]  ;;  %v1490_v29 = vld [vmem:[#allocation2 + $0x50] sm:$0xff] }
  0x2f   : > { %v1458_v54 = vld [vmem:[#allocation2 + $0xc2] sm:$0xff]  ;;  %v549_v56 = vmax.f32 %v485_v44, %v517_v27  ;;  %v550_v57 = vmax.f32 %v486_v45, %v518_v30  ;;  %v487_v62 = vmax.f32 %v423_v50, %v581_v36  ;;  %v1463_v63 = vld [vmem:[#allocation2 + $0x32] sm:$0xff]  ;;  %v438_v0 = vmax.f32 %v374_v53, %v1451_v49  ;;  %v1468_v5 = vld [vmem:[#allocation2 + $0x3a] sm:$0xff] }
  0x30   : > { %v437_v58 = vmax.f32 %v373_v47, %v1449_v48  ;;  %v534_v61 = vld [vmem:[#allocation2 + $0xe0] sm:$0xff]  ;;  %v1466_v1 = vld [vmem:[#allocation2 + $0xf1] sm:$0xff]  ;;  %v488_v2 = vmax.f32 %v424_v55, %v582_v37  ;;  %v1482_v21 = vld [vmem:[#allocation2 + $0x48] sm:$0xff] }
  0x31   : > { %v613_v3 = vmax.f32 %v549_v56, %v581_v36  ;;  %v614_v4 = vmax.f32 %v550_v57, %v582_v37  ;;  %v1471_v7 = vld [vmem:[#allocation2 + $0xf9] sm:$0xff]  ;;  %v551_v8 = vmax.f32 %v487_v62, %v1453_v51  ;;  %v502_v9 = vmax.f32 %v438_v0, %v1461_v59  ;;  %v598_v17 = vld [vmem:[#allocation2 + $0xe2] sm:$0xff]  ;;  %v1486_v27 = vld [vmem:[#allocation2 + $0xf0] sm:$0xff] }
  0x32   : > { %v501_v6 = vmax.f32 %v437_v58, %v1458_v54  ;;  %v552_v10 = vmax.f32 %v488_v2, %v1455_v52  ;;  %v375_v11 = vmax.f32 %v1466_v1, %v533_v60  ;;  %v376_v12 = vmax.f32 %v1471_v7, %v534_v61  ;;  %v597_v16 = vld [vmem:[#allocation2 + $0xda] sm:$0xff]  ;;  %v1494_v34 = vld [vmem:[#allocation2 + $0x49] sm:$0xff]  ;;  %v1503_v44 = vld [vmem:[#allocation2 + $0x51] sm:$0xff] }
  0x33   : > { %v678_v13 = vmax.f32 %v613_v3, %v1453_v51  ;;  %v679_v14 = vmax.f32 %v614_v4, %v1455_v52  ;;  %v615_v18 = vmax.f32 %v551_v8, %v1463_v63  ;;  %v566_v19 = vmax.f32 %v502_v9, %v534_v61  ;;  %v1488_v28 = vld [vmem:[#allocation2 + $0xf8] sm:$0xff]  ;;  %v1508_v53 = vld [vmem:[#allocation2 + $0x4a] sm:$0xff] }
  0x34   : > { %v565_v15 = vmax.f32 %v501_v6, %v533_v60  ;;  %v616_v20 = vmax.f32 %v552_v10, %v1468_v5  ;;  %v439_v22 = vmax.f32 %v375_v11, %v309_v40  ;;  %v440_v23 = vmax.f32 %v376_v12, %v310_v41  ;;  %v1499_v41 = vld [vmem:[#allocation2 + $0xf2] sm:$0xff]  ;;  %v1501_v43 = vld [vmem:[#allocation2 + $0xfa] sm:$0xff]  ;;  %v1514_v58 = vld [vmem:[#allocation2 + $0x109] sm:$0xff] }
  0x35   : > { %v742_v24 = vmax.f32 %v678_v13, %v1438_v33  ;;  %v743_v25 = vmax.f32 %v679_v14, %v1440_v38  ;;  %v680_v30 = vmax.f32 %v615_v18, %v1482_v21  ;;  %v630_v31 = vmax.f32 %v566_v19, %v598_v17  ;;  %v1510_v55 = vld [vmem:[#allocation2 + $0x52] sm:$0xff]  ;;  %v1518_v0 = vld [vmem:[#allocation2 + $0x108] sm:$0xff]  ;;  %v236_v12 = vld [vmem:[%s1400_s20 + $0x40] sm:$0xff] }
  0x36   : > { %v629_v26 = vmax.f32 %v565_v15, %v597_v16  ;;  %v681_v32 = vmax.f32 %v616_v20, %v1490_v29  ;;  %v503_v35 = vmax.f32 %v439_v22, %v597_v16  ;;  %v504_v36 = vmax.f32 %v440_v23, %v598_v17  ;;  %v1520_v2 = vld [vmem:[#allocation2 + $0x110] sm:$0xff]  ;;  %v1526_v6 = vld [vmem:[#allocation2 + $0x61] sm:$0xff]  ;;  %269 = vst.msk [vmem:[#allocation2 + $0x79] sm:$0xff] %vm172_vm1, %v236_v12  ;;  %v239_v22 = vld [vmem:[%s1400_s20 + $0x58] sm:$0xff] }
  0x37   : > { %v806_v37 = vmax.f32 %v742_v24, %v1463_v63  ;;  %v807_v39 = vmax.f32 %v743_v25, %v1468_v5  ;;  %v744_v45 = vmax.f32 %v680_v30, %v1494_v34  ;;  %v695_v47 = vmax.f32 %v630_v31, %v1488_v28  ;;  %v1522_v3 = vld [vmem:[#allocation2 + $0x111] sm:$0xff]  ;;  %v237_v13 = vld [vmem:[%s1400_s20 + $0x48] sm:$0xff]  ;;  %v252_v14 = vld [vmem:[%s1400_s20 + $0xc0] sm:$0xff]  ;;  %272 = vst.msk [vmem:[#allocation2 + $0x99] sm:$0xff] %vm172_vm1, %v239_v22 }
  0x38   : > { %v694_v40 = vmax.f32 %v629_v26, %v1486_v27  ;;  %v745_v50 = vmax.f32 %v681_v32, %v1503_v44  ;;  %v567_v56 = vmax.f32 %v503_v35, %v1486_v27  ;;  %v568_v57 = vmax.f32 %v504_v36, %v1488_v28  ;;  %v1540_v17 = vld [vmem:[#allocation2 + $0x69] sm:$0xff]  ;;  %270 = vst.msk [vmem:[#allocation2 + $0x81] sm:$0xff] %vm172_vm1, %v237_v13  ;;  %v255_v26 = vld [vmem:[%s1400_s20 + $0xd8] sm:$0xff] }
  0x39   : > { %v838_v60 = vpack.c.bf16 %v807_v39, %v806_v37  ;;  %v808_v62 = vmax.f32 %v744_v45, %v1508_v53  ;;  %v361_v4 = vmax.f32 %v1494_v34, %v1453_v51  ;;  %v759_v8 = vmax.f32 %v695_v47, %v1471_v7  ;;  %v253_v19 = vld [vmem:[%s1400_s20 + $0xc8] sm:$0xff]  ;;  %285 = vst.msk [vmem:[#allocation2 + $0x139] sm:$0xff] %vm172_vm1, %v252_v14  ;;  %v238_v20 = vld [vmem:[%s1400_s20 + $0x50] sm:$0xff]  ;;  %v256_v37 = vld [vmem:[%s1400_s20 + $0xe0] sm:$0xff] }
  0x3a   : > { %v758_v61 = vmax.f32 %v694_v40, %v1466_v1  ;;  %v809_v9 = vmax.f32 %v745_v50, %v1510_v55  ;;  %v631_v10 = vmax.f32 %v567_v56, %v1499_v41  ;;  %v632_v11 = vmax.f32 %v568_v57, %v1501_v43  ;;  %286 = vst.msk [vmem:[#allocation2 + $0x141] sm:$0xff] %vm172_vm1, %v253_v19  ;;  %v254_v25 = vld [vmem:[%s1400_s20 + $0xd0] sm:$0xff]  ;;  %v241_v36 = vld [vmem:[%s1400_s20 + $0x68] sm:$0xff]  ;;  %v259_v45 = vld [vmem:[%s1400_s20 + $0xf8] sm:$0xff] }
  0x3b   : > { %1243 = vmatprep.mubr.msk.bf16.mxu0 %vm172_vm1, %v838_v60  ;;  %v362_v15 = vmax.f32 %v1503_v44, %v1455_v52  ;;  %v425_v16 = vmax.f32 %v361_v4, %v1438_v33  ;;  %v377_v18 = vmax.f32 %v1514_v58, %v1486_v27  ;;  %v823_v52 = vmax.f32 %v759_v8, %v1501_v43  ;;  %v240_v27 = vld [vmem:[%s1400_s20 + $0x60] sm:$0xff]  ;;  %v257_v39 = vld [vmem:[%s1400_s20 + $0xe8] sm:$0xff]  ;;  %v1580_v50 = vld [vmem:[#allocation2 + $0x112] sm:$0xff] }
  0x3c   : > { %v822_v51 = vmax.f32 %v758_v61, %v1499_v41  ;;  %v839_v33 = vpack.c.bf16 %v809_v9, %v808_v62  ;;  %v696_v23 = vmax.f32 %v631_v10, %v1518_v0  ;;  %v697_v24 = vmax.f32 %v632_v11, %v1520_v2  ;;  %271 = vst.msk [vmem:[#allocation2 + $0x91] sm:$0xff] %vm172_vm1, %v238_v20  ;;  %v792_v47 = vld [vmem:[#allocation2 + $0x10a] sm:$0xff]  ;;  %v1586_v62 = vld [vmem:[#allocation2 + $0x121] sm:$0xff] }
  0x3d   : > { %v426_v30 = vmax.f32 %v362_v15, %v1440_v38  ;;  %v489_v31 = vmax.f32 %v425_v16, %v1463_v63  ;;  %v378_v32 = vmax.f32 %v1522_v3, %v1488_v28  ;;  %v441_v35 = vmax.f32 %v377_v18, %v1466_v1  ;;  %287 = vst.msk [vmem:[#allocation2 + $0x151] sm:$0xff] %vm172_vm1, %v254_v25  ;;  %v258_v28 = vld [vmem:[%s1400_s20 + $0xf0] sm:$0xff]  ;;  %v650_v9 = vld [vmem:[#allocation2 + $0x60] sm:$0xff] }
  0x3e   : > { %288 = vst.msk [vmem:[#allocation2 + $0x159] sm:$0xff] %vm172_vm1, %v255_v26  ;;  %273 = vst.msk [vmem:[#allocation2 + $0xa9] sm:$0xff] %vm172_vm1, %v240_v27  ;;  %v846_v40 = vpack.c.bf16 %v823_v52, %v822_v51  ;;  %1244 = vmatmul.mubr.msk.bf16.vlgmr.msra.gmra.mrb[0].mxu0 %vm172_vm1, %v839_v33  ;;  %v760_v38 = vmax.f32 %v696_v23, %v1514_v58  ;;  %v761_v63 = vmax.f32 %v697_v24, %v1522_v3  ;;  %v1599_v12 = vld [vmem:[#allocation2 + $0x129] sm:$0xff]  ;;  %v1610_v20 = vld [vmem:[#allocation2 + $0x120] sm:$0xff] }
  0x3f   : > { %v363_v1 = vmax.f32 %v1526_v6, %v1482_v21  ;;  %274 = vst.msk [vmem:[#allocation2 + $0xb1] sm:$0xff] %vm172_vm1, %v241_v36  ;;  %289 = vst.msk [vmem:[#allocation2 + $0x169] sm:$0xff] %vm172_vm1, %v256_v37  ;;  %v490_v56 = vmax.f32 %v426_v30, %v1468_v5  ;;  %v553_v57 = vmax.f32 %v489_v31, %v1482_v21  ;;  %v1606_v18 = vld [vmem:[#allocation2 + $0x62] sm:$0xff]  ;;  %v1617_v23 = vld [vmem:[#allocation2 + $0x6a] sm:$0xff] }
  0x40   : > { %290 = vst.msk [vmem:[#allocation2 + $0x171] sm:$0xff] %vm172_vm1, %v257_v39  ;;  %v442_v60 = vmax.f32 %v378_v32, %v1471_v7  ;;  %v505_v61 = vmax.f32 %v441_v35, %v1499_v41  ;;  %291 = vst.msk [vmem:[#allocation2 + $0x181] sm:$0xff] %vm172_vm1, %v258_v28  ;;  %1259 = vmatprep.mubr.msk.bf16.mxu1 %vm172_vm1, %v846_v40  ;;  %v824_v4 = vmax.f32 %v760_v38, %v792_v47  ;;  %v1621_v26 = vld [vmem:[#allocation2 + $0x128] sm:$0xff]  ;;  %v1624_v30 = vld [vmem:[#allocation2 + $0x79] sm:$0xff] }
  0x41   : > { %292 = vst.msk [vmem:[#allocation2 + $0x189] sm:$0xff] %vm172_vm1, %v259_v45  ;;  %v825_v8 = vmax.f32 %v761_v63, %v1580_v50  ;;  %v364_v5 = vmax.f32 %v1540_v17, %v1490_v29  ;;  %v427_v21 = vmax.f32 %v363_v1, %v1494_v34  ;;  %v554_v7 = vmax.f32 %v490_v56, %v1490_v29  ;;  %v651_v29 = vld [vmem:[#allocation2 + $0x68] sm:$0xff]  ;;  %v1633_v39 = vld [vmem:[#allocation2 + $0x78] sm:$0xff] }
  0x42   : > { %v617_v41 = vmax.f32 %v553_v57, %v1508_v53  ;;  %v506_v10 = vmax.f32 %v442_v60, %v1501_v43  ;;  %v569_v11 = vmax.f32 %v505_v61, %v1518_v0  ;;  %v379_v15 = vmax.f32 %v1586_v62, %v1518_v0  ;;  %v1631_v37 = vld [vmem:[#allocation2 + $0x122] sm:$0xff] }
  0x43   : > { %v847_v13 = vpack.c.bf16 %v825_v8, %v824_v4  ;;  %v428_v14 = vmax.f32 %v364_v5, %v1503_v44  ;;  %v491_v51 = vmax.f32 %v427_v21, %v1508_v53  ;;  %v618_v34 = vmax.f32 %v554_v7, %v1510_v55  ;;  %v1637_v63 = vld [vmem:[#allocation2 + $0x81] sm:$0xff]  ;;  %v1650_v5 = vld [vmem:[#allocation2 + $0x139] sm:$0xff] }
  0x44   : > { %v682_v16 = vmax.f32 %v617_v41, %v650_v9  ;;  %v570_v43 = vmax.f32 %v506_v10, %v1520_v2  ;;  %v633_v19 = vmax.f32 %v569_v11, %v792_v47  ;;  %v380_v53 = vmax.f32 %v1599_v12, %v1520_v2  ;;  %v653_v57 = vld [vmem:[#allocation2 + $0x80] sm:$0xff]  ;;  %v1655_v10 = vld [vmem:[#allocation2 + $0x138] sm:$0xff] }
  0x45   : > { %1260 = vmatmul.mubr.msk.bf16.vlgmr.msra.gmra.mrb[0].mxu1 %vm172_vm1, %v847_v13  ;;  %v492_v44 = vmax.f32 %v428_v14, %v1510_v55  ;;  %v555_v22 = vmax.f32 %v491_v51, %v650_v9  ;;  %v443_v0 = vmax.f32 %v379_v15, %v1514_v58  ;;  %v683_v52 = vmax.f32 %v618_v34, %v651_v29  ;;  %v1653_v41 = vld [vmem:[#allocation2 + $0x7a] sm:$0xff] }
  0x46   : > { %v746_v33 = vmax.f32 %v682_v16, %v1526_v6  ;;  %v634_v24 = vmax.f32 %v570_v43, %v1580_v50  ;;  %v698_v25 = vmax.f32 %v633_v19, %v1610_v20  ;;  %v444_v2 = vmax.f32 %v380_v53, %v1522_v3  ;;  %v1657_v11 = vld [vmem:[#allocation2 + $0x141] sm:$0xff]  ;;  %v1665_v16 = vld [vmem:[#allocation2 + $0x91] sm:$0xff] }
  0x47   : > { %v556_v27 = vmax.f32 %v492_v44, %v651_v29  ;;  %v619_v55 = vmax.f32 %v555_v22, %v1606_v18  ;;  %v507_v31 = vmax.f32 %v443_v0, %v792_v47  ;;  %v747_v58 = vmax.f32 %v683_v52, %v1540_v17  ;;  %v1643_v47 = vld [vmem:[#allocation2 + $0x12a] sm:$0xff]  ;;  %v781_v19 = vld [vmem:[#allocation2 + $0x82] sm:$0xff] }
  0x48   : > { %v810_v32 = vmax.f32 %v746_v33, %v1606_v18  ;;  %v699_v35 = vmax.f32 %v634_v24, %v1621_v26  ;;  %v762_v36 = vmax.f32 %v698_v25, %v1586_v62  ;;  %v508_v3 = vmax.f32 %v444_v2, %v1580_v50  ;;  %v669_v44 = vld [vmem:[#allocation2 + $0x140] sm:$0xff] }
  0x49   : > { %v620_v40 = vmax.f32 %v556_v27, %v1617_v23  ;;  %v684_v38 = vmax.f32 %v619_v55, %v1633_v39  ;;  %v571_v1 = vmax.f32 %v507_v31, %v1610_v20  ;;  %v811_v28 = vmax.f32 %v747_v58, %v1617_v23  ;;  %v1673_v33 = vld [vmem:[#allocation2 + $0x99] sm:$0xff] }
  0x4a   : > { %v763_v45 = vmax.f32 %v699_v35, %v1599_v12  ;;  %v826_v56 = vmax.f32 %v762_v36, %v1631_v37  ;;  %v365_v60 = vmax.f32 %v1624_v30, %v650_v9  ;;  %v572_v8 = vmax.f32 %v508_v3, %v1621_v26  ;;  %v1678_v25 = vld [vmem:[#allocation2 + $0x13a] sm:$0xff] }
  0x4b   : > { %v685_v61 = vmax.f32 %v620_v40, %v653_v57  ;;  %v748_v4 = vmax.f32 %v684_v38, %v1624_v30  ;;  %v635_v50 = vmax.f32 %v571_v1, %v1631_v37  ;;  %v840_v21 = vpack.c.bf16 %v811_v28, %v810_v32  ;;  %v797_v32 = vld [vmem:[#allocation2 + $0x142] sm:$0xff]  ;;  %v1692_v40 = vld [vmem:[#allocation2 + $0x159] sm:$0xff]  ;;  %v1696_v38 = vld [vmem:[#allocation2 + $0x90] sm:$0xff] }
  0x4c   : > { %v827_v7 = vmax.f32 %v763_v45, %v1643_v47  ;;  %v366_v9 = vmax.f32 %v1637_v63, %v651_v29  ;;  %v429_v13 = vmax.f32 %v365_v60, %v1526_v6  ;;  %v636_v15 = vmax.f32 %v572_v8, %v1643_v47  ;;  %v655_v60 = vld [vmem:[#allocation2 + $0x98] sm:$0xff] }
  0x4d   : > { %v749_v14 = vmax.f32 %v685_v61, %v1637_v63  ;;  %v812_v51 = vmax.f32 %v748_v4, %v1653_v41  ;;  %v700_v34 = vmax.f32 %v635_v50, %v1655_v10  ;;  %1247 = vmatprep.mubr.msk.bf16.mxu0 %vm172_vm1, %v840_v21  ;;  %v381_v6 = vmax.f32 %v1650_v5, %v1610_v20  ;;  %v1683_v20 = vld [vmem:[#allocation2 + $0x151] sm:$0xff] }
  0x4e   : > { %v848_v43 = vpack.c.bf16 %v827_v7, %v826_v56  ;;  %v430_v22 = vmax.f32 %v366_v9, %v1540_v17  ;;  %v493_v29 = vmax.f32 %v429_v13, %v1606_v18  ;;  %v701_v0 = vmax.f32 %v636_v15, %v669_v44  ;;  %v1708_v50 = vld [vmem:[#allocation2 + $0x92] sm:$0xff] }
  0x4f   : > { %v813_v53 = vmax.f32 %v749_v14, %v781_v19  ;;  %v764_v52 = vmax.f32 %v700_v34, %v1650_v5  ;;  %v382_v24 = vmax.f32 %v1657_v11, %v1621_v26  ;;  %v445_v27 = vmax.f32 %v381_v6, %v1586_v62  ;;  %v670_v9 = vld [vmem:[#allocation2 + $0x150] sm:$0xff] }
  0x50   : > { %1263 = vmatprep.mubr.msk.bf16.mxu1 %vm172_vm1, %v848_v43  ;;  %v494_v17 = vmax.f32 %v430_v22, %v1617_v23  ;;  %v557_v18 = vmax.f32 %v493_v29, %v1633_v39  ;;  %v367_v55 = vmax.f32 %v1665_v16, %v1633_v39  ;;  %v765_v31 = vmax.f32 %v701_v0, %v1657_v11  ;;  %v1715_v14 = vld [vmem:[#allocation2 + $0xa9] sm:$0xff]  ;;  %v671_v43 = vld [vmem:[#allocation2 + $0x158] sm:$0xff] }
  0x51   : > { %v841_v2 = vpack.c.bf16 %v813_v53, %v812_v51  ;;  %v828_v26 = vmax.f32 %v764_v52, %v1678_v25  ;;  %v446_v58 = vmax.f32 %v382_v24, %v1599_v12  ;;  %v509_v36 = vmax.f32 %v445_v27, %v1631_v37  ;;  %v1722_v6 = vld [vmem:[#allocation2 + $0xb1] sm:$0xff]  ;;  %v1727_v24 = vld [vmem:[#allocation2 + $0x15a] sm:$0xff] }
  0x52   : > { %v558_v35 = vmax.f32 %v494_v17, %v653_v57  ;;  %v621_v23 = vmax.f32 %v557_v18, %v1653_v41  ;;  %v368_v62 = vmax.f32 %v1673_v33, %v653_v57  ;;  %v829_v39 = vmax.f32 %v765_v31, %v797_v32  ;;  %v656_v18 = vld [vmem:[#allocation2 + $0xa8] sm:$0xff] }
  0x53   : > { %1248 = vmatmul.mubr.msk.bf16.gmra.mrb[4].mxu0 %vm172_vm1, %v841_v2  ;;  %v510_v3 = vmax.f32 %v446_v58, %v1643_v47  ;;  %v431_v1 = vmax.f32 %v367_v55, %v1624_v30  ;;  %v383_v12 = vmax.f32 %v1683_v20, %v1655_v10  ;;  %v573_v37 = vmax.f32 %v509_v36, %v1655_v10  ;;  %v1712_v10 = vld [vmem:[#allocation2 + $0x9a] sm:$0xff]  ;;  %v657_v2 = vld [vmem:[#allocation2 + $0xb0] sm:$0xff] }
  0x54   : > { %v622_v28 = vmax.f32 %v558_v35, %v781_v19  ;;  %v686_v45 = vmax.f32 %v621_v23, %v1696_v38  ;;  %v432_v56 = vmax.f32 %v368_v62, %v1637_v63  ;;  %v849_v57 = vpack.c.bf16 %v829_v39, %v828_v26  ;;  %v1733_v58 = vld [vmem:[#allocation2 + $0x169] sm:$0xff] }
  0x55   : > { %v574_v61 = vmax.f32 %v510_v3, %v669_v44  ;;  %v495_v4 = vmax.f32 %v431_v1, %v1653_v41  ;;  %v384_v8 = vmax.f32 %v1692_v40, %v669_v44  ;;  %v637_v21 = vmax.f32 %v573_v37, %v1678_v25  ;;  %v1739_v1 = vld [vmem:[#allocation2 + $0x171] sm:$0xff] }
  0x56   : > { %v687_v47 = vmax.f32 %v622_v28, %v655_v60  ;;  %v750_v30 = vmax.f32 %v686_v45, %v1665_v16  ;;  %v496_v7 = vmax.f32 %v432_v56, %v781_v19  ;;  %1264 = vmatmul.mubr.msk.bf16.gmra.mrb[4].mxu1 %vm172_vm1, %v849_v57  ;;  %v447_v41 = vmax.f32 %v383_v12, %v1650_v5  ;;  %v784_v28 = vld [vmem:[#allocation2 + $0xaa] sm:$0xff] }
  0x57   : > { %v638_v63 = vmax.f32 %v574_v61, %v797_v32  ;;  %v559_v13 = vmax.f32 %v495_v4, %v1696_v38  ;;  %v448_v51 = vmax.f32 %v384_v8, %v1657_v11  ;;  %v702_v19 = vmax.f32 %v637_v21, %v670_v9  ;;  %v798_v11 = vld [vmem:[#allocation2 + $0x152] sm:$0xff]  ;;  %v672_v45 = vld [vmem:[#allocation2 + $0x168] sm:$0xff] }
  0x58   : > { %v751_v15 = vmax.f32 %v687_v47, %v1673_v33  ;;  %v814_v34 = vmax.f32 %v750_v30, %v1708_v50  ;;  %v560_v44 = vmax.f32 %v496_v7, %v655_v60  ;;  %v511_v53 = vmax.f32 %v447_v41, %v1678_v25  ;;  %v673_v37 = vld [vmem:[#allocation2 + $0x170] sm:$0xff] }
  0x59   : > { %v703_v22 = vmax.f32 %v638_v63, %v671_v43  ;;  %v623_v29 = vmax.f32 %v559_v13, %v1708_v50  ;;  %v512_v0 = vmax.f32 %v448_v51, %v797_v32  ;;  %v766_v5 = vmax.f32 %v702_v19, %v1683_v20  ;;  %v785_v4 = vld [vmem:[#allocation2 + $0xb2] sm:$0xff] }
  0x5a   : > { %v815_v52 = vmax.f32 %v751_v15, %v1712_v10  ;;  %v624_v17 = vmax.f32 %v560_v44, %v1712_v10  ;;  %v369_v27 = vmax.f32 %v1715_v14, %v1696_v38  ;;  %v575_v26 = vmax.f32 %v511_v53, %v670_v9  ;;  %v800_v15 = vld [vmem:[#allocation2 + $0x16a] sm:$0xff]  ;;  %v738_v44 = vld [vmem:[#allocation2 + $0x181] sm:$0xff] }
  0x5b   : > { %v767_v55 = vmax.f32 %v703_v22, %v1692_v40  ;;  %v688_v31 = vmax.f32 %v623_v29, %v656_v18  ;;  %v576_v25 = vmax.f32 %v512_v0, %v671_v43  ;;  %v830_v35 = vmax.f32 %v766_v5, %v798_v11  ;;  %v739_v5 = vld [vmem:[#allocation2 + $0x189] sm:$0xff] }
  0x5c   : > { %v842_v32 = vpack.c.bf16 %v815_v52, %v814_v34  ;;  %v689_v23 = vmax.f32 %v624_v17, %v657_v2  ;;  %v370_v36 = vmax.f32 %v1722_v6, %v655_v60  ;;  %v639_v3 = vmax.f32 %v575_v26, %v798_v11  ;;  %v1754_v34 = vld [vmem:[#allocation2 + $0x172] sm:$0xff] }
  0x5d   : > { %v831_v62 = vmax.f32 %v767_v55, %v1727_v24  ;;  %v752_v39 = vmax.f32 %v688_v31, %v1715_v14  ;;  %v640_v38 = vmax.f32 %v576_v25, %v1727_v24  ;;  %v433_v56 = vmax.f32 %v369_v27, %v1665_v16  ;;  %v531_v55 = vld [vmem:[#allocation2 + $0xc0] sm:$0xff] }
  0x5e   : > { %1251 = vmatprep.mubr.msk.bf16.mxu0 %vm172_vm1, %v842_v32  ;;  %v753_v12 = vmax.f32 %v689_v23, %v1722_v6  ;;  %v434_v57 = vmax.f32 %v370_v36, %v1673_v33  ;;  %v385_v60 = vmax.f32 %v1733_v58, %v670_v9  ;;  %v704_v47 = vmax.f32 %v639_v3, %v672_v45  ;;  %v532_v32 = vld [vmem:[#allocation2 + $0xc8] sm:$0xff] }
  0x5f   : > { %v850_v61 = vpack.c.bf16 %v831_v62, %v830_v35  ;;  %v816_v8 = vmax.f32 %v752_v39, %v784_v28  ;;  %v705_v30 = vmax.f32 %v640_v38, %v673_v37  ;;  %v497_v7 = vmax.f32 %v433_v56, %v1708_v50  ;;  %v595_v23 = vld [vmem:[#allocation2 + $0xc2] sm:$0xff] }
  0x60   : > { %v817_v21 = vmax.f32 %v753_v12, %v785_v4  ;;  %v498_v63 = vmax.f32 %v434_v57, %v1712_v10  ;;  %v386_v13 = vmax.f32 %v1739_v1, %v671_v43  ;;  %v768_v16 = vmax.f32 %v704_v47, %v1733_v58  ;;  %v675_v38 = vld [vmem:[#allocation2 + $0x188] sm:$0xff]  ;;  %v724_v47 = vld [vmem:[#allocation2 + $0xd9] sm:$0xff] }
  0x61   : > { %1267 = vmatprep.mubr.msk.bf16.mxu1 %vm172_vm1, %v850_v61  ;;  %v769_v33 = vmax.f32 %v705_v30, %v1739_v1  ;;  %v449_v9 = vmax.f32 %v385_v60, %v1683_v20  ;;  %v371_v41 = vmax.f32 %v1449_v48, %v656_v18  ;;  %v561_v19 = vmax.f32 %v497_v7, %v656_v18 }
  0x62   : > { %v843_v51 = vpack.c.bf16 %v817_v21, %v816_v8  ;;  %v562_v50 = vmax.f32 %v498_v63, %v657_v2  ;;  %v450_v10 = vmax.f32 %v386_v13, %v1692_v40  ;;  %v832_v43 = vmax.f32 %v768_v16, %v800_v15  ;;  %v803_v13 = vld [vmem:[#allocation2 + $0x18a] sm:$0xff] }
  0x63   : > { %v833_v22 = vmax.f32 %v769_v33, %v1754_v34  ;;  %v513_v29 = vmax.f32 %v449_v9, %v798_v11  ;;  %v372_v53 = vmax.f32 %v1451_v49, %v657_v2  ;;  %v625_v20 = vmax.f32 %v561_v19, %v784_v28  ;;  %v676_v33 = vld [vmem:[#allocation2 + $0x198] sm:$0xff] }
  0x64   : > { %1252 = vmatmul.mubr.msk.bf16.gmra.mrb[8].mxu0 %vm172_vm1, %v843_v51  ;;  %v626_v0 = vmax.f32 %v562_v50, %v785_v4  ;;  %v514_v52 = vmax.f32 %v450_v10, %v1727_v24  ;;  %v435_v17 = vmax.f32 %v371_v41, %v1715_v14  ;;  %v387_v31 = vmax.f32 %v738_v44, %v672_v45  ;;  %v788_v41 = vld [vmem:[#allocation2 + $0xda] sm:$0xff]  ;;  %v789_v50 = vld [vmem:[#allocation2 + $0xe2] sm:$0xff] }
  0x65   : > { %v851_v18 = vpack.c.bf16 %v833_v22, %v832_v43  ;;  %v577_v27 = vmax.f32 %v513_v29, %v672_v45  ;;  %v436_v40 = vmax.f32 %v372_v53, %v1722_v6  ;;  %v690_v26 = vmax.f32 %v625_v20, %v1443_v42  ;;  %v674_v42 = vld [vmem:[#allocation2 + $0x180] sm:$0xff]  ;;  %v660_v45 = vld [vmem:[#allocation2 + $0xd8] sm:$0xff] }
  0x66   : > { %v691_v11 = vmax.f32 %v626_v0, %v1446_v46  ;;  %v578_v2 = vmax.f32 %v514_v52, %v673_v37  ;;  %v499_v25 = vmax.f32 %v435_v17, %v784_v28  ;;  %v388_v36 = vmax.f32 %v739_v5, %v673_v37  ;;  %v596_v46 = vld [vmem:[#allocation2 + $0xca] sm:$0xff]  ;;  %v677_v10 = vld [vmem:[#allocation2 + $0x1a0] sm:$0xff] }
  0x67   : > { %1268 = vmatmul.mubr.msk.bf16.gmra.mrb[8].mxu1 %vm172_vm1, %v851_v18  ;;  %v641_v35 = vmax.f32 %v577_v27, %v800_v15  ;;  %v500_v24 = vmax.f32 %v436_v40, %v785_v4  ;;  %v451_v14 = vmax.f32 %v387_v31, %v1733_v58  ;;  %v754_v62 = vmax.f32 %v690_v26, %v1449_v48  ;;  %v802_v48 = vld [vmem:[#allocation2 + $0x182] sm:$0xff]  ;;  %v804_v0 = vld [vmem:[#allocation2 + $0x19a] sm:$0xff] }
  0x68   : > { %v755_v6 = vmax.f32 %v691_v11, %v1451_v49  ;;  %v642_v39 = vmax.f32 %v578_v2, %v1754_v34  ;;  %v563_v3 = vmax.f32 %v499_v25, %v531_v55  ;;  %v452_v56 = vmax.f32 %v388_v36, %v1739_v1  ;;  %v661_v49 = vld [vmem:[#allocation2 + $0xe0] sm:$0xff] }
  0x69   : > { %v706_v12 = vmax.f32 %v641_v35, %v674_v42  ;;  %v564_v28 = vmax.f32 %v500_v24, %v532_v32  ;;  %v515_v57 = vmax.f32 %v451_v14, %v800_v15  ;;  %v818_v37 = vmax.f32 %v754_v62, %v1458_v54  ;;  %v725_v1 = vld [vmem:[#allocation2 + $0xe1] sm:$0xff]  ;;  %v1781_v11 = vld [vmem:[%s1891_s2] ss:$0 sm:$0xff] }
  0x6a   : > { %v819_v58 = vmax.f32 %v755_v6, %v1461_v59  ;;  %v707_v60 = vmax.f32 %v642_v39, %v675_v38  ;;  %v627_v61 = vmax.f32 %v563_v3, %v595_v23  ;;  %v516_v30 = vmax.f32 %v452_v56, %v1754_v34  ;;  %v741_v20 = vld [vmem:[#allocation2 + $0x1a1] sm:$0xff] }
  0x6b   : > { %v770_v4 = vmax.f32 %v706_v12, %v738_v44  ;;  %v628_v8 = vmax.f32 %v564_v28, %v596_v46  ;;  %v579_v21 = vmax.f32 %v515_v57, %v674_v42  ;;  %v740_v44 = vld [vmem:[#allocation2 + $0x199] sm:$0xff]  ;;  %v805_v18 = vld [vmem:[#allocation2 + $0x1a2] sm:$0xff] }
  0x6c   : > { %v844_v7 = vpack.c.bf16 %v819_v58, %v818_v37  ;;  %v771_v63 = vmax.f32 %v707_v60, %v739_v5  ;;  %v692_v16 = vmax.f32 %v627_v61, %v660_v45  ;;  %v580_v59 = vmax.f32 %v516_v30, %v675_v38 }
  0x6d   : > { %v834_v9 = vmax.f32 %v770_v4, %v802_v48  ;;  %v693_v54 = vmax.f32 %v628_v8, %v661_v49  ;;  %v643_v51 = vmax.f32 %v579_v21, %v802_v48 }
  0x6e   : > { %1255 = vmatprep.mubr.msk.bf16.mxu0 %vm172_vm1, %v844_v7  ;;  %v835_v15 = vmax.f32 %v771_v63, %v803_v13  ;;  %v756_v19 = vmax.f32 %v692_v16, %v724_v47  ;;  %v644_v43 = vmax.f32 %v580_v59, %v803_v13 }
  0x6f   : > { %v757_v34 = vmax.f32 %v693_v54, %v725_v1  ;;  %v708_v22 = vmax.f32 %v643_v51, %v676_v33 }
  0x70   : > { %v852_v29 = vpack.c.bf16 %v835_v15, %v834_v9  ;;  %v820_v53 = vmax.f32 %v756_v19, %v788_v41  ;;  %v709_v5 = vmax.f32 %v644_v43, %v677_v10 }
  0x71   : > { %v821_v52 = vmax.f32 %v757_v34, %v789_v50  ;;  %v772_v17 = vmax.f32 %v708_v22, %v740_v44 }
  0x72   : > { %1271 = vmatprep.mubr.msk.bf16.mxu1 %vm172_vm1, %v852_v29  ;;  %v773_v40 = vmax.f32 %v709_v5, %v741_v20 }
  0x73   : > { %v845_v27 = vpack.c.bf16 %v821_v52, %v820_v53  ;;  %v836_v55 = vmax.f32 %v772_v17, %v804_v0 }
  0x74   : > { %v837_v31 = vmax.f32 %v773_v40, %v805_v18 }
  0x75   : > { %1256 = vmatmul.mubr.msk.bf16.gmra.mrb[12].mxu0 %vm172_vm1, %v845_v27 }
  0x76   : > { %v853_v26 = vpack.c.bf16 %v837_v31, %v836_v55 }
  0x78   : > { %1272 = vmatmul.mubr.msk.bf16.gmra.mrb[12].mxu1 %vm172_vm1, %v853_v26 }
 0x111   : > { %v1245_v2 = vpop.f32.mrb[0].mxu0 }
 0x112   : > { %v957_v25 = vadd.f32 %v1245_v2, %v1781_v11  ;;  %v948_v32 = vpop.f32.mrb[1].mxu0 }
 0x113   : > { %v949_v35 = vadd.f32 %v1781_v11, %v948_v32  ;;  %v1246_v24 = vpop.f32.mrb[2].mxu0 }
 0x114   : > { %v1077_v23 = vmax.f32 %v957_v25, 0.0  ;;  %v960_v36 = vadd.f32 %v1246_v24, %v1781_v11  ;;  %v951_v14 = vpop.f32.mrb[3].mxu0 }
 0x115   : > { %v1075_v62 = vmax.f32 %v949_v35, 0.0  ;;  %v952_v6 = vadd.f32 %v1781_v11, %v951_v14 }
 0x116   : > { %1109 = vst.msk [vmem:[%s1789_s25 + $0x10] sm:$0xff] %vm172_vm1, %v1077_v23  ;;  %v1078_v39 = vmax.f32 %v960_v36, 0.0 }
 0x117   : > { %1107 = vst.msk [vmem:[%s1789_s25] sm:$0xff] %vm172_vm1, %v1075_v62  ;;  %v1076_v3 = vmax.f32 %v952_v6, 0.0 }
 0x118   : > { %v1261_v42 = vpop.f32.mrb[0].mxu1  ;;  %1110 = vst.msk [vmem:[%s1789_s25 + $0x18] sm:$0xff] %vm172_vm1, %v1078_v39 }
 0x119   : > { %v1021_v46 = vadd.f32 %v1261_v42, %v1781_v11  ;;  %v1012_v38 = vpop.f32.mrb[1].mxu1  ;;  %1108 = vst.msk [vmem:[%s1789_s25 + $0x8] sm:$0xff] %vm172_vm1, %v1076_v3 }
 0x11a   : > { %v1013_v12 = vadd.f32 %v1781_v11, %v1012_v38  ;;  %v1262_v28 = vpop.f32.mrb[2].mxu1 }
 0x11b   : > { %v1093_v45 = vmax.f32 %v1021_v46, 0.0  ;;  %v1024_v56 = vadd.f32 %v1262_v28, %v1781_v11  ;;  %v1015_v57 = vpop.f32.mrb[3].mxu1 }
 0x11c   : > { %v1091_v37 = vmax.f32 %v1013_v12, 0.0  ;;  %v1016_v58 = vadd.f32 %v1781_v11, %v1015_v57 }
 0x11d   : > { %1125 = vst.msk [vmem:[%s1789_s25 + $0x90] sm:$0xff] %vm172_vm1, %v1093_v45  ;;  %v1094_v60 = vmax.f32 %v1024_v56, 0.0 }
 0x11e   : > { %1123 = vst.msk [vmem:[%s1789_s25 + $0x80] sm:$0xff] %vm172_vm1, %v1091_v37  ;;  %v1092_v48 = vmax.f32 %v1016_v58, 0.0 }
 0x11f   : > { %1126 = vst.msk [vmem:[%s1789_s25 + $0x98] sm:$0xff] %vm172_vm1, %v1094_v60 }
 0x120   : > { %1124 = vst.msk [vmem:[%s1789_s25 + $0x88] sm:$0xff] %vm172_vm1, %v1092_v48 }
 0x126   : > { %v1249_v61 = vpop.f32.mrb[4].mxu0 }
 0x127   : > { %v973_v49 = vadd.f32 %v1249_v61, %v1781_v11  ;;  %v964_v4 = vpop.f32.mrb[5].mxu0 }
 0x128   : > { %v965_v8 = vadd.f32 %v1781_v11, %v964_v4  ;;  %v1250_v47 = vpop.f32.mrb[6].mxu0 }
 0x129   : > { %v1081_v30 = vmax.f32 %v973_v49, 0.0  ;;  %v976_v21 = vadd.f32 %v1250_v47, %v1781_v11  ;;  %v967_v7 = vpop.f32.mrb[7].mxu0  ;;  %v1265_v63 = vpop.f32.mrb[4].mxu1 }
 0x12a   : > { %v1079_v13 = vmax.f32 %v965_v8, 0.0  ;;  %v968_v16 = vadd.f32 %v1781_v11, %v967_v7  ;;  %v1037_v1 = vadd.f32 %v1265_v63, %v1781_v11  ;;  %v1028_v33 = vpop.f32.mrb[5].mxu1 }
 0x12b   : > { %1113 = vst.msk [vmem:[%s1789_s25 + $0x30] sm:$0xff] %vm172_vm1, %v1081_v30  ;;  %v1082_v9 = vmax.f32 %v976_v21, 0.0  ;;  %v1029_v54 = vadd.f32 %v1781_v11, %v1028_v33  ;;  %v1266_v41 = vpop.f32.mrb[6].mxu1 }
 0x12c   : > { %1111 = vst.msk [vmem:[%s1789_s25 + $0x20] sm:$0xff] %vm172_vm1, %v1079_v13  ;;  %v1080_v59 = vmax.f32 %v968_v16, 0.0  ;;  %v1097_v51 = vmax.f32 %v1037_v1, 0.0  ;;  %v1040_v15 = vadd.f32 %v1266_v41, %v1781_v11  ;;  %v1031_v19 = vpop.f32.mrb[7].mxu1 }
 0x12d   : > { %1114 = vst.msk [vmem:[%s1789_s25 + $0x38] sm:$0xff] %vm172_vm1, %v1082_v9  ;;  %v1095_v50 = vmax.f32 %v1029_v54, 0.0  ;;  %v1032_v10 = vadd.f32 %v1781_v11, %v1031_v19 }
 0x12e   : > { %1112 = vst.msk [vmem:[%s1789_s25 + $0x28] sm:$0xff] %vm172_vm1, %v1080_v59  ;;  %1129 = vst.msk [vmem:[%s1789_s25 + $0xb0] sm:$0xff] %vm172_vm1, %v1097_v51  ;;  %v1098_v44 = vmax.f32 %v1040_v15, 0.0 }
 0x12f   : > { %1127 = vst.msk [vmem:[%s1789_s25 + $0xa0] sm:$0xff] %vm172_vm1, %v1095_v50  ;;  %v1096_v34 = vmax.f32 %v1032_v10, 0.0 }
 0x130   : > { %1130 = vst.msk [vmem:[%s1789_s25 + $0xb8] sm:$0xff] %vm172_vm1, %v1098_v44 }
 0x131   : > { %1128 = vst.msk [vmem:[%s1789_s25 + $0xa8] sm:$0xff] %vm172_vm1, %v1096_v34 }
 0x137   : > { %v1253_v43 = vpop.f32.mrb[8].mxu0 }
 0x138   : > { %v989_v22 = vadd.f32 %v1253_v43, %v1781_v11  ;;  %v980_v29 = vpop.f32.mrb[9].mxu0 }
 0x139   : > { %v981_v53 = vadd.f32 %v1781_v11, %v980_v29  ;;  %v1254_v20 = vpop.f32.mrb[10].mxu0 }
 0x13a   : > { %v1085_v0 = vmax.f32 %v989_v22, 0.0  ;;  %v1269_v52 = vpop.f32.mrb[8].mxu1  ;;  %v992_v5 = vadd.f32 %v1254_v20, %v1781_v11  ;;  %v983_v17 = vpop.f32.mrb[11].mxu0 }
 0x13b   : > { %v1053_v18 = vadd.f32 %v1269_v52, %v1781_v11  ;;  %v1083_v27 = vmax.f32 %v981_v53, 0.0  ;;  %v1044_v40 = vpop.f32.mrb[9].mxu1  ;;  %v984_v55 = vadd.f32 %v1781_v11, %v983_v17 }
 0x13c   : > { %1117 = vst.msk [vmem:[%s1789_s25 + $0x50] sm:$0xff] %vm172_vm1, %v1085_v0  ;;  %v1045_v31 = vadd.f32 %v1781_v11, %v1044_v40  ;;  %v1086_v26 = vmax.f32 %v992_v5, 0.0  ;;  %v1270_v2 = vpop.f32.mrb[10].mxu1 }
 0x13d   : > { %v1101_v25 = vmax.f32 %v1053_v18, 0.0  ;;  %1115 = vst.msk [vmem:[%s1789_s25 + $0x40] sm:$0xff] %vm172_vm1, %v1083_v27  ;;  %v1056_v32 = vadd.f32 %v1270_v2, %v1781_v11  ;;  %v1084_v35 = vmax.f32 %v984_v55, 0.0  ;;  %v1047_v24 = vpop.f32.mrb[11].mxu1 }
 0x13e   : > { %v1099_v23 = vmax.f32 %v1045_v31, 0.0  ;;  %1118 = vst.msk [vmem:[%s1789_s25 + $0x58] sm:$0xff] %vm172_vm1, %v1086_v26  ;;  %v1048_v36 = vadd.f32 %v1781_v11, %v1047_v24 }
 0x13f   : > { %1133 = vst.msk [vmem:[%s1789_s25 + $0xd0] sm:$0xff] %vm172_vm1, %v1101_v25  ;;  %v1102_v14 = vmax.f32 %v1056_v32, 0.0  ;;  %1116 = vst.msk [vmem:[%s1789_s25 + $0x48] sm:$0xff] %vm172_vm1, %v1084_v35 }
 0x140   : > { %1131 = vst.msk [vmem:[%s1789_s25 + $0xc0] sm:$0xff] %vm172_vm1, %v1099_v23  ;;  %v1100_v62 = vmax.f32 %v1048_v36, 0.0 }
 0x141   : > { %1134 = vst.msk [vmem:[%s1789_s25 + $0xd8] sm:$0xff] %vm172_vm1, %v1102_v14 }
 0x142   : > { %1132 = vst.msk [vmem:[%s1789_s25 + $0xc8] sm:$0xff] %vm172_vm1, %v1100_v62 }
 0x148   : > { %v1257_v6 = vpop.f32.mrb[12].mxu0 }
 0x149   : > { %v1005_v39 = vadd.f32 %v1257_v6, %v1781_v11  ;;  %v996_v42 = vpop.f32.mrb[13].mxu0 }
 0x14a   : > { %v997_v3 = vadd.f32 %v1781_v11, %v996_v42  ;;  %v1258_v46 = vpop.f32.mrb[14].mxu0 }
 0x14b   : > { %v1089_v38 = vmax.f32 %v1005_v39, 0.0  ;;  %v1008_v12 = vadd.f32 %v1258_v46, %v1781_v11  ;;  %v999_v28 = vpop.f32.mrb[15].mxu0  ;;  %v1273_v45 = vpop.f32.mrb[12].mxu1 }
 0x14c   : > { %v1087_v56 = vmax.f32 %v997_v3, 0.0  ;;  %v1000_v57 = vadd.f32 %v1781_v11, %v999_v28  ;;  %v1069_v37 = vadd.f32 %v1273_v45, %v1781_v11  ;;  %v1060_v58 = vpop.f32.mrb[13].mxu1 }
 0x14d   : > { %1121 = vst.msk [vmem:[%s1789_s25 + $0x70] sm:$0xff] %vm172_vm1, %v1089_v38  ;;  %v1090_v60 = vmax.f32 %v1008_v12, 0.0  ;;  %v1061_v48 = vadd.f32 %v1781_v11, %v1060_v58  ;;  %v1274_v61 = vpop.f32.mrb[14].mxu1 }
 0x14e   : > { %1119 = vst.msk [vmem:[%s1789_s25 + $0x60] sm:$0xff] %vm172_vm1, %v1087_v56  ;;  %v1088_v49 = vmax.f32 %v1000_v57, 0.0  ;;  %v1105_v4 = vmax.f32 %v1069_v37, 0.0  ;;  %v1072_v8 = vadd.f32 %v1274_v61, %v1781_v11  ;;  %v1063_v47 = vpop.f32.mrb[15].mxu1 }
 0x14f   : > { %1122 = vst.msk [vmem:[%s1789_s25 + $0x78] sm:$0xff] %vm172_vm1, %v1090_v60  ;;  %v1103_v30 = vmax.f32 %v1061_v48, 0.0  ;;  %v1064_v21 = vadd.f32 %v1781_v11, %v1063_v47 }
 0x150   : > { %1120 = vst.msk [vmem:[%s1789_s25 + $0x68] sm:$0xff] %vm172_vm1, %v1088_v49  ;;  %1137 = vst.msk [vmem:[%s1789_s25 + $0xf0] sm:$0xff] %vm172_vm1, %v1105_v4  ;;  %v1106_v7 = vmax.f32 %v1072_v8, 0.0 }
 0x151   : > { %1135 = vst.msk [vmem:[%s1789_s25 + $0xe0] sm:$0xff] %vm172_vm1, %v1103_v30  ;;  %v1104_v63 = vmax.f32 %v1064_v21, 0.0 }
 0x152   : > { %1138 = vst.msk [vmem:[%s1789_s25 + $0xf8] sm:$0xff] %vm172_vm1, %v1106_v7 }
 0x153   : > { %1136 = vst.msk [vmem:[%s1789_s25 + $0xe8] sm:$0xff] %vm172_vm1, %v1104_v63 }
 0x154 PF: > { %s13_s12 = sadd.s32 1, %s1294_s12  }
 0x155   : > { %p10_p4 = scmp.ge.s32.totalorder %s13_s12, 4  }
 0x157   :  { %12 = sbr.rel (!%p10_p4) target bundleno = 1 (0x1), region = 64 }

// kernel: inception_forward.6
= control target key start
LH: loop header
LB: loop body
LE: loop exit
PB: predicated region body
PF: predicated region fallthrough
CT: control target
= control target key end

     0   :  { %s6705_s12 = smov 0   ;;  %s8543_s0 = inlined_call_operand.vmem [shape: bf16[2,16,16,2], index: 0, kind: input, shape index: {}]   ;;  %s8544_s1 = inlined_call_operand.vmem [shape: bf16[3,3,2,4], index: 1, kind: input, shape index: {}]   ;;  %s8545_s2 = inlined_call_operand.vmem [shape: f32[1,4], index: 2, kind: input, shape index: {}]   ;;  %s8546_s3 = inlined_call_operand.vmem [shape: f32[2,16,16,4], index: 3, kind: output, shape index: {}]  }
   0x1 LB: > { %s5491_s13 = sadd.s32 4294967295, %s6682_s12   ;;  %p5495_p0 = scmp.ge.s32.totalorder %s6682_s12, 1  ;;  %s6682_s12 = sphi %s6705_s12, %s13_s12  }
   0x2   : > { %p137_p1 = scmp.lt.s32.totalorder %s6682_s12, 3 }
   0x4   : > { %p138_p2 = pnand %p5495_p0, %p137_p1 }
   0x6   : > { %141 = sbr.rel (%p138_p2) target bundleno = 627 (0x273), region = 32 }
   0xd   : > { %v701_v0 = vld [vmem:[%s8544_s1] sm:$0x1]  ;;  %vm879_vm0 = vcmask 1040384   ;;  %vm172_vm1 = vcmask 11264   ;;  %v6684_v2 = vmov 0   ;;  %p161_p3 = scmp.lt.s32.totalorder %s5491_s13, 1 }
   0xe   : > { %6590 = vmatprep.subr.msk.bf16.mxu1 %vm879_vm0, %v701_v0  ;;  %v881_v1 = vsel %vm879_vm0, %v701_v0, 0  ;;  %173 = vst.msk [vmem:[#allocation2] sm:$0xf] %vm172_vm1, %v6684_v2  ;;  %174 = vst.msk [vmem:[#allocation2 + $0x4] sm:$0xf] %vm172_vm1, %v6684_v2  ;;  %vm175_vm2 = vcmask 8192  }
   0xf   : > { %177 = vst.msk [vmem:[#allocation2 + $0xc] sm:$0xf] %vm172_vm1, %v6684_v2  ;;  %178 = vst.msk [vmem:[#allocation2 + $0x10] sm:$0xf] %vm172_vm1, %v6684_v2  ;;  %5995 = vmatpush3.bf16.msra.mxu1 %v881_v1  ;;  %v705_v3 = vld [vmem:[%s8544_s1 + $0x4] sm:$0x1] }
  0x10   : > { %180 = vst.msk [vmem:[#allocation2 + $0x18] sm:$0xf] %vm172_vm1, %v6684_v2  ;;  %181 = vst.msk [vmem:[#allocation2 + $0x1c] sm:$0xf] %vm172_vm1, %v6684_v2  ;;  %v702_v4 = vld [vmem:[%s8544_s1 + $0x1] sm:$0x1]  ;;  %6594 = vmatprep.subr.msk.bf16.mxu0 %vm879_vm0, %v705_v3 }
  0x11   : > { %183 = vst.msk [vmem:[#allocation2 + $0x24] sm:$0xf] %vm172_vm1, %v6684_v2  ;;  %184 = vst.msk [vmem:[#allocation2 + $0x28] sm:$0xf] %vm172_vm1, %v6684_v2  ;;  %s8585_s13 = smov (!%p161_p3, %s5491_s13), 1  ;;  %v6804_v5 = vsel %vm879_vm0, %v705_v3, 0  ;;  %6591 = vmatprep.subr.msk.bf16.mxu1 %vm879_vm0, %v702_v4 }
  0x12   : > { %186 = vst.msk [vmem:[#allocation2 + $0x30] sm:$0xf] %vm172_vm1, %v6684_v2  ;;  %187 = vst.msk [vmem:[#allocation2 + $0x34] sm:$0xf] %vm172_vm1, %v6684_v2  ;;  %6131 = vmatpush3.bf16.msra.mxu0 %v6804_v5  ;;  %v6847_v6 = vld [vmem:[%s8544_s1 + $0x5] sm:$0x1] }
  0x13   : > { %189 = vst.msk [vmem:[#allocation2 + $0x3c] sm:$0xf] %vm172_vm1, %v6684_v2  ;;  %190 = vst.msk [vmem:[#allocation2 + $0x40] sm:$0xf] %vm172_vm1, %v6684_v2  ;;  %s5839_s22 = sshll.u32 %s8585_s13, 7  ;;  %6596 = vmatprep.subr.msk.bf16.mxu0 %vm879_vm0, %v6847_v6  ;;  %vm830_vm4 = vcmask 15360  }
  0x14   : > { %192 = vst.msk [vmem:[#allocation2 + $0x48] sm:$0xf] %vm172_vm1, %v6684_v2  ;;  %193 = vst.msk [vmem:[#allocation2 + $0x4c] sm:$0xf] %vm172_vm1, %v6684_v2  ;;  %vm260_vm3 = vsmask.f32 256  ;;  %s6855_s25 = scalar_lea.vmem %s8543_s0, %s5839_s22 }
  0x15   : > { %195 = vst.msk [vmem:[#allocation2 + $0x54] sm:$0xf] %vm172_vm1, %v6684_v2  ;;  %196 = vst.msk [vmem:[#allocation2 + $0x58] sm:$0xf] %vm172_vm1, %v6684_v2  ;;  %vm261_vm5 = vsmask.f32 4368 }
  0x16   : > { %198 = vst.msk [vmem:[#allocation2 + $0x60] sm:$0xf] %vm172_vm1, %v6684_v2  ;;  %199 = vst.msk [vmem:[#allocation2 + $0x64] sm:$0xf] %vm172_vm1, %v6684_v2  ;;  %vm585_vm6 = vsmask.f32 7938 }
  0x17   : > { %201 = vst.msk [vmem:[#allocation2 + $0x6c] sm:$0xf] %vm172_vm1, %v6684_v2  ;;  %202 = vst.msk [vmem:[#allocation2 + $0x70] sm:$0xf] %vm172_vm1, %v6684_v2  ;;  %v6858_v7 = vsel %vm879_vm0, %v702_v4, 0  ;;  %v6609_v11 = vld [vmem:[#allocation2] sm:$0xff]  }
  0x18   : > { %204 = vst.msk [vmem:[#allocation2 + $0x78] sm:$0xf] %vm172_vm1, %v6684_v2  ;;  %205 = vst.msk [vmem:[#allocation2 + $0x7c] sm:$0xf] %vm172_vm1, %v6684_v2  ;;  %v228_v8 = vld [vmem:[%s6855_s25] sm:$0xf]  ;;  %5996 = vmatprep.mubr.msk.bf16.mxu1 %vm830_vm4, %v6609_v11 }
  0x19   : > { %207 = vst.msk [vmem:[#allocation2 + $0x84] sm:$0xf] %vm172_vm1, %v6684_v2  ;;  %208 = vst.msk [vmem:[#allocation2 + $0x88] sm:$0xf] %vm172_vm1, %v6684_v2  ;;  %v229_v9 = vld [vmem:[%s6855_s25 + $0x4] sm:$0xf] }
  0x1a   : > { %210 = vst.msk [vmem:[#allocation2 + $0x90] sm:$0xf] %vm172_vm1, %v6684_v2  ;;  %211 = vst.msk [vmem:[#allocation2 + $0x94] sm:$0xf] %vm172_vm1, %v6684_v2  ;;  %v230_v10 = vld [vmem:[%s6855_s25 + $0x8] sm:$0xf] }
  0x1b   : > { %213 = vst.msk [vmem:[#allocation2 + $0x9c] sm:$0xf] %vm172_vm1, %v6684_v2  ;;  %214 = vst.msk [vmem:[#allocation2 + $0xa0] sm:$0xf] %vm172_vm1, %v6684_v2  ;;  %v264_v12 = vshrl.u32 %v228_v8, 16  ;;  %v267_v13 = vshll.u32 %v228_v8, 16 }
  0x1c   : > { %216 = vst.msk [vmem:[#allocation2 + $0xa8] sm:$0xf] %vm172_vm1, %v6684_v2  ;;  %217 = vst.msk [vmem:[#allocation2 + $0xac] sm:$0xf] %vm172_vm1, %v6684_v2  ;;  %v272_v14 = vshrl.u32 %v229_v9, 16  ;;  %v275_v15 = vshll.u32 %v229_v9, 16 }
  0x1d   : > { %219 = vst.msk [vmem:[#allocation2 + $0xb4] sm:$0xf] %vm172_vm1, %v6684_v2  ;;  %220 = vst.msk [vmem:[#allocation2 + $0xb8] sm:$0xf] %vm172_vm1, %v6684_v2  ;;  %v587_v16 = vld [vmem:[#allocation2 + $0xc] sm:$0xf] }
  0x1e   : > { %222 = vst.msk [vmem:[#allocation2 + $0xc0] sm:$0xf] %vm172_vm1, %v6684_v2  ;;  %223 = vst.msk [vmem:[#allocation2 + $0xc4] sm:$0xf] %vm172_vm1, %v6684_v2  ;;  %v281_v17 = vshrl.u32 %v230_v10, 16  ;;  %v266_v18 = vrot.slane %v264_v12, 7 }
  0x1f   : > { %225 = vst.msk [vmem:[#allocation2 + $0xcc] sm:$0xf] %vm172_vm1, %v6684_v2  ;;  %226 = vst.msk [vmem:[#allocation2 + $0xd0] sm:$0xf] %vm172_vm1, %v6684_v2  ;;  %v231_v19 = vld [vmem:[%s6855_s25 + $0xc] sm:$0xf] }
  0x20   : > { %179 = vst.msk [vmem:[#allocation2 + $0x14] sm:$0x1] %vm175_vm2, %v6684_v2  ;;  %176 = vst.msk [vmem:[#allocation2 + $0x8] sm:$0x1] %vm175_vm2, %v6684_v2  ;;  %v284_v20 = vshll.u32 %v230_v10, 16  ;;  %v274_v22 = vrot.slane %v272_v14, 7  ;;  %v269_v29 = vor.u32 %v267_v13, %v266_v18 }
  0x21   : > { %182 = vst.msk [vmem:[#allocation2 + $0x20] sm:$0x1] %vm175_vm2, %v6684_v2  ;;  %185 = vst.msk [vmem:[#allocation2 + $0x2c] sm:$0x1] %vm175_vm2, %v6684_v2  ;;  %v596_v21 = vld [vmem:[#allocation2 + $0x18] sm:$0xf] }
  0x22   : > { %188 = vst.msk [vmem:[#allocation2 + $0x38] sm:$0x1] %vm175_vm2, %v6684_v2  ;;  %191 = vst.msk [vmem:[#allocation2 + $0x44] sm:$0x1] %vm175_vm2, %v6684_v2  ;;  %v283_v24 = vrot.slane %v281_v17, 7  ;;  %v289_v25 = vshrl.u32 %v231_v19, 16  ;;  %v277_v34 = vor.u32 %v275_v15, %v274_v22 }
  0x23   : > { %194 = vst.msk [vmem:[#allocation2 + $0x50] sm:$0x1] %vm175_vm2, %v6684_v2  ;;  %197 = vst.msk [vmem:[#allocation2 + $0x5c] sm:$0x1] %vm175_vm2, %v6684_v2  ;;  %v292_v26 = vshll.u32 %v231_v19, 16  ;;  %v270_v30 = vrot.slane %v266_v18, 4 }
  0x24   : > { %200 = vst.msk [vmem:[#allocation2 + $0x68] sm:$0x1] %vm175_vm2, %v6684_v2  ;;  %203 = vst.msk [vmem:[#allocation2 + $0x74] sm:$0x1] %vm175_vm2, %v6684_v2  ;;  %v232_v27 = vld [vmem:[%s6855_s25 + $0x10] sm:$0xf]  ;;  %v286_v35 = vor.u32 %v284_v20, %v283_v24 }
  0x25   : > { %206 = vst.msk [vmem:[#allocation2 + $0x80] sm:$0x1] %vm175_vm2, %v6684_v2  ;;  %209 = vst.msk [vmem:[#allocation2 + $0x8c] sm:$0x1] %vm175_vm2, %v6684_v2  ;;  %v233_v31 = vld [vmem:[%s6855_s25 + $0x14] sm:$0xf] }
  0x26   : > { %212 = vst.msk [vmem:[#allocation2 + $0x98] sm:$0x1] %vm175_vm2, %v6684_v2  ;;  %215 = vst.msk [vmem:[#allocation2 + $0xa4] sm:$0x1] %vm175_vm2, %v6684_v2  ;;  %v298_v32 = vshrl.u32 %v232_v27, 16  ;;  %v301_v33 = vshll.u32 %v232_v27, 16 }
  0x27   : > { %218 = vst.msk [vmem:[#allocation2 + $0xb0] sm:$0x1] %vm175_vm2, %v6684_v2  ;;  %221 = vst.msk [vmem:[#allocation2 + $0xbc] sm:$0x1] %vm175_vm2, %v6684_v2  ;;  %v287_v36 = vrot.slane %v283_v24, 4  ;;  %v291_v37 = vrot.slane %v289_v25, 7 }
  0x28   : > { %224 = vst.msk [vmem:[#allocation2 + $0xc8] sm:$0x1] %vm175_vm2, %v6684_v2  ;;  %227 = vst.msk [vmem:[#allocation2 + $0xd4] sm:$0x1] %vm175_vm2, %v6684_v2  ;;  %v603_v38 = vld [vmem:[#allocation2 + $0x24] sm:$0xf] }
  0x29   : > { %vm6867_vm7 = vmand %vm172_vm1, %vm585_vm6  ;;  %v300_v40 = vrot.slane %v298_v32, 7  ;;  %v306_v41 = vshrl.u32 %v233_v31, 16  ;;  %v309_v42 = vshll.u32 %v233_v31, 16  ;;  %v600_v44 = vld [vmem:[#allocation2 + $0x20] sm:$0x1]  ;;  %v294_v46 = vor.u32 %v292_v26, %v291_v37  ;;  %s5840_s15 = sshll.u32 %s8585_s13, 8 }
  0x2a   : > { %vm6874_vm8 = vmor %vm260_vm3, %vm261_vm5  ;;  %v588_v39 = vsel %vm6867_vm7, %v269_v29, %v587_v16  ;;  %v296_v47 = vrot.slane %v291_v37, 4  ;;  %v597_v48 = vsel %vm6867_vm7, %v286_v35, %v596_v21  ;;  %v593_v49 = vld [vmem:[#allocation2 + $0x14] sm:$0x1]  ;;  %v234_v50 = vld [vmem:[%s6855_s25 + $0x18] sm:$0xf]  ;;  %v279_v54 = vrot.slane %v274_v22, 4  ;;  %s8442_s18 = scalar_lea.vmem %s8546_s3, %s5840_s15 }
  0x2b   : > { %vm6883_vm9 = vmand %vm175_vm2, %vm260_vm3  ;;  %v278_v45 = vsel %vm6874_vm8, %v270_v30, %v277_v34  ;;  %589 = vst [vmem:[#allocation2 + $0xc] sm:$0xf] %v588_v39  ;;  %v303_v51 = vor.u32 %v301_v33, %v300_v40  ;;  %v304_v52 = vrot.slane %v300_v40, 4  ;;  %v308_v53 = vrot.slane %v306_v41, 7  ;;  %v235_v55 = vld [vmem:[%s6855_s25 + $0x1c] sm:$0xf] }
  0x2c   : > { %590 = vst.msk [vmem:[#allocation2 + $0x10] sm:$0xf] %vm172_vm1, %v278_v45  ;;  %598 = vst [vmem:[#allocation2 + $0x18] sm:$0xf] %v597_v48  ;;  %v295_v56 = vsel %vm6874_vm8, %v287_v36, %v294_v46  ;;  %v601_v57 = vsel %vm6883_vm9, %v296_v47, %v600_v44  ;;  %v315_v58 = vshrl.u32 %v234_v50, 16  ;;  %v318_v59 = vshll.u32 %v234_v50, 16 }
  0x2d   : > { %v236_v60 = vld [vmem:[%s6855_s25 + $0x20] sm:$0xf]  ;;  %v6900_v61 = vld [vmem:[%s6855_s25 + $0x24] sm:$0xf]  ;;  %599 = vst.msk [vmem:[#allocation2 + $0x1c] sm:$0xf] %vm172_vm1, %v295_v56  ;;  %v311_v62 = vor.u32 %v309_v42, %v308_v53  ;;  %v604_v0 = vsel %vm6867_vm7, %v303_v51, %v603_v38  ;;  %v594_v1 = vsel %vm6883_vm9, %v279_v54, %v593_v49 }
  0x2e   : > { %v313_v63 = vrot.slane %v308_v53, 4  ;;  %vm1124_vm10 = vsmask.f32 3328  ;;  %vm1125_vm11 = vsmask.f32 7440  ;;  %v317_v2 = vrot.slane %v315_v58, 7 }
  0x2f   : > { %602 = vst [vmem:[#allocation2 + $0x20] sm:$0x1] %v601_v57  ;;  %605 = vst [vmem:[#allocation2 + $0x24] sm:$0xf] %v604_v0  ;;  %v323_v3 = vshrl.u32 %v235_v55, 16  ;;  %v326_v4 = vshll.u32 %v235_v55, 16  ;;  %v312_v10 = vsel %vm6874_vm8, %v304_v52, %v311_v62 }
  0x30   : > { %595 = vst [vmem:[#allocation2 + $0x14] sm:$0x1] %v594_v1  ;;  %v332_v8 = vshrl.u32 %v236_v60, 16  ;;  %v607_v9 = vld [vmem:[#allocation2 + $0x2c] sm:$0x1]  ;;  %v6911_v11 = vsel %vm879_vm0, %v6847_v6, 0  ;;  %v320_v15 = vor.u32 %v318_v59, %v317_v2  ;;  %vm6970_vm12 = vmor %vm1124_vm10, %vm1125_vm11 }
  0x31   : > { %v610_v12 = vld [vmem:[#allocation2 + $0x30] sm:$0xf]  ;;  %v335_v13 = vshll.u32 %v236_v60, 16  ;;  %v340_v14 = vshrl.u32 %v6900_v61, 16  ;;  %606 = vst.msk [vmem:[#allocation2 + $0x28] sm:$0xf] %vm172_vm1, %v312_v10  ;;  %v608_v25 = vsel %vm6883_vm9, %v313_v63, %v607_v9 }
  0x32   : > { %v321_v16 = vrot.slane %v317_v2, 4  ;;  %v325_v17 = vrot.slane %v323_v3, 7  ;;  %v6915_v18 = vrot.slane %v332_v8, 7  ;;  %v617_v19 = vld [vmem:[#allocation2 + $0x3c] sm:$0xf]  ;;  %v343_v24 = vshll.u32 %v6900_v61, 16 }
  0x33   : > { %v614_v20 = vld [vmem:[#allocation2 + $0x38] sm:$0x1]  ;;  %v6920_v21 = vld [vmem:[%s8544_s1 + $0x6] sm:$0x1]  ;;  %v2630_v6 = vld [vmem:[#allocation2 + $0xc] sm:$0xf]  ;;  %v611_v32 = vsel %vm6867_vm7, %v320_v15, %v610_v12 }
  0x34   : > { %v6922_v22 = vrot.slane %v340_v14, 7  ;;  %v6928_v26 = vld [vmem:[%s6855_s25 + $0x28] sm:$0xf]  ;;  %v6933_v27 = vld [vmem:[%s8544_s1 + $0x2] sm:$0x1]  ;;  %v6610_v29 = vld [vmem:[#allocation2 + $0xc] sm:$0xff]   ;;  %v328_v31 = vor.u32 %v326_v4, %v325_v17  ;;  %v337_v33 = vor.u32 %v335_v13, %v6915_v18 }
  0x35   : > { %v2679_v30 = vshrl.u32 %v2630_v6, 16  ;;  %609 = vst [vmem:[#allocation2 + $0x2c] sm:$0x1] %v608_v25  ;;  %v6938_v34 = vld [vmem:[#allocation2 + $0x10] sm:$0xf]  ;;  %v2682_v35 = vshll.u32 %v2630_v6, 16  ;;  %5997 = vmatmul.mubr.msk.bf16.vlgmr.msra.gmra.mrb[0].mxu1 %vm830_vm4, %v6610_v29 }
  0x36   : > { %v2633_v36 = vld [vmem:[#allocation2 + $0x18] sm:$0xf]  ;;  %v330_v37 = vrot.slane %v325_v17, 4  ;;  %612 = vst [vmem:[#allocation2 + $0x30] sm:$0xf] %v611_v32  ;;  %v2688_v40 = vshll.u32 %v6938_v34, 16  ;;  %v329_v42 = vsel %vm6874_vm8, %v321_v16, %v328_v31  ;;  %6029 = vmatpush3.bf16.msra.mxu1 %v6858_v7  ;;  %v618_v46 = vsel %vm6867_vm7, %v337_v33, %v617_v19 }
  0x37   : > { %v6611_v38 = vld [vmem:[#allocation2 + $0x18] sm:$0xff]   ;;  %v2681_v39 = vrot.slane %v2679_v30, 4  ;;  %v2692_v41 = vshrl.u32 %v6938_v34, 16  ;;  %v6946_v44 = vld [vmem:[#allocation2 + $0x14] sm:$0x1]  ;;  %v2684_v45 = vrot.slane %v2682_v35, 5  ;;  %6592 = vmatprep.subr.msk.bf16.mxu1 %vm879_vm0, %v6933_v27  ;;  %v345_v57 = vor.u32 %v343_v24, %v6922_v22 }
  0x38   : > { %613 = vst.msk [vmem:[#allocation2 + $0x34] sm:$0xf] %vm172_vm1, %v329_v42  ;;  %v615_v47 = vsel %vm6883_vm9, %v330_v37, %v614_v20  ;;  %v6955_v48 = vsel %vm879_vm0, %v6920_v21, 0  ;;  %6000 = vmatprep.mubr.msk.bf16.mxu1 %vm830_vm4, %v6611_v38  ;;  %v2690_v49 = vrot.slane %v2688_v40, 5  ;;  %v2698_v7 = vshll.u32 %v6946_v44, 16  ;;  %v6612_v58 = vld [vmem:[#allocation2 + $0x24] sm:$0xff]  }
  0x39   : > { %v2694_v50 = vrot.slane %v2692_v41, 4  ;;  %v6959_v51 = vld [vmem:[#allocation2 + $0x1c] sm:$0xf]  ;;  %619 = vst [vmem:[#allocation2 + $0x3c] sm:$0xf] %v618_v46  ;;  %v349_v52 = vshrl.u32 %v6928_v26, 16  ;;  %v2685_v53 = vor.u32 %v2684_v45, %v2681_v39 }
  0x3a   : > { %616 = vst [vmem:[#allocation2 + $0x38] sm:$0x1] %v615_v47  ;;  %v3420_v54 = vrot.slane %v6938_v34, 5  ;;  %v6965_v55 = vld [vmem:[#allocation2 + $0x20] sm:$0x1]  ;;  %v2703_v56 = vshrl.u32 %v2633_v36, 16 }
  0x3b   : > { %v2695_v60 = vor.u32 %v2694_v50, %v2690_v49  ;;  %v2700_v61 = vrot.slane %v2698_v7, 5  ;;  %v2706_v62 = vshll.u32 %v2633_v36, 16  ;;  %v2712_v63 = vshll.u32 %v6959_v51, 16  ;;  %v2636_v4 = vld [vmem:[#allocation2 + $0x24] sm:$0xf] }
  0x3c   : > { %v2686_v0 = vrot.slane %v2685_v53, 4  ;;  %v2705_v1 = vrot.slane %v2703_v56, 4  ;;  %v2716_v2 = vshrl.u32 %v6959_v51, 16  ;;  %v2722_v3 = vshll.u32 %v6965_v55, 16  ;;  %v6981_v17 = vld [vmem:[#allocation2 + $0x28] sm:$0xf] }
  0x3d   : > { %v2696_v8 = vrot.slane %v2695_v60, 4  ;;  %v3423_v9 = vrot.slane %v6946_v44, 5  ;;  %v2708_v10 = vrot.slane %v2706_v62, 5  ;;  %v2714_v12 = vrot.slane %v2712_v63, 5  ;;  %6001 = vmatmul.mubr.msk.bf16.gmra.mrb[4].mxu1 %vm830_vm4, %v6612_v58  ;;  %v6987_v25 = vld [vmem:[#allocation2 + $0x2c] sm:$0x1] }
  0x3e   : > { %v2691_v13 = vsel %vm6970_vm12, %v2686_v0, %v2690_v49  ;;  %v2718_v14 = vrot.slane %v2716_v2, 4  ;;  %v2724_v15 = vrot.slane %v2722_v3, 5  ;;  %v3427_v16 = vrot.slane %v6959_v51, 5  ;;  %v2639_v33 = vld [vmem:[#allocation2 + $0x30] sm:$0xf] }
  0x3f   : > { %v2701_v19 = vsel %vm6970_vm12, %v2696_v8, %v2700_v61  ;;  %v2709_v20 = vor.u32 %v2708_v10, %v2705_v1  ;;  %v6613_v6 = vld [vmem:[#allocation2 + $0x30] sm:$0xff]   ;;  %v338_v24 = vrot.slane %v6915_v18, 4  ;;  %v347_v31 = vrot.slane %v6922_v22, 4  ;;  %v239_v63 = vld [vmem:[%s6855_s25 + $0x2c] sm:$0xf] }
  0x40   : > { %v5645_v29 = vcombine.low %v2691_v13, %v2701_v19  ;;  %v2719_v30 = vor.u32 %v2718_v14, %v2714_v12  ;;  %v2727_v32 = vshrl.u32 %v2636_v4, 16  ;;  %6004 = vmatprep.mubr.msk.bf16.mxu1 %vm830_vm4, %v6613_v6  ;;  %v2730_v37 = vshll.u32 %v2636_v4, 16  ;;  %v6998_v42 = vld [vmem:[#allocation2 + $0x34] sm:$0xf]  ;;  %v624_v4 = vld [vmem:[#allocation2 + $0x48] sm:$0xf] }
  0x41   : > { %v2710_v35 = vrot.slane %v2709_v20, 4  ;;  %v346_v36 = vsel %vm6874_vm8, %v338_v24, %v345_v57  ;;  %v2736_v38 = vshll.u32 %v6981_v17, 16  ;;  %v2740_v40 = vshrl.u32 %v6981_v17, 16  ;;  %v7002_v49 = vld [vmem:[#allocation2 + $0x38] sm:$0x1] }
  0x42   : > { %6132 = vmatprep.mubr.msk.bf16.mxu0 %vm830_vm4, %v5645_v29  ;;  %v2720_v18 = vrot.slane %v2719_v30, 4  ;;  %620 = vst.msk [vmem:[#allocation2 + $0x40] sm:$0xf] %vm172_vm1, %v346_v36  ;;  %v2729_v39 = vrot.slane %v2727_v32, 4  ;;  %v2746_v41 = vshll.u32 %v6987_v25, 16  ;;  %v2732_v46 = vrot.slane %v2730_v37, 5 }
  0x43   : > { %v2715_v45 = vsel %vm6970_vm12, %v2710_v35, %v2714_v12  ;;  %v2738_v47 = vrot.slane %v2736_v38, 5  ;;  %v2751_v50 = vshrl.u32 %v2639_v33, 16  ;;  %v2742_v53 = vrot.slane %v2740_v40, 4  ;;  %v240_v14 = vld [vmem:[%s6855_s25 + $0x30] sm:$0xf] }
  0x44   : > { %v2725_v7 = vsel %vm6970_vm12, %v2720_v18, %v2724_v15  ;;  %v2748_v56 = vrot.slane %v2746_v41, 5  ;;  %v2754_v57 = vshll.u32 %v2639_v33, 16  ;;  %v2733_v60 = vor.u32 %v2732_v46, %v2729_v39  ;;  %v241_v24 = vld [vmem:[%s6855_s25 + $0x34] sm:$0xf]  ;;  %v621_v40 = vld [vmem:[#allocation2 + $0x44] sm:$0x1] }
  0x45   : > { %v5646_v58 = vcombine.low %v2715_v45, %v2725_v7  ;;  %v2753_v61 = vrot.slane %v2751_v50, 4  ;;  %v2760_v62 = vshll.u32 %v6998_v42, 16  ;;  %v2743_v0 = vor.u32 %v2742_v53, %v2738_v47  ;;  %v2642_v41 = vld [vmem:[#allocation2 + $0x3c] sm:$0xf] }
  0x46   : > { %v2756_v1 = vrot.slane %v2754_v57, 5  ;;  %v2764_v2 = vshrl.u32 %v6998_v42, 16  ;;  %v2770_v3 = vshll.u32 %v7002_v49, 16  ;;  %v2734_v8 = vrot.slane %v2733_v60, 4  ;;  %v631_v57 = vld [vmem:[#allocation2 + $0x54] sm:$0xf] }
  0x47   : > { %6133 = vmatmul.mubr.msk.bf16.vlgmr.msra.gmra.mrb[0].mxu0 %vm830_vm4, %v5646_v58  ;;  %v2762_v10 = vrot.slane %v2760_v62, 5  ;;  %v351_v12 = vrot.slane %v349_v52, 7  ;;  %v352_v13 = vshll.u32 %v6928_v26, 16  ;;  %v2744_v15 = vrot.slane %v2743_v0, 4  ;;  %v628_v0 = vld [vmem:[#allocation2 + $0x50] sm:$0x1] }
  0x48   : > { %6165 = vmatpush3.bf16.msra.mxu0 %v6911_v11  ;;  %v2757_v19 = vor.u32 %v2756_v1, %v2753_v61  ;;  %v2766_v20 = vrot.slane %v2764_v2, 4  ;;  %v2772_v6 = vrot.slane %v2770_v3, 5  ;;  %v2739_v30 = vsel %vm6970_vm12, %v2734_v8, %v2738_v47  ;;  %v242_v8 = vld [vmem:[%s6855_s25 + $0x38] sm:$0xf] }
  0x49   : > { %v6614_v29 = vld [vmem:[#allocation2 + $0x3c] sm:$0xff]   ;;  %v354_v32 = vor.u32 %v352_v13, %v351_v12  ;;  %v355_v33 = vrot.slane %v351_v12, 4  ;;  %v357_v35 = vshrl.u32 %v239_v63, 16  ;;  %6597 = vmatprep.subr.msk.bf16.mxu0 %vm879_vm0, %v6920_v21  ;;  %v2749_v26 = vsel %vm6970_vm12, %v2744_v15, %v2748_v56 }
  0x4a   : > { %v2758_v52 = vrot.slane %v2757_v19, 4  ;;  %v2767_v11 = vor.u32 %v2766_v20, %v2762_v10  ;;  %v360_v36 = vshll.u32 %v239_v63, 16  ;;  %6005 = vmatmul.mubr.msk.bf16.gmra.mrb[8].mxu1 %vm830_vm4, %v6614_v29  ;;  %v5647_v37 = vcombine.low %v2739_v30, %v2749_v26  ;;  %v7035_v62 = vld [vmem:[#allocation2 + $0x40] sm:$0xf]  ;;  %v243_v29 = vld [vmem:[%s6855_s25 + $0x3c] sm:$0xf] }
  0x4b   : > { %v359_v38 = vrot.slane %v357_v35, 7  ;;  %v625_v18 = vsel %vm6867_vm7, %v354_v32, %v624_v4  ;;  %v366_v39 = vshrl.u32 %v240_v14, 16  ;;  %v369_v46 = vshll.u32 %v240_v14, 16 }
  0x4c   : > { %v2763_v45 = vsel %vm6970_vm12, %v2758_v52, %v2762_v10  ;;  %v2768_v21 = vrot.slane %v2767_v11, 4  ;;  %626 = vst [vmem:[#allocation2 + $0x48] sm:$0xf] %v625_v18  ;;  %v374_v47 = vshrl.u32 %v241_v24, 16  ;;  %6136 = vmatprep.mubr.msk.bf16.mxu0 %vm830_vm4, %v5647_v37  ;;  %v377_v56 = vshll.u32 %v241_v24, 16 }
  0x4d   : > { %v362_v50 = vor.u32 %v360_v36, %v359_v38  ;;  %v364_v7 = vrot.slane %v359_v38, 4  ;;  %v368_v53 = vrot.slane %v366_v39, 7  ;;  %v622_v61 = vsel %vm6883_vm9, %v347_v31, %v621_v40  ;;  %v635_v31 = vld [vmem:[#allocation2 + $0x5c] sm:$0x1]  ;;  %v244_v18 = vld [vmem:[%s6855_s25 + $0x40] sm:$0xf] }
  0x4e   : > { %v2773_v58 = vsel %vm6970_vm12, %v2768_v21, %v2772_v6  ;;  %v376_v60 = vrot.slane %v374_v47, 7  ;;  %v2775_v63 = vshrl.u32 %v2642_v41, 16  ;;  %623 = vst [vmem:[#allocation2 + $0x44] sm:$0x1] %v622_v61  ;;  %v2778_v13 = vshll.u32 %v2642_v41, 16 }
  0x4f   : > { %v5648_v1 = vcombine.low %v2763_v45, %v2773_v58  ;;  %v363_v2 = vsel %vm6874_vm8, %v355_v33, %v362_v50  ;;  %v371_v3 = vor.u32 %v369_v46, %v368_v53  ;;  %v372_v4 = vrot.slane %v368_v53, 4  ;;  %v638_v21 = vld [vmem:[#allocation2 + $0x60] sm:$0xf] }
  0x50   : > { %627 = vst.msk [vmem:[#allocation2 + $0x4c] sm:$0xf] %vm172_vm1, %v363_v2  ;;  %v379_v10 = vor.u32 %v377_v56, %v376_v60  ;;  %v381_v22 = vrot.slane %v376_v60, 4  ;;  %v2777_v12 = vrot.slane %v2775_v63, 4  ;;  %v2784_v15 = vshll.u32 %v7035_v62, 16 }
  0x51   : > { %6137 = vmatmul.mubr.msk.bf16.gmra.mrb[4].mxu0 %vm830_vm4, %v5648_v1  ;;  %v632_v14 = vsel %vm6867_vm7, %v371_v3, %v631_v57  ;;  %v2788_v19 = vshrl.u32 %v7035_v62, 16  ;;  %v629_v20 = vsel %vm6883_vm9, %v364_v7, %v628_v0  ;;  %v2780_v24 = vrot.slane %v2778_v13, 5  ;;  %v245_v3 = vld [vmem:[%s6855_s25 + $0x44] sm:$0xf] }
  0x52   : > { %v380_v6 = vsel %vm6874_vm8, %v372_v4, %v379_v10  ;;  %633 = vst [vmem:[#allocation2 + $0x54] sm:$0xf] %v632_v14  ;;  %630 = vst [vmem:[#allocation2 + $0x50] sm:$0x1] %v629_v20  ;;  %v383_v30 = vshrl.u32 %v242_v8, 16  ;;  %v386_v32 = vshll.u32 %v242_v8, 16  ;;  %v636_v52 = vsel %vm6883_vm9, %v381_v22, %v635_v31 }
  0x53   : > { %634 = vst.msk [vmem:[#allocation2 + $0x58] sm:$0xf] %vm172_vm1, %v380_v6  ;;  %v2786_v33 = vrot.slane %v2784_v15, 5  ;;  %v2790_v35 = vrot.slane %v2788_v19, 4  ;;  %v2645_v26 = vld [vmem:[#allocation2 + $0x48] sm:$0xf]  ;;  %v2781_v11 = vor.u32 %v2780_v24, %v2777_v12 }
  0x54   : > { %v2799_v36 = vshrl.u32 %v2645_v26, 16  ;;  %v2802_v37 = vshll.u32 %v2645_v26, 16  ;;  %v385_v38 = vrot.slane %v383_v30, 7  ;;  %637 = vst [vmem:[#allocation2 + $0x5c] sm:$0x1] %v636_v52  ;;  %v3430_v39 = vrot.slane %v6965_v55, 5 }
  0x55   : > { %v2791_v40 = vor.u32 %v2790_v35, %v2786_v33  ;;  %v391_v41 = vshrl.u32 %v243_v29, 16  ;;  %v394_v45 = vshll.u32 %v243_v29, 16  ;;  %v7056_v46 = vld [vmem:[#allocation2 + $0x44] sm:$0x1]  ;;  %v2782_v47 = vrot.slane %v2781_v11, 4 }
  0x56   : > { %v2801_v50 = vrot.slane %v2799_v36, 4  ;;  %v2804_v7 = vrot.slane %v2802_v37, 5  ;;  %v388_v53 = vor.u32 %v386_v32, %v385_v38  ;;  %v2794_v58 = vshll.u32 %v7056_v46, 16 }
  0x57   : > { %v6615_v56 = vld [vmem:[#allocation2 + $0x48] sm:$0xff]   ;;  %v2792_v57 = vrot.slane %v2791_v40, 4  ;;  %v400_v60 = vshrl.u32 %v244_v18, 16  ;;  %v389_v0 = vrot.slane %v385_v38, 4  ;;  %v393_v1 = vrot.slane %v391_v41, 7 }
  0x58   : > { %v7059_v61 = vld [vmem:[#allocation2 + $0x4c] sm:$0xf]  ;;  %v2805_v63 = vor.u32 %v2804_v7, %v2801_v50  ;;  %v639_v2 = vsel %vm6867_vm7, %v388_v53, %v638_v21  ;;  %6008 = vmatprep.mubr.msk.bf16.mxu1 %vm830_vm4, %v6615_v56  ;;  %v2787_v4 = vsel %vm6970_vm12, %v2782_v47, %v2786_v33  ;;  %v2796_v8 = vrot.slane %v2794_v58, 5 }
  0x59   : > { %v7067_v10 = vld [vmem:[#allocation2 + $0x50] sm:$0x1]  ;;  %v2808_v22 = vshll.u32 %v7059_v61, 16  ;;  %640 = vst [vmem:[#allocation2 + $0x60] sm:$0xf] %v639_v2  ;;  %v2812_v31 = vshrl.u32 %v7059_v61, 16  ;;  %v396_v15 = vor.u32 %v394_v45, %v393_v1 }
  0x5a   : > { %v6616_v12 = vld [vmem:[#allocation2 + $0x54] sm:$0xff]   ;;  %v2806_v13 = vrot.slane %v2805_v63, 4  ;;  %v2818_v14 = vshll.u32 %v7067_v10, 16  ;;  %v2797_v19 = vsel %vm6970_vm12, %v2792_v57, %v2796_v8  ;;  %v398_v6 = vrot.slane %v393_v1, 4  ;;  %v645_v45 = vld [vmem:[#allocation2 + $0x6c] sm:$0xf] }
  0x5b   : > { %v2810_v20 = vrot.slane %v2808_v22, 5  ;;  %v402_v24 = vrot.slane %v400_v60, 7  ;;  %v2648_v29 = vld [vmem:[#allocation2 + $0x54] sm:$0xf]  ;;  %6009 = vmatmul.mubr.msk.bf16.gmra.mrb[12].mxu1 %vm830_vm4, %v6616_v12  ;;  %v5649_v30 = vcombine.low %v2787_v4, %v2797_v19  ;;  %v2814_v32 = vrot.slane %v2812_v31, 4 }
  0x5c   : > { %v2820_v33 = vrot.slane %v2818_v14, 5  ;;  %v397_v35 = vsel %vm6874_vm8, %v389_v0, %v396_v15  ;;  %v7077_v26 = vld [vmem:[#allocation2 + $0x58] sm:$0xf]  ;;  %v403_v11 = vshll.u32 %v244_v18, 16  ;;  %v408_v37 = vshrl.u32 %v245_v3, 16 }
  0x5d   : > { %v2811_v52 = vsel %vm6970_vm12, %v2806_v13, %v2810_v20  ;;  %641 = vst.msk [vmem:[#allocation2 + $0x64] sm:$0xf] %vm172_vm1, %v397_v35  ;;  %v406_v36 = vrot.slane %v402_v24, 4  ;;  %v7082_v38 = vld [vmem:[#allocation2 + $0x5c] sm:$0x1]  ;;  %6140 = vmatprep.mubr.msk.bf16.mxu0 %vm830_vm4, %v5649_v30  ;;  %v2815_v40 = vor.u32 %v2814_v32, %v2810_v20  ;;  %v411_v41 = vshll.u32 %v245_v3, 16 }
  0x5e   : > { %v2823_v21 = vshrl.u32 %v2648_v29, 16  ;;  %v2826_v47 = vshll.u32 %v2648_v29, 16  ;;  %v405_v50 = vor.u32 %v403_v11, %v402_v24  ;;  %v7085_v7 = vrot.slane %v408_v37, 7  ;;  %v642_v57 = vld [vmem:[#allocation2 + $0x68] sm:$0x1] }
  0x5f   : > { %v2832_v53 = vshll.u32 %v7077_v26, 16  ;;  %v2836_v56 = vshrl.u32 %v7077_v26, 16  ;;  %v2816_v18 = vrot.slane %v2815_v40, 4  ;;  %v2842_v63 = vshll.u32 %v7082_v38, 16  ;;  %v246_v20 = vld [vmem:[%s6855_s25 + $0x48] sm:$0xf] }
  0x60   : > { %v2825_v58 = vrot.slane %v2823_v21, 4  ;;  %v2828_v60 = vrot.slane %v2826_v47, 5  ;;  %v7092_v0 = vrot.slane %v3427_v16, 4  ;;  %v413_v1 = vor.u32 %v411_v41, %v7085_v7  ;;  %v2651_v4 = vld [vmem:[#allocation2 + $0x60] sm:$0xf] }
  0x61   : > { %v646_v2 = vsel %vm6867_vm7, %v405_v50, %v645_v45  ;;  %v2834_v3 = vrot.slane %v2832_v53, 5  ;;  %v2821_v8 = vsel %vm6970_vm12, %v2816_v18, %v2820_v33  ;;  %v2838_v12 = vrot.slane %v2836_v56, 4  ;;  %v247_v24 = vld [vmem:[%s6855_s25 + $0x4c] sm:$0xf] }
  0x62   : > { %647 = vst [vmem:[#allocation2 + $0x6c] sm:$0xf] %v646_v2  ;;  %v2829_v22 = vor.u32 %v2828_v60, %v2825_v58  ;;  %v2844_v13 = vrot.slane %v2842_v63, 5  ;;  %vm1867_vm13 = vcmask 1042432   ;;  %vm1868_vm14 = vcmask 1046532  }
  0x63   : > { %v5650_v31 = vcombine.low %v2811_v52, %v2821_v8  ;;  %v414_v14 = vsel %vm6874_vm8, %v406_v36, %v413_v1  ;;  %v643_v15 = vsel %vm6883_vm9, %v398_v6, %v642_v57  ;;  %v2847_v19 = vshrl.u32 %v2651_v4, 16  ;;  %v248_v6 = vld [vmem:[%s6855_s25 + $0x50] sm:$0xf]  ;;  %v652_v58 = vld [vmem:[#allocation2 + $0x78] sm:$0xf]  ;;  %vm7135_vm15 = vmor %vm1867_vm13, %vm1868_vm14 }
  0x64   : > { %v6617_v29 = vld [vmem:[#allocation2 + $0x60] sm:$0xff]   ;;  %648 = vst.msk [vmem:[#allocation2 + $0x70] sm:$0xf] %vm172_vm1, %v414_v14  ;;  %v2830_v30 = vrot.slane %v2829_v22, 4  ;;  %v2839_v32 = vor.u32 %v2838_v12, %v2834_v3  ;;  %644 = vst [vmem:[#allocation2 + $0x68] sm:$0x1] %v643_v15  ;;  %v3431_v44 = vsel %vm7135_vm15, %v7092_v0, %v3430_v39 }
  0x65   : > { %v7106_v33 = vld [vmem:[#allocation2 + $0x64] sm:$0xf]  ;;  %6141 = vmatmul.mubr.msk.bf16.gmra.mrb[8].mxu0 %vm830_vm4, %v5650_v31  ;;  %v2849_v35 = vrot.slane %v2847_v19, 4  ;;  %v2850_v52 = vshll.u32 %v2651_v4, 16  ;;  %6012 = vmatprep.mubr.msk.bf16.mxu1 %vm830_vm4, %v6617_v29  ;;  %v417_v41 = vshrl.u32 %v246_v20, 16  ;;  %v420_v45 = vshll.u32 %v246_v20, 16 }
  0x66   : > { %v2856_v11 = vshll.u32 %v7106_v33, 16  ;;  %v2860_v36 = vshrl.u32 %v7106_v33, 16  ;;  %v2835_v37 = vsel %vm6970_vm12, %v2830_v30, %v2834_v3  ;;  %v2840_v40 = vrot.slane %v2839_v32, 4  ;;  %v249_v3 = vld [vmem:[%s6855_s25 + $0x54] sm:$0xf] }
  0x67   : > { %v2852_v21 = vrot.slane %v2850_v52, 5  ;;  %v425_v53 = vshrl.u32 %v247_v24, 16  ;;  %v419_v57 = vrot.slane %v417_v41, 7  ;;  %v428_v18 = vshll.u32 %v247_v24, 16  ;;  %v659_v14 = vld [vmem:[#allocation2 + $0x84] sm:$0xf] }
  0x68   : > { %v2858_v47 = vrot.slane %v2856_v11, 5  ;;  %v2862_v50 = vrot.slane %v2860_v36, 4  ;;  %v2845_v56 = vsel %vm6970_vm12, %v2840_v40, %v2844_v13  ;;  %v434_v60 = vshrl.u32 %v248_v6, 16  ;;  %v3354_v15 = vld [vmem:[#allocation2 + $0xc] sm:$0xe] }
  0x69   : > { %v5651_v63 = vcombine.low %v2835_v37, %v2845_v56  ;;  %v2853_v1 = vor.u32 %v2852_v21, %v2849_v35  ;;  %v7117_v4 = vrot.slane %v425_v53, 7  ;;  %v422_v8 = vor.u32 %v420_v45, %v419_v57  ;;  %v3355_v35 = vld [vmem:[#allocation2 + $0x18] sm:$0xe] }
  0x6a   : > { %v2863_v2 = vor.u32 %v2862_v50, %v2858_v47  ;;  %v423_v22 = vrot.slane %v419_v57, 4  ;;  %v436_v12 = vrot.slane %v434_v60, 7  ;;  %v437_v31 = vshll.u32 %v248_v6, 16  ;;  %v250_v52 = vld [vmem:[%s6855_s25 + $0x58] sm:$0xf] }
  0x6b   : > { %v6618_v19 = vld [vmem:[#allocation2 + $0x6c] sm:$0xff]   ;;  %6144 = vmatprep.mubr.msk.bf16.mxu0 %vm830_vm4, %v5651_v63  ;;  %v7121_v13 = vld [vmem:[#allocation2 + $0x68] sm:$0x1]  ;;  %v2854_v20 = vrot.slane %v2853_v1, 4  ;;  %v430_v24 = vor.u32 %v428_v18, %v7117_v4  ;;  %v653_v32 = vsel %vm6867_vm7, %v422_v8, %v652_v58  ;;  %v442_v45 = vshrl.u32 %v249_v3, 16 }
  0x6c   : > { %v2864_v29 = vrot.slane %v2863_v2, 4  ;;  %v2866_v30 = vshll.u32 %v7121_v13, 16  ;;  %6013 = vmatmul.mubr.msk.bf16.gmra.mrb[16].mxu1 %vm830_vm4, %v6618_v19  ;;  %654 = vst [vmem:[#allocation2 + $0x78] sm:$0xf] %v653_v32  ;;  %v439_v6 = vor.u32 %v437_v31, %v436_v12  ;;  %v440_v37 = vrot.slane %v436_v12, 4 }
  0x6d   : > { %v2859_v11 = vsel %vm6970_vm12, %v2854_v20, %v2858_v47  ;;  %v431_v36 = vsel %vm6874_vm8, %v423_v22, %v430_v24  ;;  %v445_v21 = vshll.u32 %v249_v3, 16  ;;  %v5677_v47 = vrot.slane %v3354_v15, 9  ;;  %v251_v63 = vld [vmem:[%s6855_s25 + $0x5c] sm:$0xf]  ;;  %v252_v22 = vld [vmem:[%s6855_s25 + $0x60] sm:$0xf] }
  0x6e   : > { %v2868_v41 = vrot.slane %v2866_v30, 5  ;;  %655 = vst.msk [vmem:[#allocation2 + $0x7c] sm:$0xf] %vm172_vm1, %v431_v36  ;;  %v660_v50 = vsel %vm6867_vm7, %v439_v6, %v659_v14  ;;  %v3422_v53 = vrot.slane %v3420_v54, 4  ;;  %v5678_v56 = vrot.slane %v3355_v35, 9 }
  0x6f   : > { %v451_v57 = vshrl.u32 %v250_v52, 16  ;;  %v7146_v58 = vrot.slane %v442_v45, 7  ;;  %661 = vst [vmem:[#allocation2 + $0x84] sm:$0xf] %v660_v50  ;;  %v3421_v60 = vsel %vm7135_vm15, %v5677_v47, %v3420_v54  ;;  %v454_v1 = vshll.u32 %v250_v52, 16 }
  0x70   : > { %v2869_v18 = vsel %vm6970_vm12, %v2864_v29, %v2868_v41  ;;  %v3424_v3 = vsel %vm7135_vm15, %v3422_v53, %v3423_v9  ;;  %v253_v12 = vld [vmem:[%s6855_s25 + $0x64] sm:$0xf]  ;;  %v7161_v31 = vsel %vm879_vm0, %v6933_v27, 0  ;;  %v3428_v54 = vsel %vm7135_vm15, %v5678_v56, %v3427_v16  ;;  %v666_v9 = vld [vmem:[#allocation2 + $0x90] sm:$0xf] }
  0x71   : > { %v5652_v2 = vcombine.low %v2859_v11, %v2869_v18  ;;  %v453_v8 = vrot.slane %v451_v57, 7  ;;  %v447_v34 = vor.u32 %v445_v21, %v7146_v58  ;;  %v5693_v14 = vcombine.low %v3421_v60, %v3424_v3  ;;  %v3356_v15 = vld [vmem:[#allocation2 + $0x24] sm:$0xe]  ;;  %v3357_v29 = vld [vmem:[#allocation2 + $0x30] sm:$0xe] }
  0x72   : > { %v459_v20 = vshrl.u32 %v251_v63, 16  ;;  %v462_v24 = vshll.u32 %v251_v63, 16  ;;  %v468_v16 = vshrl.u32 %v252_v22, 16  ;;  %v471_v55 = vshll.u32 %v252_v22, 16  ;;  %v254_v60 = vld [vmem:[%s6855_s25 + $0x68] sm:$0xf] }
  0x73   : > { %6145 = vmatmul.mubr.msk.bf16.gmra.mrb[12].mxu0 %vm830_vm4, %v5652_v2  ;;  %v456_v27 = vor.u32 %v454_v1, %v453_v8  ;;  %v457_v19 = vrot.slane %v453_v8, 4  ;;  %v448_v51 = vsel %vm6874_vm8, %v440_v37, %v447_v34  ;;  %v476_v30 = vshrl.u32 %v253_v12, 16  ;;  %v673_v37 = vld [vmem:[#allocation2 + $0x9c] sm:$0xf]  ;;  %v255_v63 = vld [vmem:[%s6855_s25 + $0x6c] sm:$0xf] }
  0x74   : > { %6166 = vmatprep.mubr.msk.bf16.mxu0 %vm830_vm4, %v5693_v14  ;;  %662 = vst.msk [vmem:[#allocation2 + $0x88] sm:$0xf] %vm172_vm1, %v448_v51  ;;  %v7178_v39 = vrot.slane %v459_v20, 7  ;;  %v479_v35 = vshll.u32 %v253_v12, 16  ;;  %v5679_v52 = vrot.slane %v3356_v15, 9  ;;  %v5694_v11 = vcombine.low %v3428_v54, %v3431_v44 }
  0x75   : > { %v6619_v32 = vld [vmem:[#allocation2 + $0x78] sm:$0xff]   ;;  %v667_v0 = vsel %vm6867_vm7, %v456_v27, %v666_v9  ;;  %v470_v36 = vrot.slane %v468_v16, 7  ;;  %v7182_v6 = vrot.slane %v476_v30, 7  ;;  %v3434_v41 = vrot.slane %v6981_v17, 5  ;;  %v257_v34 = vld [vmem:[%s6855_s25 + $0x74] sm:$0xf] }
  0x76   : > { %668 = vst [vmem:[#allocation2 + $0x90] sm:$0xf] %v667_v0  ;;  %6016 = vmatprep.mubr.msk.bf16.mxu1 %vm830_vm4, %v6619_v32  ;;  %v464_v45 = vor.u32 %v462_v24, %v7178_v39  ;;  %v3437_v21 = vrot.slane %v6987_v25, 5  ;;  %v5680_v47 = vrot.slane %v3357_v29, 9  ;;  %v3441_v50 = vrot.slane %v6998_v42, 5 }
  0x77   : > { %v415_v53 = vrot.slane %v7085_v7, 4  ;;  %v473_v56 = vor.u32 %v471_v55, %v470_v36  ;;  %v474_v57 = vrot.slane %v470_v36, 4  ;;  %v481_v18 = vor.u32 %v479_v35, %v7182_v6  ;;  %v256_v42 = vld [vmem:[%s6855_s25 + $0x70] sm:$0xf]  ;;  %v3358_v15 = vld [vmem:[#allocation2 + $0x3c] sm:$0xe] }
  0x78   : > { %v465_v17 = vsel %vm6874_vm8, %v457_v19, %v464_v45  ;;  %v3435_v1 = vsel %vm7135_vm15, %v5679_v52, %v3434_v41  ;;  %v3436_v2 = vrot.slane %v3434_v41, 4  ;;  %v3442_v25 = vsel %vm7135_vm15, %v5680_v47, %v3441_v50  ;;  %v680_v24 = vld [vmem:[#allocation2 + $0xa8] sm:$0xf]  ;;  %v687_v45 = vld [vmem:[#allocation2 + $0xb4] sm:$0xf] }
  0x79   : > { %669 = vst.msk [vmem:[#allocation2 + $0x94] sm:$0xf] %vm172_vm1, %v465_v17  ;;  %v482_v3 = vsel %vm6874_vm8, %v474_v57, %v481_v18  ;;  %v674_v8 = vsel %vm6867_vm7, %v473_v56, %v673_v37  ;;  %v3443_v22 = vrot.slane %v3441_v50, 4  ;;  %v3444_v12 = vrot.slane %v7002_v49, 5  ;;  %v3359_v52 = vld [vmem:[#allocation2 + $0x48] sm:$0xe] }
  0x7a   : > { %675 = vst [vmem:[#allocation2 + $0x9c] sm:$0xf] %v674_v8  ;;  %676 = vst.msk [vmem:[#allocation2 + $0xa0] sm:$0xf] %vm172_vm1, %v482_v3  ;;  %v3438_v14 = vsel %vm7135_vm15, %v3436_v2, %v3437_v21  ;;  %v485_v54 = vshrl.u32 %v254_v60, 16  ;;  %v488_v44 = vshll.u32 %v254_v60, 16 }
  0x7b   : > { %6167 = vmatmul.mubr.msk.bf16.vlgmr.msra.gmra.mrb[0].mxu0 %vm830_vm4, %v5694_v11  ;;  %v493_v9 = vshrl.u32 %v255_v63, 16  ;;  %v6620_v27 = vld [vmem:[#allocation2 + $0x84] sm:$0xff]   ;;  %v5695_v19 = vcombine.low %v3435_v1, %v3438_v14  ;;  %v3445_v49 = vsel %vm7135_vm15, %v3443_v22, %v3444_v12  ;;  %v496_v20 = vshll.u32 %v255_v63, 16  ;;  %v1076_v21 = vld [vmem:[#allocation2] sm:$0xf] }
  0x7c   : > { %6199 = vmatpush3.bf16.msra.mxu0 %v6955_v48  ;;  %v502_v29 = vshrl.u32 %v256_v42, 16  ;;  %v432_v51 = vrot.slane %v7117_v4, 4  ;;  %v487_v16 = vrot.slane %v485_v54, 7  ;;  %v505_v30 = vshll.u32 %v256_v42, 16  ;;  %6017 = vmatmul.mubr.msk.bf16.gmra.mrb[20].mxu1 %vm830_vm4, %v6620_v27  ;;  %v1077_v18 = vld [vmem:[#allocation2 + $0x4] sm:$0xf] }
  0x7d   : > { %v7215_v55 = vrot.slane %v493_v9, 7  ;;  %6170 = vmatprep.mubr.msk.bf16.mxu0 %vm830_vm4, %v5695_v19  ;;  %v510_v0 = vshrl.u32 %v257_v34, 16  ;;  %v513_v48 = vshll.u32 %v257_v34, 16  ;;  %v5681_v35 = vrot.slane %v3358_v15, 9  ;;  %v1078_v22 = vld [vmem:[#allocation2 + $0x8] sm:$0x1] }
  0x7e   : > { %v504_v32 = vrot.slane %v502_v29, 7  ;;  %v5696_v11 = vcombine.low %v3442_v25, %v3445_v49  ;;  %v490_v36 = vor.u32 %v488_v44, %v487_v16  ;;  %v491_v37 = vrot.slane %v487_v16, 4  ;;  %v1079_v14 = vld [vmem:[#allocation2 + $0xc] sm:$0xf]  ;;  %v1080_v27 = vld [vmem:[#allocation2 + $0x10] sm:$0xf] }
  0x7f   : > { %v498_v41 = vor.u32 %v496_v20, %v7215_v55  ;;  %v7220_v56 = vrot.slane %v510_v0, 7  ;;  %v3448_v57 = vrot.slane %v7035_v62, 5  ;;  %v3451_v1 = vrot.slane %v7056_v46, 5  ;;  %v663_v0 = vld [vmem:[#allocation2 + $0x8c] sm:$0x1] }
  0x80   : > { %v507_v47 = vor.u32 %v505_v30, %v504_v32  ;;  %v508_v50 = vrot.slane %v504_v32, 4  ;;  %v6621_v60 = vld [vmem:[#allocation2 + $0x90] sm:$0xff]   ;;  %v681_v17 = vsel %vm6867_vm7, %v490_v36, %v680_v24  ;;  %v5682_v2 = vrot.slane %v3359_v52, 9  ;;  %v656_v24 = vld [vmem:[#allocation2 + $0x80] sm:$0x1] }
  0x81   : > { %v499_v63 = vsel %vm6874_vm8, %v491_v37, %v498_v41  ;;  %v449_v25 = vrot.slane %v7146_v58, 4  ;;  %v6622_v42 = vld [vmem:[#allocation2 + $0x9c] sm:$0xff]   ;;  %682 = vst [vmem:[#allocation2 + $0xa8] sm:$0xf] %v681_v17  ;;  %v515_v3 = vor.u32 %v513_v48, %v7220_v56  ;;  %v3449_v8 = vsel %vm7135_vm15, %v5681_v35, %v3448_v57  ;;  %6020 = vmatprep.mubr.msk.bf16.mxu1 %vm830_vm4, %v6621_v60  ;;  %v7481_v28 = vld [vmem:[#allocation2 + $0x94] sm:$0xf] }
  0x82   : > { %683 = vst.msk [vmem:[#allocation2 + $0xac] sm:$0xf] %vm172_vm1, %v499_v63  ;;  %v688_v62 = vsel %vm6867_vm7, %v507_v47, %v687_v45  ;;  %v3450_v46 = vrot.slane %v3448_v57, 4  ;;  %v3455_v58 = vrot.slane %v7059_v61, 5  ;;  %v3458_v12 = vrot.slane %v7067_v10, 5 }
  0x83   : > { %6171 = vmatmul.mubr.msk.bf16.gmra.mrb[4].mxu0 %vm830_vm4, %v5696_v11  ;;  %689 = vst [vmem:[#allocation2 + $0xb4] sm:$0xf] %v688_v62  ;;  %v1128_v34 = vshrl.u32 %v1076_v21, 16  ;;  %v516_v54 = vsel %vm6874_vm8, %v508_v50, %v515_v3  ;;  %v1131_v44 = vshll.u32 %v1076_v21, 16  ;;  %v1137_v9 = vshll.u32 %v1077_v18, 16 }
  0x84   : > { %v1141_v15 = vshrl.u32 %v1077_v18, 16  ;;  %690 = vst.msk [vmem:[#allocation2 + $0xb8] sm:$0xf] %vm172_vm1, %v516_v54  ;;  %v3452_v19 = vsel %vm7135_vm15, %v3450_v46, %v3451_v1  ;;  %v3456_v49 = vsel %vm7135_vm15, %v5682_v2, %v3455_v58  ;;  %v3457_v61 = vrot.slane %v3455_v58, 4  ;;  %v649_v10 = vld [vmem:[#allocation2 + $0x74] sm:$0x1]  ;;  %6021 = vmatmul.mubr.msk.bf16.gmra.mrb[24].mxu1 %vm830_vm4, %v6622_v42 }
  0x85   : > { %v1130_v20 = vrot.slane %v1128_v34, 4  ;;  %v5697_v29 = vcombine.low %v3449_v8, %v3452_v19  ;;  %v1133_v16 = vrot.slane %v1131_v44, 5  ;;  %v1139_v30 = vrot.slane %v1137_v9, 5  ;;  %v1081_v45 = vld [vmem:[#allocation2 + $0x14] sm:$0x1] }
  0x86   : > { %v1143_v32 = vrot.slane %v1141_v15, 4  ;;  %v3459_v48 = vsel %vm7135_vm15, %v3457_v61, %v3458_v12  ;;  %v1147_v35 = vshll.u32 %v1078_v22, 16  ;;  %v1152_v52 = vshrl.u32 %v1079_v14, 16  ;;  %v3360_v47 = vld [vmem:[#allocation2 + $0x54] sm:$0xe] }
  0x87   : > { %v1155_v11 = vshll.u32 %v1079_v14, 16  ;;  %6174 = vmatprep.mubr.msk.bf16.mxu0 %vm830_vm4, %v5697_v29  ;;  %v5698_v36 = vcombine.low %v3456_v49, %v3459_v48  ;;  %v1134_v37 = vor.u32 %v1133_v16, %v1130_v20  ;;  %v1161_v21 = vshll.u32 %v1080_v27, 16  ;;  %v3361_v62 = vld [vmem:[#allocation2 + $0x60] sm:$0xe]  ;;  %v1082_v58 = vld [vmem:[#allocation2 + $0x18] sm:$0xf] }
  0x88   : > { %v1144_v41 = vor.u32 %v1143_v32, %v1139_v30  ;;  %v1149_v57 = vrot.slane %v1147_v35, 5  ;;  %v650_v18 = vsel %vm6883_vm9, %v415_v53, %v649_v10  ;;  %v657_v60 = vsel %vm6883_vm9, %v432_v51, %v656_v24  ;;  %v7268_v44 = vld [vmem:[#allocation2 + $0x1c] sm:$0xf]  ;;  %v7280_v24 = vld [vmem:[#allocation2 + $0x20] sm:$0x1] }
  0x89   : > { %v6623_v50 = vld [vmem:[#allocation2 + $0xa8] sm:$0xff]   ;;  %v664_v63 = vsel %vm6883_vm9, %v449_v25, %v663_v0  ;;  %v1135_v17 = vrot.slane %v1134_v37, 4  ;;  %v1154_v2 = vrot.slane %v1152_v52, 4  ;;  %v1157_v42 = vrot.slane %v1155_v11, 5  ;;  %651 = vst [vmem:[#allocation2 + $0x74] sm:$0x1] %v650_v18 }
  0x8a   : > { %v1145_v1 = vrot.slane %v1144_v41, 4  ;;  %658 = vst [vmem:[#allocation2 + $0x80] sm:$0x1] %v657_v60  ;;  %665 = vst [vmem:[#allocation2 + $0x8c] sm:$0x1] %v664_v63  ;;  %6024 = vmatprep.mubr.msk.bf16.mxu1 %vm830_vm4, %v6623_v50  ;;  %v1163_v7 = vrot.slane %v1161_v21, 5 }
  0x8b   : > { %6175 = vmatmul.mubr.msk.bf16.gmra.mrb[8].mxu0 %vm830_vm4, %v5698_v36  ;;  %v1165_v53 = vshrl.u32 %v1080_v27, 16  ;;  %v1171_v4 = vshll.u32 %v1081_v45, 16  ;;  %v5683_v3 = vrot.slane %v3360_v47, 9  ;;  %v6624_v51 = vld [vmem:[#allocation2 + $0xb4] sm:$0xff]   ;;  %v1140_v25 = vsel %vm6970_vm12, %v1135_v17, %v1139_v30  ;;  %v1085_v30 = vld [vmem:[#allocation2 + $0x24] sm:$0xf] }
  0x8c   : > { %v1150_v8 = vsel %vm6970_vm12, %v1145_v1, %v1149_v57  ;;  %v1158_v22 = vor.u32 %v1157_v42, %v1154_v2  ;;  %v3462_v46 = vrot.slane %v7077_v26, 5  ;;  %v3465_v54 = vrot.slane %v7082_v38, 5  ;;  %6025 = vmatmul.mubr.msk.bf16.gmra.mrb[28].mxu1 %vm830_vm4, %v6624_v51  ;;  %v7286_v36 = vld [vmem:[#allocation2 + $0x28] sm:$0xf]  ;;  %v7294_v21 = vld [vmem:[#allocation2 + $0x2c] sm:$0x1] }
  0x8d   : > { %v5533_v12 = vcombine.low %v1140_v25, %v1150_v8  ;;  %v1167_v34 = vrot.slane %v1165_v53, 4  ;;  %v1173_v14 = vrot.slane %v1171_v4, 5  ;;  %v5684_v19 = vrot.slane %v3361_v62, 9  ;;  %v2655_v63 = vld [vmem:[#allocation2 + $0x70] sm:$0xf] }
  0x8e   : > { %v1159_v9 = vrot.slane %v1158_v22, 4  ;;  %v3463_v15 = vsel %vm7135_vm15, %v5683_v3, %v3462_v46  ;;  %v3464_v27 = vrot.slane %v3462_v46, 4  ;;  %v3469_v26 = vrot.slane %v7106_v33, 5  ;;  %v3362_v17 = vld [vmem:[#allocation2 + $0x6c] sm:$0xe] }
  0x8f   : > { %6030 = vmatprep.mubr.msk.bf16.mxu1 %vm830_vm4, %v5533_v12  ;;  %v1168_v49 = vor.u32 %v1167_v34, %v1163_v7  ;;  %v3472_v61 = vrot.slane %v7121_v13, 5  ;;  %v1176_v20 = vshrl.u32 %v1082_v58, 16  ;;  %v1179_v29 = vshll.u32 %v1082_v58, 16 }
  0x90   : > { %v1164_v38 = vsel %vm6970_vm12, %v1159_v9, %v1163_v7  ;;  %v3466_v10 = vsel %vm7135_vm15, %v3464_v27, %v3465_v54  ;;  %v1185_v16 = vshll.u32 %v7268_v44, 16  ;;  %v3470_v33 = vsel %vm7135_vm15, %v5684_v19, %v3469_v26  ;;  %v2656_v51 = vld [vmem:[#allocation2 + $0x74] sm:$0x1] }
  0x91   : > { %v1169_v32 = vrot.slane %v1168_v49, 4  ;;  %v5699_v0 = vcombine.low %v3463_v15, %v3466_v10  ;;  %v3471_v48 = vrot.slane %v3469_v26, 4  ;;  %v1178_v13 = vrot.slane %v1176_v20, 4  ;;  %v7309_v26 = vld [vmem:[#allocation2 + $0x7c] sm:$0xf] }
  0x92   : > { %v1181_v35 = vrot.slane %v1179_v29, 5  ;;  %v1187_v52 = vrot.slane %v1185_v16, 5  ;;  %v1189_v11 = vshrl.u32 %v7268_v44, 16  ;;  %v1195_v45 = vshll.u32 %v7280_v24, 16  ;;  %v7314_v16 = vld [vmem:[#allocation2 + $0x80] sm:$0x1] }
  0x93   : > { %v1174_v37 = vsel %vm6970_vm12, %v1169_v32, %v1173_v14  ;;  %6178 = vmatprep.mubr.msk.bf16.mxu0 %vm830_vm4, %v5699_v0  ;;  %v3473_v41 = vsel %vm7135_vm15, %v3471_v48, %v3472_v61  ;;  %v1200_v47 = vshrl.u32 %v1085_v30, 16  ;;  %v1203_v42 = vshll.u32 %v1085_v30, 16  ;;  %v3363_v61 = vld [vmem:[#allocation2 + $0x78] sm:$0xe]  ;;  %v1088_v30 = vld [vmem:[#allocation2 + $0x30] sm:$0xf] }
  0x94   : > { %v5534_v50 = vcombine.low %v1164_v38, %v1174_v37  ;;  %v5700_v57 = vcombine.low %v3470_v33, %v3473_v41  ;;  %v1182_v18 = vor.u32 %v1181_v35, %v1178_v13  ;;  %v1191_v60 = vrot.slane %v1189_v11, 4  ;;  %v7318_v13 = vld [vmem:[#allocation2 + $0x34] sm:$0xf]  ;;  %v7325_v41 = vld [vmem:[#allocation2 + $0x38] sm:$0x1] }
  0x95   : > { %v1197_v1 = vrot.slane %v1195_v45, 5  ;;  %v1202_v2 = vrot.slane %v1200_v47, 4  ;;  %v1209_v7 = vshll.u32 %v7286_v36, 16  ;;  %v1213_v3 = vshrl.u32 %v7286_v36, 16 }
  0x96   : > { %6031 = vmatmul.mubr.msk.bf16.vlgmr.msra.gmra.mrb[0].mxu1 %vm830_vm4, %v5534_v50  ;;  %6179 = vmatmul.mubr.msk.bf16.gmra.mrb[12].mxu0 %vm830_vm4, %v5700_v57  ;;  %v1183_v53 = vrot.slane %v1182_v18, 4  ;;  %v1192_v4 = vor.u32 %v1191_v60, %v1187_v52  ;;  %v1219_v62 = vshll.u32 %v7294_v21, 16  ;;  %v1205_v25 = vrot.slane %v1203_v42, 5  ;;  %v1091_v18 = vld [vmem:[#allocation2 + $0x3c] sm:$0xf] }
  0x97   : > { %v1211_v8 = vrot.slane %v1209_v7, 5  ;;  %6063 = vmatpush3.bf16.msra.mxu1 %v7161_v31  ;;  %v5685_v22 = vrot.slane %v3362_v17, 9  ;;  %v3476_v46 = vrot.slane %v2655_v63, 5  ;;  %v1215_v34 = vrot.slane %v1213_v3, 4  ;;  %v7339_v3 = vld [vmem:[#allocation2 + $0x44] sm:$0x1] }
  0x98   : > { %v1188_v58 = vsel %vm6970_vm12, %v1183_v53, %v1187_v52  ;;  %v1193_v12 = vrot.slane %v1192_v4, 4  ;;  %v1206_v14 = vor.u32 %v1205_v25, %v1202_v2  ;;  %v3479_v15 = vrot.slane %v2656_v51, 5  ;;  %v7334_v2 = vld [vmem:[#allocation2 + $0x40] sm:$0xf] }
  0x99   : > { %v3477_v54 = vsel %vm7135_vm15, %v5685_v22, %v3476_v46  ;;  %v3478_v9 = vrot.slane %v3476_v46, 4  ;;  %v466_v27 = vrot.slane %v7178_v39, 4  ;;  %v1216_v49 = vor.u32 %v1215_v34, %v1211_v8  ;;  %v2661_v22 = vld [vmem:[#allocation2 + $0x88] sm:$0xf] }
  0x9a   : > { %v1198_v19 = vsel %vm6970_vm12, %v1193_v12, %v1197_v1  ;;  %v1221_v31 = vrot.slane %v1219_v62, 5  ;;  %v483_v20 = vrot.slane %v7182_v6, 4  ;;  %v1207_v10 = vrot.slane %v1206_v14, 4  ;;  %v3364_v14 = vld [vmem:[#allocation2 + $0x84] sm:$0xe] }
  0x9b   : > { %v5535_v38 = vcombine.low %v1188_v58, %v1198_v19  ;;  %v3480_v29 = vsel %vm7135_vm15, %v3478_v9, %v3479_v15  ;;  %v500_v32 = vrot.slane %v7215_v55, 4  ;;  %v517_v0 = vrot.slane %v7220_v56, 4 }
  0x9c   : > { %v1217_v33 = vrot.slane %v1216_v49, 4  ;;  %v5701_v48 = vcombine.low %v3477_v54, %v3480_v29  ;;  %v1212_v35 = vsel %vm6970_vm12, %v1207_v10, %v1211_v8  ;;  %v2904_v52 = vshll.u32 %v7309_v26, 16  ;;  %v670_v49 = vld [vmem:[#allocation2 + $0x98] sm:$0x1]  ;;  %v2662_v29 = vld [vmem:[#allocation2 + $0x8c] sm:$0x1] }
  0x9d   : > { %6034 = vmatprep.mubr.msk.bf16.mxu1 %vm830_vm4, %v5535_v38  ;;  %v5686_v11 = vrot.slane %v3363_v61, 9  ;;  %v3483_v37 = vrot.slane %v7309_v26, 5  ;;  %v2908_v47 = vshrl.u32 %v7309_v26, 16  ;;  %v3486_v50 = vrot.slane %v7314_v16, 5 }
  0x9e   : > { %v1222_v45 = vsel %vm6970_vm12, %v1217_v33, %v1221_v31  ;;  %6182 = vmatprep.mubr.msk.bf16.mxu0 %vm830_vm4, %v5701_v48  ;;  %v1224_v57 = vshrl.u32 %v1088_v30, 16  ;;  %v1227_v1 = vshll.u32 %v1088_v30, 16  ;;  %v2914_v42 = vshll.u32 %v7314_v16, 16  ;;  %v2664_v30 = vld [vmem:[#allocation2 + $0x94] sm:$0xf] }
  0x9f   : > { %v5536_v60 = vcombine.low %v1212_v35, %v1222_v45  ;;  %v3484_v63 = vsel %vm7135_vm15, %v5686_v11, %v3483_v37  ;;  %v3485_v17 = vrot.slane %v3483_v37, 4  ;;  %v1233_v53 = vshll.u32 %v7318_v13, 16  ;;  %v3365_v33 = vld [vmem:[#allocation2 + $0x90] sm:$0xe]  ;;  %v1094_v45 = vld [vmem:[#allocation2 + $0x48] sm:$0xf] }
  0xa0   : > { %v1226_v7 = vrot.slane %v1224_v57, 4  ;;  %v1237_v4 = vshrl.u32 %v7318_v13, 16  ;;  %v1229_v51 = vrot.slane %v1227_v1, 5  ;;  %v1243_v25 = vshll.u32 %v7325_v41, 16 }
  0xa1   : > { %6035 = vmatmul.mubr.msk.bf16.gmra.mrb[4].mxu1 %vm830_vm4, %v5536_v60  ;;  %v3487_v62 = vsel %vm7135_vm15, %v3485_v17, %v3486_v50  ;;  %v1248_v8 = vshrl.u32 %v1091_v18, 16  ;;  %v1235_v58 = vrot.slane %v1233_v53, 5  ;;  %v1251_v34 = vshll.u32 %v1091_v18, 16 }
  0xa2   : > { %v5702_v46 = vcombine.low %v3484_v63, %v3487_v62  ;;  %v1239_v12 = vrot.slane %v1237_v4, 4  ;;  %v1230_v54 = vor.u32 %v1229_v51, %v1226_v7  ;;  %v1245_v9 = vrot.slane %v1243_v25, 5  ;;  %v7349_v63 = vld [vmem:[#allocation2 + $0x4c] sm:$0xf]  ;;  %v7358_v4 = vld [vmem:[%s8544_s1 + $0x7] sm:$0x1] }
  0xa3   : > { %v1250_v15 = vrot.slane %v1248_v8, 4  ;;  %v1257_v19 = vshll.u32 %v7334_v2, 16  ;;  %v1253_v61 = vrot.slane %v1251_v34, 5  ;;  %v1261_v38 = vshrl.u32 %v7334_v2, 16  ;;  %6598 = vmatprep.subr.msk.bf16.mxu0 %vm879_vm0, %v7358_v4  ;;  %v7370_v34 = vld [vmem:[#allocation2 + $0x50] sm:$0x1] }
  0xa4   : > { %6183 = vmatmul.mubr.msk.bf16.gmra.mrb[16].mxu0 %vm830_vm4, %v5702_v46  ;;  %v1240_v31 = vor.u32 %v1239_v12, %v1235_v58  ;;  %v1267_v10 = vshll.u32 %v7339_v3, 16  ;;  %v1231_v48 = vrot.slane %v1230_v54, 4  ;;  %v5687_v11 = vrot.slane %v3364_v14, 9  ;;  %v1097_v14 = vld [vmem:[#allocation2 + $0x54] sm:$0xf] }
  0xa5   : > { %v1259_v35 = vrot.slane %v1257_v19, 5  ;;  %v3490_v37 = vrot.slane %v2661_v22, 5  ;;  %v1254_v57 = vor.u32 %v1253_v61, %v1250_v15  ;;  %v1263_v18 = vrot.slane %v1261_v38, 4  ;;  %v7376_v19 = vld [vmem:[#allocation2 + $0x5c] sm:$0x1] }
  0xa6   : > { %v1241_v50 = vrot.slane %v1240_v31, 4  ;;  %v1269_v60 = vrot.slane %v1267_v10, 5  ;;  %v1236_v17 = vsel %vm6970_vm12, %v1231_v48, %v1235_v58  ;;  %v3493_v53 = vrot.slane %v2662_v29, 5  ;;  %v677_v10 = vld [vmem:[#allocation2 + $0xa4] sm:$0x1] }
  0xa7   : > { %v3491_v1 = vsel %vm7135_vm15, %v5687_v11, %v3490_v37  ;;  %v3492_v7 = vrot.slane %v3490_v37, 4  ;;  %v1255_v51 = vrot.slane %v1254_v57, 4  ;;  %v1264_v25 = vor.u32 %v1263_v18, %v1259_v35  ;;  %v2667_v57 = vld [vmem:[#allocation2 + $0xa0] sm:$0xf]  ;;  %v3366_v18 = vld [vmem:[#allocation2 + $0x9c] sm:$0xe] }
  0xa8   : > { %v1246_v62 = vsel %vm6970_vm12, %v1241_v50, %v1245_v9  ;;  %v671_v8 = vsel %vm6883_vm9, %v466_v27, %v670_v49  ;;  %v5688_v58 = vrot.slane %v3365_v33, 9  ;;  %v3497_v12 = vrot.slane %v2664_v30, 5  ;;  %v7374_v27 = vld [vmem:[#allocation2 + $0x58] sm:$0xf] }
  0xa9   : > { %v5537_v22 = vcombine.low %v1236_v17, %v1246_v62  ;;  %v3494_v46 = vsel %vm7135_vm15, %v3492_v7, %v3493_v53  ;;  %672 = vst [vmem:[#allocation2 + $0x98] sm:$0x1] %v671_v8  ;;  %v1260_v54 = vsel %vm6970_vm12, %v1255_v51, %v1259_v35  ;;  %v1265_v39 = vrot.slane %v1264_v25, 4  ;;  %v684_v25 = vld [vmem:[#allocation2 + $0xb0] sm:$0x1] }
  0xaa   : > { %v5703_v9 = vcombine.low %v3491_v1, %v3494_v46  ;;  %v1272_v15 = vshrl.u32 %v1094_v45, 16  ;;  %v3498_v49 = vsel %vm7135_vm15, %v5688_v58, %v3497_v12  ;;  %v3499_v31 = vrot.slane %v3497_v12, 4 }
  0xab   : > { %6038 = vmatprep.mubr.msk.bf16.mxu1 %vm830_vm4, %v5537_v22  ;;  %v1275_v61 = vshll.u32 %v1094_v45, 16  ;;  %v1281_v38 = vshll.u32 %v7349_v63, 16  ;;  %v1270_v29 = vsel %vm6970_vm12, %v1265_v39, %v1269_v60  ;;  %v1285_v33 = vshrl.u32 %v7349_v63, 16 }
  0xac   : > { %6186 = vmatprep.mubr.msk.bf16.mxu0 %vm830_vm4, %v5703_v9  ;;  %v1274_v30 = vrot.slane %v1272_v15, 4  ;;  %v1291_v48 = vshll.u32 %v7370_v34, 16  ;;  %v5538_v35 = vcombine.low %v1260_v54, %v1270_v29  ;;  %v1296_v50 = vshrl.u32 %v1097_v14, 16 }
  0xad   : > { %v1277_v11 = vrot.slane %v1275_v61, 5  ;;  %v1283_v37 = vrot.slane %v1281_v38, 5  ;;  %v1287_v45 = vrot.slane %v1285_v33, 4  ;;  %v1299_v1 = vshll.u32 %v1097_v14, 16  ;;  %v3367_v14 = vld [vmem:[#allocation2 + $0xa8] sm:$0xe] }
  0xae   : > { %v1293_v17 = vrot.slane %v1291_v48, 5  ;;  %v1305_v7 = vshll.u32 %v7374_v27, 16  ;;  %6039 = vmatmul.mubr.msk.bf16.gmra.mrb[8].mxu1 %vm830_vm4, %v5538_v35  ;;  %v1298_v53 = vrot.slane %v1296_v50, 4  ;;  %v1309_v62 = vshrl.u32 %v7374_v27, 16  ;;  %v2670_v61 = vld [vmem:[#allocation2 + $0xac] sm:$0xf] }
  0xaf   : > { %v1278_v60 = vor.u32 %v1277_v11, %v1274_v30  ;;  %v1315_v51 = vshll.u32 %v7376_v19, 16  ;;  %v1288_v22 = vor.u32 %v1287_v45, %v1283_v37  ;;  %v1301_v46 = vrot.slane %v1299_v1, 5  ;;  %v1100_v38 = vld [vmem:[#allocation2 + $0x60] sm:$0xf]  ;;  %v7395_v35 = vld [vmem:[#allocation2 + $0x64] sm:$0xf] }
  0xb0   : > { %v2665_v8 = vld [vmem:[#allocation2 + $0x98] sm:$0x1]  ;;  %v1307_v58 = vrot.slane %v1305_v7, 5  ;;  %v678_v12 = vsel %vm6883_vm9, %v483_v20, %v677_v10  ;;  %v1311_v9 = vrot.slane %v1309_v62, 4  ;;  %v5689_v33 = vrot.slane %v3366_v18, 9 }
  0xb1   : > { %v3500_v54 = vrot.slane %v2665_v8, 5  ;;  %v1279_v39 = vrot.slane %v1278_v60, 4  ;;  %v1317_v15 = vrot.slane %v1315_v51, 5  ;;  %679 = vst [vmem:[#allocation2 + $0xa4] sm:$0x1] %v678_v12  ;;  %v1289_v29 = vrot.slane %v1288_v22, 4 }
  0xb2   : > { %v1302_v30 = vor.u32 %v1301_v46, %v1298_v53  ;;  %v3504_v48 = vrot.slane %v2667_v57, 5  ;;  %v1312_v10 = vor.u32 %v1311_v9, %v1307_v58  ;;  %v685_v11 = vsel %vm6883_vm9, %v500_v32, %v684_v25  ;;  %v7405_v50 = vld [vmem:[#allocation2 + $0x68] sm:$0x1]  ;;  %v1103_v53 = vld [vmem:[#allocation2 + $0x6c] sm:$0xf] }
  0xb3   : > { %v3501_v6 = vsel %vm7135_vm15, %v3499_v31, %v3500_v54  ;;  %v1284_v20 = vsel %vm6970_vm12, %v1279_v39, %v1283_v37  ;;  %v1294_v57 = vsel %vm6970_vm12, %v1289_v29, %v1293_v17  ;;  %686 = vst [vmem:[#allocation2 + $0xb0] sm:$0x1] %v685_v11  ;;  %v5690_v60 = vrot.slane %v3367_v14, 9  ;;  %v7414_v51 = vld [vmem:[#allocation2 + $0x70] sm:$0xf] }
  0xb4   : > { %v5704_v45 = vcombine.low %v3498_v49, %v3501_v6  ;;  %v1303_v18 = vrot.slane %v1302_v30, 4  ;;  %v3505_v1 = vsel %vm7135_vm15, %v5689_v33, %v3504_v48  ;;  %v5539_v31 = vcombine.low %v1284_v20, %v1294_v57  ;;  %v7424_v29 = vld [vmem:[#allocation2 + $0x74] sm:$0x1] }
  0xb5   : > { %v1313_v7 = vrot.slane %v1312_v10, 4  ;;  %v3506_v37 = vrot.slane %v3504_v48, 4  ;;  %v3511_v32 = vrot.slane %v2670_v61, 5  ;;  %v1320_v49 = vshrl.u32 %v1100_v38, 16 }
  0xb6   : > { %6187 = vmatmul.mubr.msk.bf16.gmra.mrb[20].mxu0 %vm830_vm4, %v5704_v45  ;;  %v1308_v55 = vsel %vm6970_vm12, %v1303_v18, %v1307_v58  ;;  %v1323_v62 = vshll.u32 %v1100_v38, 16  ;;  %6042 = vmatprep.mubr.msk.bf16.mxu1 %vm830_vm4, %v5539_v31  ;;  %v1329_v25 = vshll.u32 %v7395_v35, 16  ;;  %v1333_v8 = vshrl.u32 %v7395_v35, 16  ;;  %v3368_v18 = vld [vmem:[#allocation2 + $0xb4] sm:$0xe] }
  0xb7   : > { %v1318_v17 = vsel %vm6970_vm12, %v1313_v7, %v1317_v15  ;;  %v1339_v22 = vshll.u32 %v7405_v50, 16  ;;  %v3512_v58 = vsel %vm7135_vm15, %v5690_v60, %v3511_v32  ;;  %v3513_v14 = vrot.slane %v3511_v32, 4  ;;  %v691_v15 = vld [vmem:[#allocation2 + $0xbc] sm:$0x1]  ;;  %v2673_v32 = vld [vmem:[#allocation2 + $0xb8] sm:$0xf] }
  0xb8   : > { %v5540_v46 = vcombine.low %v1308_v55, %v1318_v17  ;;  %v2668_v12 = vld [vmem:[#allocation2 + $0xa4] sm:$0x1]  ;;  %v1322_v54 = vrot.slane %v1320_v49, 4  ;;  %v1325_v9 = vrot.slane %v1323_v62, 5  ;;  %v1331_v61 = vrot.slane %v1329_v25, 5 }
  0xb9   : > { %v3507_v39 = vrot.slane %v2668_v12, 5  ;;  %v1335_v38 = vrot.slane %v1333_v8, 4  ;;  %v1341_v30 = vrot.slane %v1339_v22, 5  ;;  %v1344_v33 = vshrl.u32 %v1103_v53, 16  ;;  %v258_v49 = vld [vmem:[%s6855_s25 + $0x78] sm:$0xf] }
  0xba   : > { %6043 = vmatmul.mubr.msk.bf16.gmra.mrb[12].mxu1 %vm830_vm4, %v5540_v46  ;;  %v1347_v48 = vshll.u32 %v1103_v53, 16  ;;  %v1353_v6 = vshll.u32 %v7414_v51, 16  ;;  %v2671_v10 = vld [vmem:[#allocation2 + $0xb0] sm:$0x1]  ;;  %v1326_v11 = vor.u32 %v1325_v9, %v1322_v54  ;;  %v1357_v57 = vshrl.u32 %v7414_v51, 16 }
  0xbb   : > { %v3508_v20 = vsel %vm7135_vm15, %v3506_v37, %v3507_v39  ;;  %v1336_v45 = vor.u32 %v1335_v38, %v1331_v61  ;;  %v3514_v7 = vrot.slane %v2671_v10, 5  ;;  %v1346_v60 = vrot.slane %v1344_v33, 4  ;;  %v259_v8 = vld [vmem:[%s6855_s25 + $0x7c] sm:$0xf]  ;;  %v1106_v12 = vld [vmem:[#allocation2 + $0x78] sm:$0xf] }
  0xbc   : > { %v5705_v31 = vcombine.low %v3505_v1, %v3508_v20  ;;  %v1349_v55 = vrot.slane %v1347_v48, 5  ;;  %v1327_v62 = vrot.slane %v1326_v11, 4  ;;  %v1355_v17 = vrot.slane %v1353_v6, 5  ;;  %v7444_v54 = vld [vmem:[%s8544_s1 + $0x3] sm:$0x1] }
  0xbd   : > { %v1337_v53 = vrot.slane %v1336_v45, 4  ;;  %v1359_v25 = vrot.slane %v1357_v57, 4  ;;  %v3515_v37 = vsel %vm7135_vm15, %v3513_v14, %v3514_v7  ;;  %v1363_v46 = vshll.u32 %v7424_v29, 16  ;;  %6593 = vmatprep.subr.msk.bf16.mxu1 %vm879_vm0, %v7444_v54  ;;  %v7453_v10 = vld [vmem:[#allocation2 + $0x7c] sm:$0xf] }
  0xbe   : > { %6190 = vmatprep.mubr.msk.bf16.mxu0 %vm830_vm4, %v5705_v31  ;;  %v1350_v22 = vor.u32 %v1349_v55, %v1346_v60  ;;  %v692_v1 = vsel %vm6883_vm9, %v517_v0, %v691_v15  ;;  %v5706_v39 = vcombine.low %v3512_v58, %v3515_v37  ;;  %v1332_v9 = vsel %vm6970_vm12, %v1327_v62, %v1331_v61  ;;  %v694_v45 = vld [vmem:[#allocation2 + $0xc0] sm:$0xf] }
  0xbf   : > { %v1342_v14 = vsel %vm6970_vm12, %v1337_v53, %v1341_v30  ;;  %v1360_v38 = vor.u32 %v1359_v25, %v1355_v17  ;;  %693 = vst [vmem:[#allocation2 + $0xbc] sm:$0x1] %v692_v1  ;;  %v1365_v15 = vrot.slane %v1363_v46, 5  ;;  %v5691_v33 = vrot.slane %v3368_v18, 9  ;;  %v7458_v57 = vld [vmem:[#allocation2 + $0x80] sm:$0x1] }
  0xc0   : > { %v5541_v56 = vcombine.low %v1332_v9, %v1342_v14  ;;  %v1351_v0 = vrot.slane %v1350_v22, 4  ;;  %6191 = vmatmul.mubr.msk.bf16.gmra.mrb[24].mxu0 %vm830_vm4, %v5706_v39  ;;  %v3518_v6 = vrot.slane %v2673_v32, 5  ;;  %v519_v58 = vshrl.u32 %v258_v49, 16  ;;  %v698_v32 = vld [vmem:[#allocation2 + $0xc8] sm:$0x1] }
  0xc1   : > { %v1361_v48 = vrot.slane %v1360_v38, 4  ;;  %v522_v20 = vshll.u32 %v258_v49, 16  ;;  %v527_v30 = vshrl.u32 %v259_v8, 16  ;;  %v530_v11 = vshll.u32 %v259_v8, 16 }
  0xc2   : > { %6046 = vmatprep.mubr.msk.bf16.mxu1 %vm830_vm4, %v5541_v56  ;;  %v1356_v61 = vsel %vm6970_vm12, %v1351_v0, %v1355_v17  ;;  %v1368_v31 = vshrl.u32 %v1106_v12, 16  ;;  %v3519_v7 = vsel %vm7135_vm15, %v5691_v33, %v3518_v6  ;;  %v3520_v60 = vrot.slane %v3518_v6, 4  ;;  %v1109_v17 = vld [vmem:[#allocation2 + $0x84] sm:$0xf]  ;;  %v7470_v33 = vld [vmem:[#allocation2 + $0x88] sm:$0xf] }
  0xc3   : > { %v1366_v18 = vsel %vm6970_vm12, %v1361_v48, %v1365_v15  ;;  %v521_v55 = vrot.slane %v519_v58, 7  ;;  %v529_v62 = vrot.slane %v527_v30, 7  ;;  %v1371_v25 = vshll.u32 %v1106_v12, 16  ;;  %v1112_v30 = vld [vmem:[#allocation2 + $0x90] sm:$0xf] }
  0xc4   : > { %v5542_v49 = vcombine.low %v1356_v61, %v1366_v18  ;;  %v1370_v53 = vrot.slane %v1368_v31, 4  ;;  %v1377_v22 = vshll.u32 %v7453_v10, 16  ;;  %v1381_v46 = vshrl.u32 %v7453_v10, 16  ;;  %v7476_v61 = vld [vmem:[#allocation2 + $0x8c] sm:$0x1] }
  0xc5   : > { %v524_v37 = vor.u32 %v522_v20, %v521_v55  ;;  %v525_v8 = vrot.slane %v521_v55, 4  ;;  %v532_v39 = vor.u32 %v530_v11, %v529_v62  ;;  %v534_v9 = vrot.slane %v529_v62, 4 }
  0xc6   : > { %6047 = vmatmul.mubr.msk.bf16.gmra.mrb[16].mxu1 %vm830_vm4, %v5542_v49  ;;  %v2674_v1 = vld [vmem:[#allocation2 + $0xbc] sm:$0x1]  ;;  %v1373_v14 = vrot.slane %v1371_v25, 5  ;;  %v1387_v38 = vshll.u32 %v7458_v57, 16  ;;  %v1379_v12 = vrot.slane %v1377_v22, 5  ;;  %v1383_v15 = vrot.slane %v1381_v46, 4 }
  0xc7   : > { %v3521_v56 = vrot.slane %v2674_v1, 5  ;;  %v695_v0 = vsel %vm6867_vm7, %v524_v37, %v694_v45  ;;  %v533_v48 = vsel %vm6874_vm8, %v525_v8, %v532_v39  ;;  %v699_v6 = vsel %vm6883_vm9, %v534_v9, %v698_v32  ;;  %v7493_v8 = vld [vmem:[#allocation2 + $0x98] sm:$0x1] }
  0xc8   : > { %696 = vst [vmem:[#allocation2 + $0xc0] sm:$0xf] %v695_v0  ;;  %v1374_v58 = vor.u32 %v1373_v14, %v1370_v53  ;;  %v1389_v20 = vrot.slane %v1387_v38, 5  ;;  %697 = vst.msk [vmem:[#allocation2 + $0xc4] sm:$0xf] %vm172_vm1, %v533_v48  ;;  %v1384_v11 = vor.u32 %v1383_v15, %v1379_v12  ;;  %v1392_v45 = vshrl.u32 %v1109_v17, 16 }
  0xc9   : > { %v3522_v23 = vsel %vm7135_vm15, %v3520_v60, %v3521_v56  ;;  %700 = vst [vmem:[#allocation2 + $0xc8] sm:$0x1] %v699_v6  ;;  %v1395_v31 = vshll.u32 %v1109_v17, 16  ;;  %v1401_v43 = vshll.u32 %v7470_v33, 16  ;;  %v1405_v32 = vshrl.u32 %v7470_v33, 16 }
  0xca   : > { %v5707_v18 = vcombine.low %v3519_v7, %v3522_v23  ;;  %v1375_v55 = vrot.slane %v1374_v58, 4  ;;  %v1385_v49 = vrot.slane %v1384_v11, 4  ;;  %v1394_v62 = vrot.slane %v1392_v45, 4  ;;  %v1115_v6 = vld [vmem:[#allocation2 + $0x9c] sm:$0xf] }
  0xcb   : > { %v1397_v53 = vrot.slane %v1395_v31, 5  ;;  %v1411_v25 = vshll.u32 %v7476_v61, 16  ;;  %v1403_v37 = vrot.slane %v1401_v43, 5  ;;  %v1407_v17 = vrot.slane %v1405_v32, 4  ;;  %v7500_v58 = vld [vmem:[#allocation2 + $0xa0] sm:$0xf] }
  0xcc   : > { %6194 = vmatprep.mubr.msk.bf16.mxu0 %vm830_vm4, %v5707_v18  ;;  %v1380_v60 = vsel %vm6970_vm12, %v1375_v55, %v1379_v12  ;;  %v7491_v7 = vsel %vm879_vm0, %v7358_v4, 0  ;;  %v1390_v22 = vsel %vm6970_vm12, %v1385_v49, %v1389_v20  ;;  %v1416_v39 = vshrl.u32 %v1112_v30, 16  ;;  %v7503_v31 = vld [vmem:[#allocation2 + $0xa4] sm:$0x1] }
  0xcd   : > { %v1398_v46 = vor.u32 %v1397_v53, %v1394_v62  ;;  %v1413_v1 = vrot.slane %v1411_v25, 5  ;;  %v5543_v9 = vcombine.low %v1380_v60, %v1390_v22  ;;  %v1408_v14 = vor.u32 %v1407_v17, %v1403_v37 }
  0xce   : > { %v1419_v38 = vshll.u32 %v1112_v30, 16  ;;  %v1425_v56 = vshll.u32 %v7481_v28, 16  ;;  %v1418_v15 = vrot.slane %v1416_v39, 4  ;;  %v1429_v48 = vshrl.u32 %v7481_v28, 16 }
  0xcf   : > { %v3369_v0 = vld [vmem:[#allocation2 + $0xc0] sm:$0xe]  ;;  %v1399_v12 = vrot.slane %v1398_v46, 4  ;;  %v1435_v4 = vshll.u32 %v7493_v8, 16  ;;  %v2676_v23 = vld [vmem:[#allocation2 + $0xc4] sm:$0xf]  ;;  %6050 = vmatprep.mubr.msk.bf16.mxu1 %vm830_vm4, %v5543_v9 }
  0xd0   : > { %v2677_v20 = vld [vmem:[#allocation2 + $0xc8] sm:$0x1]  ;;  %v5692_v11 = vrot.slane %v3369_v0, 9  ;;  %v1409_v45 = vrot.slane %v1408_v14, 4  ;;  %v3525_v30 = vrot.slane %v2676_v23, 5  ;;  %v1421_v43 = vrot.slane %v1419_v38, 5 }
  0xd1   : > { %v3528_v18 = vrot.slane %v2677_v20, 5  ;;  %v1404_v55 = vsel %vm6970_vm12, %v1399_v12, %v1403_v37  ;;  %v1427_v49 = vrot.slane %v1425_v56, 5  ;;  %v1431_v62 = vrot.slane %v1429_v48, 4  ;;  %v1118_v12 = vld [vmem:[#allocation2 + $0xa8] sm:$0xf] }
  0xd2   : > { %v1414_v32 = vsel %vm6970_vm12, %v1409_v45, %v1413_v1  ;;  %v1437_v53 = vrot.slane %v1435_v4, 5  ;;  %v3526_v25 = vsel %vm7135_vm15, %v5692_v11, %v3525_v30  ;;  %v3527_v60 = vrot.slane %v3525_v30, 4  ;;  %v6625_v1 = vld [vmem:[#allocation2 + $0x18] sm:$0xff]   ;;  %v7517_v20 = vld [vmem:[#allocation2 + $0xac] sm:$0xf] }
  0xd3   : > { %v5544_v17 = vcombine.low %v1404_v55, %v1414_v32  ;;  %v1422_v22 = vor.u32 %v1421_v43, %v1418_v15  ;;  %v1432_v46 = vor.u32 %v1431_v62, %v1427_v49  ;;  %v1440_v39 = vshrl.u32 %v1115_v6, 16 }
  0xd4   : > { %v1443_v9 = vshll.u32 %v1115_v6, 16  ;;  %v1449_v14 = vshll.u32 %v7500_v58, 16  ;;  %v3529_v37 = vsel %vm7135_vm15, %v3527_v60, %v3528_v18  ;;  %v1453_v56 = vshrl.u32 %v7500_v58, 16  ;;  %v7521_v18 = vld [vmem:[#allocation2 + $0xb0] sm:$0x1] }
  0xd5   : > { %6051 = vmatmul.mubr.msk.bf16.gmra.mrb[20].mxu1 %vm830_vm4, %v5544_v17  ;;  %v1423_v38 = vrot.slane %v1422_v22, 4  ;;  %v1459_v0 = vshll.u32 %v7503_v31, 16  ;;  %v5708_v48 = vcombine.low %v3526_v25, %v3529_v37  ;;  %v1433_v4 = vrot.slane %v1432_v46, 4  ;;  %v1121_v25 = vld [vmem:[#allocation2 + $0xb4] sm:$0xf] }
  0xd6   : > { %v1442_v15 = vrot.slane %v1440_v39, 4  ;;  %v1445_v23 = vrot.slane %v1443_v9, 5  ;;  %v1451_v11 = vrot.slane %v1449_v14, 5  ;;  %v1455_v45 = vrot.slane %v1453_v56, 4  ;;  %v7530_v37 = vld [vmem:[#allocation2 + $0xb8] sm:$0xf] }
  0xd7   : > { %v1428_v6 = vsel %vm6970_vm12, %v1423_v38, %v1427_v49  ;;  %v1461_v30 = vrot.slane %v1459_v0, 5  ;;  %6195 = vmatmul.mubr.msk.bf16.gmra.mrb[28].mxu0 %vm830_vm4, %v5708_v48  ;;  %v1438_v55 = vsel %vm6970_vm12, %v1433_v4, %v1437_v53  ;;  %v1464_v32 = vshrl.u32 %v1118_v12, 16  ;;  %v6626_v53 = vld [vmem:[#allocation2 + $0x24] sm:$0xff]  }
  0xd8   : > { %v1446_v43 = vor.u32 %v1445_v23, %v1442_v15  ;;  %v1467_v62 = vshll.u32 %v1118_v12, 16  ;;  %6200 = vmatprep.mubr.msk.bf16.mxu0 %vm830_vm4, %v6625_v1  ;;  %v5545_v60 = vcombine.low %v1428_v6, %v1438_v55  ;;  %v1456_v17 = vor.u32 %v1455_v45, %v1451_v11  ;;  %v7535_v15 = vld [vmem:[#allocation2 + $0xbc] sm:$0x1]  ;;  %v1803_v6 = vld [vmem:[#allocation2] sm:$0xe]  ;;  %v6627_v55 = vld [vmem:[#allocation2 + $0x30] sm:$0xff]  }
  0xd9   : > { %v1473_v49 = vshll.u32 %v7517_v20, 16  ;;  %v1477_v22 = vshrl.u32 %v7517_v20, 16  ;;  %v1466_v39 = vrot.slane %v1464_v32, 4  ;;  %v1483_v14 = vshll.u32 %v7521_v18, 16 }
  0xda   : > { %v1447_v46 = vrot.slane %v1446_v43, 4  ;;  %v1469_v9 = vrot.slane %v1467_v62, 5  ;;  %6054 = vmatprep.mubr.msk.bf16.mxu1 %vm830_vm4, %v5545_v60  ;;  %v1457_v38 = vrot.slane %v1456_v17, 4  ;;  %v1488_v1 = vshrl.u32 %v1121_v25, 16 }
  0xdb   : > { %v1475_v56 = vrot.slane %v1473_v49, 5  ;;  %v1479_v0 = vrot.slane %v1477_v22, 4  ;;  %v1485_v4 = vrot.slane %v1483_v14, 5  ;;  %v1491_v23 = vshll.u32 %v1121_v25, 16 }
  0xdc   : > { %v1452_v12 = vsel %vm6970_vm12, %v1447_v46, %v1451_v11  ;;  %v1470_v48 = vor.u32 %v1469_v9, %v1466_v39  ;;  %v1462_v45 = vsel %vm6970_vm12, %v1457_v38, %v1461_v30  ;;  %v1490_v32 = vrot.slane %v1488_v1, 4  ;;  %v1804_v11 = vld [vmem:[#allocation2 + $0xc] sm:$0xe]  ;;  %v7545_v30 = vld [vmem:[%s8544_s1 + $0x8] sm:$0x1] }
  0xdd   : > { %v1480_v43 = vor.u32 %v1479_v0, %v1475_v56  ;;  %v1497_v62 = vshll.u32 %v7530_v37, 16  ;;  %v5546_v60 = vcombine.low %v1452_v12, %v1462_v45  ;;  %v1493_v49 = vrot.slane %v1491_v23, 5  ;;  %v6657_v1 = vld [vmem:[#allocation2 + $0x4] sm:$0xf]  ;;  %v6658_v23 = vld [vmem:[#allocation2 + $0x8] sm:$0x1] }
  0xde   : > { %v1471_v17 = vrot.slane %v1470_v48, 4  ;;  %v1501_v22 = vshrl.u32 %v7530_v37, 16  ;;  %v1507_v9 = vshll.u32 %v7535_v15, 16  ;;  %v5565_v25 = vrot.slane %v1803_v6, 9 }
  0xdf   : > { %v1481_v46 = vrot.slane %v1480_v43, 4  ;;  %v1499_v39 = vrot.slane %v1497_v62, 5  ;;  %6201 = vmatmul.mubr.msk.bf16.vlgmr.msra.gmra.mrb[0].mxu0 %vm830_vm4, %v6626_v53  ;;  %6055 = vmatmul.mubr.msk.bf16.gmra.mrb[24].mxu1 %vm830_vm4, %v5546_v60  ;;  %v1494_v38 = vor.u32 %v1493_v49, %v1490_v32  ;;  %v1872_v12 = vrot.slane %v6657_v1, 5  ;;  %v1805_v43 = vld [vmem:[#allocation2 + $0x18] sm:$0xe] }
  0xe0   : > { %v1476_v14 = vsel %vm6970_vm12, %v1471_v17, %v1475_v56  ;;  %v1503_v0 = vrot.slane %v1501_v22, 4  ;;  %v7553_v48 = vrot.slane %v2904_v52, 5  ;;  %6233 = vmatpush3.bf16.msra.mxu0 %v7491_v7  ;;  %6204 = vmatprep.mubr.msk.bf16.mxu0 %vm830_vm4, %v6627_v55  ;;  %v1875_v6 = vrot.slane %v6658_v23, 5  ;;  %v1806_v17 = vld [vmem:[#allocation2 + $0x24] sm:$0xe]  ;;  %v6628_v52 = vld [vmem:[#allocation2 + $0x3c] sm:$0xff]  }
  0xe1   : > { %v1486_v53 = vsel %vm6970_vm12, %v1481_v46, %v1485_v4  ;;  %v5566_v45 = vrot.slane %v1804_v11, 9  ;;  %v1495_v32 = vrot.slane %v1494_v38, 4  ;;  %v1509_v60 = vrot.slane %v1507_v9, 5  ;;  %6599 = vmatprep.subr.msk.bf16.mxu0 %vm879_vm0, %v7545_v30  ;;  %v6659_v49 = vld [vmem:[#allocation2 + $0x10] sm:$0xf] }
  0xe2   : > { %v5547_v56 = vcombine.low %v1476_v14, %v1486_v53  ;;  %v1504_v62 = vor.u32 %v1503_v0, %v1499_v39  ;;  %v1873_v7 = vsel %vm7135_vm15, %v5565_v25, %v1872_v12  ;;  %v1874_v55 = vrot.slane %v1872_v12, 4  ;;  %v6660_v4 = vld [vmem:[#allocation2 + $0x14] sm:$0x1]  ;;  %v1807_v1 = vld [vmem:[#allocation2 + $0x30] sm:$0xe]  ;;  %v6629_v14 = vld [vmem:[#allocation2 + $0x48] sm:$0xff]  }
  0xe3   : > { %v1879_v22 = vrot.slane %v6659_v49, 5  ;;  %v1882_v46 = vrot.slane %v6660_v4, 5  ;;  %v1500_v11 = vsel %vm6970_vm12, %v1495_v32, %v1499_v39  ;;  %v5567_v38 = vrot.slane %v1805_v43, 9 }
  0xe4   : > { %6058 = vmatprep.mubr.msk.bf16.mxu1 %vm830_vm4, %v5547_v56  ;;  %v1505_v9 = vrot.slane %v1504_v62, 4  ;;  %v1886_v0 = vrot.slane %v7268_v44, 5  ;;  %v1876_v53 = vsel %vm7135_vm15, %v1874_v55, %v1875_v6  ;;  %v1889_v23 = vrot.slane %v7280_v24, 5  ;;  %v1808_v62 = vld [vmem:[#allocation2 + $0x3c] sm:$0xe] }
  0xe5   : > { %v1880_v25 = vsel %vm7135_vm15, %v5566_v45, %v1879_v22  ;;  %v1881_v12 = vrot.slane %v1879_v22, 4  ;;  %v5581_v49 = vcombine.low %v1873_v7, %v1876_v53  ;;  %v5568_v39 = vrot.slane %v1806_v17, 9  ;;  %v1809_v7 = vld [vmem:[#allocation2 + $0x48] sm:$0xe]  ;;  %v1810_v55 = vld [vmem:[#allocation2 + $0x54] sm:$0xe] }
  0xe6   : > { %v1510_v56 = vsel %vm6970_vm12, %v1505_v9, %v1509_v60  ;;  %v1888_v4 = vrot.slane %v1886_v0, 4  ;;  %v1893_v44 = vrot.slane %v7286_v36, 5  ;;  %v1896_v6 = vrot.slane %v7294_v21, 5 }
  0xe7   : > { %v5548_v32 = vcombine.low %v1500_v11, %v1510_v56  ;;  %v1883_v43 = vsel %vm7135_vm15, %v1881_v12, %v1882_v46  ;;  %v7580_v45 = vrot.slane %v2908_v47, 4  ;;  %6205 = vmatmul.mubr.msk.bf16.gmra.mrb[4].mxu0 %vm830_vm4, %v6628_v52  ;;  %v1887_v60 = vsel %vm7135_vm15, %v5567_v38, %v1886_v0 }
  0xe8   : > { %v5582_v24 = vcombine.low %v1880_v25, %v1883_v43  ;;  %v5569_v17 = vrot.slane %v1807_v1, 9  ;;  %6208 = vmatprep.mubr.msk.bf16.mxu0 %vm830_vm4, %v6629_v14  ;;  %v1890_v36 = vsel %vm7135_vm15, %v1888_v4, %v1889_v23  ;;  %v1895_v21 = vrot.slane %v1893_v44, 4  ;;  %v6630_v14 = vld [vmem:[#allocation2 + $0x54] sm:$0xff]   ;;  %v6631_v25 = vld [vmem:[#allocation2 + $0x60] sm:$0xff]  }
  0xe9   : > { %6059 = vmatmul.mubr.msk.bf16.gmra.mrb[28].mxu1 %vm830_vm4, %v5548_v32  ;;  %v2435_v26 = vsel %vm879_vm0, %v7444_v54, 0  ;;  %v1900_v47 = vrot.slane %v7318_v13, 5  ;;  %v7595_v52 = vsel %vm7135_vm15, %v5568_v39, %v1893_v44  ;;  %v1903_v22 = vrot.slane %v7325_v41, 5  ;;  %v1812_v32 = vld [vmem:[#allocation2 + $0x6c] sm:$0xe] }
  0xea   : > { %6064 = vmatprep.mubr.msk.bf16.mxu1 %vm830_vm4, %v5581_v49  ;;  %v5570_v46 = vrot.slane %v1808_v62, 9  ;;  %v1907_v1 = vrot.slane %v7334_v2, 5  ;;  %v7601_v11 = vsel %vm7135_vm15, %v1895_v21, %v1896_v6  ;;  %v1910_v9 = vrot.slane %v7339_v3, 5  ;;  %v1811_v49 = vld [vmem:[#allocation2 + $0x60] sm:$0xe] }
  0xeb   : > { %v7605_v54 = vsel %vm7135_vm15, %v5569_v17, %v1900_v47  ;;  %v1902_v13 = vrot.slane %v1900_v47, 4  ;;  %v5583_v38 = vcombine.low %v1887_v60, %v1890_v36  ;;  %v5571_v53 = vrot.slane %v1809_v7, 9  ;;  %v1813_v43 = vld [vmem:[#allocation2 + $0x78] sm:$0xe]  ;;  %v1814_v62 = vld [vmem:[#allocation2 + $0x84] sm:$0xe] }
  0xec   : > { %v1909_v0 = vrot.slane %v1907_v1, 4  ;;  %v1914_v41 = vrot.slane %v7349_v63, 5  ;;  %v1917_v12 = vrot.slane %v7370_v34, 5  ;;  %v5572_v23 = vrot.slane %v1810_v55, 9 }
  0xed   : > { %v7611_v2 = vsel %vm7135_vm15, %v1902_v13, %v1903_v22  ;;  %v1921_v56 = vrot.slane %v7374_v27, 5  ;;  %v5584_v3 = vcombine.low %v7595_v52, %v7601_v11  ;;  %v7621_v63 = vsel %vm7135_vm15, %v5570_v46, %v1907_v1  ;;  %v4179_v11 = vld [vmem:[#allocation2 + $0x18] sm:$0xf]  ;;  %v6632_v13 = vld [vmem:[#allocation2 + $0x6c] sm:$0xff]  }
  0xee   : > { %v5585_v4 = vcombine.low %v7605_v54, %v7611_v2  ;;  %v1916_v39 = vrot.slane %v1914_v41, 4  ;;  %v7625_v34 = vsel %vm7135_vm15, %v1909_v0, %v1910_v9  ;;  %v1924_v6 = vrot.slane %v7376_v19, 5  ;;  %v7673_v0 = vld [vmem:[#allocation2 + $0x1c] sm:$0xf] }
  0xef   : > { %v7629_v27 = vsel %vm7135_vm15, %v5572_v23, %v1921_v56  ;;  %v1923_v44 = vrot.slane %v1921_v56, 4  ;;  %6209 = vmatmul.mubr.msk.bf16.gmra.mrb[8].mxu0 %vm830_vm4, %v6630_v14  ;;  %v7635_v60 = vsel %vm7135_vm15, %v5571_v53, %v1914_v41  ;;  %v5573_v17 = vrot.slane %v1811_v49, 9  ;;  %v7685_v23 = vld [vmem:[#allocation2 + $0x20] sm:$0x1] }
  0xf0   : > { %v1928_v7 = vrot.slane %v7395_v35, 5  ;;  %v1931_v55 = vrot.slane %v7405_v50, 5  ;;  %6212 = vmatprep.mubr.msk.bf16.mxu0 %vm830_vm4, %v6631_v25  ;;  %v7643_v36 = vsel %vm7135_vm15, %v1916_v39, %v1917_v12  ;;  %v5574_v21 = vrot.slane %v1812_v32, 9 }
  0xf1   : > { %6065 = vmatmul.mubr.msk.bf16.vlgmr.msra.gmra.mrb[0].mxu1 %vm830_vm4, %v5582_v24  ;;  %v7647_v19 = vsel %vm7135_vm15, %v1923_v44, %v1924_v6  ;;  %v1935_v47 = vrot.slane %v7414_v51, 5  ;;  %v1938_v52 = vrot.slane %v7424_v29, 5  ;;  %v5575_v1 = vrot.slane %v1813_v43, 9 }
  0xf2   : > { %6068 = vmatprep.mubr.msk.bf16.mxu1 %vm830_vm4, %v5583_v38  ;;  %6097 = vmatpush3.bf16.msra.mxu1 %v2435_v26  ;;  %v5588_v35 = vcombine.low %v7629_v27, %v7647_v19  ;;  %v7655_v50 = vsel %vm7135_vm15, %v5573_v17, %v1928_v7  ;;  %v1930_v24 = vrot.slane %v1928_v7, 4  ;;  %v1942_v51 = vrot.slane %v7453_v10, 5  ;;  %v6661_v26 = vld [vmem:[%s8544_s1 + $0x4] sm:$0x1]  ;;  %v6633_v10 = vld [vmem:[#allocation2 + $0x78] sm:$0xff]  }
  0xf3   : > { %v7660_v22 = vsel %vm7135_vm15, %v5574_v21, %v1935_v47  ;;  %v1937_v46 = vrot.slane %v1935_v47, 4  ;;  %6595 = vmatprep.subr.msk.bf16.mxu1 %vm879_vm0, %v6661_v26  ;;  %v1945_v29 = vrot.slane %v7458_v57, 5  ;;  %v5576_v14 = vrot.slane %v1814_v62, 9  ;;  %v4182_v57 = vld [vmem:[#allocation2 + $0x24] sm:$0xf] }
  0xf4   : > { %v7669_v9 = vsel %vm7135_vm15, %v1930_v24, %v1931_v55  ;;  %v1949_v38 = vrot.slane %v7470_v33, 5  ;;  %v7683_v25 = vsel %vm7135_vm15, %v5575_v1, %v1942_v51  ;;  %v1944_v12 = vrot.slane %v1942_v51, 4  ;;  %v7708_v55 = vld [vmem:[#allocation2 + $0x28] sm:$0xf] }
  0xf5   : > { %v5589_v53 = vcombine.low %v7655_v50, %v7669_v9  ;;  %v7679_v41 = vsel %vm7135_vm15, %v1937_v46, %v1938_v52  ;;  %v1952_v39 = vrot.slane %v7476_v61, 5  ;;  %v4228_v43 = vshrl.u32 %v4179_v11, 16 }
  0xf6   : > { %v5590_v33 = vcombine.low %v7660_v22, %v7679_v41  ;;  %v7691_v56 = vsel %vm7135_vm15, %v5576_v14, %v1949_v38  ;;  %v1951_v49 = vrot.slane %v1949_v38, 4  ;;  %v7696_v32 = vsel %vm7135_vm15, %v1944_v12, %v1945_v29  ;;  %v6634_v14 = vld [vmem:[#allocation2 + $0x84] sm:$0xff]   ;;  %v6635_v38 = vld [vmem:[#allocation2 + $0x90] sm:$0xff]   ;;  %v1816_v12 = vld [vmem:[#allocation2 + $0x9c] sm:$0xe] }
  0xf7   : > { %v4231_v44 = vshll.u32 %v4179_v11, 16  ;;  %v4237_v6 = vshll.u32 %v7673_v0, 16  ;;  %6213 = vmatmul.mubr.msk.bf16.gmra.mrb[12].mxu0 %vm830_vm4, %v6632_v13  ;;  %v5591_v62 = vcombine.low %v7683_v25, %v7696_v32  ;;  %v4241_v7 = vshrl.u32 %v7673_v0, 16  ;;  %v6640_v32 = vld [vmem:[#allocation2 + $0xcc] sm:$0xff]  }
  0xf8   : > { %v7704_v17 = vsel %vm7135_vm15, %v1951_v49, %v1952_v39  ;;  %v4247_v61 = vshll.u32 %v7685_v23, 16  ;;  %6216 = vmatprep.mubr.msk.bf16.mxu0 %vm830_vm4, %v6633_v10  ;;  %v4230_v47 = vrot.slane %v4228_v43, 4  ;;  %v7718_v46 = vrot.slane %v2914_v42, 5  ;;  %v1815_v42 = vld [vmem:[#allocation2 + $0x90] sm:$0xe] }
  0xf9   : > { %6069 = vmatmul.mubr.msk.bf16.gmra.mrb[4].mxu1 %vm830_vm4, %v5584_v3  ;;  %v5592_v21 = vcombine.low %v7691_v56, %v7704_v17  ;;  %v4233_v24 = vrot.slane %v4231_v44, 5  ;;  %v7714_v52 = vrot.slane %v4237_v6, 5  ;;  %v4243_v1 = vrot.slane %v4241_v7, 4  ;;  %v7724_v3 = vld [vmem:[#allocation2 + $0x2c] sm:$0x1] }
  0xfa   : > { %6072 = vmatprep.mubr.msk.bf16.mxu1 %vm830_vm4, %v5585_v4  ;;  %v4252_v51 = vshrl.u32 %v4182_v57, 16  ;;  %v4255_v11 = vshll.u32 %v4182_v57, 16  ;;  %v5586_v26 = vcombine.low %v7621_v63, %v7625_v34  ;;  %v4261_v29 = vshll.u32 %v7708_v55, 16  ;;  %v4185_v39 = vld [vmem:[#allocation2 + $0x30] sm:$0xf] }
  0xfb   : > { %v4234_v13 = vor.u32 %v4233_v24, %v4230_v47  ;;  %v4265_v16 = vshrl.u32 %v7708_v55, 16  ;;  %v5587_v54 = vcombine.low %v7635_v60, %v7643_v36  ;;  %v4244_v2 = vor.u32 %v4243_v1, %v7714_v52 }
  0xfc   : > { %v4254_v4 = vrot.slane %v4252_v51, 4  ;;  %v4257_v10 = vrot.slane %v4255_v11, 5  ;;  %v4249_v57 = vrot.slane %v4247_v61, 5  ;;  %v7733_v49 = vrot.slane %v4261_v29, 5 }
  0xfd   : > { %v4267_v63 = vrot.slane %v4265_v16, 4  ;;  %v4271_v34 = vshll.u32 %v7724_v3, 16  ;;  %v4235_v43 = vrot.slane %v4234_v13, 4  ;;  %v4245_v44 = vrot.slane %v4244_v2, 4  ;;  %v7754_v13 = vld [vmem:[#allocation2 + $0x34] sm:$0xf] }
  0xfe   : > { %v5577_v6 = vrot.slane %v1815_v42, 9  ;;  %v1956_v7 = vrot.slane %v7481_v28, 5  ;;  %v1959_v47 = vrot.slane %v7493_v8, 5  ;;  %v5578_v60 = vrot.slane %v1816_v12, 9  ;;  %v7774_v2 = vld [vmem:[#allocation2 + $0x40] sm:$0xf] }
  0xff   : > { %6217 = vmatmul.mubr.msk.bf16.gmra.mrb[16].mxu0 %vm830_vm4, %v6634_v14  ;;  %v4258_v36 = vor.u32 %v4257_v10, %v4254_v4  ;;  %v4268_v24 = vor.u32 %v4267_v63, %v7733_v49  ;;  %v7746_v51 = vrot.slane %v4271_v34, 5  ;;  %v7750_v28 = vsel %vm879_vm0, %v7545_v30, 0  ;;  %v4188_v30 = vld [vmem:[#allocation2 + $0x3c] sm:$0xf]  ;;  %v1817_v34 = vld [vmem:[#allocation2 + $0xa8] sm:$0xe] }
 0x100   : > { %v7742_v61 = vsel %vm7135_vm15, %v5577_v6, %v1956_v7  ;;  %v1958_v1 = vrot.slane %v1956_v7, 4  ;;  %6220 = vmatprep.mubr.msk.bf16.mxu0 %vm830_vm4, %v6635_v38  ;;  %v1963_v8 = vrot.slane %v7500_v58, 5  ;;  %v1966_v11 = vrot.slane %v7503_v31, 5  ;;  %v6636_v14 = vld [vmem:[#allocation2 + $0x9c] sm:$0xff]   ;;  %v7782_v6 = vld [vmem:[#allocation2 + $0x44] sm:$0x1] }
 0x101   : > { %6073 = vmatmul.mubr.msk.bf16.gmra.mrb[8].mxu1 %vm830_vm4, %v5586_v26  ;;  %v4240_v26 = vsel %vm6970_vm12, %v4235_v43, %v7714_v52  ;;  %v4276_v16 = vshrl.u32 %v4185_v39, 16  ;;  %v4279_v42 = vshll.u32 %v4185_v39, 16  ;;  %v4250_v58 = vsel %vm6970_vm12, %v4245_v44, %v4249_v57  ;;  %v7772_v52 = vld [vmem:[#allocation2 + $0x38] sm:$0x1]  ;;  %v6637_v39 = vld [vmem:[#allocation2 + $0xa8] sm:$0xff]  }
 0x102   : > { %6076 = vmatprep.mubr.msk.bf16.mxu1 %vm830_vm4, %v5587_v54  ;;  %v7762_v29 = vsel %vm7135_vm15, %v1958_v1, %v1959_v47  ;;  %v7770_v38 = vsel %vm7135_vm15, %v5578_v60, %v1963_v8  ;;  %v1965_v54 = vrot.slane %v1963_v8, 4  ;;  %v4259_v4 = vrot.slane %v4258_v36, 4  ;;  %v4191_v60 = vld [vmem:[#allocation2 + $0x48] sm:$0xf] }
 0x103   : > { %v4269_v10 = vrot.slane %v4268_v24, 4  ;;  %v4278_v12 = vrot.slane %v4276_v16, 4  ;;  %v4285_v63 = vshll.u32 %v7754_v13, 16  ;;  %v4281_v43 = vrot.slane %v4279_v42, 5  ;;  %v1818_v42 = vld [vmem:[#allocation2 + $0xb4] sm:$0xe] }
 0x104   : > { %v7779_v57 = vsel %vm7135_vm15, %v1965_v54, %v1966_v11  ;;  %v4289_v44 = vshrl.u32 %v7754_v13, 16  ;;  %v4300_v7 = vshrl.u32 %v4188_v30, 16  ;;  %v4303_v24 = vshll.u32 %v4188_v30, 16 }
 0x105   : > { %v7788_v36 = vrot.slane %v4285_v63, 5  ;;  %v7790_v1 = vcombine.low %v4240_v26, %v4250_v58  ;;  %v4295_v11 = vshll.u32 %v7772_v52, 16  ;;  %v4309_v16 = vshll.u32 %v7774_v2, 16 }
 0x106   : > { %v4291_v8 = vrot.slane %v4289_v44, 4  ;;  %v4264_v54 = vsel %vm6970_vm12, %v4259_v4, %v7733_v49  ;;  %v4302_v47 = vrot.slane %v4300_v7, 4  ;;  %v4305_v31 = vrot.slane %v4303_v24, 5  ;;  %v6638_v4 = vld [vmem:[#allocation2 + $0xb4] sm:$0xff]   ;;  %v6639_v44 = vld [vmem:[#allocation2 + $0xc0] sm:$0xff]  }
 0x107   : > { %6221 = vmatmul.mubr.msk.bf16.gmra.mrb[20].mxu0 %vm830_vm4, %v6636_v14  ;;  %v4313_v63 = vshrl.u32 %v7774_v2, 16  ;;  %v4282_v26 = vor.u32 %v4281_v43, %v4278_v12  ;;  %v7804_v30 = vrot.slane %v4309_v16, 5  ;;  %v5579_v14 = vrot.slane %v1817_v34, 9  ;;  %v4194_v43 = vld [vmem:[#allocation2 + $0x54] sm:$0xf] }
 0x108   : > { %6224 = vmatprep.mubr.msk.bf16.mxu0 %vm830_vm4, %v6637_v39  ;;  %v1970_v58 = vrot.slane %v7517_v20, 5  ;;  %v4274_v49 = vsel %vm6970_vm12, %v4269_v10, %v7746_v51  ;;  %v4292_v27 = vor.u32 %v4291_v8, %v7788_v36  ;;  %v7816_v12 = vrot.slane %v4295_v11, 5  ;;  %v7825_v10 = vld [vmem:[#allocation2 + $0x4c] sm:$0xf] }
 0x109   : > { %6077 = vmatmul.mubr.msk.bf16.gmra.mrb[12].mxu1 %vm830_vm4, %v5588_v35  ;;  %v4315_v19 = vrot.slane %v4313_v63, 4  ;;  %v4319_v35 = vshll.u32 %v7782_v6, 16  ;;  %v1973_v50 = vrot.slane %v7521_v18, 5  ;;  %v4306_v9 = vor.u32 %v4305_v31, %v4302_v47 }
 0x10a   : > { %6080 = vmatprep.mubr.msk.bf16.mxu1 %vm830_vm4, %v5589_v53  ;;  %v7820_v20 = vsel %vm7135_vm15, %v5579_v14, %v1970_v58  ;;  %v1972_v34 = vrot.slane %v1970_v58, 4  ;;  %v5580_v39 = vrot.slane %v1818_v42, 9  ;;  %v1977_v51 = vrot.slane %v7530_v37, 5 }
 0x10b   : > { %v4316_v53 = vor.u32 %v4315_v19, %v7804_v30  ;;  %v4283_v7 = vrot.slane %v4282_v26, 4  ;;  %v1980_v8 = vrot.slane %v7535_v15, 5  ;;  %v4324_v11 = vshrl.u32 %v4191_v60, 16 }
 0x10c   : > { %v7829_v24 = vsel %vm7135_vm15, %v1972_v34, %v1973_v50  ;;  %v7832_v16 = vcombine.low %v4264_v54, %v4274_v49  ;;  %v4293_v18 = vrot.slane %v4292_v27, 4  ;;  %v4321_v31 = vrot.slane %v4319_v35, 5  ;;  %v7843_v49 = vld [vmem:[#allocation2 + $0x58] sm:$0xf] }
 0x10d   : > { %v5595_v47 = vcombine.low %v7820_v20, %v7829_v24  ;;  %v7838_v37 = vsel %vm7135_vm15, %v5580_v39, %v1977_v51  ;;  %v1979_v42 = vrot.slane %v1977_v51, 4  ;;  %v4326_v63 = vrot.slane %v4324_v11, 4 }
 0x10e   : > { %v4327_v26 = vshll.u32 %v4191_v60, 16  ;;  %v4307_v14 = vrot.slane %v4306_v9, 4  ;;  %v4317_v58 = vrot.slane %v4316_v53, 4  ;;  %v4333_v15 = vshll.u32 %v7825_v10, 16  ;;  %v7870_v9 = vld [vmem:[#allocation2 + $0x5c] sm:$0x1] }
 0x10f   : > { %6225 = vmatmul.mubr.msk.bf16.gmra.mrb[24].mxu0 %vm830_vm4, %v6638_v4  ;;  %v4337_v54 = vshrl.u32 %v7825_v10, 16  ;;  %v4288_v60 = vsel %vm6970_vm12, %v4283_v7, %v7788_v36  ;;  %v7855_v27 = vsel %vm7135_vm15, %v1979_v42, %v1980_v8  ;;  %v4348_v35 = vshrl.u32 %v4194_v43, 16  ;;  %v4197_v4 = vld [vmem:[#allocation2 + $0x60] sm:$0xf] }
 0x110   : > { %6228 = vmatprep.mubr.msk.bf16.mxu0 %vm830_vm4, %v6639_v44  ;;  %v4329_v19 = vrot.slane %v4327_v26, 5  ;;  %v4298_v22 = vsel %vm6970_vm12, %v4293_v18, %v7816_v12  ;;  %v5596_v41 = vcombine.low %v7838_v37, %v7855_v27  ;;  %v7868_v36 = vrot.slane %v4333_v15, 5  ;;  %v7879_v44 = vld [vmem:[#allocation2 + $0x64] sm:$0xf] }
 0x111   : > { %6081 = vmatmul.mubr.msk.bf16.gmra.mrb[16].mxu1 %vm830_vm4, %v5590_v33  ;;  %v7866_v33 = vld [vmem:[#allocation2 + $0x50] sm:$0x1]  ;;  %v4339_v34 = vrot.slane %v4337_v54, 4  ;;  %v4350_v53 = vrot.slane %v4348_v35, 4  ;;  %v4351_v39 = vshll.u32 %v4194_v43, 16  ;;  %v4357_v25 = vshll.u32 %v7843_v49, 16 }
 0x112   : > { %6084 = vmatprep.mubr.msk.bf16.mxu1 %vm830_vm4, %v5591_v62  ;;  %v4330_v50 = vor.u32 %v4329_v19, %v4326_v63  ;;  %v4312_v62 = vsel %vm6970_vm12, %v4307_v14, %v7804_v30  ;;  %v4322_v12 = vsel %vm6970_vm12, %v4317_v58, %v4321_v31  ;;  %v4361_v51 = vshrl.u32 %v7843_v49, 16  ;;  %v7886_v30 = vld [vmem:[#allocation2 + $0x68] sm:$0x1]  ;;  %v4200_v19 = vld [vmem:[#allocation2 + $0x6c] sm:$0xf] }
 0x113   : > { %v4372_v7 = vshrl.u32 %v4197_v4, 16  ;;  %v4343_v8 = vshll.u32 %v7866_v33, 16  ;;  %v4353_v11 = vrot.slane %v4351_v39, 5  ;;  %v7882_v18 = vrot.slane %v4357_v25, 5  ;;  %v7896_v25 = vld [vmem:[#allocation2 + $0x70] sm:$0xf] }
 0x114   : > { %v4375_v43 = vshll.u32 %v4197_v4, 16  ;;  %v4340_v42 = vor.u32 %v4339_v34, %v7868_v36  ;;  %v4363_v63 = vrot.slane %v4361_v51, 4  ;;  %v4367_v26 = vshll.u32 %v7870_v9, 16 }
 0x115   : > { %v4374_v14 = vrot.slane %v4372_v7, 4  ;;  %v7888_v31 = vrot.slane %v4330_v50, 4  ;;  %v4354_v58 = vor.u32 %v4353_v11, %v4350_v53  ;;  %v4381_v54 = vshll.u32 %v7879_v44, 16  ;;  %v7909_v7 = vld [vmem:[#allocation2 + $0x74] sm:$0x1] }
 0x116   : > { %v4377_v15 = vrot.slane %v4375_v43, 5  ;;  %v5759_v35 = vcombine.low %v4288_v60, %v4298_v22  ;;  %v7892_v39 = vcombine.low %v4312_v62, %v4322_v12  ;;  %v4364_v4 = vor.u32 %v4363_v63, %v7882_v18  ;;  %v4203_v11 = vld [vmem:[#allocation2 + $0x78] sm:$0xf]  ;;  %v7917_v63 = vld [vmem:[#allocation2 + $0x7c] sm:$0xf] }
 0x117   : > { %6229 = vmatmul.mubr.msk.bf16.gmra.mrb[28].mxu0 %vm830_vm4, %v6640_v32  ;;  %v4385_v34 = vshrl.u32 %v7879_v44, 16  ;;  %v4345_v50 = vrot.slane %v4343_v8, 5  ;;  %v4383_v32 = vrot.slane %v4381_v54, 5  ;;  %v4391_v60 = vshll.u32 %v7886_v30, 16 }
 0x118   : > { %6234 = vmatprep.mubr.msk.bf16.mxu0 %vm830_vm4, %v7790_v1  ;;  %v4378_v53 = vor.u32 %v4377_v15, %v4374_v14  ;;  %v8565_v22 = vcombine.low %v7742_v61, %v7762_v29  ;;  %v4341_v62 = vrot.slane %v4340_v42, 4  ;;  %v4369_v12 = vrot.slane %v4367_v26, 5 }
 0x119   : > { %6085 = vmatmul.mubr.msk.bf16.gmra.mrb[20].mxu1 %vm830_vm4, %v5592_v21  ;;  %v4387_v51 = vrot.slane %v4385_v34, 4  ;;  %v4396_v56 = vshrl.u32 %v4200_v19, 16  ;;  %v4336_v17 = vsel %vm6970_vm12, %v7888_v31, %v7868_v36  ;;  %v4355_v21 = vrot.slane %v4354_v58, 4 }
 0x11a   : > { %6088 = vmatprep.mubr.msk.bf16.mxu1 %vm830_vm4, %v8565_v22  ;;  %v4399_v1 = vshll.u32 %v4200_v19, 16  ;;  %v4405_v8 = vshll.u32 %v7896_v25, 16  ;;  %v4365_v43 = vrot.slane %v4364_v4, 4  ;;  %v4409_v42 = vshrl.u32 %v7896_v25, 16 }
 0x11b   : > { %v4388_v61 = vor.u32 %v4387_v51, %v4383_v32  ;;  %v4398_v29 = vrot.slane %v4396_v56, 4  ;;  %v4379_v26 = vrot.slane %v4378_v53, 4  ;;  %v4393_v14 = vrot.slane %v4391_v60, 5  ;;  %v4206_v56 = vld [vmem:[#allocation2 + $0x84] sm:$0xf] }
 0x11c   : > { %v4401_v15 = vrot.slane %v4399_v1, 5  ;;  %v7919_v54 = vrot.slane %v4405_v8, 5  ;;  %v4411_v22 = vrot.slane %v4409_v42, 4  ;;  %v4415_v36 = vshll.u32 %v7909_v7, 16 }
 0x11d   : > { %v4389_v34 = vrot.slane %v4388_v61, 4  ;;  %v4420_v31 = vshrl.u32 %v4203_v11, 16  ;;  %v4423_v19 = vshll.u32 %v4203_v11, 16  ;;  %v4429_v4 = vshll.u32 %v7917_v63, 16  ;;  %v7934_v11 = vld [vmem:[#allocation2 + $0x88] sm:$0xf] }
 0x11e   : > { %v4402_v58 = vor.u32 %v4401_v15, %v4398_v29  ;;  %v4433_v51 = vshrl.u32 %v7917_v63, 16  ;;  %v4346_v53 = vsel %vm6970_vm12, %v4341_v62, %v4345_v50  ;;  %v4360_v60 = vsel %vm6970_vm12, %v4355_v21, %v7882_v18  ;;  %v7943_v50 = vld [vmem:[#allocation2 + $0x80] sm:$0x1] }
 0x11f   : > { %6235 = vmatmul.mubr.msk.bf16.vlgmr.msra.gmra.mrb[0].mxu0 %vm830_vm4, %v7832_v16  ;;  %v4370_v1 = vsel %vm6970_vm12, %v4365_v43, %v4369_v12  ;;  %v4412_v8 = vor.u32 %v4411_v22, %v7919_v54  ;;  %v8566_v61 = vcombine.low %v7770_v38, %v7779_v57  ;;  %v4384_v16 = vsel %vm6970_vm12, %v4379_v26, %v4383_v32 }
 0x120   : > { %6267 = vmatpush3.bf16.msra.mxu0 %v7750_v28  ;;  %v4422_v18 = vrot.slane %v4420_v31, 4  ;;  %v4425_v62 = vrot.slane %v4423_v19, 5  ;;  %v7945_v21 = vrot.slane %v4429_v4, 5  ;;  %6238 = vmatprep.mubr.msk.bf16.mxu0 %vm830_vm4, %v5759_v35  ;;  %v4394_v28 = vsel %vm6970_vm12, %v4389_v34, %v4393_v14  ;;  %v4209_v35 = vld [vmem:[#allocation2 + $0x90] sm:$0xf] }
 0x121   : > { %6089 = vmatmul.mubr.msk.bf16.gmra.mrb[24].mxu1 %vm830_vm4, %v8566_v61  ;;  %v7954_v38 = vrot.slane %v4402_v58, 4  ;;  %v4435_v57 = vrot.slane %v4433_v51, 4  ;;  %v4444_v32 = vshrl.u32 %v4206_v56, 16  ;;  %v7956_v12 = vrot.slane %v4412_v8, 4  ;;  %v7969_v31 = vld [vmem:[#allocation2 + $0x8c] sm:$0x1] }
 0x122   : > { %6092 = vmatprep.mubr.msk.bf16.mxu1 %vm830_vm4, %v5595_v47  ;;  %v7958_v43 = vrot.slane %v4415_v36, 5  ;;  %v4447_v29 = vshll.u32 %v4206_v56, 16  ;;  %v4453_v42 = vshll.u32 %v7934_v11, 16  ;;  %v5761_v26 = vcombine.low %v4336_v17, %v4346_v53  ;;  %v7964_v47 = vld [vmem:[#allocation2 + $0x94] sm:$0xf]  ;;  %v6641_v58 = vld [vmem:[#allocation2 + $0xc] sm:$0xff]  }
 0x123   : > { %v7961_v15 = vcombine.low %v4360_v60, %v4370_v1  ;;  %v4439_v20 = vshll.u32 %v7943_v50, 16  ;;  %v4446_v24 = vrot.slane %v4444_v32, 4  ;;  %8567 = vst [vmem:[#allocation3_spill] sm:$0xff] %v7964_v47  ;;  %v7966_v14 = vcombine.low %v4384_v16, %v4394_v28  ;;  %v7982_v60 = vld [vmem:[#allocation2 + $0x98] sm:$0x1] }
 0x124   : > { %v4426_v34 = vor.u32 %v4425_v62, %v4422_v18  ;;  %v4436_v22 = vor.u32 %v4435_v57, %v7945_v21  ;;  %v4449_v36 = vrot.slane %v4447_v29, 5  ;;  %v4408_v17 = vsel %vm6970_vm12, %v7954_v38, %v7919_v54  ;;  %8568 = vst [vmem:[#allocation4_spill] sm:$0xff] %v7982_v60  ;;  %v4212_v61 = vld [vmem:[#allocation2 + $0x9c] sm:$0xf]  ;;  %v7988_v28 = vld [vmem:[#allocation2 + $0xa0] sm:$0xf] }
 0x125   : > { %v7975_v19 = vrot.slane %v4453_v42, 5  ;;  %v4457_v4 = vshrl.u32 %v7934_v11, 16  ;;  %v4468_v51 = vshrl.u32 %v4209_v35, 16  ;;  %v4418_v56 = vsel %vm6970_vm12, %v7956_v12, %v7958_v43 }
 0x126   : > { %v4450_v53 = vor.u32 %v4449_v36, %v4446_v24  ;;  %v4471_v1 = vshll.u32 %v4209_v35, 16  ;;  %v4477_v8 = vshll.u32 %v7964_v47, 16  ;;  %v4441_v54 = vrot.slane %v4439_v20, 5  ;;  %v6642_v36 = vld [vmem:[#allocation2 + $0x18] sm:$0xff]  }
 0x127   : > { %6239 = vmatmul.mubr.msk.bf16.gmra.mrb[4].mxu0 %vm830_vm4, %v7892_v39  ;;  %v4459_v16 = vrot.slane %v4457_v4, 4  ;;  %v4463_v18 = vshll.u32 %v7969_v31, 16  ;;  %v4470_v62 = vrot.slane %v4468_v51, 4  ;;  %v4427_v38 = vrot.slane %v4426_v34, 4 }
 0x128   : > { %6242 = vmatprep.mubr.msk.bf16.mxu0 %vm830_vm4, %v5761_v26  ;;  %v4437_v57 = vrot.slane %v4436_v22, 4  ;;  %v4451_v32 = vrot.slane %v4450_v53, 4  ;;  %v4473_v12 = vrot.slane %v4471_v1, 5  ;;  %v7997_v43 = vrot.slane %v4477_v8, 5  ;;  %v4215_v26 = vld [vmem:[#allocation2 + $0xa8] sm:$0xf] }
 0x129   : > { %6093 = vmatmul.mubr.msk.bf16.gmra.mrb[28].mxu1 %vm830_vm4, %v5596_v41  ;;  %v4460_v39 = vor.u32 %v4459_v16, %v7975_v19  ;;  %v4481_v29 = vshrl.u32 %v7964_v47, 16  ;;  %v4492_v42 = vshrl.u32 %v4212_v61, 16  ;;  %v4487_v37 = vshll.u32 %v7982_v60, 16  ;;  %v8012_v16 = vld [vmem:[#allocation2 + $0xa4] sm:$0x1] }
 0x12a   : > { %6098 = vmatprep.mubr.msk.bf16.mxu1 %vm830_vm4, %v6641_v58  ;;  %v4474_v35 = vor.u32 %v4473_v12, %v4470_v62  ;;  %v4495_v27 = vshll.u32 %v4212_v61, 16  ;;  %v4501_v41 = vshll.u32 %v7988_v28, 16  ;;  %v4465_v24 = vrot.slane %v4463_v18, 5  ;;  %v6643_v58 = vld [vmem:[#allocation2 + $0x24] sm:$0xff]   ;;  %v8016_v62 = vld [vmem:[#allocation2 + $0xac] sm:$0xf] }
 0x12b   : > { %v4461_v20 = vrot.slane %v4460_v39, 4  ;;  %v4483_v34 = vrot.slane %v4481_v29, 4  ;;  %v4494_v22 = vrot.slane %v4492_v42, 4  ;;  %v4432_v4 = vsel %vm6970_vm12, %v4427_v38, %v7945_v21  ;;  %8569 = vst [vmem:[#allocation5_spill] sm:$0xff] %v8016_v62 }
 0x12c   : > { %v4442_v51 = vsel %vm6970_vm12, %v4437_v57, %v4441_v54  ;;  %v4497_v53 = vrot.slane %v4495_v27, 5  ;;  %v4505_v1 = vshrl.u32 %v7988_v28, 16  ;;  %v4456_v8 = vsel %vm6970_vm12, %v4451_v32, %v7975_v19  ;;  %v4218_v57 = vld [vmem:[#allocation2 + $0xb4] sm:$0xf] }
 0x12d   : > { %v4484_v61 = vor.u32 %v4483_v34, %v7997_v43  ;;  %v8014_v18 = vrot.slane %v4501_v41, 5  ;;  %v4516_v12 = vshrl.u32 %v4215_v26, 16  ;;  %v4475_v21 = vrot.slane %v4474_v35, 4 }
 0x12e   : > { %v4489_v38 = vrot.slane %v4487_v37, 5  ;;  %v4498_v39 = vor.u32 %v4497_v53, %v4494_v22  ;;  %v4507_v54 = vrot.slane %v4505_v1, 4  ;;  %v4466_v19 = vsel %vm6970_vm12, %v4461_v20, %v4465_v24  ;;  %v8036_v24 = vld [vmem:[#allocation2 + $0xb8] sm:$0xf] }
 0x12f   : > { %6243 = vmatmul.mubr.msk.bf16.gmra.mrb[8].mxu0 %vm830_vm4, %v7961_v15  ;;  %v4485_v32 = vrot.slane %v4484_v61, 4  ;;  %v4518_v29 = vrot.slane %v4516_v12, 4  ;;  %v4519_v42 = vshll.u32 %v4215_v26, 16  ;;  %v8570_v27 = vor.u32 %v7580_v45, %v7553_v48  ;;  %8571 = vst [vmem:[#allocation6_spill] sm:$0xff] %v8036_v24 }
 0x130   : > { %6246 = vmatprep.mubr.msk.bf16.mxu0 %vm830_vm4, %v7966_v14  ;;  %v5764_v35 = vcombine.low %v4408_v17, %v4418_v56  ;;  %v4525_v37 = vshll.u32 %v8016_v62, 16  ;;  %v4529_v15 = vshrl.u32 %v8016_v62, 16  ;;  %v4508_v26 = vor.u32 %v4507_v54, %v8014_v18  ;;  %v8045_v56 = vld [vmem:[#allocation2 + $0xb0] sm:$0x1] }
 0x131   : > { %v8025_v41 = vrot.slane %v8570_v27, 4  ;;  %6099 = vmatmul.mubr.msk.bf16.vlgmr.msra.gmra.mrb[0].mxu1 %vm830_vm4, %v6642_v36  ;;  %v4511_v45 = vshll.u32 %v8012_v16, 16  ;;  %v4521_v20 = vrot.slane %v4519_v42, 5  ;;  %v4540_v34 = vshrl.u32 %v4218_v57, 16  ;;  %8572 = vst [vmem:[#allocation7_spill] sm:$0xff] %v8045_v56 }
 0x132   : > { %6102 = vmatprep.mubr.msk.bf16.mxu1 %vm830_vm4, %v6643_v58  ;;  %6301 = vmatpush3.bf16.msra.mxu1 %v6804_v5  ;;  %v5765_v22 = vcombine.low %v4432_v4, %v4442_v51  ;;  %v8038_v36 = vcombine.low %v4456_v8, %v4466_v19  ;;  %v4480_v14 = vsel %vm6970_vm12, %v4475_v21, %v7997_v43  ;;  %v8043_v17 = vrot.slane %v4498_v39, 4  ;;  %v6644_v5 = vld [vmem:[#allocation2 + $0x30] sm:$0xff]   ;;  %v6645_v58 = vld [vmem:[#allocation2 + $0x3c] sm:$0xff]  }
 0x133   : > { %v4490_v53 = vsel %vm6970_vm12, %v4485_v32, %v4489_v38  ;;  %v4522_v1 = vor.u32 %v4521_v20, %v4518_v29  ;;  %v8049_v61 = vrot.slane %v4525_v37, 5  ;;  %v4531_v12 = vrot.slane %v4529_v15, 4  ;;  %v4221_v4 = vld [vmem:[#allocation2 + $0xc0] sm:$0xf]  ;;  %v8051_v51 = vld [vmem:[#allocation2 + $0xbc] sm:$0x1] }
 0x134   : > { %8573 = vst [vmem:[#allocation8_spill] sm:$0xff] %v8051_v51  ;;  %v4542_v8 = vrot.slane %v4540_v34, 4  ;;  %v4543_v54 = vshll.u32 %v4218_v57, 16  ;;  %v4549_v43 = vshll.u32 %v8036_v24, 16  ;;  %v4553_v21 = vshrl.u32 %v8036_v24, 16 }
 0x135   : > { %v8055_v39 = vrot.slane %v4508_v26, 4  ;;  %v8057_v19 = vrot.slane %v4511_v45, 5  ;;  %v8059_v42 = vrot.slane %v4522_v1, 4  ;;  %v4535_v38 = vshll.u32 %v8045_v56, 16  ;;  %v8062_v32 = vld [vmem:[#allocation2 + $0xc4] sm:$0xf] }
 0x136   : > { %8574 = vst [vmem:[#allocation9_spill] sm:$0xff] %v8062_v32  ;;  %v4545_v29 = vrot.slane %v4543_v54, 5  ;;  %v8064_v27 = vrot.slane %v4549_v43, 5  ;;  %v4555_v37 = vrot.slane %v4553_v21, 4  ;;  %v8066_v15 = vld [vmem:[#allocation2 + $0xc8] sm:$0x1]  ;;  %v5767_v20 = vcombine.low %v4480_v14, %v4490_v53 }
 0x137   : > { %8575 = vst [vmem:[#allocation10_spill] sm:$0xff] %v8066_v15  ;;  %v4564_v57 = vshrl.u32 %v4221_v4, 16  ;;  %6247 = vmatmul.mubr.msk.bf16.gmra.mrb[12].mxu0 %vm830_vm4, %v5764_v35  ;;  %v4504_v26 = vsel %vm6970_vm12, %v8043_v17, %v8014_v18  ;;  %v4532_v45 = vor.u32 %v4531_v12, %v8049_v61  ;;  %v4567_v34 = vshll.u32 %v4221_v4, 16  ;;  %v4224_v35 = vld [vmem:[#allocation2 + $0xcc] sm:$0xf] }
 0x138   : > { %6250 = vmatprep.mubr.msk.bf16.mxu0 %vm830_vm4, %v5765_v22  ;;  %v4546_v1 = vor.u32 %v4545_v29, %v4542_v8  ;;  %v4559_v54 = vshll.u32 %v8051_v51, 16  ;;  %v4573_v21 = vshll.u32 %v8062_v32, 16  ;;  %v4556_v14 = vor.u32 %v4555_v37, %v8064_v27  ;;  %v8082_v12 = vld [vmem:[#allocation2 + $0xd0] sm:$0xf]  ;;  %v6646_v8 = vld [vmem:[#allocation2 + $0x48] sm:$0xff]  }
 0x139   : > { %6103 = vmatmul.mubr.msk.bf16.gmra.mrb[4].mxu1 %vm830_vm4, %v6644_v5  ;;  %v4566_v43 = vrot.slane %v4564_v57, 4  ;;  %v4569_v53 = vrot.slane %v4567_v34, 5  ;;  %v4577_v18 = vshrl.u32 %v8062_v32, 16  ;;  %v4583_v17 = vshll.u32 %v8066_v15, 16  ;;  %v8092_v32 = vld [vmem:[#allocation2 + $0xd4] sm:$0x1] }
 0x13a   : > { %6106 = vmatprep.mubr.msk.bf16.mxu1 %vm830_vm4, %v6645_v58  ;;  %v4514_v22 = vsel %vm6970_vm12, %v8055_v39, %v8057_v19  ;;  %v4528_v5 = vsel %vm6970_vm12, %v8059_v42, %v8049_v61  ;;  %v4537_v58 = vrot.slane %v4535_v38, 5  ;;  %v4575_v4 = vrot.slane %v4573_v21, 5  ;;  %v6647_v39 = vld [vmem:[#allocation2 + $0x54] sm:$0xff]  }
 0x13b   : > { %v4533_v29 = vrot.slane %v4532_v45, 4  ;;  %v4570_v37 = vor.u32 %v4569_v53, %v4566_v43  ;;  %v4579_v57 = vrot.slane %v4577_v18, 4  ;;  %v4588_v34 = vshrl.u32 %v4224_v35, 16  ;;  %v4903_v61 = vld [vmem:[#allocation2 + $0x18] sm:$0xe] }
 0x13c   : > { %v4547_v15 = vrot.slane %v4546_v1, 4  ;;  %v4561_v51 = vrot.slane %v4559_v54, 5  ;;  %v4591_v24 = vshll.u32 %v4224_v35, 16  ;;  %v4597_v56 = vshll.u32 %v8082_v12, 16  ;;  %v4904_v18 = vld [vmem:[#allocation2 + $0x24] sm:$0xe] }
 0x13d   : > { %v4557_v19 = vrot.slane %v4556_v14, 4  ;;  %v4580_v62 = vor.u32 %v4579_v57, %v4575_v4  ;;  %v4585_v60 = vrot.slane %v4583_v17, 5  ;;  %v4590_v47 = vrot.slane %v4588_v34, 4  ;;  %v4907_v34 = vld [vmem:[#allocation2 + $0x48] sm:$0xe] }
 0x13e   : > { %v4571_v42 = vrot.slane %v4570_v37, 4  ;;  %v4593_v38 = vrot.slane %v4591_v24, 5  ;;  %v8095_v21 = vrot.slane %v4597_v56, 5  ;;  %v4601_v45 = vshrl.u32 %v8082_v12, 16 }
 0x13f   : > { %6251 = vmatmul.mubr.msk.bf16.gmra.mrb[16].mxu0 %vm830_vm4, %v8038_v36  ;;  %v4538_v1 = vsel %vm6970_vm12, %v4533_v29, %v4537_v58  ;;  %v4581_v54 = vrot.slane %v4580_v62, 4  ;;  %v4607_v43 = vshll.u32 %v8092_v32, 16  ;;  %v4969_v35 = vrot.slane %v7673_v0, 5  ;;  %v4905_v58 = vld [vmem:[#allocation2 + $0x30] sm:$0xe] }
 0x140   : > { %6254 = vmatprep.mubr.msk.bf16.mxu0 %vm830_vm4, %v5767_v20  ;;  %v4594_v24 = vor.u32 %v4593_v38, %v4590_v47  ;;  %v4603_v56 = vrot.slane %v4601_v45, 4  ;;  %v5789_v14 = vrot.slane %v4903_v61, 9  ;;  %v4972_v53 = vrot.slane %v7685_v23, 5 }
 0x141   : > { %6107 = vmatmul.mubr.msk.bf16.gmra.mrb[8].mxu1 %vm830_vm4, %v6646_v8  ;;  %v5768_v17 = vcombine.low %v4504_v26, %v4514_v22  ;;  %v4552_v62 = vsel %vm6970_vm12, %v4547_v15, %v8064_v27  ;;  %v4562_v0 = vsel %vm6970_vm12, %v4557_v19, %v4561_v51  ;;  %v4971_v36 = vrot.slane %v4969_v35, 4  ;;  %v4906_v27 = vld [vmem:[#allocation2 + $0x3c] sm:$0xe]  ;;  %v6648_v15 = vld [vmem:[#allocation2 + $0x60] sm:$0xff]   ;;  %v6649_v19 = vld [vmem:[#allocation2 + $0x6c] sm:$0xff]  }
 0x142   : > { %6110 = vmatprep.mubr.msk.bf16.mxu1 %vm830_vm4, %v6647_v39  ;;  %v4576_v47 = vsel %vm6970_vm12, %v4571_v42, %v4575_v4  ;;  %v4586_v20 = vsel %vm6970_vm12, %v4581_v54, %v4585_v60  ;;  %v4595_v23 = vrot.slane %v4594_v24, 4  ;;  %v4604_v26 = vor.u32 %v4603_v56, %v8095_v21  ;;  %v4908_v54 = vld [vmem:[#allocation2 + $0x54] sm:$0xe]  ;;  %v2654_v24 = vld [vmem:[#allocation2 + $0x6c] sm:$0xf] }
 0x143   : > { %v5769_v22 = vcombine.low %v4528_v5, %v4538_v1  ;;  %v4609_v8 = vrot.slane %v4607_v43, 5  ;;  %v5790_v29 = vrot.slane %v4904_v18, 9  ;;  %v4976_v37 = vrot.slane %v7708_v55, 5 }
 0x144   : > { %v4605_v57 = vrot.slane %v4604_v26, 4  ;;  %v8121_v51 = vsel %vm7135_vm15, %v5789_v14, %v4969_v35  ;;  %v8125_v4 = vsel %vm7135_vm15, %v4971_v36, %v4972_v53  ;;  %v5791_v60 = vrot.slane %v4905_v58, 9  ;;  %v6650_v26 = vld [vmem:[#allocation2 + $0x78] sm:$0xff]  }
 0x145   : > { %v5770_v39 = vcombine.low %v4552_v62, %v4562_v0  ;;  %v5771_v5 = vcombine.low %v4576_v47, %v4586_v20  ;;  %v4979_v61 = vrot.slane %v7724_v3, 5  ;;  %v4983_v55 = vrot.slane %v7754_v13, 5  ;;  %v2657_v47 = vld [vmem:[#allocation2 + $0x78] sm:$0xf] }
 0x146   : > { %v4600_v42 = vsel %vm6970_vm12, %v4595_v23, %v8095_v21  ;;  %v5792_v38 = vrot.slane %v4906_v27, 9  ;;  %v4990_v45 = vrot.slane %v7774_v2, 5  ;;  %v4993_v1 = vrot.slane %v7782_v6, 5  ;;  %v6651_v27 = vld [vmem:[#allocation2 + $0x84] sm:$0xff]  }
 0x147   : > { %6255 = vmatmul.mubr.msk.bf16.gmra.mrb[20].mxu0 %vm830_vm4, %v5768_v17  ;;  %v5805_v43 = vcombine.low %v8121_v51, %v8125_v4  ;;  %v8139_v3 = vsel %vm7135_vm15, %v5790_v29, %v4976_v37  ;;  %v4978_v13 = vrot.slane %v4976_v37, 4  ;;  %v5793_v35 = vrot.slane %v4907_v34, 9  ;;  %v4909_v34 = vld [vmem:[#allocation2 + $0x60] sm:$0xe]  ;;  %v6666_v51 = vld [vmem:[#allocation2 + $0x94] sm:$0xf] }
 0x148   : > { %6258 = vmatprep.mubr.msk.bf16.mxu0 %vm830_vm4, %v5769_v22  ;;  %v4610_v2 = vsel %vm6970_vm12, %v4605_v57, %v4609_v8  ;;  %v8147_v6 = vsel %vm7135_vm15, %v5791_v60, %v4983_v55  ;;  %v8151_v21 = vsel %vm7135_vm15, %v5792_v38, %v4990_v45  ;;  %v4992_v56 = vrot.slane %v4990_v45, 4  ;;  %v6662_v8 = vld [vmem:[#allocation2 + $0x70] sm:$0xf]  ;;  %v4910_v45 = vld [vmem:[#allocation2 + $0x6c] sm:$0xe] }
 0x149   : > { %6111 = vmatmul.mubr.msk.bf16.gmra.mrb[12].mxu1 %vm830_vm4, %v6648_v15  ;;  %v4997_v14 = vrot.slane %v7825_v10, 5  ;;  %v5000_v53 = vrot.slane %v7866_v33, 5  ;;  %v5794_v18 = vrot.slane %v4908_v54, 9  ;;  %v5004_v17 = vrot.slane %v7843_v49, 5 }
 0x14a   : > { %6114 = vmatprep.mubr.msk.bf16.mxu1 %vm830_vm4, %v6649_v19  ;;  %v8159_v62 = vsel %vm7135_vm15, %v4992_v56, %v4993_v1  ;;  %v5007_v0 = vrot.slane %v7870_v9, 5  ;;  %v2871_v36 = vshrl.u32 %v2654_v24, 16  ;;  %v2874_v58 = vshll.u32 %v2654_v24, 16 }
 0x14b   : > { %v4985_v20 = vrot.slane %v4983_v55, 4  ;;  %v5808_v23 = vcombine.low %v8151_v21, %v8159_v62  ;;  %v8166_v10 = vsel %vm7135_vm15, %v5793_v35, %v4997_v14  ;;  %v4999_v33 = vrot.slane %v4997_v14, 4  ;;  %v6663_v35 = vld [vmem:[#allocation2 + $0x74] sm:$0x1] }
 0x14c   : > { %v4986_v49 = vrot.slane %v7772_v52, 5  ;;  %v8171_v22 = vsel %vm7135_vm15, %v5794_v18, %v5004_v17  ;;  %v5006_v9 = vrot.slane %v5004_v17, 4  ;;  %v2880_v29 = vshll.u32 %v6662_v8, 16 }
 0x14d   : > { %v5772_v37 = vcombine.low %v4600_v42, %v4610_v2  ;;  %v8175_v15 = vsel %vm7135_vm15, %v4999_v33, %v5000_v53  ;;  %v2884_v57 = vshrl.u32 %v6662_v8, 16  ;;  %v2895_v60 = vshrl.u32 %v2657_v47, 16  ;;  %v6653_v8 = vld [vmem:[#allocation2 + $0x9c] sm:$0xff]  }
 0x14e   : > { %v5809_v19 = vcombine.low %v8166_v10, %v8175_v15  ;;  %v8181_v52 = vsel %vm7135_vm15, %v5006_v9, %v5007_v0  ;;  %v2873_v55 = vrot.slane %v2871_v36, 4  ;;  %v2876_v38 = vrot.slane %v2874_v58, 5 }
 0x14f   : > { %6259 = vmatmul.mubr.msk.bf16.gmra.mrb[24].mxu0 %vm830_vm4, %v5770_v39  ;;  %v8186_v42 = vsel %vm7135_vm15, %v4978_v13, %v4979_v61  ;;  %v5810_v1 = vcombine.low %v8171_v22, %v8181_v52  ;;  %v8190_v54 = vrot.slane %v2880_v29, 5  ;;  %v2890_v24 = vshll.u32 %v6663_v35, 16  ;;  %v2660_v13 = vld [vmem:[#allocation2 + $0x84] sm:$0xf] }
 0x150   : > { %6262 = vmatprep.mubr.msk.bf16.mxu0 %vm830_vm4, %v5771_v5  ;;  %v2897_v2 = vrot.slane %v2895_v60, 4  ;;  %v2898_v56 = vshll.u32 %v2657_v47, 16  ;;  %v2917_v39 = vsel %vm6970_vm12, %v8025_v41, %v7718_v46  ;;  %v5795_v61 = vrot.slane %v4909_v34, 9 }
 0x151   : > { %6115 = vmatmul.mubr.msk.bf16.gmra.mrb[16].mxu1 %vm830_vm4, %v6650_v26  ;;  %v2886_v14 = vrot.slane %v2884_v57, 4  ;;  %v5011_v53 = vrot.slane %v7879_v44, 5  ;;  %v5014_v18 = vrot.slane %v7886_v30, 5  ;;  %v5796_v17 = vrot.slane %v4910_v45, 9  ;;  %v6652_v44 = vld [vmem:[#allocation2 + $0x90] sm:$0xff]  }
 0x152   : > { %6118 = vmatprep.mubr.msk.bf16.mxu1 %vm830_vm4, %v6651_v27  ;;  %v2877_v0 = vor.u32 %v2876_v38, %v2873_v55  ;;  %v2900_v36 = vrot.slane %v2898_v56, 5  ;;  %v5018_v5 = vrot.slane %v7896_v25, 5  ;;  %v5021_v58 = vrot.slane %v7909_v7, 5  ;;  %v2663_v57 = vld [vmem:[#allocation2 + $0x90] sm:$0xf] }
 0x153   : > { %v8205_v47 = vsel %vm7135_vm15, %v4985_v20, %v4986_v49  ;;  %v8209_v46 = vsel %vm7135_vm15, %v5795_v61, %v5011_v53  ;;  %v5013_v41 = vrot.slane %v5011_v53, 4  ;;  %v2919_v33 = vshrl.u32 %v2660_v13, 16  ;;  %v6664_v49 = vld [vmem:[#allocation2 + $0x88] sm:$0xf] }
 0x154   : > { %v2901_v26 = vor.u32 %v2900_v36, %v2897_v2  ;;  %v8213_v30 = vsel %vm7135_vm15, %v5796_v17, %v5018_v5  ;;  %v5020_v9 = vrot.slane %v5018_v5, 4  ;;  %v2922_v25 = vshll.u32 %v2660_v13, 16  ;;  %v6665_v17 = vld [vmem:[#allocation2 + $0x8c] sm:$0x1]  ;;  %v4911_v36 = vld [vmem:[#allocation2 + $0x78] sm:$0xe] }
 0x155   : > { %v2887_v7 = vor.u32 %v2886_v14, %v8190_v54  ;;  %v8216_v29 = vrot.slane %v2890_v24, 5  ;;  %v8220_v20 = vsel %vm7135_vm15, %v5013_v41, %v5014_v18  ;;  %v2928_v27 = vshll.u32 %v6664_v49, 16 }
 0x156   : > { %v8222_v60 = vrot.slane %v2877_v0, 4  ;;  %v2902_v34 = vrot.slane %v2901_v26, 4  ;;  %v5811_v55 = vcombine.low %v8209_v46, %v8220_v20  ;;  %v8228_v38 = vsel %vm7135_vm15, %v5020_v9, %v5021_v58 }
 0x157   : > { %6263 = vmatmul.mubr.msk.bf16.gmra.mrb[28].mxu0 %vm830_vm4, %v5772_v37  ;;  %v5812_v45 = vcombine.low %v8213_v30, %v8228_v38  ;;  %v2921_v35 = vrot.slane %v2919_v33, 4  ;;  %v2924_v24 = vrot.slane %v2922_v25, 5  ;;  %v2932_v2 = vshrl.u32 %v6664_v49, 16  ;;  %v6654_v33 = vld [vmem:[#allocation2 + $0xa8] sm:$0xff]   ;;  %v4912_v25 = vld [vmem:[#allocation2 + $0x84] sm:$0xe] }
 0x158   : > { %6268 = vmatprep.mubr.msk.bf16.mxu0 %vm830_vm4, %v5805_v43  ;;  %v2907_v56 = vsel %vm6970_vm12, %v2902_v34, %v7553_v48  ;;  %v8241_v61 = vrot.slane %v2928_v27, 5  ;;  %v2943_v37 = vshrl.u32 %v2663_v57, 16  ;;  %v2946_v13 = vshll.u32 %v2663_v57, 16  ;;  %v2666_v57 = vld [vmem:[#allocation2 + $0x9c] sm:$0xf] }
 0x159   : > { %6119 = vmatmul.mubr.msk.bf16.gmra.mrb[20].mxu1 %vm830_vm4, %v6652_v44  ;;  %v2888_v14 = vrot.slane %v2887_v7, 4  ;;  %v8244_v53 = vcombine.low %v2907_v56, %v2917_v39  ;;  %v2934_v18 = vrot.slane %v2932_v2, 4  ;;  %v2938_v0 = vshll.u32 %v6665_v17, 16  ;;  %v6668_v17 = vld [vmem:[#allocation2 + $0xa0] sm:$0xf] }
 0x15a   : > { %6122 = vmatprep.mubr.msk.bf16.mxu1 %vm830_vm4, %v6653_v8  ;;  %v2952_v4 = vshll.u32 %v6666_v51, 16  ;;  %v2956_v43 = vshrl.u32 %v6666_v51, 16  ;;  %v5806_v5 = vcombine.low %v8139_v3, %v8186_v42  ;;  %v5807_v48 = vcombine.low %v8147_v6, %v8205_v47  ;;  %v6655_v8 = vld [vmem:[#allocation2 + $0xb4] sm:$0xff]   ;;  %v4915_v38 = vld [vmem:[#allocation2 + $0xa8] sm:$0xe] }
 0x15b   : > { %v2925_v58 = vor.u32 %v2924_v24, %v2921_v35  ;;  %v2945_v41 = vrot.slane %v2943_v37, 4  ;;  %v2935_v44 = vor.u32 %v2934_v18, %v8241_v61  ;;  %v2948_v39 = vrot.slane %v2946_v13, 5  ;;  %v6667_v24 = vld [vmem:[#allocation2 + $0x98] sm:$0x1] }
 0x15c   : > { %v5797_v26 = vrot.slane %v4911_v36, 9  ;;  %v5025_v9 = vrot.slane %v7917_v63, 5  ;;  %v2883_v7 = vsel %vm6970_vm12, %v8222_v60, %v8190_v54  ;;  %v2893_v3 = vsel %vm6970_vm12, %v2888_v14, %v8216_v29 }
 0x15d   : > { %v2940_v6 = vrot.slane %v2938_v0, 5  ;;  %v5028_v42 = vrot.slane %v7943_v50, 5  ;;  %v8260_v47 = vrot.slane %v2952_v4, 5  ;;  %v2958_v49 = vrot.slane %v2956_v43, 4  ;;  %v2669_v43 = vld [vmem:[#allocation2 + $0xa8] sm:$0xf] }
 0x15e   : > { %v8264_v63 = vsel %vm7135_vm15, %v5797_v26, %v5025_v9  ;;  %v5027_v27 = vrot.slane %v5025_v9, 4  ;;  %v2926_v34 = vrot.slane %v2925_v58, 4  ;;  %v5798_v54 = vrot.slane %v4912_v25, 9 }
 0x15f   : > { %6269 = vmatmul.mubr.msk.bf16.vlgmr.msra.gmra.mrb[0].mxu0 %vm830_vm4, %v5806_v5  ;;  %v5032_v60 = vrot.slane %v7934_v11, 5  ;;  %v5035_v29 = vrot.slane %v7969_v31, 5  ;;  %v2936_v50 = vrot.slane %v2935_v44, 4  ;;  %v2949_v35 = vor.u32 %v2948_v39, %v2945_v41  ;;  %v6656_v5 = vld [vmem:[#allocation2 + $0xc0] sm:$0xff]  }
 0x160   : > { %6272 = vmatprep.mubr.msk.bf16.mxu0 %vm830_vm4, %v5807_v48  ;;  %v2962_v2 = vshll.u32 %v6667_v24, 16  ;;  %v8273_v56 = vsel %vm7135_vm15, %v5027_v27, %v5028_v42  ;;  %v2967_v13 = vshrl.u32 %v2666_v57, 16  ;;  %v2959_v14 = vor.u32 %v2958_v49, %v8260_v47  ;;  %v6670_v49 = vld [vmem:[#allocation2 + $0xac] sm:$0xf] }
 0x161   : > { %6123 = vmatmul.mubr.msk.bf16.gmra.mrb[24].mxu1 %vm830_vm4, %v6654_v33  ;;  %v5813_v37 = vcombine.low %v8264_v63, %v8273_v56  ;;  %v8280_v11 = vsel %vm7135_vm15, %v5798_v54, %v5032_v60  ;;  %v5034_v31 = vrot.slane %v5032_v60, 4  ;;  %v2970_v18 = vshll.u32 %v2666_v57, 16  ;;  %v4913_v54 = vld [vmem:[#allocation2 + $0x90] sm:$0xe] }
 0x162   : > { %6126 = vmatprep.mubr.msk.bf16.mxu1 %vm830_vm4, %v6655_v8  ;;  %v2976_v0 = vshll.u32 %v6668_v17, 16  ;;  %v2980_v36 = vshrl.u32 %v6668_v17, 16  ;;  %v5653_v51 = vcombine.low %v2883_v7, %v2893_v3  ;;  %v2931_v48 = vsel %vm6970_vm12, %v2926_v34, %v8241_v61  ;;  %v4914_v61 = vld [vmem:[#allocation2 + $0x9c] sm:$0xe] }
 0x163   : > { %v8285_v4 = vsel %vm7135_vm15, %v5034_v31, %v5035_v29  ;;  %v2941_v58 = vsel %vm6970_vm12, %v2936_v50, %v2940_v6  ;;  %v8292_v41 = vrot.slane %v2949_v35, 4  ;;  %v2969_v44 = vrot.slane %v2967_v13, 4  ;;  %v6669_v6 = vld [vmem:[#allocation2 + $0xa4] sm:$0x1]  ;;  %v2672_v50 = vld [vmem:[#allocation2 + $0xb4] sm:$0xf] }
 0x164   : > { %v5814_v33 = vcombine.low %v8280_v11, %v8285_v4  ;;  %v2972_v39 = vrot.slane %v2970_v18, 5  ;;  %v8296_v26 = vrot.slane %v2976_v0, 5  ;;  %v2982_v9 = vrot.slane %v2980_v36, 4 }
 0x165   : > { %v8298_v25 = vrot.slane %v2959_v14, 4  ;;  %v8300_v8 = vrot.slane %v2962_v2, 5  ;;  %v2991_v7 = vshrl.u32 %v2669_v43, 16  ;;  %v2994_v3 = vshll.u32 %v2669_v43, 16 }
 0x166   : > { %v2986_v42 = vshll.u32 %v6669_v6, 16  ;;  %v3000_v27 = vshll.u32 %v6670_v49, 16  ;;  %v3004_v57 = vshrl.u32 %v6670_v49, 16  ;;  %v5655_v34 = vcombine.low %v2931_v48, %v2941_v58  ;;  %v8576_v48 = vld [vmem:[#allocation3_spill] sm:$0xff]  ;;  %v6673_v6 = vld [vmem:[#allocation2 + $0xc4] sm:$0xf] }
 0x167   : > { %6273 = vmatmul.mubr.msk.bf16.gmra.mrb[4].mxu0 %vm830_vm4, %v5808_v23  ;;  %v2955_v21 = vsel %vm6970_vm12, %v8292_v41, %v8260_v47  ;;  %v2973_v62 = vor.u32 %v2972_v39, %v2969_v44  ;;  %v2983_v23 = vor.u32 %v2982_v9, %v8296_v26  ;;  %v5800_v60 = vrot.slane %v4914_v61, 9  ;;  %v6671_v47 = vld [vmem:[#allocation2 + $0xb0] sm:$0x1]  ;;  %v6672_v44 = vld [vmem:[#allocation2 + $0xb8] sm:$0xf] }
 0x168   : > { %6276 = vmatprep.mubr.msk.bf16.mxu0 %vm830_vm4, %v5809_v19  ;;  %v2965_v10 = vsel %vm6970_vm12, %v8298_v25, %v8300_v8  ;;  %v2993_v15 = vrot.slane %v2991_v7, 4  ;;  %v2996_v19 = vrot.slane %v2994_v3, 5  ;;  %v5046_v29 = vrot.slane %v7988_v28, 5  ;;  %v2675_v28 = vld [vmem:[#allocation2 + $0xc0] sm:$0xf] }
 0x169   : > { %6127 = vmatmul.mubr.msk.bf16.gmra.mrb[28].mxu1 %vm830_vm4, %v6656_v5  ;;  %v2988_v35 = vrot.slane %v2986_v42, 5  ;;  %v8322_v24 = vrot.slane %v3000_v27, 5  ;;  %v3006_v2 = vrot.slane %v3004_v57, 4  ;;  %v3010_v31 = vshll.u32 %v6671_v47, 16 }
 0x16a   : > { %6148 = vmatprep.mubr.msk.bf16.mxu1 %vm830_vm4, %v5653_v51  ;;  %v5799_v13 = vrot.slane %v4913_v54, 9  ;;  %v8326_v14 = vsel %vm7135_vm15, %v5800_v60, %v5046_v29  ;;  %v5048_v18 = vrot.slane %v5046_v29, 4  ;;  %v5049_v17 = vrot.slane %v8012_v16, 5  ;;  %v8577_v54 = vld [vmem:[#allocation4_spill] sm:$0xff] }
 0x16b   : > { %v2974_v0 = vrot.slane %v2973_v62, 4  ;;  %v2984_v36 = vrot.slane %v2983_v23, 4  ;;  %v3015_v51 = vshrl.u32 %v2672_v50, 16  ;;  %v3018_v43 = vshll.u32 %v2672_v50, 16 }
 0x16c   : > { %v2997_v5 = vor.u32 %v2996_v19, %v2993_v15  ;;  %v5039_v58 = vrot.slane %v8576_v48, 5  ;;  %v8332_v41 = vsel %vm7135_vm15, %v5048_v18, %v5049_v17  ;;  %v3024_v39 = vshll.u32 %v6672_v44, 16 }
 0x16d   : > { %v3007_v16 = vor.u32 %v3006_v2, %v8322_v24  ;;  %v5816_v9 = vcombine.low %v8326_v14, %v8332_v41  ;;  %v3017_v25 = vrot.slane %v3015_v51, 4  ;;  %v3020_v8 = vrot.slane %v3018_v43, 5 }
 0x16e   : > { %v3012_v7 = vrot.slane %v3010_v31, 5  ;;  %v3026_v3 = vrot.slane %v3024_v39, 5  ;;  %v3028_v22 = vshrl.u32 %v6672_v44, 16  ;;  %v3039_v52 = vshrl.u32 %v2675_v28, 16 }
 0x16f   : > { %6277 = vmatmul.mubr.msk.bf16.gmra.mrb[8].mxu0 %vm830_vm4, %v5810_v1  ;;  %v2979_v1 = vsel %vm6970_vm12, %v2974_v0, %v8296_v26  ;;  %v3042_v61 = vshll.u32 %v2675_v28, 16  ;;  %v3048_v42 = vshll.u32 %v6673_v6, 16  ;;  %v3052_v49 = vshrl.u32 %v6673_v6, 16  ;;  %v6675_v0 = vld [vmem:[#allocation2 + $0xc8] sm:$0x1] }
 0x170   : > { %6280 = vmatprep.mubr.msk.bf16.mxu0 %vm830_vm4, %v5811_v55  ;;  %v3021_v46 = vor.u32 %v3020_v8, %v3017_v25  ;;  %v3030_v20 = vrot.slane %v3028_v22, 4  ;;  %v6674_v55 = vld [vmem:[#allocation2 + $0xbc] sm:$0x1]  ;;  %v2998_v57 = vrot.slane %v2997_v5, 4  ;;  %v3008_v62 = vrot.slane %v3007_v16, 4 }
 0x171   : > { %6149 = vmatmul.mubr.msk.bf16.vlgmr.msra.gmra.mrb[16].mxu1 %vm830_vm4, %v8244_v53  ;;  %v2989_v53 = vsel %vm6970_vm12, %v2984_v36, %v2988_v35  ;;  %v3034_v27 = vshll.u32 %v6674_v55, 16  ;;  %v5041_v23 = vrot.slane %v5039_v58, 4  ;;  %v5656_v60 = vcombine.low %v2955_v21, %v2965_v10  ;;  %v8579_v16 = vld [vmem:[#allocation7_spill] sm:$0xff] }
 0x172   : > { %6152 = vmatprep.mubr.msk.bf16.mxu1 %vm830_vm4, %v5655_v34  ;;  %v5042_v34 = vrot.slane %v8577_v54, 5  ;;  %v3031_v15 = vor.u32 %v3030_v20, %v3026_v3  ;;  %v3041_v19 = vrot.slane %v3039_v52, 4  ;;  %v3044_v26 = vrot.slane %v3042_v61, 5  ;;  %v8580_v61 = vld [vmem:[#allocation6_spill] sm:$0xff] }
 0x173   : > { %v5657_v29 = vcombine.low %v2979_v1, %v2989_v53  ;;  %v3050_v50 = vrot.slane %v3048_v42, 5  ;;  %v3054_v2 = vrot.slane %v3052_v49, 4  ;;  %v5040_v47 = vsel %vm7135_vm15, %v5799_v13, %v5039_v58  ;;  %v4916_v1 = vld [vmem:[#allocation2 + $0xb4] sm:$0xe]  ;;  %v8581_v49 = vld [vmem:[#allocation9_spill] sm:$0xff] }
 0x174   : > { %v3022_v35 = vrot.slane %v3021_v46, 4  ;;  %v3032_v31 = vrot.slane %v3031_v15, 4  ;;  %v3036_v18 = vrot.slane %v3034_v27, 5  ;;  %v3003_v21 = vsel %vm6970_vm12, %v2998_v57, %v8322_v24  ;;  %v4918_v24 = vld [vmem:[#allocation2 + $0xcc] sm:$0xe] }
 0x175   : > { %v3013_v10 = vsel %vm6970_vm12, %v3008_v62, %v3012_v7  ;;  %v5043_v17 = vsel %vm7135_vm15, %v5041_v23, %v5042_v34  ;;  %v3058_v13 = vshll.u32 %v6675_v0, 16  ;;  %v3045_v30 = vor.u32 %v3044_v26, %v3041_v19  ;;  %v4917_v46 = vld [vmem:[#allocation2 + $0xc0] sm:$0xe] }
 0x176   : > { %v3055_v51 = vor.u32 %v3054_v2, %v3050_v50  ;;  %v5658_v43 = vcombine.low %v3003_v21, %v3013_v10  ;;  %v5815_v28 = vcombine.low %v5040_v47, %v5043_v17  ;;  %v3027_v5 = vsel %vm6970_vm12, %v3022_v35, %v3026_v3  ;;  %v8582_v62 = vld [vmem:[#allocation8_spill] sm:$0xff] }
 0x177   : > { %6281 = vmatmul.mubr.msk.bf16.gmra.mrb[12].mxu0 %vm830_vm4, %v5812_v45  ;;  %v8578_v45 = vld [vmem:[#allocation5_spill] sm:$0xff]  ;;  %v3037_v48 = vsel %vm6970_vm12, %v3032_v31, %v3036_v18  ;;  %v3060_v58 = vrot.slane %v3058_v13, 5  ;;  %v5801_v63 = vrot.slane %v4915_v38, 9  ;;  %v5804_v56 = vrot.slane %v4918_v24, 9 }
 0x178   : > { %6284 = vmatprep.mubr.msk.bf16.mxu0 %vm830_vm4, %v5813_v37  ;;  %v5053_v36 = vrot.slane %v8578_v45, 5  ;;  %v5074_v37 = vrot.slane %v8082_v12, 5  ;;  %v3046_v44 = vrot.slane %v3045_v30, 4  ;;  %v5056_v25 = vrot.slane %v8579_v16, 5 }
 0x179   : > { %6153 = vmatmul.mubr.msk.bf16.gmra.mrb[20].mxu1 %vm830_vm4, %v5656_v60  ;;  %v5077_v8 = vrot.slane %v8092_v32, 5  ;;  %v5659_v7 = vcombine.low %v3027_v5, %v3037_v48  ;;  %v3056_v22 = vrot.slane %v3055_v51, 4  ;;  %v5060_v6 = vrot.slane %v8580_v61, 5  ;;  %v8583_v60 = vld [vmem:[#allocation10_spill] sm:$0xff] }
 0x17a   : > { %6156 = vmatprep.mubr.msk.bf16.mxu1 %vm830_vm4, %v5657_v29  ;;  %v5055_v39 = vrot.slane %v5053_v36, 4  ;;  %v5075_v52 = vsel %vm7135_vm15, %v5804_v56, %v5074_v37  ;;  %v5076_v3 = vrot.slane %v5074_v37, 4  ;;  %v5054_v32 = vsel %vm7135_vm15, %v5801_v63, %v5053_v36  ;;  %v8432_v36 = vld [vmem:[%s8545_s2] ss:$0 sm:$0xff] }
 0x17b   : > { %v3051_v11 = vsel %vm6970_vm12, %v3046_v44, %v3050_v50  ;;  %v3061_v4 = vsel %vm6970_vm12, %v3056_v22, %v3060_v58  ;;  %v5067_v53 = vrot.slane %v8581_v49, 5  ;;  %v5802_v20 = vrot.slane %v4916_v1, 9 }
 0x17c   : > { %v5078_v12 = vsel %vm7135_vm15, %v5076_v3, %v5077_v8  ;;  %v5660_v55 = vcombine.low %v3051_v11, %v3061_v4  ;;  %v5062_v57 = vrot.slane %v5060_v6, 4  ;;  %v5063_v23 = vrot.slane %v8582_v62, 5 }
 0x17d   : > { %v5820_v42 = vcombine.low %v5075_v52, %v5078_v12  ;;  %v5803_v54 = vrot.slane %v4917_v46, 9  ;;  %v5069_v34 = vrot.slane %v5067_v53, 4  ;;  %v5070_v15 = vrot.slane %v8583_v60, 5 }
 0x17e   : > { %v5061_v59 = vsel %vm7135_vm15, %v5802_v20, %v5060_v6  ;;  %v5064_v19 = vsel %vm7135_vm15, %v5062_v57, %v5063_v23  ;;  %vm5403_vm0 = vcmask 31744  }
 0x17f   : > { %6285 = vmatmul.mubr.msk.bf16.gmra.mrb[16].mxu0 %vm830_vm4, %v5814_v33  ;;  %v5057_v33 = vsel %vm7135_vm15, %v5055_v39, %v5056_v25  ;;  %v5068_v26 = vsel %vm7135_vm15, %v5803_v54, %v5067_v53  ;;  %v5071_v29 = vsel %vm7135_vm15, %v5069_v34, %v5070_v15  ;;  %v5818_v50 = vcombine.low %v5061_v59, %v5064_v19 }
 0x180   : > { %6288 = vmatprep.mubr.msk.bf16.mxu0 %vm830_vm4, %v5815_v28  ;;  %v5817_v27 = vcombine.low %v5054_v32, %v5057_v33  ;;  %v5819_v14 = vcombine.low %v5068_v26, %v5071_v29 }
 0x181   : > { %6157 = vmatmul.mubr.msk.bf16.gmra.mrb[24].mxu1 %vm830_vm4, %v5658_v43 }
 0x182   : > { %6160 = vmatprep.mubr.msk.bf16.mxu1 %vm830_vm4, %v5659_v7 }
 0x187   : > { %6289 = vmatmul.mubr.msk.bf16.gmra.mrb[20].mxu0 %vm830_vm4, %v5816_v9 }
 0x188   : > { %6292 = vmatprep.mubr.msk.bf16.mxu0 %vm830_vm4, %v5817_v27 }
 0x189   : > { %6161 = vmatmul.mubr.msk.bf16.gmra.mrb[28].mxu1 %vm830_vm4, %v5660_v55 }
 0x18f   : > { %6293 = vmatmul.mubr.msk.bf16.gmra.mrb[24].mxu0 %vm830_vm4, %v5818_v50 }
 0x190   : > { %6296 = vmatprep.mubr.msk.bf16.mxu0 %vm830_vm4, %v5819_v14 }
 0x197   : > { %6297 = vmatmul.mubr.msk.bf16.gmra.mrb[28].mxu0 %vm830_vm4, %v5820_v42 }
 0x204   : > { %v6100_v41 = vpop.f32.mrb[0].mxu1 }
 0x205   : > { %v2471_v9 = vpop.f32.mrb[1].mxu1  ;;  %v6302_v24 = vadd.f32 %v6100_v41, %v8432_v36 }
 0x206   : > { %v6101_v2 = vpop.f32.mrb[2].mxu1  ;;  %v6304_v51 = vadd.f32 %v8432_v36, %v2471_v9 }
 0x207   : > { %v2474_v47 = vpop.f32.mrb[3].mxu1  ;;  %v6306_v28 = vadd.f32 %v6101_v2, %v8432_v36 }
 0x208   : > { %v6308_v58 = vadd.f32 %v8432_v36, %v2474_v47 }
 0x20c   : > { %v6104_v35 = vpop.f32.mrb[4].mxu1 }
 0x20d   : > { %v2487_v31 = vpop.f32.mrb[5].mxu1  ;;  %v6310_v22 = vadd.f32 %v6104_v35, %v8432_v36 }
 0x20e   : > { %v6105_v18 = vpop.f32.mrb[6].mxu1  ;;  %v6312_v52 = vadd.f32 %v8432_v36, %v2487_v31 }
 0x20f   : > { %v2490_v21 = vpop.f32.mrb[7].mxu1  ;;  %v6314_v12 = vadd.f32 %v6105_v18, %v8432_v36 }
 0x210   : > { %v6316_v61 = vadd.f32 %v8432_v36, %v2490_v21 }
 0x214   : > { %v6108_v10 = vpop.f32.mrb[8].mxu1 }
 0x215   : > { %v2503_v40 = vpop.f32.mrb[9].mxu1  ;;  %v6318_v55 = vadd.f32 %v6108_v10, %v8432_v36 }
 0x216   : > { %v6109_v17 = vpop.f32.mrb[10].mxu1  ;;  %v6320_v27 = vadd.f32 %v8432_v36, %v2503_v40 }
 0x217   : > { %v2506_v0 = vpop.f32.mrb[11].mxu1  ;;  %v6322_v62 = vadd.f32 %v6109_v17, %v8432_v36 }
 0x218   : > { %v6324_v60 = vadd.f32 %v8432_v36, %v2506_v0 }
 0x21c   : > { %v8421_v13 = vpop.f32.mrb[12].mxu1 }
 0x21d   : > { %v8423_v30 = vpop.f32.mrb[13].mxu1  ;;  %v6326_v31 = vadd.f32 %v8421_v13, %v8432_v36 }
 0x21e   : > { %v8425_v38 = vpop.f32.mrb[14].mxu1  ;;  %v6328_v18 = vadd.f32 %v8432_v36, %v8423_v30 }
 0x21f   : > { %v8427_v45 = vpop.f32.mrb[15].mxu1  ;;  %v6330_v10 = vadd.f32 %v8425_v38, %v8432_v36 }
 0x232   : > { %v6270_v43 = vpop.f32.mrb[0].mxu0 }
 0x233   : > { %v6303_v5 = vadd.f32 %v6302_v24, %v6270_v43  ;;  %v5212_v48 = vpop.f32.mrb[1].mxu0  ;;  %v6332_v24 = vadd.f32 %v8432_v36, %v8427_v45 }
 0x234   : > { %v6305_v63 = vadd.f32 %v6304_v51, %v5212_v48  ;;  %v6271_v56 = vpop.f32.mrb[2].mxu0 }
 0x235   : > { %v5373_v37 = vmax.f32 %v6303_v5, 0.0  ;;  %v6307_v44 = vadd.f32 %v6306_v28, %v6271_v56  ;;  %v5215_v39 = vpop.f32.mrb[3].mxu0 }
 0x236   : > { %v5371_v16 = vmax.f32 %v6305_v63, 0.0  ;;  %v6309_v25 = vadd.f32 %v6308_v58, %v5215_v39 }
 0x237   : > { %5406 = vst.msk [vmem:[%s8442_s18 + $0x10] sm:$0xff] %vm5403_vm0, %v5373_v37  ;;  %v5374_v8 = vmax.f32 %v6307_v44, 0.0 }
 0x238   : > { %5404 = vst.msk [vmem:[%s8442_s18] sm:$0xff] %vm5403_vm0, %v5371_v16  ;;  %v5372_v7 = vmax.f32 %v6309_v25, 0.0 }
 0x239   : > { %5407 = vst.msk [vmem:[%s8442_s18 + $0x18] sm:$0xff] %vm5403_vm0, %v5374_v8 }
 0x23a   : > { %5405 = vst.msk [vmem:[%s8442_s18 + $0x8] sm:$0xff] %vm5403_vm0, %v5372_v7  ;;  %v6274_v3 = vpop.f32.mrb[4].mxu0 }
 0x23b   : > { %v6311_v32 = vadd.f32 %v6310_v22, %v6274_v3  ;;  %v5228_v1 = vpop.f32.mrb[5].mxu0 }
 0x23c   : > { %v6313_v6 = vadd.f32 %v6312_v52, %v5228_v1  ;;  %v6275_v42 = vpop.f32.mrb[6].mxu0 }
 0x23d   : > { %v5377_v11 = vmax.f32 %v6311_v32, 0.0  ;;  %v6315_v4 = vadd.f32 %v6314_v12, %v6275_v42  ;;  %v5231_v33 = vpop.f32.mrb[7].mxu0 }
 0x23e   : > { %v5375_v49 = vmax.f32 %v6313_v6, 0.0  ;;  %v6317_v53 = vadd.f32 %v6316_v61, %v5231_v33 }
 0x23f   : > { %5410 = vst.msk [vmem:[%s8442_s18 + $0x30] sm:$0xff] %vm5403_vm0, %v5377_v11  ;;  %v5378_v46 = vmax.f32 %v6315_v4, 0.0 }
 0x240   : > { %5408 = vst.msk [vmem:[%s8442_s18 + $0x20] sm:$0xff] %vm5403_vm0, %v5375_v49  ;;  %v5376_v20 = vmax.f32 %v6317_v53, 0.0 }
 0x241   : > { %5411 = vst.msk [vmem:[%s8442_s18 + $0x38] sm:$0xff] %vm5403_vm0, %v5378_v46 }
 0x242   : > { %5409 = vst.msk [vmem:[%s8442_s18 + $0x28] sm:$0xff] %vm5403_vm0, %v5376_v20  ;;  %v6278_v57 = vpop.f32.mrb[8].mxu0 }
 0x243   : > { %v6319_v23 = vadd.f32 %v6318_v55, %v6278_v57  ;;  %v5244_v54 = vpop.f32.mrb[9].mxu0 }
 0x244   : > { %v6150_v34 = vpop.f32.mrb[16].mxu1  ;;  %v6321_v15 = vadd.f32 %v6320_v27, %v5244_v54  ;;  %v6279_v59 = vpop.f32.mrb[10].mxu0 }
 0x245   : > { %v3259_v19 = vpop.f32.mrb[17].mxu1  ;;  %v5381_v26 = vmax.f32 %v6319_v23, 0.0  ;;  %v6323_v29 = vadd.f32 %v6322_v62, %v6279_v59  ;;  %v5247_v50 = vpop.f32.mrb[11].mxu0  ;;  %v6334_v45 = vadd.f32 %v6150_v34, %v8432_v36 }
 0x246   : > { %v6151_v14 = vpop.f32.mrb[18].mxu1  ;;  %v5379_v41 = vmax.f32 %v6321_v15, 0.0  ;;  %v6325_v9 = vadd.f32 %v6324_v60, %v5247_v50  ;;  %v6336_v44 = vadd.f32 %v8432_v36, %v3259_v19 }
 0x247   : > { %v3262_v2 = vpop.f32.mrb[19].mxu1  ;;  %5414 = vst.msk [vmem:[%s8442_s18 + $0x50] sm:$0xff] %vm5403_vm0, %v5381_v26  ;;  %v5382_v47 = vmax.f32 %v6323_v29, 0.0  ;;  %v6338_v16 = vadd.f32 %v6151_v14, %v8432_v36 }
 0x248   : > { %5412 = vst.msk [vmem:[%s8442_s18 + $0x40] sm:$0xff] %vm5403_vm0, %v5379_v41  ;;  %v5380_v35 = vmax.f32 %v6325_v9, 0.0  ;;  %v6340_v22 = vadd.f32 %v8432_v36, %v3262_v2 }
 0x249   : > { %5415 = vst.msk [vmem:[%s8442_s18 + $0x58] sm:$0xff] %vm5403_vm0, %v5382_v47 }
 0x24a   : > { %5413 = vst.msk [vmem:[%s8442_s18 + $0x48] sm:$0xff] %vm5403_vm0, %v5380_v35  ;;  %v6282_v21 = vpop.f32.mrb[12].mxu0 }
 0x24b   : > { %v6327_v40 = vadd.f32 %v6326_v31, %v6282_v21  ;;  %v5260_v17 = vpop.f32.mrb[13].mxu0 }
 0x24c   : > { %v6154_v0 = vpop.f32.mrb[20].mxu1  ;;  %v6329_v13 = vadd.f32 %v6328_v18, %v5260_v17  ;;  %v6283_v51 = vpop.f32.mrb[14].mxu0 }
 0x24d   : > { %v3275_v43 = vpop.f32.mrb[21].mxu1  ;;  %v5385_v30 = vmax.f32 %v6327_v40, 0.0  ;;  %v6331_v28 = vadd.f32 %v6330_v10, %v6283_v51  ;;  %v5263_v5 = vpop.f32.mrb[15].mxu0  ;;  %v6342_v53 = vadd.f32 %v6154_v0, %v8432_v36 }
 0x24e   : > { %v6155_v48 = vpop.f32.mrb[22].mxu1  ;;  %v5383_v58 = vmax.f32 %v6329_v13, 0.0  ;;  %v6333_v63 = vadd.f32 %v6332_v24, %v5263_v5  ;;  %v6344_v46 = vadd.f32 %v8432_v36, %v3275_v43 }
 0x24f   : > { %v3278_v56 = vpop.f32.mrb[23].mxu1  ;;  %5418 = vst.msk [vmem:[%s8442_s18 + $0x70] sm:$0xff] %vm5403_vm0, %v5385_v30  ;;  %v5386_v38 = vmax.f32 %v6331_v28, 0.0  ;;  %v6346_v55 = vadd.f32 %v6155_v48, %v8432_v36 }
 0x250   : > { %5416 = vst.msk [vmem:[%s8442_s18 + $0x60] sm:$0xff] %vm5403_vm0, %v5383_v58  ;;  %v5384_v37 = vmax.f32 %v6333_v63, 0.0  ;;  %v6348_v23 = vadd.f32 %v8432_v36, %v3278_v56 }
 0x251   : > { %5419 = vst.msk [vmem:[%s8442_s18 + $0x78] sm:$0xff] %vm5403_vm0, %v5386_v38 }
 0x252   : > { %5417 = vst.msk [vmem:[%s8442_s18 + $0x68] sm:$0xff] %vm5403_vm0, %v5384_v37  ;;  %v6286_v39 = vpop.f32.mrb[16].mxu0 }
 0x253   : > { %v6335_v25 = vadd.f32 %v6334_v45, %v6286_v39  ;;  %v5276_v8 = vpop.f32.mrb[17].mxu0 }
 0x254   : > { %v6158_v7 = vpop.f32.mrb[24].mxu1  ;;  %v6337_v52 = vadd.f32 %v6336_v44, %v5276_v8  ;;  %v6287_v3 = vpop.f32.mrb[18].mxu0 }
 0x255   : > { %v3291_v12 = vpop.f32.mrb[25].mxu1  ;;  %v5389_v32 = vmax.f32 %v6335_v25, 0.0  ;;  %v6339_v1 = vadd.f32 %v6338_v16, %v6287_v3  ;;  %v5279_v61 = vpop.f32.mrb[19].mxu0  ;;  %v6350_v2 = vadd.f32 %v6158_v7, %v8432_v36 }
 0x256   : > { %v6159_v6 = vpop.f32.mrb[26].mxu1  ;;  %v5387_v42 = vmax.f32 %v6337_v52, 0.0  ;;  %v6341_v11 = vadd.f32 %v6340_v22, %v5279_v61  ;;  %v6352_v47 = vadd.f32 %v8432_v36, %v3291_v12 }
 0x257   : > { %v3294_v4 = vpop.f32.mrb[27].mxu1  ;;  %5422 = vst.msk [vmem:[%s8442_s18 + $0x90] sm:$0xff] %vm5403_vm0, %v5389_v32  ;;  %v5390_v33 = vmax.f32 %v6339_v1, 0.0  ;;  %v6354_v31 = vadd.f32 %v6159_v6, %v8432_v36 }
 0x258   : > { %5420 = vst.msk [vmem:[%s8442_s18 + $0x80] sm:$0xff] %vm5403_vm0, %v5387_v42  ;;  %v5388_v49 = vmax.f32 %v6341_v11, 0.0  ;;  %v6356_v10 = vadd.f32 %v8432_v36, %v3294_v4 }
 0x259   : > { %5423 = vst.msk [vmem:[%s8442_s18 + $0x98] sm:$0xff] %vm5403_vm0, %v5390_v33 }
 0x25a   : > { %5421 = vst.msk [vmem:[%s8442_s18 + $0x88] sm:$0xff] %vm5403_vm0, %v5388_v49  ;;  %v6290_v20 = vpop.f32.mrb[20].mxu0 }
 0x25b   : > { %v6343_v27 = vadd.f32 %v6342_v53, %v6290_v20  ;;  %v5292_v57 = vpop.f32.mrb[21].mxu0 }
 0x25c   : > { %v6162_v62 = vpop.f32.mrb[28].mxu1  ;;  %v6345_v54 = vadd.f32 %v6344_v46, %v5292_v57  ;;  %v6291_v34 = vpop.f32.mrb[22].mxu0 }
 0x25d   : > { %v3307_v60 = vpop.f32.mrb[29].mxu1  ;;  %v5393_v15 = vmax.f32 %v6343_v27, 0.0  ;;  %v6347_v59 = vadd.f32 %v6346_v55, %v6291_v34  ;;  %v5295_v19 = vpop.f32.mrb[23].mxu0  ;;  %v6358_v5 = vadd.f32 %v6162_v62, %v8432_v36 }
 0x25e   : > { %v6163_v26 = vpop.f32.mrb[30].mxu1  ;;  %v5391_v29 = vmax.f32 %v6345_v54, 0.0  ;;  %v6349_v50 = vadd.f32 %v6348_v23, %v5295_v19  ;;  %v6360_v48 = vadd.f32 %v8432_v36, %v3307_v60 }
 0x25f   : > { %v3310_v14 = vpop.f32.mrb[31].mxu1  ;;  %5426 = vst.msk [vmem:[%s8442_s18 + $0xb0] sm:$0xff] %vm5403_vm0, %v5393_v15  ;;  %v5394_v41 = vmax.f32 %v6347_v59, 0.0  ;;  %v6362_v63 = vadd.f32 %v6163_v26, %v8432_v36 }
 0x260   : > { %5424 = vst.msk [vmem:[%s8442_s18 + $0xa0] sm:$0xff] %vm5403_vm0, %v5391_v29  ;;  %v5392_v9 = vmax.f32 %v6349_v50, 0.0  ;;  %v6364_v37 = vadd.f32 %v8432_v36, %v3310_v14 }
 0x261   : > { %5427 = vst.msk [vmem:[%s8442_s18 + $0xb8] sm:$0xff] %vm5403_vm0, %v5394_v41 }
 0x262   : > { %5425 = vst.msk [vmem:[%s8442_s18 + $0xa8] sm:$0xff] %vm5403_vm0, %v5392_v9  ;;  %v6294_v35 = vpop.f32.mrb[24].mxu0 }
 0x263   : > { %v6351_v18 = vadd.f32 %v6350_v2, %v6294_v35  ;;  %v5308_v21 = vpop.f32.mrb[25].mxu0 }
 0x264   : > { %v6353_v40 = vadd.f32 %v6352_v47, %v5308_v21  ;;  %v6295_v17 = vpop.f32.mrb[26].mxu0 }
 0x265   : > { %v5397_v0 = vmax.f32 %v6351_v18, 0.0  ;;  %v6355_v24 = vadd.f32 %v6354_v31, %v6295_v17  ;;  %v5311_v13 = vpop.f32.mrb[27].mxu0 }
 0x266   : > { %v5395_v51 = vmax.f32 %v6353_v40, 0.0  ;;  %v6357_v43 = vadd.f32 %v6356_v10, %v5311_v13 }
 0x267   : > { %5430 = vst.msk [vmem:[%s8442_s18 + $0xd0] sm:$0xff] %vm5403_vm0, %v5397_v0  ;;  %v5398_v30 = vmax.f32 %v6355_v24, 0.0 }
 0x268   : > { %5428 = vst.msk [vmem:[%s8442_s18 + $0xc0] sm:$0xff] %vm5403_vm0, %v5395_v51  ;;  %v5396_v28 = vmax.f32 %v6357_v43, 0.0 }
 0x269   : > { %5431 = vst.msk [vmem:[%s8442_s18 + $0xd8] sm:$0xff] %vm5403_vm0, %v5398_v30 }
 0x26a   : > { %5429 = vst.msk [vmem:[%s8442_s18 + $0xc8] sm:$0xff] %vm5403_vm0, %v5396_v28  ;;  %v6298_v58 = vpop.f32.mrb[28].mxu0 }
 0x26b   : > { %v6359_v56 = vadd.f32 %v6358_v5, %v6298_v58  ;;  %v5324_v38 = vpop.f32.mrb[29].mxu0 }
 0x26c   : > { %v6361_v45 = vadd.f32 %v6360_v48, %v5324_v38  ;;  %v6299_v44 = vpop.f32.mrb[30].mxu0 }
 0x26d   : > { %v5401_v39 = vmax.f32 %v6359_v56, 0.0  ;;  %v6363_v16 = vadd.f32 %v6362_v63, %v6299_v44  ;;  %v5327_v25 = vpop.f32.mrb[31].mxu0 }
 0x26e   : > { %v5399_v8 = vmax.f32 %v6361_v45, 0.0  ;;  %v6365_v7 = vadd.f32 %v6364_v37, %v5327_v25 }
 0x26f   : > { %5434 = vst.msk [vmem:[%s8442_s18 + $0xf0] sm:$0xff] %vm5403_vm0, %v5401_v39  ;;  %v5402_v22 = vmax.f32 %v6363_v16, 0.0 }
 0x270   : > { %5432 = vst.msk [vmem:[%s8442_s18 + $0xe0] sm:$0xff] %vm5403_vm0, %v5399_v8  ;;  %v5400_v52 = vmax.f32 %v6365_v7, 0.0 }
 0x271   : > { %5435 = vst.msk [vmem:[%s8442_s18 + $0xf8] sm:$0xff] %vm5403_vm0, %v5402_v22 }
 0x272   : > { %5433 = vst.msk [vmem:[%s8442_s18 + $0xe8] sm:$0xff] %vm5403_vm0, %v5400_v52 }
 0x273 PF: > { %s13_s12 = sadd.s32 1, %s6682_s12  }
 0x274   : > { %p10_p4 = scmp.ge.s32.totalorder %s13_s12, 4  }
 0x276   :  { %12 = sbr.rel (!%p10_p4) target bundleno = 1 (0x1), region = 64 }

// kernel: inception_forward.5
= control target key start
LH: loop header
LB: loop body
LE: loop exit
PB: predicated region body
PF: predicated region fallthrough
CT: control target
= control target key end

     0   :  { %s6705_s12 = smov 0   ;;  %s8543_s0 = inlined_call_operand.vmem [shape: bf16[2,16,16,4], index: 0, kind: input, shape index: {}]   ;;  %s8544_s1 = inlined_call_operand.vmem [shape: bf16[3,3,4,8], index: 1, kind: input, shape index: {}]   ;;  %s8545_s2 = inlined_call_operand.vmem [shape: f32[1,8], index: 2, kind: input, shape index: {}]   ;;  %s8546_s3 = inlined_call_operand.vmem [shape: f32[2,16,16,8], index: 3, kind: output, shape index: {}]  }
   0x1 LB: > { %s5491_s13 = sadd.s32 4294967295, %s6682_s12   ;;  %p5495_p0 = scmp.ge.s32.totalorder %s6682_s12, 1  ;;  %s6682_s12 = sphi %s6705_s12, %s13_s12  }
   0x2   : > { %p137_p1 = scmp.lt.s32.totalorder %s6682_s12, 3 }
   0x4   : > { %p138_p2 = pnand %p5495_p0, %p137_p1 }
   0x6   : > { %141 = sbr.rel (%p138_p2) target bundleno = 627 (0x273), region = 32 }
   0xd   : > { %v701_v0 = vld [vmem:[%s8544_s1] sm:$0x3]  ;;  %vm879_vm0 = vcmask 1041408   ;;  %vm172_vm1 = vcmask 27648   ;;  %v6684_v2 = vmov 0   ;;  %p161_p3 = scmp.lt.s32.totalorder %s5491_s13, 1 }
   0xe   : > { %6590 = vmatprep.subr.msk.bf16.mxu1 %vm879_vm0, %v701_v0  ;;  %v881_v1 = vsel %vm879_vm0, %v701_v0, 0  ;;  %173 = vst.msk [vmem:[#allocation2] sm:$0xf] %vm172_vm1, %v6684_v2  ;;  %174 = vst.msk [vmem:[#allocation2 + $0x4] sm:$0xf] %vm172_vm1, %v6684_v2  ;;  %vm175_vm2 = vcmask 24576  }
   0xf   : > { %177 = vst.msk [vmem:[#allocation2 + $0xc] sm:$0xf] %vm172_vm1, %v6684_v2  ;;  %178 = vst.msk [vmem:[#allocation2 + $0x10] sm:$0xf] %vm172_vm1, %v6684_v2  ;;  %5995 = vmatpush3.bf16.msra.mxu1 %v881_v1  ;;  %v705_v3 = vld [vmem:[%s8544_s1 + $0x8] sm:$0x3] }
  0x10   : > { %180 = vst.msk [vmem:[#allocation2 + $0x18] sm:$0xf] %vm172_vm1, %v6684_v2  ;;  %181 = vst.msk [vmem:[#allocation2 + $0x1c] sm:$0xf] %vm172_vm1, %v6684_v2  ;;  %v702_v4 = vld [vmem:[%s8544_s1 + $0x2] sm:$0x3]  ;;  %6594 = vmatprep.subr.msk.bf16.mxu0 %vm879_vm0, %v705_v3 }
  0x11   : > { %183 = vst.msk [vmem:[#allocation2 + $0x24] sm:$0xf] %vm172_vm1, %v6684_v2  ;;  %184 = vst.msk [vmem:[#allocation2 + $0x28] sm:$0xf] %vm172_vm1, %v6684_v2  ;;  %s8585_s13 = smov (!%p161_p3, %s5491_s13), 1  ;;  %v6804_v5 = vsel %vm879_vm0, %v705_v3, 0  ;;  %6591 = vmatprep.subr.msk.bf16.mxu1 %vm879_vm0, %v702_v4 }
  0x12   : > { %186 = vst.msk [vmem:[#allocation2 + $0x30] sm:$0xf] %vm172_vm1, %v6684_v2  ;;  %187 = vst.msk [vmem:[#allocation2 + $0x34] sm:$0xf] %vm172_vm1, %v6684_v2  ;;  %6131 = vmatpush3.bf16.msra.mxu0 %v6804_v5  ;;  %v6847_v6 = vld [vmem:[%s8544_s1 + $0xa] sm:$0x3] }
  0x13   : > { %189 = vst.msk [vmem:[#allocation2 + $0x3c] sm:$0xf] %vm172_vm1, %v6684_v2  ;;  %190 = vst.msk [vmem:[#allocation2 + $0x40] sm:$0xf] %vm172_vm1, %v6684_v2  ;;  %s5839_s22 = sshll.u32 %s8585_s13, 7  ;;  %6596 = vmatprep.subr.msk.bf16.mxu0 %vm879_vm0, %v6847_v6  ;;  %vm830_vm4 = vcmask 31744  }
  0x14   : > { %192 = vst.msk [vmem:[#allocation2 + $0x48] sm:$0xf] %vm172_vm1, %v6684_v2  ;;  %193 = vst.msk [vmem:[#allocation2 + $0x4c] sm:$0xf] %vm172_vm1, %v6684_v2  ;;  %vm260_vm3 = vsmask.f32 256  ;;  %s6855_s25 = scalar_lea.vmem %s8543_s0, %s5839_s22 }
  0x15   : > { %195 = vst.msk [vmem:[#allocation2 + $0x54] sm:$0xf] %vm172_vm1, %v6684_v2  ;;  %196 = vst.msk [vmem:[#allocation2 + $0x58] sm:$0xf] %vm172_vm1, %v6684_v2  ;;  %vm261_vm5 = vsmask.f32 4368 }
  0x16   : > { %198 = vst.msk [vmem:[#allocation2 + $0x60] sm:$0xf] %vm172_vm1, %v6684_v2  ;;  %199 = vst.msk [vmem:[#allocation2 + $0x64] sm:$0xf] %vm172_vm1, %v6684_v2  ;;  %vm585_vm6 = vsmask.f32 7938 }
  0x17   : > { %201 = vst.msk [vmem:[#allocation2 + $0x6c] sm:$0xf] %vm172_vm1, %v6684_v2  ;;  %202 = vst.msk [vmem:[#allocation2 + $0x70] sm:$0xf] %vm172_vm1, %v6684_v2  ;;  %v6858_v7 = vsel %vm879_vm0, %v702_v4, 0  ;;  %v6609_v11 = vld [vmem:[#allocation2] sm:$0xff]  }
  0x18   : > { %204 = vst.msk [vmem:[#allocation2 + $0x78] sm:$0xf] %vm172_vm1, %v6684_v2  ;;  %205 = vst.msk [vmem:[#allocation2 + $0x7c] sm:$0xf] %vm172_vm1, %v6684_v2  ;;  %v228_v8 = vld [vmem:[%s6855_s25] sm:$0xf]  ;;  %5996 = vmatprep.mubr.msk.bf16.mxu1 %vm830_vm4, %v6609_v11 }
  0x19   : > { %207 = vst.msk [vmem:[#allocation2 + $0x84] sm:$0xf] %vm172_vm1, %v6684_v2  ;;  %208 = vst.msk [vmem:[#allocation2 + $0x88] sm:$0xf] %vm172_vm1, %v6684_v2  ;;  %v229_v9 = vld [vmem:[%s6855_s25 + $0x4] sm:$0xf] }
  0x1a   : > { %210 = vst.msk [vmem:[#allocation2 + $0x90] sm:$0xf] %vm172_vm1, %v6684_v2  ;;  %211 = vst.msk [vmem:[#allocation2 + $0x94] sm:$0xf] %vm172_vm1, %v6684_v2  ;;  %v230_v10 = vld [vmem:[%s6855_s25 + $0x8] sm:$0xf] }
  0x1b   : > { %213 = vst.msk [vmem:[#allocation2 + $0x9c] sm:$0xf] %vm172_vm1, %v6684_v2  ;;  %214 = vst.msk [vmem:[#allocation2 + $0xa0] sm:$0xf] %vm172_vm1, %v6684_v2  ;;  %v264_v12 = vshrl.u32 %v228_v8, 16  ;;  %v267_v13 = vshll.u32 %v228_v8, 16 }
  0x1c   : > { %216 = vst.msk [vmem:[#allocation2 + $0xa8] sm:$0xf] %vm172_vm1, %v6684_v2  ;;  %217 = vst.msk [vmem:[#allocation2 + $0xac] sm:$0xf] %vm172_vm1, %v6684_v2  ;;  %v272_v14 = vshrl.u32 %v229_v9, 16  ;;  %v275_v15 = vshll.u32 %v229_v9, 16 }
  0x1d   : > { %219 = vst.msk [vmem:[#allocation2 + $0xb4] sm:$0xf] %vm172_vm1, %v6684_v2  ;;  %220 = vst.msk [vmem:[#allocation2 + $0xb8] sm:$0xf] %vm172_vm1, %v6684_v2  ;;  %v587_v16 = vld [vmem:[#allocation2 + $0xc] sm:$0xf] }
  0x1e   : > { %222 = vst.msk [vmem:[#allocation2 + $0xc0] sm:$0xf] %vm172_vm1, %v6684_v2  ;;  %223 = vst.msk [vmem:[#allocation2 + $0xc4] sm:$0xf] %vm172_vm1, %v6684_v2  ;;  %v281_v17 = vshrl.u32 %v230_v10, 16  ;;  %v266_v18 = vrot.slane %v264_v12, 7 }
  0x1f   : > { %225 = vst.msk [vmem:[#allocation2 + $0xcc] sm:$0xf] %vm172_vm1, %v6684_v2  ;;  %226 = vst.msk [vmem:[#allocation2 + $0xd0] sm:$0xf] %vm172_vm1, %v6684_v2  ;;  %v231_v19 = vld [vmem:[%s6855_s25 + $0xc] sm:$0xf] }
  0x20   : > { %179 = vst.msk [vmem:[#allocation2 + $0x14] sm:$0x1] %vm175_vm2, %v6684_v2  ;;  %176 = vst.msk [vmem:[#allocation2 + $0x8] sm:$0x1] %vm175_vm2, %v6684_v2  ;;  %v284_v20 = vshll.u32 %v230_v10, 16  ;;  %v274_v22 = vrot.slane %v272_v14, 7  ;;  %v269_v29 = vor.u32 %v267_v13, %v266_v18 }
  0x21   : > { %182 = vst.msk [vmem:[#allocation2 + $0x20] sm:$0x1] %vm175_vm2, %v6684_v2  ;;  %185 = vst.msk [vmem:[#allocation2 + $0x2c] sm:$0x1] %vm175_vm2, %v6684_v2  ;;  %v596_v21 = vld [vmem:[#allocation2 + $0x18] sm:$0xf] }
  0x22   : > { %188 = vst.msk [vmem:[#allocation2 + $0x38] sm:$0x1] %vm175_vm2, %v6684_v2  ;;  %191 = vst.msk [vmem:[#allocation2 + $0x44] sm:$0x1] %vm175_vm2, %v6684_v2  ;;  %v283_v24 = vrot.slane %v281_v17, 7  ;;  %v289_v25 = vshrl.u32 %v231_v19, 16  ;;  %v277_v34 = vor.u32 %v275_v15, %v274_v22 }
  0x23   : > { %194 = vst.msk [vmem:[#allocation2 + $0x50] sm:$0x1] %vm175_vm2, %v6684_v2  ;;  %197 = vst.msk [vmem:[#allocation2 + $0x5c] sm:$0x1] %vm175_vm2, %v6684_v2  ;;  %v292_v26 = vshll.u32 %v231_v19, 16  ;;  %v270_v30 = vrot.slane %v266_v18, 4 }
  0x24   : > { %200 = vst.msk [vmem:[#allocation2 + $0x68] sm:$0x1] %vm175_vm2, %v6684_v2  ;;  %203 = vst.msk [vmem:[#allocation2 + $0x74] sm:$0x1] %vm175_vm2, %v6684_v2  ;;  %v232_v27 = vld [vmem:[%s6855_s25 + $0x10] sm:$0xf]  ;;  %v286_v35 = vor.u32 %v284_v20, %v283_v24 }
  0x25   : > { %206 = vst.msk [vmem:[#allocation2 + $0x80] sm:$0x1] %vm175_vm2, %v6684_v2  ;;  %209 = vst.msk [vmem:[#allocation2 + $0x8c] sm:$0x1] %vm175_vm2, %v6684_v2  ;;  %v233_v31 = vld [vmem:[%s6855_s25 + $0x14] sm:$0xf] }
  0x26   : > { %212 = vst.msk [vmem:[#allocation2 + $0x98] sm:$0x1] %vm175_vm2, %v6684_v2  ;;  %215 = vst.msk [vmem:[#allocation2 + $0xa4] sm:$0x1] %vm175_vm2, %v6684_v2  ;;  %v298_v32 = vshrl.u32 %v232_v27, 16  ;;  %v301_v33 = vshll.u32 %v232_v27, 16 }
  0x27   : > { %218 = vst.msk [vmem:[#allocation2 + $0xb0] sm:$0x1] %vm175_vm2, %v6684_v2  ;;  %221 = vst.msk [vmem:[#allocation2 + $0xbc] sm:$0x1] %vm175_vm2, %v6684_v2  ;;  %v287_v36 = vrot.slane %v283_v24, 4  ;;  %v291_v37 = vrot.slane %v289_v25, 7 }
  0x28   : > { %224 = vst.msk [vmem:[#allocation2 + $0xc8] sm:$0x1] %vm175_vm2, %v6684_v2  ;;  %227 = vst.msk [vmem:[#allocation2 + $0xd4] sm:$0x1] %vm175_vm2, %v6684_v2  ;;  %v603_v38 = vld [vmem:[#allocation2 + $0x24] sm:$0xf] }
  0x29   : > { %vm6867_vm7 = vmand %vm172_vm1, %vm585_vm6  ;;  %v300_v40 = vrot.slane %v298_v32, 7  ;;  %v306_v41 = vshrl.u32 %v233_v31, 16  ;;  %v309_v42 = vshll.u32 %v233_v31, 16  ;;  %v600_v44 = vld [vmem:[#allocation2 + $0x20] sm:$0x1]  ;;  %v294_v46 = vor.u32 %v292_v26, %v291_v37  ;;  %s5840_s15 = sshll.u32 %s8585_s13, 8 }
  0x2a   : > { %vm6874_vm8 = vmor %vm260_vm3, %vm261_vm5  ;;  %v588_v39 = vsel %vm6867_vm7, %v269_v29, %v587_v16  ;;  %v296_v47 = vrot.slane %v291_v37, 4  ;;  %v597_v48 = vsel %vm6867_vm7, %v286_v35, %v596_v21  ;;  %v593_v49 = vld [vmem:[#allocation2 + $0x14] sm:$0x1]  ;;  %v234_v50 = vld [vmem:[%s6855_s25 + $0x18] sm:$0xf]  ;;  %v279_v54 = vrot.slane %v274_v22, 4  ;;  %s8442_s18 = scalar_lea.vmem %s8546_s3, %s5840_s15 }
  0x2b   : > { %vm6883_vm9 = vmand %vm175_vm2, %vm260_vm3  ;;  %v278_v45 = vsel %vm6874_vm8, %v270_v30, %v277_v34  ;;  %589 = vst [vmem:[#allocation2 + $0xc] sm:$0xf] %v588_v39  ;;  %v303_v51 = vor.u32 %v301_v33, %v300_v40  ;;  %v304_v52 = vrot.slane %v300_v40, 4  ;;  %v308_v53 = vrot.slane %v306_v41, 7  ;;  %v235_v55 = vld [vmem:[%s6855_s25 + $0x1c] sm:$0xf] }
  0x2c   : > { %590 = vst.msk [vmem:[#allocation2 + $0x10] sm:$0xf] %vm172_vm1, %v278_v45  ;;  %598 = vst [vmem:[#allocation2 + $0x18] sm:$0xf] %v597_v48  ;;  %v295_v56 = vsel %vm6874_vm8, %v287_v36, %v294_v46  ;;  %v601_v57 = vsel %vm6883_vm9, %v296_v47, %v600_v44  ;;  %v315_v58 = vshrl.u32 %v234_v50, 16  ;;  %v318_v59 = vshll.u32 %v234_v50, 16 }
  0x2d   : > { %v236_v60 = vld [vmem:[%s6855_s25 + $0x20] sm:$0xf]  ;;  %v6900_v61 = vld [vmem:[%s6855_s25 + $0x24] sm:$0xf]  ;;  %599 = vst.msk [vmem:[#allocation2 + $0x1c] sm:$0xf] %vm172_vm1, %v295_v56  ;;  %v311_v62 = vor.u32 %v309_v42, %v308_v53  ;;  %v604_v0 = vsel %vm6867_vm7, %v303_v51, %v603_v38  ;;  %v594_v1 = vsel %vm6883_vm9, %v279_v54, %v593_v49 }
  0x2e   : > { %v313_v63 = vrot.slane %v308_v53, 4  ;;  %vm1124_vm10 = vsmask.f32 3328  ;;  %vm1125_vm11 = vsmask.f32 7440  ;;  %v317_v2 = vrot.slane %v315_v58, 7 }
  0x2f   : > { %602 = vst [vmem:[#allocation2 + $0x20] sm:$0x1] %v601_v57  ;;  %605 = vst [vmem:[#allocation2 + $0x24] sm:$0xf] %v604_v0  ;;  %v323_v3 = vshrl.u32 %v235_v55, 16  ;;  %v326_v4 = vshll.u32 %v235_v55, 16  ;;  %v312_v10 = vsel %vm6874_vm8, %v304_v52, %v311_v62 }
  0x30   : > { %595 = vst [vmem:[#allocation2 + $0x14] sm:$0x1] %v594_v1  ;;  %v332_v8 = vshrl.u32 %v236_v60, 16  ;;  %v607_v9 = vld [vmem:[#allocation2 + $0x2c] sm:$0x1]  ;;  %v6911_v11 = vsel %vm879_vm0, %v6847_v6, 0  ;;  %v320_v15 = vor.u32 %v318_v59, %v317_v2  ;;  %vm6970_vm12 = vmor %vm1124_vm10, %vm1125_vm11 }
  0x31   : > { %v610_v12 = vld [vmem:[#allocation2 + $0x30] sm:$0xf]  ;;  %v335_v13 = vshll.u32 %v236_v60, 16  ;;  %v340_v14 = vshrl.u32 %v6900_v61, 16  ;;  %606 = vst.msk [vmem:[#allocation2 + $0x28] sm:$0xf] %vm172_vm1, %v312_v10  ;;  %v608_v25 = vsel %vm6883_vm9, %v313_v63, %v607_v9 }
  0x32   : > { %v321_v16 = vrot.slane %v317_v2, 4  ;;  %v325_v17 = vrot.slane %v323_v3, 7  ;;  %v6915_v18 = vrot.slane %v332_v8, 7  ;;  %v617_v19 = vld [vmem:[#allocation2 + $0x3c] sm:$0xf]  ;;  %v343_v24 = vshll.u32 %v6900_v61, 16 }
  0x33   : > { %v614_v20 = vld [vmem:[#allocation2 + $0x38] sm:$0x1]  ;;  %v6920_v21 = vld [vmem:[%s8544_s1 + $0xc] sm:$0x3]  ;;  %v6922_v22 = vrot.slane %v340_v14, 7  ;;  %v611_v32 = vsel %vm6867_vm7, %v320_v15, %v610_v12  ;;  %vm1867_vm13 = vcmask 1042432  }
  0x34   : > { %v2630_v6 = vld [vmem:[#allocation2 + $0xc] sm:$0xf]  ;;  %v6928_v26 = vld [vmem:[%s6855_s25 + $0x28] sm:$0xf]  ;;  %v6933_v27 = vld [vmem:[%s8544_s1 + $0x4] sm:$0x3]  ;;  %v328_v31 = vor.u32 %v326_v4, %v325_v17  ;;  %v337_v33 = vor.u32 %v335_v13, %v6915_v18 }
  0x35   : > { %v6610_v29 = vld [vmem:[#allocation2 + $0xc] sm:$0xff]   ;;  %v2679_v30 = vshrl.u32 %v2630_v6, 16  ;;  %609 = vst [vmem:[#allocation2 + $0x2c] sm:$0x1] %v608_v25  ;;  %v2682_v35 = vshll.u32 %v2630_v6, 16  ;;  %v330_v37 = vrot.slane %v325_v17, 4  ;;  %v345_v57 = vor.u32 %v343_v24, %v6922_v22 }
  0x36   : > { %v6938_v34 = vld [vmem:[#allocation2 + $0x10] sm:$0xf]  ;;  %v2633_v36 = vld [vmem:[#allocation2 + $0x18] sm:$0xf]  ;;  %612 = vst [vmem:[#allocation2 + $0x30] sm:$0xf] %v611_v32  ;;  %5997 = vmatmul.mubr.msk.bf16.vlgmr.msra.gmra.mrb[0].mxu1 %vm830_vm4, %v6610_v29  ;;  %v329_v42 = vsel %vm6874_vm8, %v321_v16, %v328_v31  ;;  %v618_v46 = vsel %vm6867_vm7, %v337_v33, %v617_v19 }
  0x37   : > { %v6611_v38 = vld [vmem:[#allocation2 + $0x18] sm:$0xff]   ;;  %v2681_v39 = vrot.slane %v2679_v30, 4  ;;  %v2688_v40 = vshll.u32 %v6938_v34, 16  ;;  %v2692_v41 = vshrl.u32 %v6938_v34, 16  ;;  %6029 = vmatpush3.bf16.msra.mxu1 %v6858_v7  ;;  %v6946_v44 = vld [vmem:[#allocation2 + $0x14] sm:$0x1]  ;;  %v615_v47 = vsel %vm6883_vm9, %v330_v37, %v614_v20 }
  0x38   : > { %v2684_v45 = vrot.slane %v2682_v35, 5  ;;  %613 = vst.msk [vmem:[#allocation2 + $0x34] sm:$0xf] %vm172_vm1, %v329_v42  ;;  %v6955_v48 = vsel %vm879_vm0, %v6920_v21, 0  ;;  %6000 = vmatprep.mubr.msk.bf16.mxu1 %vm830_vm4, %v6611_v38  ;;  %v2698_v7 = vshll.u32 %v6946_v44, 16  ;;  %v349_v52 = vshrl.u32 %v6928_v26, 16  ;;  %6592 = vmatprep.subr.msk.bf16.mxu1 %vm879_vm0, %v6933_v27 }
  0x39   : > { %v2690_v49 = vrot.slane %v2688_v40, 5  ;;  %v2694_v50 = vrot.slane %v2692_v41, 4  ;;  %v6959_v51 = vld [vmem:[#allocation2 + $0x1c] sm:$0xf]  ;;  %619 = vst [vmem:[#allocation2 + $0x3c] sm:$0xf] %v618_v46 }
  0x3a   : > { %616 = vst [vmem:[#allocation2 + $0x38] sm:$0x1] %v615_v47  ;;  %v2685_v53 = vor.u32 %v2684_v45, %v2681_v39  ;;  %v3420_v54 = vrot.slane %v6938_v34, 5  ;;  %v6965_v55 = vld [vmem:[#allocation2 + $0x20] sm:$0x1]  ;;  %v2703_v56 = vshrl.u32 %v2633_v36, 16 }
  0x3b   : > { %v6612_v58 = vld [vmem:[#allocation2 + $0x24] sm:$0xff]   ;;  %v2695_v60 = vor.u32 %v2694_v50, %v2690_v49  ;;  %v2700_v61 = vrot.slane %v2698_v7, 5  ;;  %v2706_v62 = vshll.u32 %v2633_v36, 16  ;;  %v2712_v63 = vshll.u32 %v6959_v51, 16 }
  0x3c   : > { %v2686_v0 = vrot.slane %v2685_v53, 4  ;;  %v2705_v1 = vrot.slane %v2703_v56, 4  ;;  %v2716_v2 = vshrl.u32 %v6959_v51, 16  ;;  %v2722_v3 = vshll.u32 %v6965_v55, 16  ;;  %v2636_v4 = vld [vmem:[#allocation2 + $0x24] sm:$0xf] }
  0x3d   : > { %v2696_v8 = vrot.slane %v2695_v60, 4  ;;  %v3423_v9 = vrot.slane %v6946_v44, 5  ;;  %v2708_v10 = vrot.slane %v2706_v62, 5  ;;  %v2714_v12 = vrot.slane %v2712_v63, 5  ;;  %v6981_v17 = vld [vmem:[#allocation2 + $0x28] sm:$0xf] }
  0x3e   : > { %v2691_v13 = vsel %vm6970_vm12, %v2686_v0, %v2690_v49  ;;  %v2718_v14 = vrot.slane %v2716_v2, 4  ;;  %v2724_v15 = vrot.slane %v2722_v3, 5  ;;  %v3427_v16 = vrot.slane %v6959_v51, 5  ;;  %6001 = vmatmul.mubr.msk.bf16.gmra.mrb[4].mxu1 %vm830_vm4, %v6612_v58  ;;  %v6987_v25 = vld [vmem:[#allocation2 + $0x2c] sm:$0x1] }
  0x3f   : > { %v2701_v19 = vsel %vm6970_vm12, %v2696_v8, %v2700_v61  ;;  %v2709_v20 = vor.u32 %v2708_v10, %v2705_v1  ;;  %v6613_v6 = vld [vmem:[#allocation2 + $0x30] sm:$0xff]   ;;  %v338_v24 = vrot.slane %v6915_v18, 4  ;;  %v347_v31 = vrot.slane %v6922_v22, 4  ;;  %v239_v63 = vld [vmem:[%s6855_s25 + $0x2c] sm:$0xf] }
  0x40   : > { %v5645_v29 = vcombine.low %v2691_v13, %v2701_v19  ;;  %v2719_v30 = vor.u32 %v2718_v14, %v2714_v12  ;;  %v2727_v32 = vshrl.u32 %v2636_v4, 16  ;;  %v2639_v33 = vld [vmem:[#allocation2 + $0x30] sm:$0xf]  ;;  %6004 = vmatprep.mubr.msk.bf16.mxu1 %vm830_vm4, %v6613_v6  ;;  %v2730_v37 = vshll.u32 %v2636_v4, 16  ;;  %v6998_v42 = vld [vmem:[#allocation2 + $0x34] sm:$0xf] }
  0x41   : > { %v2710_v35 = vrot.slane %v2709_v20, 4  ;;  %v346_v36 = vsel %vm6874_vm8, %v338_v24, %v345_v57  ;;  %v2736_v38 = vshll.u32 %v6981_v17, 16  ;;  %v2740_v40 = vshrl.u32 %v6981_v17, 16  ;;  %v7002_v49 = vld [vmem:[#allocation2 + $0x38] sm:$0x1] }
  0x42   : > { %6132 = vmatprep.mubr.msk.bf16.mxu0 %vm830_vm4, %v5645_v29  ;;  %v2720_v18 = vrot.slane %v2719_v30, 4  ;;  %620 = vst.msk [vmem:[#allocation2 + $0x40] sm:$0xf] %vm172_vm1, %v346_v36  ;;  %v2729_v39 = vrot.slane %v2727_v32, 4  ;;  %v2746_v41 = vshll.u32 %v6987_v25, 16  ;;  %v2732_v46 = vrot.slane %v2730_v37, 5 }
  0x43   : > { %v2715_v45 = vsel %vm6970_vm12, %v2710_v35, %v2714_v12  ;;  %v2738_v47 = vrot.slane %v2736_v38, 5  ;;  %v2751_v50 = vshrl.u32 %v2639_v33, 16  ;;  %v2742_v53 = vrot.slane %v2740_v40, 4  ;;  %v624_v4 = vld [vmem:[#allocation2 + $0x48] sm:$0xf] }
  0x44   : > { %v2725_v7 = vsel %vm6970_vm12, %v2720_v18, %v2724_v15  ;;  %v2748_v56 = vrot.slane %v2746_v41, 5  ;;  %v2754_v57 = vshll.u32 %v2639_v33, 16  ;;  %v2733_v60 = vor.u32 %v2732_v46, %v2729_v39  ;;  %v240_v14 = vld [vmem:[%s6855_s25 + $0x30] sm:$0xf]  ;;  %v241_v24 = vld [vmem:[%s6855_s25 + $0x34] sm:$0xf] }
  0x45   : > { %v5646_v58 = vcombine.low %v2715_v45, %v2725_v7  ;;  %v2753_v61 = vrot.slane %v2751_v50, 4  ;;  %v2760_v62 = vshll.u32 %v6998_v42, 16  ;;  %v2743_v0 = vor.u32 %v2742_v53, %v2738_v47  ;;  %v621_v40 = vld [vmem:[#allocation2 + $0x44] sm:$0x1]  ;;  %v2642_v41 = vld [vmem:[#allocation2 + $0x3c] sm:$0xf] }
  0x46   : > { %v2756_v1 = vrot.slane %v2754_v57, 5  ;;  %v2764_v2 = vshrl.u32 %v6998_v42, 16  ;;  %v2770_v3 = vshll.u32 %v7002_v49, 16  ;;  %v2734_v8 = vrot.slane %v2733_v60, 4  ;;  %v631_v57 = vld [vmem:[#allocation2 + $0x54] sm:$0xf] }
  0x47   : > { %6133 = vmatmul.mubr.msk.bf16.vlgmr.msra.gmra.mrb[0].mxu0 %vm830_vm4, %v5646_v58  ;;  %v2762_v10 = vrot.slane %v2760_v62, 5  ;;  %v351_v12 = vrot.slane %v349_v52, 7  ;;  %v352_v13 = vshll.u32 %v6928_v26, 16  ;;  %v2744_v15 = vrot.slane %v2743_v0, 4  ;;  %v628_v0 = vld [vmem:[#allocation2 + $0x50] sm:$0x1] }
  0x48   : > { %6165 = vmatpush3.bf16.msra.mxu0 %v6911_v11  ;;  %v2757_v19 = vor.u32 %v2756_v1, %v2753_v61  ;;  %v2766_v20 = vrot.slane %v2764_v2, 4  ;;  %v2772_v6 = vrot.slane %v2770_v3, 5  ;;  %v2739_v30 = vsel %vm6970_vm12, %v2734_v8, %v2738_v47  ;;  %v242_v8 = vld [vmem:[%s6855_s25 + $0x38] sm:$0xf] }
  0x49   : > { %v6614_v29 = vld [vmem:[#allocation2 + $0x3c] sm:$0xff]   ;;  %v354_v32 = vor.u32 %v352_v13, %v351_v12  ;;  %v355_v33 = vrot.slane %v351_v12, 4  ;;  %v357_v35 = vshrl.u32 %v239_v63, 16  ;;  %6597 = vmatprep.subr.msk.bf16.mxu0 %vm879_vm0, %v6920_v21  ;;  %v2749_v26 = vsel %vm6970_vm12, %v2744_v15, %v2748_v56 }
  0x4a   : > { %v2758_v52 = vrot.slane %v2757_v19, 4  ;;  %v2767_v11 = vor.u32 %v2766_v20, %v2762_v10  ;;  %v360_v36 = vshll.u32 %v239_v63, 16  ;;  %6005 = vmatmul.mubr.msk.bf16.gmra.mrb[8].mxu1 %vm830_vm4, %v6614_v29  ;;  %v5647_v37 = vcombine.low %v2739_v30, %v2749_v26  ;;  %v7035_v62 = vld [vmem:[#allocation2 + $0x40] sm:$0xf]  ;;  %v243_v29 = vld [vmem:[%s6855_s25 + $0x3c] sm:$0xf] }
  0x4b   : > { %v359_v38 = vrot.slane %v357_v35, 7  ;;  %v625_v18 = vsel %vm6867_vm7, %v354_v32, %v624_v4  ;;  %v366_v39 = vshrl.u32 %v240_v14, 16  ;;  %v369_v46 = vshll.u32 %v240_v14, 16 }
  0x4c   : > { %v2763_v45 = vsel %vm6970_vm12, %v2758_v52, %v2762_v10  ;;  %v2768_v21 = vrot.slane %v2767_v11, 4  ;;  %626 = vst [vmem:[#allocation2 + $0x48] sm:$0xf] %v625_v18  ;;  %v374_v47 = vshrl.u32 %v241_v24, 16  ;;  %6136 = vmatprep.mubr.msk.bf16.mxu0 %vm830_vm4, %v5647_v37  ;;  %v377_v56 = vshll.u32 %v241_v24, 16 }
  0x4d   : > { %v362_v50 = vor.u32 %v360_v36, %v359_v38  ;;  %v364_v7 = vrot.slane %v359_v38, 4  ;;  %v368_v53 = vrot.slane %v366_v39, 7  ;;  %v622_v61 = vsel %vm6883_vm9, %v347_v31, %v621_v40  ;;  %v635_v31 = vld [vmem:[#allocation2 + $0x5c] sm:$0x1]  ;;  %v244_v18 = vld [vmem:[%s6855_s25 + $0x40] sm:$0xf] }
  0x4e   : > { %v2773_v58 = vsel %vm6970_vm12, %v2768_v21, %v2772_v6  ;;  %v376_v60 = vrot.slane %v374_v47, 7  ;;  %v2775_v63 = vshrl.u32 %v2642_v41, 16  ;;  %623 = vst [vmem:[#allocation2 + $0x44] sm:$0x1] %v622_v61  ;;  %v2778_v13 = vshll.u32 %v2642_v41, 16 }
  0x4f   : > { %v5648_v1 = vcombine.low %v2763_v45, %v2773_v58  ;;  %v363_v2 = vsel %vm6874_vm8, %v355_v33, %v362_v50  ;;  %v371_v3 = vor.u32 %v369_v46, %v368_v53  ;;  %v372_v4 = vrot.slane %v368_v53, 4  ;;  %v638_v21 = vld [vmem:[#allocation2 + $0x60] sm:$0xf] }
  0x50   : > { %627 = vst.msk [vmem:[#allocation2 + $0x4c] sm:$0xf] %vm172_vm1, %v363_v2  ;;  %v379_v10 = vor.u32 %v377_v56, %v376_v60  ;;  %v381_v22 = vrot.slane %v376_v60, 4  ;;  %v2777_v12 = vrot.slane %v2775_v63, 4  ;;  %v2784_v15 = vshll.u32 %v7035_v62, 16 }
  0x51   : > { %6137 = vmatmul.mubr.msk.bf16.gmra.mrb[4].mxu0 %vm830_vm4, %v5648_v1  ;;  %v632_v14 = vsel %vm6867_vm7, %v371_v3, %v631_v57  ;;  %v2788_v19 = vshrl.u32 %v7035_v62, 16  ;;  %v629_v20 = vsel %vm6883_vm9, %v364_v7, %v628_v0  ;;  %v2780_v24 = vrot.slane %v2778_v13, 5  ;;  %v245_v3 = vld [vmem:[%s6855_s25 + $0x44] sm:$0xf] }
  0x52   : > { %v380_v6 = vsel %vm6874_vm8, %v372_v4, %v379_v10  ;;  %633 = vst [vmem:[#allocation2 + $0x54] sm:$0xf] %v632_v14  ;;  %630 = vst [vmem:[#allocation2 + $0x50] sm:$0x1] %v629_v20  ;;  %v383_v30 = vshrl.u32 %v242_v8, 16  ;;  %v386_v32 = vshll.u32 %v242_v8, 16  ;;  %v636_v52 = vsel %vm6883_vm9, %v381_v22, %v635_v31 }
  0x53   : > { %634 = vst.msk [vmem:[#allocation2 + $0x58] sm:$0xf] %vm172_vm1, %v380_v6  ;;  %v2786_v33 = vrot.slane %v2784_v15, 5  ;;  %v2790_v35 = vrot.slane %v2788_v19, 4  ;;  %v2645_v26 = vld [vmem:[#allocation2 + $0x48] sm:$0xf]  ;;  %v2781_v11 = vor.u32 %v2780_v24, %v2777_v12 }
  0x54   : > { %v2799_v36 = vshrl.u32 %v2645_v26, 16  ;;  %v2802_v37 = vshll.u32 %v2645_v26, 16  ;;  %v385_v38 = vrot.slane %v383_v30, 7  ;;  %637 = vst [vmem:[#allocation2 + $0x5c] sm:$0x1] %v636_v52  ;;  %v3430_v39 = vrot.slane %v6965_v55, 5 }
  0x55   : > { %v2791_v40 = vor.u32 %v2790_v35, %v2786_v33  ;;  %v391_v41 = vshrl.u32 %v243_v29, 16  ;;  %v394_v45 = vshll.u32 %v243_v29, 16  ;;  %v7056_v46 = vld [vmem:[#allocation2 + $0x44] sm:$0x1]  ;;  %v2782_v47 = vrot.slane %v2781_v11, 4 }
  0x56   : > { %v2801_v50 = vrot.slane %v2799_v36, 4  ;;  %v2804_v7 = vrot.slane %v2802_v37, 5  ;;  %v388_v53 = vor.u32 %v386_v32, %v385_v38  ;;  %v2794_v58 = vshll.u32 %v7056_v46, 16 }
  0x57   : > { %v6615_v56 = vld [vmem:[#allocation2 + $0x48] sm:$0xff]   ;;  %v2792_v57 = vrot.slane %v2791_v40, 4  ;;  %v400_v60 = vshrl.u32 %v244_v18, 16  ;;  %v389_v0 = vrot.slane %v385_v38, 4  ;;  %v393_v1 = vrot.slane %v391_v41, 7 }
  0x58   : > { %v7059_v61 = vld [vmem:[#allocation2 + $0x4c] sm:$0xf]  ;;  %v2805_v63 = vor.u32 %v2804_v7, %v2801_v50  ;;  %v639_v2 = vsel %vm6867_vm7, %v388_v53, %v638_v21  ;;  %6008 = vmatprep.mubr.msk.bf16.mxu1 %vm830_vm4, %v6615_v56  ;;  %v2787_v4 = vsel %vm6970_vm12, %v2782_v47, %v2786_v33  ;;  %v2796_v8 = vrot.slane %v2794_v58, 5 }
  0x59   : > { %v7067_v10 = vld [vmem:[#allocation2 + $0x50] sm:$0x1]  ;;  %v2808_v22 = vshll.u32 %v7059_v61, 16  ;;  %640 = vst [vmem:[#allocation2 + $0x60] sm:$0xf] %v639_v2  ;;  %v2812_v31 = vshrl.u32 %v7059_v61, 16  ;;  %v396_v15 = vor.u32 %v394_v45, %v393_v1 }
  0x5a   : > { %v6616_v12 = vld [vmem:[#allocation2 + $0x54] sm:$0xff]   ;;  %v2806_v13 = vrot.slane %v2805_v63, 4  ;;  %v2818_v14 = vshll.u32 %v7067_v10, 16  ;;  %v2797_v19 = vsel %vm6970_vm12, %v2792_v57, %v2796_v8  ;;  %v398_v6 = vrot.slane %v393_v1, 4  ;;  %v645_v45 = vld [vmem:[#allocation2 + $0x6c] sm:$0xf] }
  0x5b   : > { %v2810_v20 = vrot.slane %v2808_v22, 5  ;;  %v402_v24 = vrot.slane %v400_v60, 7  ;;  %v2648_v29 = vld [vmem:[#allocation2 + $0x54] sm:$0xf]  ;;  %6009 = vmatmul.mubr.msk.bf16.gmra.mrb[12].mxu1 %vm830_vm4, %v6616_v12  ;;  %v5649_v30 = vcombine.low %v2787_v4, %v2797_v19  ;;  %v2814_v32 = vrot.slane %v2812_v31, 4 }
  0x5c   : > { %v2820_v33 = vrot.slane %v2818_v14, 5  ;;  %v397_v35 = vsel %vm6874_vm8, %v389_v0, %v396_v15  ;;  %v7077_v26 = vld [vmem:[#allocation2 + $0x58] sm:$0xf]  ;;  %v403_v11 = vshll.u32 %v244_v18, 16  ;;  %v408_v37 = vshrl.u32 %v245_v3, 16 }
  0x5d   : > { %v2811_v52 = vsel %vm6970_vm12, %v2806_v13, %v2810_v20  ;;  %641 = vst.msk [vmem:[#allocation2 + $0x64] sm:$0xf] %vm172_vm1, %v397_v35  ;;  %v406_v36 = vrot.slane %v402_v24, 4  ;;  %v7082_v38 = vld [vmem:[#allocation2 + $0x5c] sm:$0x1]  ;;  %6140 = vmatprep.mubr.msk.bf16.mxu0 %vm830_vm4, %v5649_v30  ;;  %v2815_v40 = vor.u32 %v2814_v32, %v2810_v20  ;;  %v411_v41 = vshll.u32 %v245_v3, 16 }
  0x5e   : > { %v2823_v21 = vshrl.u32 %v2648_v29, 16  ;;  %v2826_v47 = vshll.u32 %v2648_v29, 16  ;;  %v405_v50 = vor.u32 %v403_v11, %v402_v24  ;;  %v7085_v7 = vrot.slane %v408_v37, 7  ;;  %v642_v57 = vld [vmem:[#allocation2 + $0x68] sm:$0x1] }
  0x5f   : > { %v2832_v53 = vshll.u32 %v7077_v26, 16  ;;  %v2836_v56 = vshrl.u32 %v7077_v26, 16  ;;  %v2816_v18 = vrot.slane %v2815_v40, 4  ;;  %v2842_v63 = vshll.u32 %v7082_v38, 16  ;;  %v246_v20 = vld [vmem:[%s6855_s25 + $0x48] sm:$0xf] }
  0x60   : > { %v2825_v58 = vrot.slane %v2823_v21, 4  ;;  %v2828_v60 = vrot.slane %v2826_v47, 5  ;;  %v7092_v0 = vrot.slane %v3427_v16, 4  ;;  %v413_v1 = vor.u32 %v411_v41, %v7085_v7  ;;  %v2651_v4 = vld [vmem:[#allocation2 + $0x60] sm:$0xf] }
  0x61   : > { %v646_v2 = vsel %vm6867_vm7, %v405_v50, %v645_v45  ;;  %v2834_v3 = vrot.slane %v2832_v53, 5  ;;  %v2821_v8 = vsel %vm6970_vm12, %v2816_v18, %v2820_v33  ;;  %v2838_v12 = vrot.slane %v2836_v56, 4  ;;  %v247_v24 = vld [vmem:[%s6855_s25 + $0x4c] sm:$0xf] }
  0x62   : > { %647 = vst [vmem:[#allocation2 + $0x6c] sm:$0xf] %v646_v2  ;;  %v2829_v22 = vor.u32 %v2828_v60, %v2825_v58  ;;  %v2844_v13 = vrot.slane %v2842_v63, 5  ;;  %vm1868_vm14 = vcmask 1046532   ;;  %v5650_v31 = vcombine.low %v2811_v52, %v2821_v8  ;;  %v652_v58 = vld [vmem:[#allocation2 + $0x78] sm:$0xf] }
  0x63   : > { %v414_v14 = vsel %vm6874_vm8, %v406_v36, %v413_v1  ;;  %v643_v15 = vsel %vm6883_vm9, %v398_v6, %v642_v57  ;;  %v2847_v19 = vshrl.u32 %v2651_v4, 16  ;;  %v2839_v32 = vor.u32 %v2838_v12, %v2834_v3  ;;  %v248_v6 = vld [vmem:[%s6855_s25 + $0x50] sm:$0xf]  ;;  %vm7135_vm15 = vmor %vm1867_vm13, %vm1868_vm14 }
  0x64   : > { %v6617_v29 = vld [vmem:[#allocation2 + $0x60] sm:$0xff]   ;;  %648 = vst.msk [vmem:[#allocation2 + $0x70] sm:$0xf] %vm172_vm1, %v414_v14  ;;  %v2830_v30 = vrot.slane %v2829_v22, 4  ;;  %644 = vst [vmem:[#allocation2 + $0x68] sm:$0x1] %v643_v15  ;;  %6141 = vmatmul.mubr.msk.bf16.gmra.mrb[8].mxu0 %vm830_vm4, %v5650_v31  ;;  %v3431_v44 = vsel %vm7135_vm15, %v7092_v0, %v3430_v39 }
  0x65   : > { %v7106_v33 = vld [vmem:[#allocation2 + $0x64] sm:$0xf]  ;;  %v2849_v35 = vrot.slane %v2847_v19, 4  ;;  %v2850_v52 = vshll.u32 %v2651_v4, 16  ;;  %6012 = vmatprep.mubr.msk.bf16.mxu1 %vm830_vm4, %v6617_v29  ;;  %v2840_v40 = vrot.slane %v2839_v32, 4  ;;  %v417_v41 = vshrl.u32 %v246_v20, 16 }
  0x66   : > { %v2856_v11 = vshll.u32 %v7106_v33, 16  ;;  %v2860_v36 = vshrl.u32 %v7106_v33, 16  ;;  %v2835_v37 = vsel %vm6970_vm12, %v2830_v30, %v2834_v3  ;;  %v420_v45 = vshll.u32 %v246_v20, 16  ;;  %v249_v3 = vld [vmem:[%s6855_s25 + $0x54] sm:$0xf] }
  0x67   : > { %v2852_v21 = vrot.slane %v2850_v52, 5  ;;  %v425_v53 = vshrl.u32 %v247_v24, 16  ;;  %v2845_v56 = vsel %vm6970_vm12, %v2840_v40, %v2844_v13  ;;  %v419_v57 = vrot.slane %v417_v41, 7  ;;  %v659_v14 = vld [vmem:[#allocation2 + $0x84] sm:$0xf] }
  0x68   : > { %v2858_v47 = vrot.slane %v2856_v11, 5  ;;  %v2862_v50 = vrot.slane %v2860_v36, 4  ;;  %v428_v18 = vshll.u32 %v247_v24, 16  ;;  %v434_v60 = vshrl.u32 %v248_v6, 16  ;;  %v3354_v15 = vld [vmem:[#allocation2 + $0xc] sm:$0xe] }
  0x69   : > { %v5651_v63 = vcombine.low %v2835_v37, %v2845_v56  ;;  %v2853_v1 = vor.u32 %v2852_v21, %v2849_v35  ;;  %v7117_v4 = vrot.slane %v425_v53, 7  ;;  %v422_v8 = vor.u32 %v420_v45, %v419_v57  ;;  %v3355_v35 = vld [vmem:[#allocation2 + $0x18] sm:$0xe] }
  0x6a   : > { %v2863_v2 = vor.u32 %v2862_v50, %v2858_v47  ;;  %v423_v22 = vrot.slane %v419_v57, 4  ;;  %v436_v12 = vrot.slane %v434_v60, 7  ;;  %v437_v31 = vshll.u32 %v248_v6, 16  ;;  %v250_v52 = vld [vmem:[%s6855_s25 + $0x58] sm:$0xf] }
  0x6b   : > { %v6618_v19 = vld [vmem:[#allocation2 + $0x6c] sm:$0xff]   ;;  %6144 = vmatprep.mubr.msk.bf16.mxu0 %vm830_vm4, %v5651_v63  ;;  %v7121_v13 = vld [vmem:[#allocation2 + $0x68] sm:$0x1]  ;;  %v2854_v20 = vrot.slane %v2853_v1, 4  ;;  %v430_v24 = vor.u32 %v428_v18, %v7117_v4  ;;  %v653_v32 = vsel %vm6867_vm7, %v422_v8, %v652_v58  ;;  %v442_v45 = vshrl.u32 %v249_v3, 16 }
  0x6c   : > { %v2864_v29 = vrot.slane %v2863_v2, 4  ;;  %v2866_v30 = vshll.u32 %v7121_v13, 16  ;;  %6013 = vmatmul.mubr.msk.bf16.gmra.mrb[16].mxu1 %vm830_vm4, %v6618_v19  ;;  %654 = vst [vmem:[#allocation2 + $0x78] sm:$0xf] %v653_v32  ;;  %v439_v6 = vor.u32 %v437_v31, %v436_v12  ;;  %v440_v37 = vrot.slane %v436_v12, 4 }
  0x6d   : > { %v2859_v11 = vsel %vm6970_vm12, %v2854_v20, %v2858_v47  ;;  %v431_v36 = vsel %vm6874_vm8, %v423_v22, %v430_v24  ;;  %v445_v21 = vshll.u32 %v249_v3, 16  ;;  %v5677_v47 = vrot.slane %v3354_v15, 9  ;;  %v251_v63 = vld [vmem:[%s6855_s25 + $0x5c] sm:$0xf]  ;;  %v252_v22 = vld [vmem:[%s6855_s25 + $0x60] sm:$0xf] }
  0x6e   : > { %v2868_v41 = vrot.slane %v2866_v30, 5  ;;  %655 = vst.msk [vmem:[#allocation2 + $0x7c] sm:$0xf] %vm172_vm1, %v431_v36  ;;  %v660_v50 = vsel %vm6867_vm7, %v439_v6, %v659_v14  ;;  %v3422_v53 = vrot.slane %v3420_v54, 4  ;;  %v5678_v56 = vrot.slane %v3355_v35, 9 }
  0x6f   : > { %v451_v57 = vshrl.u32 %v250_v52, 16  ;;  %v7146_v58 = vrot.slane %v442_v45, 7  ;;  %661 = vst [vmem:[#allocation2 + $0x84] sm:$0xf] %v660_v50  ;;  %v3421_v60 = vsel %vm7135_vm15, %v5677_v47, %v3420_v54  ;;  %v454_v1 = vshll.u32 %v250_v52, 16 }
  0x70   : > { %v2869_v18 = vsel %vm6970_vm12, %v2864_v29, %v2868_v41  ;;  %v3424_v3 = vsel %vm7135_vm15, %v3422_v53, %v3423_v9  ;;  %v253_v12 = vld [vmem:[%s6855_s25 + $0x64] sm:$0xf]  ;;  %v7161_v31 = vsel %vm879_vm0, %v6933_v27, 0  ;;  %v3428_v54 = vsel %vm7135_vm15, %v5678_v56, %v3427_v16  ;;  %v666_v9 = vld [vmem:[#allocation2 + $0x90] sm:$0xf] }
  0x71   : > { %v5652_v2 = vcombine.low %v2859_v11, %v2869_v18  ;;  %v453_v8 = vrot.slane %v451_v57, 7  ;;  %v447_v34 = vor.u32 %v445_v21, %v7146_v58  ;;  %v5693_v14 = vcombine.low %v3421_v60, %v3424_v3  ;;  %v3356_v15 = vld [vmem:[#allocation2 + $0x24] sm:$0xe]  ;;  %v3357_v29 = vld [vmem:[#allocation2 + $0x30] sm:$0xe] }
  0x72   : > { %v459_v20 = vshrl.u32 %v251_v63, 16  ;;  %v462_v24 = vshll.u32 %v251_v63, 16  ;;  %v468_v16 = vshrl.u32 %v252_v22, 16  ;;  %v471_v55 = vshll.u32 %v252_v22, 16  ;;  %v254_v60 = vld [vmem:[%s6855_s25 + $0x68] sm:$0xf] }
  0x73   : > { %6145 = vmatmul.mubr.msk.bf16.gmra.mrb[12].mxu0 %vm830_vm4, %v5652_v2  ;;  %v456_v27 = vor.u32 %v454_v1, %v453_v8  ;;  %v457_v19 = vrot.slane %v453_v8, 4  ;;  %v448_v51 = vsel %vm6874_vm8, %v440_v37, %v447_v34  ;;  %v476_v30 = vshrl.u32 %v253_v12, 16  ;;  %v673_v37 = vld [vmem:[#allocation2 + $0x9c] sm:$0xf]  ;;  %v255_v63 = vld [vmem:[%s6855_s25 + $0x6c] sm:$0xf] }
  0x74   : > { %6166 = vmatprep.mubr.msk.bf16.mxu0 %vm830_vm4, %v5693_v14  ;;  %662 = vst.msk [vmem:[#allocation2 + $0x88] sm:$0xf] %vm172_vm1, %v448_v51  ;;  %v7178_v39 = vrot.slane %v459_v20, 7  ;;  %v479_v35 = vshll.u32 %v253_v12, 16  ;;  %v5679_v52 = vrot.slane %v3356_v15, 9  ;;  %v5694_v11 = vcombine.low %v3428_v54, %v3431_v44 }
  0x75   : > { %v6619_v32 = vld [vmem:[#allocation2 + $0x78] sm:$0xff]   ;;  %v667_v0 = vsel %vm6867_vm7, %v456_v27, %v666_v9  ;;  %v470_v36 = vrot.slane %v468_v16, 7  ;;  %v7182_v6 = vrot.slane %v476_v30, 7  ;;  %v3434_v41 = vrot.slane %v6981_v17, 5  ;;  %v257_v34 = vld [vmem:[%s6855_s25 + $0x74] sm:$0xf] }
  0x76   : > { %668 = vst [vmem:[#allocation2 + $0x90] sm:$0xf] %v667_v0  ;;  %6016 = vmatprep.mubr.msk.bf16.mxu1 %vm830_vm4, %v6619_v32  ;;  %v464_v45 = vor.u32 %v462_v24, %v7178_v39  ;;  %v3437_v21 = vrot.slane %v6987_v25, 5  ;;  %v5680_v47 = vrot.slane %v3357_v29, 9  ;;  %v3441_v50 = vrot.slane %v6998_v42, 5 }
  0x77   : > { %v415_v53 = vrot.slane %v7085_v7, 4  ;;  %v473_v56 = vor.u32 %v471_v55, %v470_v36  ;;  %v474_v57 = vrot.slane %v470_v36, 4  ;;  %v481_v18 = vor.u32 %v479_v35, %v7182_v6  ;;  %v256_v42 = vld [vmem:[%s6855_s25 + $0x70] sm:$0xf]  ;;  %v3358_v15 = vld [vmem:[#allocation2 + $0x3c] sm:$0xe] }
  0x78   : > { %v465_v17 = vsel %vm6874_vm8, %v457_v19, %v464_v45  ;;  %v3435_v1 = vsel %vm7135_vm15, %v5679_v52, %v3434_v41  ;;  %v3436_v2 = vrot.slane %v3434_v41, 4  ;;  %v3442_v25 = vsel %vm7135_vm15, %v5680_v47, %v3441_v50  ;;  %v680_v24 = vld [vmem:[#allocation2 + $0xa8] sm:$0xf]  ;;  %v687_v45 = vld [vmem:[#allocation2 + $0xb4] sm:$0xf] }
  0x79   : > { %669 = vst.msk [vmem:[#allocation2 + $0x94] sm:$0xf] %vm172_vm1, %v465_v17  ;;  %v482_v3 = vsel %vm6874_vm8, %v474_v57, %v481_v18  ;;  %v674_v8 = vsel %vm6867_vm7, %v473_v56, %v673_v37  ;;  %v3443_v22 = vrot.slane %v3441_v50, 4  ;;  %v3444_v12 = vrot.slane %v7002_v49, 5  ;;  %v3359_v52 = vld [vmem:[#allocation2 + $0x48] sm:$0xe] }
  0x7a   : > { %675 = vst [vmem:[#allocation2 + $0x9c] sm:$0xf] %v674_v8  ;;  %676 = vst.msk [vmem:[#allocation2 + $0xa0] sm:$0xf] %vm172_vm1, %v482_v3  ;;  %v3438_v14 = vsel %vm7135_vm15, %v3436_v2, %v3437_v21  ;;  %v485_v54 = vshrl.u32 %v254_v60, 16  ;;  %v488_v44 = vshll.u32 %v254_v60, 16 }
  0x7b   : > { %6167 = vmatmul.mubr.msk.bf16.vlgmr.msra.gmra.mrb[0].mxu0 %vm830_vm4, %v5694_v11  ;;  %v493_v9 = vshrl.u32 %v255_v63, 16  ;;  %v6620_v27 = vld [vmem:[#allocation2 + $0x84] sm:$0xff]   ;;  %v5695_v19 = vcombine.low %v3435_v1, %v3438_v14  ;;  %v3445_v49 = vsel %vm7135_vm15, %v3443_v22, %v3444_v12  ;;  %v496_v20 = vshll.u32 %v255_v63, 16  ;;  %v1076_v21 = vld [vmem:[#allocation2] sm:$0xf] }
  0x7c   : > { %6199 = vmatpush3.bf16.msra.mxu0 %v6955_v48  ;;  %v502_v29 = vshrl.u32 %v256_v42, 16  ;;  %v432_v51 = vrot.slane %v7117_v4, 4  ;;  %v487_v16 = vrot.slane %v485_v54, 7  ;;  %v505_v30 = vshll.u32 %v256_v42, 16  ;;  %6017 = vmatmul.mubr.msk.bf16.gmra.mrb[20].mxu1 %vm830_vm4, %v6620_v27  ;;  %v1077_v18 = vld [vmem:[#allocation2 + $0x4] sm:$0xf] }
  0x7d   : > { %v7215_v55 = vrot.slane %v493_v9, 7  ;;  %6170 = vmatprep.mubr.msk.bf16.mxu0 %vm830_vm4, %v5695_v19  ;;  %v510_v0 = vshrl.u32 %v257_v34, 16  ;;  %v513_v48 = vshll.u32 %v257_v34, 16  ;;  %v5681_v35 = vrot.slane %v3358_v15, 9  ;;  %v1078_v22 = vld [vmem:[#allocation2 + $0x8] sm:$0x1] }
  0x7e   : > { %v504_v32 = vrot.slane %v502_v29, 7  ;;  %v5696_v11 = vcombine.low %v3442_v25, %v3445_v49  ;;  %v490_v36 = vor.u32 %v488_v44, %v487_v16  ;;  %v491_v37 = vrot.slane %v487_v16, 4  ;;  %v1079_v14 = vld [vmem:[#allocation2 + $0xc] sm:$0xf]  ;;  %v1080_v27 = vld [vmem:[#allocation2 + $0x10] sm:$0xf] }
  0x7f   : > { %v498_v41 = vor.u32 %v496_v20, %v7215_v55  ;;  %v7220_v56 = vrot.slane %v510_v0, 7  ;;  %v3448_v57 = vrot.slane %v7035_v62, 5  ;;  %v3451_v1 = vrot.slane %v7056_v46, 5  ;;  %v663_v0 = vld [vmem:[#allocation2 + $0x8c] sm:$0x1] }
  0x80   : > { %v507_v47 = vor.u32 %v505_v30, %v504_v32  ;;  %v508_v50 = vrot.slane %v504_v32, 4  ;;  %v6621_v60 = vld [vmem:[#allocation2 + $0x90] sm:$0xff]   ;;  %v681_v17 = vsel %vm6867_vm7, %v490_v36, %v680_v24  ;;  %v5682_v2 = vrot.slane %v3359_v52, 9  ;;  %v656_v24 = vld [vmem:[#allocation2 + $0x80] sm:$0x1] }
  0x81   : > { %v499_v63 = vsel %vm6874_vm8, %v491_v37, %v498_v41  ;;  %v449_v25 = vrot.slane %v7146_v58, 4  ;;  %v6622_v42 = vld [vmem:[#allocation2 + $0x9c] sm:$0xff]   ;;  %682 = vst [vmem:[#allocation2 + $0xa8] sm:$0xf] %v681_v17  ;;  %v515_v3 = vor.u32 %v513_v48, %v7220_v56  ;;  %v3449_v8 = vsel %vm7135_vm15, %v5681_v35, %v3448_v57  ;;  %6020 = vmatprep.mubr.msk.bf16.mxu1 %vm830_vm4, %v6621_v60  ;;  %v7481_v28 = vld [vmem:[#allocation2 + $0x94] sm:$0xf] }
  0x82   : > { %683 = vst.msk [vmem:[#allocation2 + $0xac] sm:$0xf] %vm172_vm1, %v499_v63  ;;  %v688_v62 = vsel %vm6867_vm7, %v507_v47, %v687_v45  ;;  %v3450_v46 = vrot.slane %v3448_v57, 4  ;;  %v3455_v58 = vrot.slane %v7059_v61, 5  ;;  %v3458_v12 = vrot.slane %v7067_v10, 5 }
  0x83   : > { %6171 = vmatmul.mubr.msk.bf16.gmra.mrb[4].mxu0 %vm830_vm4, %v5696_v11  ;;  %689 = vst [vmem:[#allocation2 + $0xb4] sm:$0xf] %v688_v62  ;;  %v1128_v34 = vshrl.u32 %v1076_v21, 16  ;;  %v516_v54 = vsel %vm6874_vm8, %v508_v50, %v515_v3  ;;  %v1131_v44 = vshll.u32 %v1076_v21, 16  ;;  %v1137_v9 = vshll.u32 %v1077_v18, 16 }
  0x84   : > { %v1141_v15 = vshrl.u32 %v1077_v18, 16  ;;  %690 = vst.msk [vmem:[#allocation2 + $0xb8] sm:$0xf] %vm172_vm1, %v516_v54  ;;  %v3452_v19 = vsel %vm7135_vm15, %v3450_v46, %v3451_v1  ;;  %v3456_v49 = vsel %vm7135_vm15, %v5682_v2, %v3455_v58  ;;  %v3457_v61 = vrot.slane %v3455_v58, 4  ;;  %v649_v10 = vld [vmem:[#allocation2 + $0x74] sm:$0x1]  ;;  %6021 = vmatmul.mubr.msk.bf16.gmra.mrb[24].mxu1 %vm830_vm4, %v6622_v42 }
  0x85   : > { %v1130_v20 = vrot.slane %v1128_v34, 4  ;;  %v5697_v29 = vcombine.low %v3449_v8, %v3452_v19  ;;  %v1133_v16 = vrot.slane %v1131_v44, 5  ;;  %v1139_v30 = vrot.slane %v1137_v9, 5  ;;  %v1081_v45 = vld [vmem:[#allocation2 + $0x14] sm:$0x1] }
  0x86   : > { %v1143_v32 = vrot.slane %v1141_v15, 4  ;;  %v3459_v48 = vsel %vm7135_vm15, %v3457_v61, %v3458_v12  ;;  %v1147_v35 = vshll.u32 %v1078_v22, 16  ;;  %v1152_v52 = vshrl.u32 %v1079_v14, 16  ;;  %v3360_v47 = vld [vmem:[#allocation2 + $0x54] sm:$0xe] }
  0x87   : > { %v1155_v11 = vshll.u32 %v1079_v14, 16  ;;  %6174 = vmatprep.mubr.msk.bf16.mxu0 %vm830_vm4, %v5697_v29  ;;  %v5698_v36 = vcombine.low %v3456_v49, %v3459_v48  ;;  %v1134_v37 = vor.u32 %v1133_v16, %v1130_v20  ;;  %v1161_v21 = vshll.u32 %v1080_v27, 16  ;;  %v3361_v62 = vld [vmem:[#allocation2 + $0x60] sm:$0xe]  ;;  %v1082_v58 = vld [vmem:[#allocation2 + $0x18] sm:$0xf] }
  0x88   : > { %v1144_v41 = vor.u32 %v1143_v32, %v1139_v30  ;;  %v1149_v57 = vrot.slane %v1147_v35, 5  ;;  %v650_v18 = vsel %vm6883_vm9, %v415_v53, %v649_v10  ;;  %v657_v60 = vsel %vm6883_vm9, %v432_v51, %v656_v24  ;;  %v7268_v44 = vld [vmem:[#allocation2 + $0x1c] sm:$0xf]  ;;  %v7280_v24 = vld [vmem:[#allocation2 + $0x20] sm:$0x1] }
  0x89   : > { %v6623_v50 = vld [vmem:[#allocation2 + $0xa8] sm:$0xff]   ;;  %v664_v63 = vsel %vm6883_vm9, %v449_v25, %v663_v0  ;;  %v1135_v17 = vrot.slane %v1134_v37, 4  ;;  %v1154_v2 = vrot.slane %v1152_v52, 4  ;;  %v1157_v42 = vrot.slane %v1155_v11, 5  ;;  %651 = vst [vmem:[#allocation2 + $0x74] sm:$0x1] %v650_v18 }
  0x8a   : > { %v1145_v1 = vrot.slane %v1144_v41, 4  ;;  %658 = vst [vmem:[#allocation2 + $0x80] sm:$0x1] %v657_v60  ;;  %665 = vst [vmem:[#allocation2 + $0x8c] sm:$0x1] %v664_v63  ;;  %6024 = vmatprep.mubr.msk.bf16.mxu1 %vm830_vm4, %v6623_v50  ;;  %v1163_v7 = vrot.slane %v1161_v21, 5 }
  0x8b   : > { %6175 = vmatmul.mubr.msk.bf16.gmra.mrb[8].mxu0 %vm830_vm4, %v5698_v36  ;;  %v1165_v53 = vshrl.u32 %v1080_v27, 16  ;;  %v1171_v4 = vshll.u32 %v1081_v45, 16  ;;  %v5683_v3 = vrot.slane %v3360_v47, 9  ;;  %v6624_v51 = vld [vmem:[#allocation2 + $0xb4] sm:$0xff]   ;;  %v1140_v25 = vsel %vm6970_vm12, %v1135_v17, %v1139_v30  ;;  %v1085_v30 = vld [vmem:[#allocation2 + $0x24] sm:$0xf] }
  0x8c   : > { %v1150_v8 = vsel %vm6970_vm12, %v1145_v1, %v1149_v57  ;;  %v1158_v22 = vor.u32 %v1157_v42, %v1154_v2  ;;  %v3462_v46 = vrot.slane %v7077_v26, 5  ;;  %v3465_v54 = vrot.slane %v7082_v38, 5  ;;  %6025 = vmatmul.mubr.msk.bf16.gmra.mrb[28].mxu1 %vm830_vm4, %v6624_v51  ;;  %v7286_v36 = vld [vmem:[#allocation2 + $0x28] sm:$0xf]  ;;  %v7294_v21 = vld [vmem:[#allocation2 + $0x2c] sm:$0x1] }
  0x8d   : > { %v5533_v12 = vcombine.low %v1140_v25, %v1150_v8  ;;  %v1167_v34 = vrot.slane %v1165_v53, 4  ;;  %v1173_v14 = vrot.slane %v1171_v4, 5  ;;  %v5684_v19 = vrot.slane %v3361_v62, 9  ;;  %v2655_v63 = vld [vmem:[#allocation2 + $0x70] sm:$0xf] }
  0x8e   : > { %v1159_v9 = vrot.slane %v1158_v22, 4  ;;  %v3463_v15 = vsel %vm7135_vm15, %v5683_v3, %v3462_v46  ;;  %v3464_v27 = vrot.slane %v3462_v46, 4  ;;  %v3469_v26 = vrot.slane %v7106_v33, 5  ;;  %v3362_v17 = vld [vmem:[#allocation2 + $0x6c] sm:$0xe] }
  0x8f   : > { %6030 = vmatprep.mubr.msk.bf16.mxu1 %vm830_vm4, %v5533_v12  ;;  %v1168_v49 = vor.u32 %v1167_v34, %v1163_v7  ;;  %v3472_v61 = vrot.slane %v7121_v13, 5  ;;  %v1176_v20 = vshrl.u32 %v1082_v58, 16  ;;  %v1179_v29 = vshll.u32 %v1082_v58, 16 }
  0x90   : > { %v1164_v38 = vsel %vm6970_vm12, %v1159_v9, %v1163_v7  ;;  %v3466_v10 = vsel %vm7135_vm15, %v3464_v27, %v3465_v54  ;;  %v1185_v16 = vshll.u32 %v7268_v44, 16  ;;  %v3470_v33 = vsel %vm7135_vm15, %v5684_v19, %v3469_v26  ;;  %v2656_v51 = vld [vmem:[#allocation2 + $0x74] sm:$0x1] }
  0x91   : > { %v1169_v32 = vrot.slane %v1168_v49, 4  ;;  %v5699_v0 = vcombine.low %v3463_v15, %v3466_v10  ;;  %v3471_v48 = vrot.slane %v3469_v26, 4  ;;  %v1178_v13 = vrot.slane %v1176_v20, 4  ;;  %v7309_v26 = vld [vmem:[#allocation2 + $0x7c] sm:$0xf] }
  0x92   : > { %v1181_v35 = vrot.slane %v1179_v29, 5  ;;  %v1187_v52 = vrot.slane %v1185_v16, 5  ;;  %v1189_v11 = vshrl.u32 %v7268_v44, 16  ;;  %v1195_v45 = vshll.u32 %v7280_v24, 16  ;;  %v7314_v16 = vld [vmem:[#allocation2 + $0x80] sm:$0x1] }
  0x93   : > { %v1174_v37 = vsel %vm6970_vm12, %v1169_v32, %v1173_v14  ;;  %6178 = vmatprep.mubr.msk.bf16.mxu0 %vm830_vm4, %v5699_v0  ;;  %v3473_v41 = vsel %vm7135_vm15, %v3471_v48, %v3472_v61  ;;  %v1200_v47 = vshrl.u32 %v1085_v30, 16  ;;  %v1203_v42 = vshll.u32 %v1085_v30, 16  ;;  %v3363_v61 = vld [vmem:[#allocation2 + $0x78] sm:$0xe]  ;;  %v1088_v30 = vld [vmem:[#allocation2 + $0x30] sm:$0xf] }
  0x94   : > { %v5534_v50 = vcombine.low %v1164_v38, %v1174_v37  ;;  %v5700_v57 = vcombine.low %v3470_v33, %v3473_v41  ;;  %v1182_v18 = vor.u32 %v1181_v35, %v1178_v13  ;;  %v1191_v60 = vrot.slane %v1189_v11, 4  ;;  %v7318_v13 = vld [vmem:[#allocation2 + $0x34] sm:$0xf]  ;;  %v7325_v41 = vld [vmem:[#allocation2 + $0x38] sm:$0x1] }
  0x95   : > { %v1197_v1 = vrot.slane %v1195_v45, 5  ;;  %v1202_v2 = vrot.slane %v1200_v47, 4  ;;  %v1209_v7 = vshll.u32 %v7286_v36, 16  ;;  %v1213_v3 = vshrl.u32 %v7286_v36, 16 }
  0x96   : > { %6031 = vmatmul.mubr.msk.bf16.vlgmr.msra.gmra.mrb[0].mxu1 %vm830_vm4, %v5534_v50  ;;  %6179 = vmatmul.mubr.msk.bf16.gmra.mrb[12].mxu0 %vm830_vm4, %v5700_v57  ;;  %v1183_v53 = vrot.slane %v1182_v18, 4  ;;  %v1192_v4 = vor.u32 %v1191_v60, %v1187_v52  ;;  %v1219_v62 = vshll.u32 %v7294_v21, 16  ;;  %v1205_v25 = vrot.slane %v1203_v42, 5  ;;  %v1091_v18 = vld [vmem:[#allocation2 + $0x3c] sm:$0xf] }
  0x97   : > { %v1211_v8 = vrot.slane %v1209_v7, 5  ;;  %6063 = vmatpush3.bf16.msra.mxu1 %v7161_v31  ;;  %v5685_v22 = vrot.slane %v3362_v17, 9  ;;  %v3476_v46 = vrot.slane %v2655_v63, 5  ;;  %v1215_v34 = vrot.slane %v1213_v3, 4  ;;  %v7339_v3 = vld [vmem:[#allocation2 + $0x44] sm:$0x1] }
  0x98   : > { %v1188_v58 = vsel %vm6970_vm12, %v1183_v53, %v1187_v52  ;;  %v1193_v12 = vrot.slane %v1192_v4, 4  ;;  %v1206_v14 = vor.u32 %v1205_v25, %v1202_v2  ;;  %v3479_v15 = vrot.slane %v2656_v51, 5  ;;  %v7334_v2 = vld [vmem:[#allocation2 + $0x40] sm:$0xf] }
  0x99   : > { %v3477_v54 = vsel %vm7135_vm15, %v5685_v22, %v3476_v46  ;;  %v3478_v9 = vrot.slane %v3476_v46, 4  ;;  %v466_v27 = vrot.slane %v7178_v39, 4  ;;  %v1216_v49 = vor.u32 %v1215_v34, %v1211_v8  ;;  %v2661_v22 = vld [vmem:[#allocation2 + $0x88] sm:$0xf] }
  0x9a   : > { %v1198_v19 = vsel %vm6970_vm12, %v1193_v12, %v1197_v1  ;;  %v1221_v31 = vrot.slane %v1219_v62, 5  ;;  %v483_v20 = vrot.slane %v7182_v6, 4  ;;  %v1207_v10 = vrot.slane %v1206_v14, 4  ;;  %v3364_v14 = vld [vmem:[#allocation2 + $0x84] sm:$0xe] }
  0x9b   : > { %v5535_v38 = vcombine.low %v1188_v58, %v1198_v19  ;;  %v3480_v29 = vsel %vm7135_vm15, %v3478_v9, %v3479_v15  ;;  %v500_v32 = vrot.slane %v7215_v55, 4  ;;  %v517_v0 = vrot.slane %v7220_v56, 4 }
  0x9c   : > { %v1217_v33 = vrot.slane %v1216_v49, 4  ;;  %v5701_v48 = vcombine.low %v3477_v54, %v3480_v29  ;;  %v1212_v35 = vsel %vm6970_vm12, %v1207_v10, %v1211_v8  ;;  %v2904_v52 = vshll.u32 %v7309_v26, 16  ;;  %v670_v49 = vld [vmem:[#allocation2 + $0x98] sm:$0x1]  ;;  %v2662_v29 = vld [vmem:[#allocation2 + $0x8c] sm:$0x1] }
  0x9d   : > { %6034 = vmatprep.mubr.msk.bf16.mxu1 %vm830_vm4, %v5535_v38  ;;  %v5686_v11 = vrot.slane %v3363_v61, 9  ;;  %v3483_v37 = vrot.slane %v7309_v26, 5  ;;  %v2908_v47 = vshrl.u32 %v7309_v26, 16  ;;  %v3486_v50 = vrot.slane %v7314_v16, 5 }
  0x9e   : > { %v1222_v45 = vsel %vm6970_vm12, %v1217_v33, %v1221_v31  ;;  %6182 = vmatprep.mubr.msk.bf16.mxu0 %vm830_vm4, %v5701_v48  ;;  %v1224_v57 = vshrl.u32 %v1088_v30, 16  ;;  %v1227_v1 = vshll.u32 %v1088_v30, 16  ;;  %v2914_v42 = vshll.u32 %v7314_v16, 16  ;;  %v2664_v30 = vld [vmem:[#allocation2 + $0x94] sm:$0xf] }
  0x9f   : > { %v5536_v60 = vcombine.low %v1212_v35, %v1222_v45  ;;  %v3484_v63 = vsel %vm7135_vm15, %v5686_v11, %v3483_v37  ;;  %v3485_v17 = vrot.slane %v3483_v37, 4  ;;  %v1233_v53 = vshll.u32 %v7318_v13, 16  ;;  %v3365_v33 = vld [vmem:[#allocation2 + $0x90] sm:$0xe]  ;;  %v1094_v45 = vld [vmem:[#allocation2 + $0x48] sm:$0xf] }
  0xa0   : > { %v1226_v7 = vrot.slane %v1224_v57, 4  ;;  %v1237_v4 = vshrl.u32 %v7318_v13, 16  ;;  %v1229_v51 = vrot.slane %v1227_v1, 5  ;;  %v1243_v25 = vshll.u32 %v7325_v41, 16 }
  0xa1   : > { %6035 = vmatmul.mubr.msk.bf16.gmra.mrb[4].mxu1 %vm830_vm4, %v5536_v60  ;;  %v3487_v62 = vsel %vm7135_vm15, %v3485_v17, %v3486_v50  ;;  %v1248_v8 = vshrl.u32 %v1091_v18, 16  ;;  %v1235_v58 = vrot.slane %v1233_v53, 5  ;;  %v1251_v34 = vshll.u32 %v1091_v18, 16 }
  0xa2   : > { %v5702_v46 = vcombine.low %v3484_v63, %v3487_v62  ;;  %v1239_v12 = vrot.slane %v1237_v4, 4  ;;  %v1230_v54 = vor.u32 %v1229_v51, %v1226_v7  ;;  %v1245_v9 = vrot.slane %v1243_v25, 5  ;;  %v7349_v63 = vld [vmem:[#allocation2 + $0x4c] sm:$0xf] }
  0xa3   : > { %v1250_v15 = vrot.slane %v1248_v8, 4  ;;  %v1257_v19 = vshll.u32 %v7334_v2, 16  ;;  %v1253_v61 = vrot.slane %v1251_v34, 5  ;;  %v1261_v38 = vshrl.u32 %v7334_v2, 16  ;;  %v7358_v4 = vld [vmem:[%s8544_s1 + $0xe] sm:$0x3] }
  0xa4   : > { %6183 = vmatmul.mubr.msk.bf16.gmra.mrb[16].mxu0 %vm830_vm4, %v5702_v46  ;;  %v1240_v31 = vor.u32 %v1239_v12, %v1235_v58  ;;  %v1267_v10 = vshll.u32 %v7339_v3, 16  ;;  %v1231_v48 = vrot.slane %v1230_v54, 4  ;;  %v5687_v11 = vrot.slane %v3364_v14, 9  ;;  %6598 = vmatprep.subr.msk.bf16.mxu0 %vm879_vm0, %v7358_v4  ;;  %v7370_v34 = vld [vmem:[#allocation2 + $0x50] sm:$0x1] }
  0xa5   : > { %v1259_v35 = vrot.slane %v1257_v19, 5  ;;  %v3490_v37 = vrot.slane %v2661_v22, 5  ;;  %v1254_v57 = vor.u32 %v1253_v61, %v1250_v15  ;;  %v1263_v18 = vrot.slane %v1261_v38, 4  ;;  %v1097_v14 = vld [vmem:[#allocation2 + $0x54] sm:$0xf] }
  0xa6   : > { %v1241_v50 = vrot.slane %v1240_v31, 4  ;;  %v1269_v60 = vrot.slane %v1267_v10, 5  ;;  %v1236_v17 = vsel %vm6970_vm12, %v1231_v48, %v1235_v58  ;;  %v3493_v53 = vrot.slane %v2662_v29, 5  ;;  %v7376_v19 = vld [vmem:[#allocation2 + $0x5c] sm:$0x1] }
  0xa7   : > { %v3491_v1 = vsel %vm7135_vm15, %v5687_v11, %v3490_v37  ;;  %v3492_v7 = vrot.slane %v3490_v37, 4  ;;  %v1255_v51 = vrot.slane %v1254_v57, 4  ;;  %v1264_v25 = vor.u32 %v1263_v18, %v1259_v35  ;;  %v677_v10 = vld [vmem:[#allocation2 + $0xa4] sm:$0x1]  ;;  %v2667_v57 = vld [vmem:[#allocation2 + $0xa0] sm:$0xf] }
  0xa8   : > { %v1246_v62 = vsel %vm6970_vm12, %v1241_v50, %v1245_v9  ;;  %v671_v8 = vsel %vm6883_vm9, %v466_v27, %v670_v49  ;;  %v5688_v58 = vrot.slane %v3365_v33, 9  ;;  %v3497_v12 = vrot.slane %v2664_v30, 5  ;;  %v7374_v27 = vld [vmem:[#allocation2 + $0x58] sm:$0xf]  ;;  %v3366_v18 = vld [vmem:[#allocation2 + $0x9c] sm:$0xe] }
  0xa9   : > { %v5537_v22 = vcombine.low %v1236_v17, %v1246_v62  ;;  %v3494_v46 = vsel %vm7135_vm15, %v3492_v7, %v3493_v53  ;;  %672 = vst [vmem:[#allocation2 + $0x98] sm:$0x1] %v671_v8  ;;  %v1260_v54 = vsel %vm6970_vm12, %v1255_v51, %v1259_v35  ;;  %v1265_v39 = vrot.slane %v1264_v25, 4  ;;  %v684_v25 = vld [vmem:[#allocation2 + $0xb0] sm:$0x1] }
  0xaa   : > { %v5703_v9 = vcombine.low %v3491_v1, %v3494_v46  ;;  %v1272_v15 = vshrl.u32 %v1094_v45, 16  ;;  %v3498_v49 = vsel %vm7135_vm15, %v5688_v58, %v3497_v12  ;;  %v3499_v31 = vrot.slane %v3497_v12, 4 }
  0xab   : > { %6038 = vmatprep.mubr.msk.bf16.mxu1 %vm830_vm4, %v5537_v22  ;;  %v1275_v61 = vshll.u32 %v1094_v45, 16  ;;  %v1281_v38 = vshll.u32 %v7349_v63, 16  ;;  %v1270_v29 = vsel %vm6970_vm12, %v1265_v39, %v1269_v60  ;;  %v1285_v33 = vshrl.u32 %v7349_v63, 16 }
  0xac   : > { %6186 = vmatprep.mubr.msk.bf16.mxu0 %vm830_vm4, %v5703_v9  ;;  %v1274_v30 = vrot.slane %v1272_v15, 4  ;;  %v1291_v48 = vshll.u32 %v7370_v34, 16  ;;  %v5538_v35 = vcombine.low %v1260_v54, %v1270_v29  ;;  %v1296_v50 = vshrl.u32 %v1097_v14, 16 }
  0xad   : > { %v1277_v11 = vrot.slane %v1275_v61, 5  ;;  %v1283_v37 = vrot.slane %v1281_v38, 5  ;;  %v1287_v45 = vrot.slane %v1285_v33, 4  ;;  %v1299_v1 = vshll.u32 %v1097_v14, 16  ;;  %v3367_v14 = vld [vmem:[#allocation2 + $0xa8] sm:$0xe] }
  0xae   : > { %v1293_v17 = vrot.slane %v1291_v48, 5  ;;  %v1305_v7 = vshll.u32 %v7374_v27, 16  ;;  %6039 = vmatmul.mubr.msk.bf16.gmra.mrb[8].mxu1 %vm830_vm4, %v5538_v35  ;;  %v1298_v53 = vrot.slane %v1296_v50, 4  ;;  %v1309_v62 = vshrl.u32 %v7374_v27, 16  ;;  %v2670_v61 = vld [vmem:[#allocation2 + $0xac] sm:$0xf] }
  0xaf   : > { %v1278_v60 = vor.u32 %v1277_v11, %v1274_v30  ;;  %v1315_v51 = vshll.u32 %v7376_v19, 16  ;;  %v1288_v22 = vor.u32 %v1287_v45, %v1283_v37  ;;  %v1301_v46 = vrot.slane %v1299_v1, 5  ;;  %v1100_v38 = vld [vmem:[#allocation2 + $0x60] sm:$0xf]  ;;  %v7395_v35 = vld [vmem:[#allocation2 + $0x64] sm:$0xf] }
  0xb0   : > { %v2665_v8 = vld [vmem:[#allocation2 + $0x98] sm:$0x1]  ;;  %v1307_v58 = vrot.slane %v1305_v7, 5  ;;  %v678_v12 = vsel %vm6883_vm9, %v483_v20, %v677_v10  ;;  %v1311_v9 = vrot.slane %v1309_v62, 4  ;;  %v5689_v33 = vrot.slane %v3366_v18, 9 }
  0xb1   : > { %v3500_v54 = vrot.slane %v2665_v8, 5  ;;  %v1279_v39 = vrot.slane %v1278_v60, 4  ;;  %v1317_v15 = vrot.slane %v1315_v51, 5  ;;  %679 = vst [vmem:[#allocation2 + $0xa4] sm:$0x1] %v678_v12  ;;  %v1289_v29 = vrot.slane %v1288_v22, 4 }
  0xb2   : > { %v1302_v30 = vor.u32 %v1301_v46, %v1298_v53  ;;  %v3504_v48 = vrot.slane %v2667_v57, 5  ;;  %v1312_v10 = vor.u32 %v1311_v9, %v1307_v58  ;;  %v685_v11 = vsel %vm6883_vm9, %v500_v32, %v684_v25  ;;  %v7405_v50 = vld [vmem:[#allocation2 + $0x68] sm:$0x1]  ;;  %v1103_v53 = vld [vmem:[#allocation2 + $0x6c] sm:$0xf] }
  0xb3   : > { %v3501_v6 = vsel %vm7135_vm15, %v3499_v31, %v3500_v54  ;;  %v1284_v20 = vsel %vm6970_vm12, %v1279_v39, %v1283_v37  ;;  %v1294_v57 = vsel %vm6970_vm12, %v1289_v29, %v1293_v17  ;;  %686 = vst [vmem:[#allocation2 + $0xb0] sm:$0x1] %v685_v11  ;;  %v5690_v60 = vrot.slane %v3367_v14, 9  ;;  %v7414_v51 = vld [vmem:[#allocation2 + $0x70] sm:$0xf] }
  0xb4   : > { %v5704_v45 = vcombine.low %v3498_v49, %v3501_v6  ;;  %v1303_v18 = vrot.slane %v1302_v30, 4  ;;  %v3505_v1 = vsel %vm7135_vm15, %v5689_v33, %v3504_v48  ;;  %v5539_v31 = vcombine.low %v1284_v20, %v1294_v57  ;;  %v7424_v29 = vld [vmem:[#allocation2 + $0x74] sm:$0x1] }
  0xb5   : > { %v1313_v7 = vrot.slane %v1312_v10, 4  ;;  %v3506_v37 = vrot.slane %v3504_v48, 4  ;;  %v3511_v32 = vrot.slane %v2670_v61, 5  ;;  %v1320_v49 = vshrl.u32 %v1100_v38, 16 }
  0xb6   : > { %6187 = vmatmul.mubr.msk.bf16.gmra.mrb[20].mxu0 %vm830_vm4, %v5704_v45  ;;  %v1308_v55 = vsel %vm6970_vm12, %v1303_v18, %v1307_v58  ;;  %v1323_v62 = vshll.u32 %v1100_v38, 16  ;;  %6042 = vmatprep.mubr.msk.bf16.mxu1 %vm830_vm4, %v5539_v31  ;;  %v1329_v25 = vshll.u32 %v7395_v35, 16  ;;  %v1333_v8 = vshrl.u32 %v7395_v35, 16  ;;  %v3368_v18 = vld [vmem:[#allocation2 + $0xb4] sm:$0xe] }
  0xb7   : > { %v1318_v17 = vsel %vm6970_vm12, %v1313_v7, %v1317_v15  ;;  %v1339_v22 = vshll.u32 %v7405_v50, 16  ;;  %v3512_v58 = vsel %vm7135_vm15, %v5690_v60, %v3511_v32  ;;  %v3513_v14 = vrot.slane %v3511_v32, 4  ;;  %v691_v15 = vld [vmem:[#allocation2 + $0xbc] sm:$0x1]  ;;  %v2673_v32 = vld [vmem:[#allocation2 + $0xb8] sm:$0xf] }
  0xb8   : > { %v5540_v46 = vcombine.low %v1308_v55, %v1318_v17  ;;  %v2668_v12 = vld [vmem:[#allocation2 + $0xa4] sm:$0x1]  ;;  %v1322_v54 = vrot.slane %v1320_v49, 4  ;;  %v1325_v9 = vrot.slane %v1323_v62, 5  ;;  %v1331_v61 = vrot.slane %v1329_v25, 5 }
  0xb9   : > { %v3507_v39 = vrot.slane %v2668_v12, 5  ;;  %v1335_v38 = vrot.slane %v1333_v8, 4  ;;  %v1341_v30 = vrot.slane %v1339_v22, 5  ;;  %v1344_v33 = vshrl.u32 %v1103_v53, 16  ;;  %v258_v49 = vld [vmem:[%s6855_s25 + $0x78] sm:$0xf] }
  0xba   : > { %6043 = vmatmul.mubr.msk.bf16.gmra.mrb[12].mxu1 %vm830_vm4, %v5540_v46  ;;  %v1347_v48 = vshll.u32 %v1103_v53, 16  ;;  %v1353_v6 = vshll.u32 %v7414_v51, 16  ;;  %v2671_v10 = vld [vmem:[#allocation2 + $0xb0] sm:$0x1]  ;;  %v1326_v11 = vor.u32 %v1325_v9, %v1322_v54  ;;  %v1357_v57 = vshrl.u32 %v7414_v51, 16 }
  0xbb   : > { %v3508_v20 = vsel %vm7135_vm15, %v3506_v37, %v3507_v39  ;;  %v1336_v45 = vor.u32 %v1335_v38, %v1331_v61  ;;  %v3514_v7 = vrot.slane %v2671_v10, 5  ;;  %v1346_v60 = vrot.slane %v1344_v33, 4  ;;  %v259_v8 = vld [vmem:[%s6855_s25 + $0x7c] sm:$0xf]  ;;  %v1106_v12 = vld [vmem:[#allocation2 + $0x78] sm:$0xf] }
  0xbc   : > { %v5705_v31 = vcombine.low %v3505_v1, %v3508_v20  ;;  %v1349_v55 = vrot.slane %v1347_v48, 5  ;;  %v1327_v62 = vrot.slane %v1326_v11, 4  ;;  %v1355_v17 = vrot.slane %v1353_v6, 5  ;;  %v7444_v54 = vld [vmem:[%s8544_s1 + $0x6] sm:$0x3] }
  0xbd   : > { %v1337_v53 = vrot.slane %v1336_v45, 4  ;;  %v1359_v25 = vrot.slane %v1357_v57, 4  ;;  %v3515_v37 = vsel %vm7135_vm15, %v3513_v14, %v3514_v7  ;;  %v1363_v46 = vshll.u32 %v7424_v29, 16  ;;  %6593 = vmatprep.subr.msk.bf16.mxu1 %vm879_vm0, %v7444_v54  ;;  %v7453_v10 = vld [vmem:[#allocation2 + $0x7c] sm:$0xf] }
  0xbe   : > { %6190 = vmatprep.mubr.msk.bf16.mxu0 %vm830_vm4, %v5705_v31  ;;  %v1350_v22 = vor.u32 %v1349_v55, %v1346_v60  ;;  %v692_v1 = vsel %vm6883_vm9, %v517_v0, %v691_v15  ;;  %v5706_v39 = vcombine.low %v3512_v58, %v3515_v37  ;;  %v1332_v9 = vsel %vm6970_vm12, %v1327_v62, %v1331_v61  ;;  %v694_v45 = vld [vmem:[#allocation2 + $0xc0] sm:$0xf] }
  0xbf   : > { %v1342_v14 = vsel %vm6970_vm12, %v1337_v53, %v1341_v30  ;;  %v1360_v38 = vor.u32 %v1359_v25, %v1355_v17  ;;  %693 = vst [vmem:[#allocation2 + $0xbc] sm:$0x1] %v692_v1  ;;  %v1365_v15 = vrot.slane %v1363_v46, 5  ;;  %v5691_v33 = vrot.slane %v3368_v18, 9  ;;  %v7458_v57 = vld [vmem:[#allocation2 + $0x80] sm:$0x1] }
  0xc0   : > { %v5541_v56 = vcombine.low %v1332_v9, %v1342_v14  ;;  %v1351_v0 = vrot.slane %v1350_v22, 4  ;;  %6191 = vmatmul.mubr.msk.bf16.gmra.mrb[24].mxu0 %vm830_vm4, %v5706_v39  ;;  %v3518_v6 = vrot.slane %v2673_v32, 5  ;;  %v519_v58 = vshrl.u32 %v258_v49, 16  ;;  %v698_v32 = vld [vmem:[#allocation2 + $0xc8] sm:$0x1] }
  0xc1   : > { %v1361_v48 = vrot.slane %v1360_v38, 4  ;;  %v522_v20 = vshll.u32 %v258_v49, 16  ;;  %v527_v30 = vshrl.u32 %v259_v8, 16  ;;  %v530_v11 = vshll.u32 %v259_v8, 16 }
  0xc2   : > { %6046 = vmatprep.mubr.msk.bf16.mxu1 %vm830_vm4, %v5541_v56  ;;  %v1356_v61 = vsel %vm6970_vm12, %v1351_v0, %v1355_v17  ;;  %v1368_v31 = vshrl.u32 %v1106_v12, 16  ;;  %v3519_v7 = vsel %vm7135_vm15, %v5691_v33, %v3518_v6  ;;  %v3520_v60 = vrot.slane %v3518_v6, 4  ;;  %v1109_v17 = vld [vmem:[#allocation2 + $0x84] sm:$0xf]  ;;  %v7470_v33 = vld [vmem:[#allocation2 + $0x88] sm:$0xf] }
  0xc3   : > { %v1366_v18 = vsel %vm6970_vm12, %v1361_v48, %v1365_v15  ;;  %v521_v55 = vrot.slane %v519_v58, 7  ;;  %v529_v62 = vrot.slane %v527_v30, 7  ;;  %v1371_v25 = vshll.u32 %v1106_v12, 16  ;;  %v1112_v30 = vld [vmem:[#allocation2 + $0x90] sm:$0xf] }
  0xc4   : > { %v5542_v49 = vcombine.low %v1356_v61, %v1366_v18  ;;  %v1370_v53 = vrot.slane %v1368_v31, 4  ;;  %v1377_v22 = vshll.u32 %v7453_v10, 16  ;;  %v1381_v46 = vshrl.u32 %v7453_v10, 16  ;;  %v7476_v61 = vld [vmem:[#allocation2 + $0x8c] sm:$0x1] }
  0xc5   : > { %v524_v37 = vor.u32 %v522_v20, %v521_v55  ;;  %v525_v8 = vrot.slane %v521_v55, 4  ;;  %v532_v39 = vor.u32 %v530_v11, %v529_v62  ;;  %v534_v9 = vrot.slane %v529_v62, 4 }
  0xc6   : > { %6047 = vmatmul.mubr.msk.bf16.gmra.mrb[16].mxu1 %vm830_vm4, %v5542_v49  ;;  %v2674_v1 = vld [vmem:[#allocation2 + $0xbc] sm:$0x1]  ;;  %v1373_v14 = vrot.slane %v1371_v25, 5  ;;  %v1387_v38 = vshll.u32 %v7458_v57, 16  ;;  %v1379_v12 = vrot.slane %v1377_v22, 5  ;;  %v1383_v15 = vrot.slane %v1381_v46, 4 }
  0xc7   : > { %v3521_v56 = vrot.slane %v2674_v1, 5  ;;  %v695_v0 = vsel %vm6867_vm7, %v524_v37, %v694_v45  ;;  %v533_v48 = vsel %vm6874_vm8, %v525_v8, %v532_v39  ;;  %v699_v6 = vsel %vm6883_vm9, %v534_v9, %v698_v32  ;;  %v7493_v8 = vld [vmem:[#allocation2 + $0x98] sm:$0x1] }
  0xc8   : > { %696 = vst [vmem:[#allocation2 + $0xc0] sm:$0xf] %v695_v0  ;;  %v1374_v58 = vor.u32 %v1373_v14, %v1370_v53  ;;  %v1389_v20 = vrot.slane %v1387_v38, 5  ;;  %697 = vst.msk [vmem:[#allocation2 + $0xc4] sm:$0xf] %vm172_vm1, %v533_v48  ;;  %v1384_v11 = vor.u32 %v1383_v15, %v1379_v12  ;;  %v1392_v45 = vshrl.u32 %v1109_v17, 16 }
  0xc9   : > { %v3522_v23 = vsel %vm7135_vm15, %v3520_v60, %v3521_v56  ;;  %700 = vst [vmem:[#allocation2 + $0xc8] sm:$0x1] %v699_v6  ;;  %v1395_v31 = vshll.u32 %v1109_v17, 16  ;;  %v1401_v43 = vshll.u32 %v7470_v33, 16  ;;  %v1405_v32 = vshrl.u32 %v7470_v33, 16 }
  0xca   : > { %v5707_v18 = vcombine.low %v3519_v7, %v3522_v23  ;;  %v1375_v55 = vrot.slane %v1374_v58, 4  ;;  %v1385_v49 = vrot.slane %v1384_v11, 4  ;;  %v1394_v62 = vrot.slane %v1392_v45, 4  ;;  %v1115_v6 = vld [vmem:[#allocation2 + $0x9c] sm:$0xf] }
  0xcb   : > { %v1397_v53 = vrot.slane %v1395_v31, 5  ;;  %v1411_v25 = vshll.u32 %v7476_v61, 16  ;;  %v1403_v37 = vrot.slane %v1401_v43, 5  ;;  %v1407_v17 = vrot.slane %v1405_v32, 4  ;;  %v7500_v58 = vld [vmem:[#allocation2 + $0xa0] sm:$0xf] }
  0xcc   : > { %6194 = vmatprep.mubr.msk.bf16.mxu0 %vm830_vm4, %v5707_v18  ;;  %v1380_v60 = vsel %vm6970_vm12, %v1375_v55, %v1379_v12  ;;  %v7491_v7 = vsel %vm879_vm0, %v7358_v4, 0  ;;  %v1390_v22 = vsel %vm6970_vm12, %v1385_v49, %v1389_v20  ;;  %v1416_v39 = vshrl.u32 %v1112_v30, 16  ;;  %v7503_v31 = vld [vmem:[#allocation2 + $0xa4] sm:$0x1] }
  0xcd   : > { %v1398_v46 = vor.u32 %v1397_v53, %v1394_v62  ;;  %v1413_v1 = vrot.slane %v1411_v25, 5  ;;  %v5543_v9 = vcombine.low %v1380_v60, %v1390_v22  ;;  %v1408_v14 = vor.u32 %v1407_v17, %v1403_v37 }
  0xce   : > { %v1419_v38 = vshll.u32 %v1112_v30, 16  ;;  %v1425_v56 = vshll.u32 %v7481_v28, 16  ;;  %v1418_v15 = vrot.slane %v1416_v39, 4  ;;  %v1429_v48 = vshrl.u32 %v7481_v28, 16 }
  0xcf   : > { %v3369_v0 = vld [vmem:[#allocation2 + $0xc0] sm:$0xe]  ;;  %v1399_v12 = vrot.slane %v1398_v46, 4  ;;  %v1435_v4 = vshll.u32 %v7493_v8, 16  ;;  %v2676_v23 = vld [vmem:[#allocation2 + $0xc4] sm:$0xf]  ;;  %6050 = vmatprep.mubr.msk.bf16.mxu1 %vm830_vm4, %v5543_v9 }
  0xd0   : > { %v2677_v20 = vld [vmem:[#allocation2 + $0xc8] sm:$0x1]  ;;  %v5692_v11 = vrot.slane %v3369_v0, 9  ;;  %v1409_v45 = vrot.slane %v1408_v14, 4  ;;  %v3525_v30 = vrot.slane %v2676_v23, 5  ;;  %v1421_v43 = vrot.slane %v1419_v38, 5 }
  0xd1   : > { %v3528_v18 = vrot.slane %v2677_v20, 5  ;;  %v1404_v55 = vsel %vm6970_vm12, %v1399_v12, %v1403_v37  ;;  %v1427_v49 = vrot.slane %v1425_v56, 5  ;;  %v1431_v62 = vrot.slane %v1429_v48, 4  ;;  %v1118_v12 = vld [vmem:[#allocation2 + $0xa8] sm:$0xf] }
  0xd2   : > { %v1414_v32 = vsel %vm6970_vm12, %v1409_v45, %v1413_v1  ;;  %v1437_v53 = vrot.slane %v1435_v4, 5  ;;  %v3526_v25 = vsel %vm7135_vm15, %v5692_v11, %v3525_v30  ;;  %v3527_v60 = vrot.slane %v3525_v30, 4  ;;  %v6625_v1 = vld [vmem:[#allocation2 + $0x18] sm:$0xff]   ;;  %v7517_v20 = vld [vmem:[#allocation2 + $0xac] sm:$0xf] }
  0xd3   : > { %v5544_v17 = vcombine.low %v1404_v55, %v1414_v32  ;;  %v1422_v22 = vor.u32 %v1421_v43, %v1418_v15  ;;  %v1432_v46 = vor.u32 %v1431_v62, %v1427_v49  ;;  %v1440_v39 = vshrl.u32 %v1115_v6, 16 }
  0xd4   : > { %v1443_v9 = vshll.u32 %v1115_v6, 16  ;;  %v1449_v14 = vshll.u32 %v7500_v58, 16  ;;  %v3529_v37 = vsel %vm7135_vm15, %v3527_v60, %v3528_v18  ;;  %v1453_v56 = vshrl.u32 %v7500_v58, 16  ;;  %v7521_v18 = vld [vmem:[#allocation2 + $0xb0] sm:$0x1] }
  0xd5   : > { %6051 = vmatmul.mubr.msk.bf16.gmra.mrb[20].mxu1 %vm830_vm4, %v5544_v17  ;;  %v1423_v38 = vrot.slane %v1422_v22, 4  ;;  %v1459_v0 = vshll.u32 %v7503_v31, 16  ;;  %v5708_v48 = vcombine.low %v3526_v25, %v3529_v37  ;;  %v1433_v4 = vrot.slane %v1432_v46, 4  ;;  %v1121_v25 = vld [vmem:[#allocation2 + $0xb4] sm:$0xf] }
  0xd6   : > { %v1442_v15 = vrot.slane %v1440_v39, 4  ;;  %v1445_v23 = vrot.slane %v1443_v9, 5  ;;  %v1451_v11 = vrot.slane %v1449_v14, 5  ;;  %v1455_v45 = vrot.slane %v1453_v56, 4  ;;  %v7530_v37 = vld [vmem:[#allocation2 + $0xb8] sm:$0xf] }
  0xd7   : > { %v1428_v6 = vsel %vm6970_vm12, %v1423_v38, %v1427_v49  ;;  %v1461_v30 = vrot.slane %v1459_v0, 5  ;;  %6195 = vmatmul.mubr.msk.bf16.gmra.mrb[28].mxu0 %vm830_vm4, %v5708_v48  ;;  %v1438_v55 = vsel %vm6970_vm12, %v1433_v4, %v1437_v53  ;;  %v1464_v32 = vshrl.u32 %v1118_v12, 16  ;;  %v6626_v53 = vld [vmem:[#allocation2 + $0x24] sm:$0xff]  }
  0xd8   : > { %v1446_v43 = vor.u32 %v1445_v23, %v1442_v15  ;;  %v1467_v62 = vshll.u32 %v1118_v12, 16  ;;  %6200 = vmatprep.mubr.msk.bf16.mxu0 %vm830_vm4, %v6625_v1  ;;  %v5545_v60 = vcombine.low %v1428_v6, %v1438_v55  ;;  %v1456_v17 = vor.u32 %v1455_v45, %v1451_v11  ;;  %v7535_v15 = vld [vmem:[#allocation2 + $0xbc] sm:$0x1]  ;;  %v1803_v6 = vld [vmem:[#allocation2] sm:$0xe]  ;;  %v6627_v55 = vld [vmem:[#allocation2 + $0x30] sm:$0xff]  }
  0xd9   : > { %v1473_v49 = vshll.u32 %v7517_v20, 16  ;;  %v1477_v22 = vshrl.u32 %v7517_v20, 16  ;;  %v1466_v39 = vrot.slane %v1464_v32, 4  ;;  %v1483_v14 = vshll.u32 %v7521_v18, 16 }
  0xda   : > { %v1447_v46 = vrot.slane %v1446_v43, 4  ;;  %v1469_v9 = vrot.slane %v1467_v62, 5  ;;  %6054 = vmatprep.mubr.msk.bf16.mxu1 %vm830_vm4, %v5545_v60  ;;  %v1457_v38 = vrot.slane %v1456_v17, 4  ;;  %v1488_v1 = vshrl.u32 %v1121_v25, 16 }
  0xdb   : > { %v1475_v56 = vrot.slane %v1473_v49, 5  ;;  %v1479_v0 = vrot.slane %v1477_v22, 4  ;;  %v1485_v4 = vrot.slane %v1483_v14, 5  ;;  %v1491_v23 = vshll.u32 %v1121_v25, 16 }
  0xdc   : > { %v1452_v12 = vsel %vm6970_vm12, %v1447_v46, %v1451_v11  ;;  %v1470_v48 = vor.u32 %v1469_v9, %v1466_v39  ;;  %v1462_v45 = vsel %vm6970_vm12, %v1457_v38, %v1461_v30  ;;  %v1490_v32 = vrot.slane %v1488_v1, 4  ;;  %v1804_v11 = vld [vmem:[#allocation2 + $0xc] sm:$0xe]  ;;  %v7545_v30 = vld [vmem:[%s8544_s1 + $0x10] sm:$0x3] }
  0xdd   : > { %v1480_v43 = vor.u32 %v1479_v0, %v1475_v56  ;;  %v1497_v62 = vshll.u32 %v7530_v37, 16  ;;  %v5546_v60 = vcombine.low %v1452_v12, %v1462_v45  ;;  %v1493_v49 = vrot.slane %v1491_v23, 5  ;;  %v6657_v1 = vld [vmem:[#allocation2 + $0x4] sm:$0xf]  ;;  %v6658_v23 = vld [vmem:[#allocation2 + $0x8] sm:$0x1] }
  0xde   : > { %v1471_v17 = vrot.slane %v1470_v48, 4  ;;  %v1501_v22 = vshrl.u32 %v7530_v37, 16  ;;  %v1507_v9 = vshll.u32 %v7535_v15, 16  ;;  %v5565_v25 = vrot.slane %v1803_v6, 9 }
  0xdf   : > { %v1481_v46 = vrot.slane %v1480_v43, 4  ;;  %v1499_v39 = vrot.slane %v1497_v62, 5  ;;  %6201 = vmatmul.mubr.msk.bf16.vlgmr.msra.gmra.mrb[0].mxu0 %vm830_vm4, %v6626_v53  ;;  %6055 = vmatmul.mubr.msk.bf16.gmra.mrb[24].mxu1 %vm830_vm4, %v5546_v60  ;;  %v1494_v38 = vor.u32 %v1493_v49, %v1490_v32  ;;  %v1872_v12 = vrot.slane %v6657_v1, 5  ;;  %v1805_v43 = vld [vmem:[#allocation2 + $0x18] sm:$0xe] }
  0xe0   : > { %v1476_v14 = vsel %vm6970_vm12, %v1471_v17, %v1475_v56  ;;  %v1503_v0 = vrot.slane %v1501_v22, 4  ;;  %v7553_v48 = vrot.slane %v2904_v52, 5  ;;  %6233 = vmatpush3.bf16.msra.mxu0 %v7491_v7  ;;  %6204 = vmatprep.mubr.msk.bf16.mxu0 %vm830_vm4, %v6627_v55  ;;  %v1875_v6 = vrot.slane %v6658_v23, 5  ;;  %v1806_v17 = vld [vmem:[#allocation2 + $0x24] sm:$0xe]  ;;  %v6628_v52 = vld [vmem:[#allocation2 + $0x3c] sm:$0xff]  }
  0xe1   : > { %v1486_v53 = vsel %vm6970_vm12, %v1481_v46, %v1485_v4  ;;  %v5566_v45 = vrot.slane %v1804_v11, 9  ;;  %v1495_v32 = vrot.slane %v1494_v38, 4  ;;  %v1509_v60 = vrot.slane %v1507_v9, 5  ;;  %6599 = vmatprep.subr.msk.bf16.mxu0 %vm879_vm0, %v7545_v30  ;;  %v6659_v49 = vld [vmem:[#allocation2 + $0x10] sm:$0xf] }
  0xe2   : > { %v5547_v56 = vcombine.low %v1476_v14, %v1486_v53  ;;  %v1504_v62 = vor.u32 %v1503_v0, %v1499_v39  ;;  %v1873_v7 = vsel %vm7135_vm15, %v5565_v25, %v1872_v12  ;;  %v1874_v55 = vrot.slane %v1872_v12, 4  ;;  %v6660_v4 = vld [vmem:[#allocation2 + $0x14] sm:$0x1]  ;;  %v1807_v1 = vld [vmem:[#allocation2 + $0x30] sm:$0xe]  ;;  %v6629_v14 = vld [vmem:[#allocation2 + $0x48] sm:$0xff]  }
  0xe3   : > { %v1879_v22 = vrot.slane %v6659_v49, 5  ;;  %v1882_v46 = vrot.slane %v6660_v4, 5  ;;  %v1500_v11 = vsel %vm6970_vm12, %v1495_v32, %v1499_v39  ;;  %v5567_v38 = vrot.slane %v1805_v43, 9 }
  0xe4   : > { %6058 = vmatprep.mubr.msk.bf16.mxu1 %vm830_vm4, %v5547_v56  ;;  %v1505_v9 = vrot.slane %v1504_v62, 4  ;;  %v1886_v0 = vrot.slane %v7268_v44, 5  ;;  %v1876_v53 = vsel %vm7135_vm15, %v1874_v55, %v1875_v6  ;;  %v1889_v23 = vrot.slane %v7280_v24, 5  ;;  %v1808_v62 = vld [vmem:[#allocation2 + $0x3c] sm:$0xe] }
  0xe5   : > { %v1880_v25 = vsel %vm7135_vm15, %v5566_v45, %v1879_v22  ;;  %v1881_v12 = vrot.slane %v1879_v22, 4  ;;  %v5581_v49 = vcombine.low %v1873_v7, %v1876_v53  ;;  %v5568_v39 = vrot.slane %v1806_v17, 9  ;;  %v1809_v7 = vld [vmem:[#allocation2 + $0x48] sm:$0xe]  ;;  %v1810_v55 = vld [vmem:[#allocation2 + $0x54] sm:$0xe] }
  0xe6   : > { %v1510_v56 = vsel %vm6970_vm12, %v1505_v9, %v1509_v60  ;;  %v1888_v4 = vrot.slane %v1886_v0, 4  ;;  %v1893_v44 = vrot.slane %v7286_v36, 5  ;;  %v1896_v6 = vrot.slane %v7294_v21, 5 }
  0xe7   : > { %v5548_v32 = vcombine.low %v1500_v11, %v1510_v56  ;;  %v1883_v43 = vsel %vm7135_vm15, %v1881_v12, %v1882_v46  ;;  %v7580_v45 = vrot.slane %v2908_v47, 4  ;;  %6205 = vmatmul.mubr.msk.bf16.gmra.mrb[4].mxu0 %vm830_vm4, %v6628_v52  ;;  %v1887_v60 = vsel %vm7135_vm15, %v5567_v38, %v1886_v0 }
  0xe8   : > { %v5582_v24 = vcombine.low %v1880_v25, %v1883_v43  ;;  %v5569_v17 = vrot.slane %v1807_v1, 9  ;;  %6208 = vmatprep.mubr.msk.bf16.mxu0 %vm830_vm4, %v6629_v14  ;;  %v1890_v36 = vsel %vm7135_vm15, %v1888_v4, %v1889_v23  ;;  %v1895_v21 = vrot.slane %v1893_v44, 4  ;;  %v6630_v14 = vld [vmem:[#allocation2 + $0x54] sm:$0xff]   ;;  %v6631_v25 = vld [vmem:[#allocation2 + $0x60] sm:$0xff]  }
  0xe9   : > { %6059 = vmatmul.mubr.msk.bf16.gmra.mrb[28].mxu1 %vm830_vm4, %v5548_v32  ;;  %v2435_v26 = vsel %vm879_vm0, %v7444_v54, 0  ;;  %v1900_v47 = vrot.slane %v7318_v13, 5  ;;  %v7595_v52 = vsel %vm7135_vm15, %v5568_v39, %v1893_v44  ;;  %v1903_v22 = vrot.slane %v7325_v41, 5  ;;  %v1812_v32 = vld [vmem:[#allocation2 + $0x6c] sm:$0xe] }
  0xea   : > { %6064 = vmatprep.mubr.msk.bf16.mxu1 %vm830_vm4, %v5581_v49  ;;  %v5570_v46 = vrot.slane %v1808_v62, 9  ;;  %v1907_v1 = vrot.slane %v7334_v2, 5  ;;  %v7601_v11 = vsel %vm7135_vm15, %v1895_v21, %v1896_v6  ;;  %v1910_v9 = vrot.slane %v7339_v3, 5  ;;  %v1811_v49 = vld [vmem:[#allocation2 + $0x60] sm:$0xe] }
  0xeb   : > { %v7605_v54 = vsel %vm7135_vm15, %v5569_v17, %v1900_v47  ;;  %v1902_v13 = vrot.slane %v1900_v47, 4  ;;  %v5583_v38 = vcombine.low %v1887_v60, %v1890_v36  ;;  %v5571_v53 = vrot.slane %v1809_v7, 9  ;;  %v1813_v43 = vld [vmem:[#allocation2 + $0x78] sm:$0xe]  ;;  %v1814_v62 = vld [vmem:[#allocation2 + $0x84] sm:$0xe] }
  0xec   : > { %v1909_v0 = vrot.slane %v1907_v1, 4  ;;  %v1914_v41 = vrot.slane %v7349_v63, 5  ;;  %v1917_v12 = vrot.slane %v7370_v34, 5  ;;  %v5572_v23 = vrot.slane %v1810_v55, 9 }
  0xed   : > { %v7611_v2 = vsel %vm7135_vm15, %v1902_v13, %v1903_v22  ;;  %v1921_v56 = vrot.slane %v7374_v27, 5  ;;  %v5584_v3 = vcombine.low %v7595_v52, %v7601_v11  ;;  %v7621_v63 = vsel %vm7135_vm15, %v5570_v46, %v1907_v1  ;;  %v4179_v11 = vld [vmem:[#allocation2 + $0x18] sm:$0xf]  ;;  %v6632_v13 = vld [vmem:[#allocation2 + $0x6c] sm:$0xff]  }
  0xee   : > { %v5585_v4 = vcombine.low %v7605_v54, %v7611_v2  ;;  %v1916_v39 = vrot.slane %v1914_v41, 4  ;;  %v7625_v34 = vsel %vm7135_vm15, %v1909_v0, %v1910_v9  ;;  %v1924_v6 = vrot.slane %v7376_v19, 5  ;;  %v7673_v0 = vld [vmem:[#allocation2 + $0x1c] sm:$0xf] }
  0xef   : > { %v7629_v27 = vsel %vm7135_vm15, %v5572_v23, %v1921_v56  ;;  %v1923_v44 = vrot.slane %v1921_v56, 4  ;;  %6209 = vmatmul.mubr.msk.bf16.gmra.mrb[8].mxu0 %vm830_vm4, %v6630_v14  ;;  %v7635_v60 = vsel %vm7135_vm15, %v5571_v53, %v1914_v41  ;;  %v5573_v17 = vrot.slane %v1811_v49, 9  ;;  %v7685_v23 = vld [vmem:[#allocation2 + $0x20] sm:$0x1] }
  0xf0   : > { %v1928_v7 = vrot.slane %v7395_v35, 5  ;;  %v1931_v55 = vrot.slane %v7405_v50, 5  ;;  %6212 = vmatprep.mubr.msk.bf16.mxu0 %vm830_vm4, %v6631_v25  ;;  %v7643_v36 = vsel %vm7135_vm15, %v1916_v39, %v1917_v12  ;;  %v5574_v21 = vrot.slane %v1812_v32, 9 }
  0xf1   : > { %6065 = vmatmul.mubr.msk.bf16.vlgmr.msra.gmra.mrb[0].mxu1 %vm830_vm4, %v5582_v24  ;;  %v7647_v19 = vsel %vm7135_vm15, %v1923_v44, %v1924_v6  ;;  %v1935_v47 = vrot.slane %v7414_v51, 5  ;;  %v1938_v52 = vrot.slane %v7424_v29, 5  ;;  %v5575_v1 = vrot.slane %v1813_v43, 9 }
  0xf2   : > { %6068 = vmatprep.mubr.msk.bf16.mxu1 %vm830_vm4, %v5583_v38  ;;  %6097 = vmatpush3.bf16.msra.mxu1 %v2435_v26  ;;  %v5588_v35 = vcombine.low %v7629_v27, %v7647_v19  ;;  %v7655_v50 = vsel %vm7135_vm15, %v5573_v17, %v1928_v7  ;;  %v1930_v24 = vrot.slane %v1928_v7, 4  ;;  %v1942_v51 = vrot.slane %v7453_v10, 5  ;;  %v6661_v26 = vld [vmem:[%s8544_s1 + $0x8] sm:$0x3]  ;;  %v6633_v10 = vld [vmem:[#allocation2 + $0x78] sm:$0xff]  }
  0xf3   : > { %v7660_v22 = vsel %vm7135_vm15, %v5574_v21, %v1935_v47  ;;  %v1937_v46 = vrot.slane %v1935_v47, 4  ;;  %6595 = vmatprep.subr.msk.bf16.mxu1 %vm879_vm0, %v6661_v26  ;;  %v1945_v29 = vrot.slane %v7458_v57, 5  ;;  %v5576_v14 = vrot.slane %v1814_v62, 9  ;;  %v4182_v57 = vld [vmem:[#allocation2 + $0x24] sm:$0xf] }
  0xf4   : > { %v7669_v9 = vsel %vm7135_vm15, %v1930_v24, %v1931_v55  ;;  %v1949_v38 = vrot.slane %v7470_v33, 5  ;;  %v7683_v25 = vsel %vm7135_vm15, %v5575_v1, %v1942_v51  ;;  %v1944_v12 = vrot.slane %v1942_v51, 4  ;;  %v7708_v55 = vld [vmem:[#allocation2 + $0x28] sm:$0xf] }
  0xf5   : > { %v5589_v53 = vcombine.low %v7655_v50, %v7669_v9  ;;  %v7679_v41 = vsel %vm7135_vm15, %v1937_v46, %v1938_v52  ;;  %v1952_v39 = vrot.slane %v7476_v61, 5  ;;  %v4228_v43 = vshrl.u32 %v4179_v11, 16 }
  0xf6   : > { %v5590_v33 = vcombine.low %v7660_v22, %v7679_v41  ;;  %v7691_v56 = vsel %vm7135_vm15, %v5576_v14, %v1949_v38  ;;  %v1951_v49 = vrot.slane %v1949_v38, 4  ;;  %v7696_v32 = vsel %vm7135_vm15, %v1944_v12, %v1945_v29  ;;  %v6634_v14 = vld [vmem:[#allocation2 + $0x84] sm:$0xff]   ;;  %v6635_v38 = vld [vmem:[#allocation2 + $0x90] sm:$0xff]   ;;  %v1816_v12 = vld [vmem:[#allocation2 + $0x9c] sm:$0xe] }
  0xf7   : > { %v4231_v44 = vshll.u32 %v4179_v11, 16  ;;  %v4237_v6 = vshll.u32 %v7673_v0, 16  ;;  %6213 = vmatmul.mubr.msk.bf16.gmra.mrb[12].mxu0 %vm830_vm4, %v6632_v13  ;;  %v5591_v62 = vcombine.low %v7683_v25, %v7696_v32  ;;  %v4241_v7 = vshrl.u32 %v7673_v0, 16  ;;  %v6640_v32 = vld [vmem:[#allocation2 + $0xcc] sm:$0xff]  }
  0xf8   : > { %v7704_v17 = vsel %vm7135_vm15, %v1951_v49, %v1952_v39  ;;  %v4247_v61 = vshll.u32 %v7685_v23, 16  ;;  %6216 = vmatprep.mubr.msk.bf16.mxu0 %vm830_vm4, %v6633_v10  ;;  %v4230_v47 = vrot.slane %v4228_v43, 4  ;;  %v7718_v46 = vrot.slane %v2914_v42, 5  ;;  %v1815_v42 = vld [vmem:[#allocation2 + $0x90] sm:$0xe] }
  0xf9   : > { %6069 = vmatmul.mubr.msk.bf16.gmra.mrb[4].mxu1 %vm830_vm4, %v5584_v3  ;;  %v5592_v21 = vcombine.low %v7691_v56, %v7704_v17  ;;  %v4233_v24 = vrot.slane %v4231_v44, 5  ;;  %v7714_v52 = vrot.slane %v4237_v6, 5  ;;  %v4243_v1 = vrot.slane %v4241_v7, 4  ;;  %v7724_v3 = vld [vmem:[#allocation2 + $0x2c] sm:$0x1] }
  0xfa   : > { %6072 = vmatprep.mubr.msk.bf16.mxu1 %vm830_vm4, %v5585_v4  ;;  %v4252_v51 = vshrl.u32 %v4182_v57, 16  ;;  %v4255_v11 = vshll.u32 %v4182_v57, 16  ;;  %v5586_v26 = vcombine.low %v7621_v63, %v7625_v34  ;;  %v4261_v29 = vshll.u32 %v7708_v55, 16  ;;  %v4185_v39 = vld [vmem:[#allocation2 + $0x30] sm:$0xf] }
  0xfb   : > { %v4234_v13 = vor.u32 %v4233_v24, %v4230_v47  ;;  %v4265_v16 = vshrl.u32 %v7708_v55, 16  ;;  %v5587_v54 = vcombine.low %v7635_v60, %v7643_v36  ;;  %v4244_v2 = vor.u32 %v4243_v1, %v7714_v52 }
  0xfc   : > { %v4254_v4 = vrot.slane %v4252_v51, 4  ;;  %v4257_v10 = vrot.slane %v4255_v11, 5  ;;  %v4249_v57 = vrot.slane %v4247_v61, 5  ;;  %v7733_v49 = vrot.slane %v4261_v29, 5 }
  0xfd   : > { %v4267_v63 = vrot.slane %v4265_v16, 4  ;;  %v4271_v34 = vshll.u32 %v7724_v3, 16  ;;  %v4235_v43 = vrot.slane %v4234_v13, 4  ;;  %v4245_v44 = vrot.slane %v4244_v2, 4  ;;  %v7754_v13 = vld [vmem:[#allocation2 + $0x34] sm:$0xf] }
  0xfe   : > { %v5577_v6 = vrot.slane %v1815_v42, 9  ;;  %v1956_v7 = vrot.slane %v7481_v28, 5  ;;  %v1959_v47 = vrot.slane %v7493_v8, 5  ;;  %v5578_v60 = vrot.slane %v1816_v12, 9  ;;  %v7774_v2 = vld [vmem:[#allocation2 + $0x40] sm:$0xf] }
  0xff   : > { %6217 = vmatmul.mubr.msk.bf16.gmra.mrb[16].mxu0 %vm830_vm4, %v6634_v14  ;;  %v4258_v36 = vor.u32 %v4257_v10, %v4254_v4  ;;  %v4268_v24 = vor.u32 %v4267_v63, %v7733_v49  ;;  %v7746_v51 = vrot.slane %v4271_v34, 5  ;;  %v7750_v28 = vsel %vm879_vm0, %v7545_v30, 0  ;;  %v4188_v30 = vld [vmem:[#allocation2 + $0x3c] sm:$0xf]  ;;  %v1817_v34 = vld [vmem:[#allocation2 + $0xa8] sm:$0xe] }
 0x100   : > { %v7742_v61 = vsel %vm7135_vm15, %v5577_v6, %v1956_v7  ;;  %v1958_v1 = vrot.slane %v1956_v7, 4  ;;  %6220 = vmatprep.mubr.msk.bf16.mxu0 %vm830_vm4, %v6635_v38  ;;  %v1963_v8 = vrot.slane %v7500_v58, 5  ;;  %v1966_v11 = vrot.slane %v7503_v31, 5  ;;  %v6636_v14 = vld [vmem:[#allocation2 + $0x9c] sm:$0xff]   ;;  %v7782_v6 = vld [vmem:[#allocation2 + $0x44] sm:$0x1] }
 0x101   : > { %6073 = vmatmul.mubr.msk.bf16.gmra.mrb[8].mxu1 %vm830_vm4, %v5586_v26  ;;  %v4240_v26 = vsel %vm6970_vm12, %v4235_v43, %v7714_v52  ;;  %v4276_v16 = vshrl.u32 %v4185_v39, 16  ;;  %v4279_v42 = vshll.u32 %v4185_v39, 16  ;;  %v4250_v58 = vsel %vm6970_vm12, %v4245_v44, %v4249_v57  ;;  %v7772_v52 = vld [vmem:[#allocation2 + $0x38] sm:$0x1]  ;;  %v6637_v39 = vld [vmem:[#allocation2 + $0xa8] sm:$0xff]  }
 0x102   : > { %6076 = vmatprep.mubr.msk.bf16.mxu1 %vm830_vm4, %v5587_v54  ;;  %v7762_v29 = vsel %vm7135_vm15, %v1958_v1, %v1959_v47  ;;  %v7770_v38 = vsel %vm7135_vm15, %v5578_v60, %v1963_v8  ;;  %v1965_v54 = vrot.slane %v1963_v8, 4  ;;  %v4259_v4 = vrot.slane %v4258_v36, 4  ;;  %v4191_v60 = vld [vmem:[#allocation2 + $0x48] sm:$0xf] }
 0x103   : > { %v4269_v10 = vrot.slane %v4268_v24, 4  ;;  %v4278_v12 = vrot.slane %v4276_v16, 4  ;;  %v4285_v63 = vshll.u32 %v7754_v13, 16  ;;  %v4281_v43 = vrot.slane %v4279_v42, 5  ;;  %v1818_v42 = vld [vmem:[#allocation2 + $0xb4] sm:$0xe] }
 0x104   : > { %v7779_v57 = vsel %vm7135_vm15, %v1965_v54, %v1966_v11  ;;  %v4289_v44 = vshrl.u32 %v7754_v13, 16  ;;  %v4300_v7 = vshrl.u32 %v4188_v30, 16  ;;  %v4303_v24 = vshll.u32 %v4188_v30, 16 }
 0x105   : > { %v7788_v36 = vrot.slane %v4285_v63, 5  ;;  %v7790_v1 = vcombine.low %v4240_v26, %v4250_v58  ;;  %v4295_v11 = vshll.u32 %v7772_v52, 16  ;;  %v4309_v16 = vshll.u32 %v7774_v2, 16 }
 0x106   : > { %v4291_v8 = vrot.slane %v4289_v44, 4  ;;  %v4264_v54 = vsel %vm6970_vm12, %v4259_v4, %v7733_v49  ;;  %v4302_v47 = vrot.slane %v4300_v7, 4  ;;  %v4305_v31 = vrot.slane %v4303_v24, 5  ;;  %v6638_v4 = vld [vmem:[#allocation2 + $0xb4] sm:$0xff]   ;;  %v6639_v44 = vld [vmem:[#allocation2 + $0xc0] sm:$0xff]  }
 0x107   : > { %6221 = vmatmul.mubr.msk.bf16.gmra.mrb[20].mxu0 %vm830_vm4, %v6636_v14  ;;  %v4313_v63 = vshrl.u32 %v7774_v2, 16  ;;  %v4282_v26 = vor.u32 %v4281_v43, %v4278_v12  ;;  %v7804_v30 = vrot.slane %v4309_v16, 5  ;;  %v5579_v14 = vrot.slane %v1817_v34, 9  ;;  %v4194_v43 = vld [vmem:[#allocation2 + $0x54] sm:$0xf] }
 0x108   : > { %6224 = vmatprep.mubr.msk.bf16.mxu0 %vm830_vm4, %v6637_v39  ;;  %v1970_v58 = vrot.slane %v7517_v20, 5  ;;  %v4274_v49 = vsel %vm6970_vm12, %v4269_v10, %v7746_v51  ;;  %v4292_v27 = vor.u32 %v4291_v8, %v7788_v36  ;;  %v7816_v12 = vrot.slane %v4295_v11, 5  ;;  %v7825_v10 = vld [vmem:[#allocation2 + $0x4c] sm:$0xf] }
 0x109   : > { %6077 = vmatmul.mubr.msk.bf16.gmra.mrb[12].mxu1 %vm830_vm4, %v5588_v35  ;;  %v4315_v19 = vrot.slane %v4313_v63, 4  ;;  %v4319_v35 = vshll.u32 %v7782_v6, 16  ;;  %v1973_v50 = vrot.slane %v7521_v18, 5  ;;  %v4306_v9 = vor.u32 %v4305_v31, %v4302_v47 }
 0x10a   : > { %6080 = vmatprep.mubr.msk.bf16.mxu1 %vm830_vm4, %v5589_v53  ;;  %v7820_v20 = vsel %vm7135_vm15, %v5579_v14, %v1970_v58  ;;  %v1972_v34 = vrot.slane %v1970_v58, 4  ;;  %v5580_v39 = vrot.slane %v1818_v42, 9  ;;  %v1977_v51 = vrot.slane %v7530_v37, 5 }
 0x10b   : > { %v4316_v53 = vor.u32 %v4315_v19, %v7804_v30  ;;  %v4283_v7 = vrot.slane %v4282_v26, 4  ;;  %v1980_v8 = vrot.slane %v7535_v15, 5  ;;  %v4324_v11 = vshrl.u32 %v4191_v60, 16 }
 0x10c   : > { %v7829_v24 = vsel %vm7135_vm15, %v1972_v34, %v1973_v50  ;;  %v7832_v16 = vcombine.low %v4264_v54, %v4274_v49  ;;  %v4293_v18 = vrot.slane %v4292_v27, 4  ;;  %v4321_v31 = vrot.slane %v4319_v35, 5  ;;  %v7843_v49 = vld [vmem:[#allocation2 + $0x58] sm:$0xf] }
 0x10d   : > { %v5595_v47 = vcombine.low %v7820_v20, %v7829_v24  ;;  %v7838_v37 = vsel %vm7135_vm15, %v5580_v39, %v1977_v51  ;;  %v1979_v42 = vrot.slane %v1977_v51, 4  ;;  %v4326_v63 = vrot.slane %v4324_v11, 4 }
 0x10e   : > { %v4327_v26 = vshll.u32 %v4191_v60, 16  ;;  %v4307_v14 = vrot.slane %v4306_v9, 4  ;;  %v4317_v58 = vrot.slane %v4316_v53, 4  ;;  %v4333_v15 = vshll.u32 %v7825_v10, 16  ;;  %v7870_v9 = vld [vmem:[#allocation2 + $0x5c] sm:$0x1] }
 0x10f   : > { %6225 = vmatmul.mubr.msk.bf16.gmra.mrb[24].mxu0 %vm830_vm4, %v6638_v4  ;;  %v4337_v54 = vshrl.u32 %v7825_v10, 16  ;;  %v4288_v60 = vsel %vm6970_vm12, %v4283_v7, %v7788_v36  ;;  %v7855_v27 = vsel %vm7135_vm15, %v1979_v42, %v1980_v8  ;;  %v4348_v35 = vshrl.u32 %v4194_v43, 16  ;;  %v4197_v4 = vld [vmem:[#allocation2 + $0x60] sm:$0xf] }
 0x110   : > { %6228 = vmatprep.mubr.msk.bf16.mxu0 %vm830_vm4, %v6639_v44  ;;  %v4329_v19 = vrot.slane %v4327_v26, 5  ;;  %v4298_v22 = vsel %vm6970_vm12, %v4293_v18, %v7816_v12  ;;  %v5596_v41 = vcombine.low %v7838_v37, %v7855_v27  ;;  %v7868_v36 = vrot.slane %v4333_v15, 5  ;;  %v7879_v44 = vld [vmem:[#allocation2 + $0x64] sm:$0xf] }
 0x111   : > { %6081 = vmatmul.mubr.msk.bf16.gmra.mrb[16].mxu1 %vm830_vm4, %v5590_v33  ;;  %v7866_v33 = vld [vmem:[#allocation2 + $0x50] sm:$0x1]  ;;  %v4339_v34 = vrot.slane %v4337_v54, 4  ;;  %v4350_v53 = vrot.slane %v4348_v35, 4  ;;  %v4351_v39 = vshll.u32 %v4194_v43, 16  ;;  %v4357_v25 = vshll.u32 %v7843_v49, 16 }
 0x112   : > { %6084 = vmatprep.mubr.msk.bf16.mxu1 %vm830_vm4, %v5591_v62  ;;  %v4330_v50 = vor.u32 %v4329_v19, %v4326_v63  ;;  %v4312_v62 = vsel %vm6970_vm12, %v4307_v14, %v7804_v30  ;;  %v4322_v12 = vsel %vm6970_vm12, %v4317_v58, %v4321_v31  ;;  %v4361_v51 = vshrl.u32 %v7843_v49, 16  ;;  %v7886_v30 = vld [vmem:[#allocation2 + $0x68] sm:$0x1]  ;;  %v4200_v19 = vld [vmem:[#allocation2 + $0x6c] sm:$0xf] }
 0x113   : > { %v4372_v7 = vshrl.u32 %v4197_v4, 16  ;;  %v4343_v8 = vshll.u32 %v7866_v33, 16  ;;  %v4353_v11 = vrot.slane %v4351_v39, 5  ;;  %v7882_v18 = vrot.slane %v4357_v25, 5  ;;  %v7896_v25 = vld [vmem:[#allocation2 + $0x70] sm:$0xf] }
 0x114   : > { %v4375_v43 = vshll.u32 %v4197_v4, 16  ;;  %v4340_v42 = vor.u32 %v4339_v34, %v7868_v36  ;;  %v4363_v63 = vrot.slane %v4361_v51, 4  ;;  %v4367_v26 = vshll.u32 %v7870_v9, 16 }
 0x115   : > { %v4374_v14 = vrot.slane %v4372_v7, 4  ;;  %v7888_v31 = vrot.slane %v4330_v50, 4  ;;  %v4354_v58 = vor.u32 %v4353_v11, %v4350_v53  ;;  %v4381_v54 = vshll.u32 %v7879_v44, 16  ;;  %v7909_v7 = vld [vmem:[#allocation2 + $0x74] sm:$0x1] }
 0x116   : > { %v4377_v15 = vrot.slane %v4375_v43, 5  ;;  %v5759_v35 = vcombine.low %v4288_v60, %v4298_v22  ;;  %v7892_v39 = vcombine.low %v4312_v62, %v4322_v12  ;;  %v4364_v4 = vor.u32 %v4363_v63, %v7882_v18  ;;  %v4203_v11 = vld [vmem:[#allocation2 + $0x78] sm:$0xf]  ;;  %v7917_v63 = vld [vmem:[#allocation2 + $0x7c] sm:$0xf] }
 0x117   : > { %6229 = vmatmul.mubr.msk.bf16.gmra.mrb[28].mxu0 %vm830_vm4, %v6640_v32  ;;  %v4385_v34 = vshrl.u32 %v7879_v44, 16  ;;  %v4345_v50 = vrot.slane %v4343_v8, 5  ;;  %v4383_v32 = vrot.slane %v4381_v54, 5  ;;  %v4391_v60 = vshll.u32 %v7886_v30, 16 }
 0x118   : > { %6234 = vmatprep.mubr.msk.bf16.mxu0 %vm830_vm4, %v7790_v1  ;;  %v4378_v53 = vor.u32 %v4377_v15, %v4374_v14  ;;  %v8565_v22 = vcombine.low %v7742_v61, %v7762_v29  ;;  %v4341_v62 = vrot.slane %v4340_v42, 4  ;;  %v4369_v12 = vrot.slane %v4367_v26, 5 }
 0x119   : > { %6085 = vmatmul.mubr.msk.bf16.gmra.mrb[20].mxu1 %vm830_vm4, %v5592_v21  ;;  %v4387_v51 = vrot.slane %v4385_v34, 4  ;;  %v4396_v56 = vshrl.u32 %v4200_v19, 16  ;;  %v4336_v17 = vsel %vm6970_vm12, %v7888_v31, %v7868_v36  ;;  %v4355_v21 = vrot.slane %v4354_v58, 4 }
 0x11a   : > { %6088 = vmatprep.mubr.msk.bf16.mxu1 %vm830_vm4, %v8565_v22  ;;  %v4399_v1 = vshll.u32 %v4200_v19, 16  ;;  %v4405_v8 = vshll.u32 %v7896_v25, 16  ;;  %v4365_v43 = vrot.slane %v4364_v4, 4  ;;  %v4409_v42 = vshrl.u32 %v7896_v25, 16 }
 0x11b   : > { %v4388_v61 = vor.u32 %v4387_v51, %v4383_v32  ;;  %v4398_v29 = vrot.slane %v4396_v56, 4  ;;  %v4379_v26 = vrot.slane %v4378_v53, 4  ;;  %v4393_v14 = vrot.slane %v4391_v60, 5  ;;  %v4206_v56 = vld [vmem:[#allocation2 + $0x84] sm:$0xf] }
 0x11c   : > { %v4401_v15 = vrot.slane %v4399_v1, 5  ;;  %v7919_v54 = vrot.slane %v4405_v8, 5  ;;  %v4411_v22 = vrot.slane %v4409_v42, 4  ;;  %v4415_v36 = vshll.u32 %v7909_v7, 16 }
 0x11d   : > { %v4389_v34 = vrot.slane %v4388_v61, 4  ;;  %v4420_v31 = vshrl.u32 %v4203_v11, 16  ;;  %v4423_v19 = vshll.u32 %v4203_v11, 16  ;;  %v4429_v4 = vshll.u32 %v7917_v63, 16  ;;  %v7934_v11 = vld [vmem:[#allocation2 + $0x88] sm:$0xf] }
 0x11e   : > { %v4402_v58 = vor.u32 %v4401_v15, %v4398_v29  ;;  %v4433_v51 = vshrl.u32 %v7917_v63, 16  ;;  %v4346_v53 = vsel %vm6970_vm12, %v4341_v62, %v4345_v50  ;;  %v4360_v60 = vsel %vm6970_vm12, %v4355_v21, %v7882_v18  ;;  %v7943_v50 = vld [vmem:[#allocation2 + $0x80] sm:$0x1] }
 0x11f   : > { %6235 = vmatmul.mubr.msk.bf16.vlgmr.msra.gmra.mrb[0].mxu0 %vm830_vm4, %v7832_v16  ;;  %v4370_v1 = vsel %vm6970_vm12, %v4365_v43, %v4369_v12  ;;  %v4412_v8 = vor.u32 %v4411_v22, %v7919_v54  ;;  %v8566_v61 = vcombine.low %v7770_v38, %v7779_v57  ;;  %v4384_v16 = vsel %vm6970_vm12, %v4379_v26, %v4383_v32 }
 0x120   : > { %6267 = vmatpush3.bf16.msra.mxu0 %v7750_v28  ;;  %v4422_v18 = vrot.slane %v4420_v31, 4  ;;  %v4425_v62 = vrot.slane %v4423_v19, 5  ;;  %v7945_v21 = vrot.slane %v4429_v4, 5  ;;  %6238 = vmatprep.mubr.msk.bf16.mxu0 %vm830_vm4, %v5759_v35  ;;  %v4394_v28 = vsel %vm6970_vm12, %v4389_v34, %v4393_v14  ;;  %v4209_v35 = vld [vmem:[#allocation2 + $0x90] sm:$0xf] }
 0x121   : > { %6089 = vmatmul.mubr.msk.bf16.gmra.mrb[24].mxu1 %vm830_vm4, %v8566_v61  ;;  %v7954_v38 = vrot.slane %v4402_v58, 4  ;;  %v4435_v57 = vrot.slane %v4433_v51, 4  ;;  %v4444_v32 = vshrl.u32 %v4206_v56, 16  ;;  %v7956_v12 = vrot.slane %v4412_v8, 4  ;;  %v7969_v31 = vld [vmem:[#allocation2 + $0x8c] sm:$0x1] }
 0x122   : > { %6092 = vmatprep.mubr.msk.bf16.mxu1 %vm830_vm4, %v5595_v47  ;;  %v7958_v43 = vrot.slane %v4415_v36, 5  ;;  %v4447_v29 = vshll.u32 %v4206_v56, 16  ;;  %v4453_v42 = vshll.u32 %v7934_v11, 16  ;;  %v5761_v26 = vcombine.low %v4336_v17, %v4346_v53  ;;  %v7964_v47 = vld [vmem:[#allocation2 + $0x94] sm:$0xf]  ;;  %v6641_v58 = vld [vmem:[#allocation2 + $0xc] sm:$0xff]  }
 0x123   : > { %v7961_v15 = vcombine.low %v4360_v60, %v4370_v1  ;;  %v4439_v20 = vshll.u32 %v7943_v50, 16  ;;  %v4446_v24 = vrot.slane %v4444_v32, 4  ;;  %8567 = vst [vmem:[#allocation3_spill] sm:$0xff] %v7964_v47  ;;  %v7966_v14 = vcombine.low %v4384_v16, %v4394_v28  ;;  %v7982_v60 = vld [vmem:[#allocation2 + $0x98] sm:$0x1] }
 0x124   : > { %v4426_v34 = vor.u32 %v4425_v62, %v4422_v18  ;;  %v4436_v22 = vor.u32 %v4435_v57, %v7945_v21  ;;  %v4449_v36 = vrot.slane %v4447_v29, 5  ;;  %v4408_v17 = vsel %vm6970_vm12, %v7954_v38, %v7919_v54  ;;  %8568 = vst [vmem:[#allocation4_spill] sm:$0xff] %v7982_v60  ;;  %v4212_v61 = vld [vmem:[#allocation2 + $0x9c] sm:$0xf]  ;;  %v7988_v28 = vld [vmem:[#allocation2 + $0xa0] sm:$0xf] }
 0x125   : > { %v7975_v19 = vrot.slane %v4453_v42, 5  ;;  %v4457_v4 = vshrl.u32 %v7934_v11, 16  ;;  %v4468_v51 = vshrl.u32 %v4209_v35, 16  ;;  %v4418_v56 = vsel %vm6970_vm12, %v7956_v12, %v7958_v43 }
 0x126   : > { %v4450_v53 = vor.u32 %v4449_v36, %v4446_v24  ;;  %v4471_v1 = vshll.u32 %v4209_v35, 16  ;;  %v4477_v8 = vshll.u32 %v7964_v47, 16  ;;  %v4441_v54 = vrot.slane %v4439_v20, 5  ;;  %v6642_v36 = vld [vmem:[#allocation2 + $0x18] sm:$0xff]  }
 0x127   : > { %6239 = vmatmul.mubr.msk.bf16.gmra.mrb[4].mxu0 %vm830_vm4, %v7892_v39  ;;  %v4459_v16 = vrot.slane %v4457_v4, 4  ;;  %v4463_v18 = vshll.u32 %v7969_v31, 16  ;;  %v4470_v62 = vrot.slane %v4468_v51, 4  ;;  %v4427_v38 = vrot.slane %v4426_v34, 4 }
 0x128   : > { %6242 = vmatprep.mubr.msk.bf16.mxu0 %vm830_vm4, %v5761_v26  ;;  %v4437_v57 = vrot.slane %v4436_v22, 4  ;;  %v4451_v32 = vrot.slane %v4450_v53, 4  ;;  %v4473_v12 = vrot.slane %v4471_v1, 5  ;;  %v7997_v43 = vrot.slane %v4477_v8, 5  ;;  %v4215_v26 = vld [vmem:[#allocation2 + $0xa8] sm:$0xf] }
 0x129   : > { %6093 = vmatmul.mubr.msk.bf16.gmra.mrb[28].mxu1 %vm830_vm4, %v5596_v41  ;;  %v4460_v39 = vor.u32 %v4459_v16, %v7975_v19  ;;  %v4481_v29 = vshrl.u32 %v7964_v47, 16  ;;  %v4492_v42 = vshrl.u32 %v4212_v61, 16  ;;  %v4487_v37 = vshll.u32 %v7982_v60, 16  ;;  %v8012_v16 = vld [vmem:[#allocation2 + $0xa4] sm:$0x1] }
 0x12a   : > { %6098 = vmatprep.mubr.msk.bf16.mxu1 %vm830_vm4, %v6641_v58  ;;  %v4474_v35 = vor.u32 %v4473_v12, %v4470_v62  ;;  %v4495_v27 = vshll.u32 %v4212_v61, 16  ;;  %v4501_v41 = vshll.u32 %v7988_v28, 16  ;;  %v4465_v24 = vrot.slane %v4463_v18, 5  ;;  %v6643_v58 = vld [vmem:[#allocation2 + $0x24] sm:$0xff]   ;;  %v8016_v62 = vld [vmem:[#allocation2 + $0xac] sm:$0xf] }
 0x12b   : > { %v4461_v20 = vrot.slane %v4460_v39, 4  ;;  %v4483_v34 = vrot.slane %v4481_v29, 4  ;;  %v4494_v22 = vrot.slane %v4492_v42, 4  ;;  %v4432_v4 = vsel %vm6970_vm12, %v4427_v38, %v7945_v21  ;;  %8569 = vst [vmem:[#allocation5_spill] sm:$0xff] %v8016_v62 }
 0x12c   : > { %v4442_v51 = vsel %vm6970_vm12, %v4437_v57, %v4441_v54  ;;  %v4497_v53 = vrot.slane %v4495_v27, 5  ;;  %v4505_v1 = vshrl.u32 %v7988_v28, 16  ;;  %v4456_v8 = vsel %vm6970_vm12, %v4451_v32, %v7975_v19  ;;  %v4218_v57 = vld [vmem:[#allocation2 + $0xb4] sm:$0xf] }
 0x12d   : > { %v4484_v61 = vor.u32 %v4483_v34, %v7997_v43  ;;  %v8014_v18 = vrot.slane %v4501_v41, 5  ;;  %v4516_v12 = vshrl.u32 %v4215_v26, 16  ;;  %v4475_v21 = vrot.slane %v4474_v35, 4 }
 0x12e   : > { %v4489_v38 = vrot.slane %v4487_v37, 5  ;;  %v4498_v39 = vor.u32 %v4497_v53, %v4494_v22  ;;  %v4507_v54 = vrot.slane %v4505_v1, 4  ;;  %v4466_v19 = vsel %vm6970_vm12, %v4461_v20, %v4465_v24  ;;  %v8036_v24 = vld [vmem:[#allocation2 + $0xb8] sm:$0xf] }
 0x12f   : > { %6243 = vmatmul.mubr.msk.bf16.gmra.mrb[8].mxu0 %vm830_vm4, %v7961_v15  ;;  %v4485_v32 = vrot.slane %v4484_v61, 4  ;;  %v4518_v29 = vrot.slane %v4516_v12, 4  ;;  %v4519_v42 = vshll.u32 %v4215_v26, 16  ;;  %v8570_v27 = vor.u32 %v7580_v45, %v7553_v48  ;;  %8571 = vst [vmem:[#allocation6_spill] sm:$0xff] %v8036_v24 }
 0x130   : > { %6246 = vmatprep.mubr.msk.bf16.mxu0 %vm830_vm4, %v7966_v14  ;;  %v5764_v35 = vcombine.low %v4408_v17, %v4418_v56  ;;  %v4525_v37 = vshll.u32 %v8016_v62, 16  ;;  %v4529_v15 = vshrl.u32 %v8016_v62, 16  ;;  %v4508_v26 = vor.u32 %v4507_v54, %v8014_v18  ;;  %v8045_v56 = vld [vmem:[#allocation2 + $0xb0] sm:$0x1] }
 0x131   : > { %v8025_v41 = vrot.slane %v8570_v27, 4  ;;  %6099 = vmatmul.mubr.msk.bf16.vlgmr.msra.gmra.mrb[0].mxu1 %vm830_vm4, %v6642_v36  ;;  %v4511_v45 = vshll.u32 %v8012_v16, 16  ;;  %v4521_v20 = vrot.slane %v4519_v42, 5  ;;  %v4540_v34 = vshrl.u32 %v4218_v57, 16  ;;  %8572 = vst [vmem:[#allocation7_spill] sm:$0xff] %v8045_v56 }
 0x132   : > { %6102 = vmatprep.mubr.msk.bf16.mxu1 %vm830_vm4, %v6643_v58  ;;  %6301 = vmatpush3.bf16.msra.mxu1 %v6804_v5  ;;  %v5765_v22 = vcombine.low %v4432_v4, %v4442_v51  ;;  %v8038_v36 = vcombine.low %v4456_v8, %v4466_v19  ;;  %v4480_v14 = vsel %vm6970_vm12, %v4475_v21, %v7997_v43  ;;  %v8043_v17 = vrot.slane %v4498_v39, 4  ;;  %v6644_v5 = vld [vmem:[#allocation2 + $0x30] sm:$0xff]   ;;  %v6645_v58 = vld [vmem:[#allocation2 + $0x3c] sm:$0xff]  }
 0x133   : > { %v4490_v53 = vsel %vm6970_vm12, %v4485_v32, %v4489_v38  ;;  %v4522_v1 = vor.u32 %v4521_v20, %v4518_v29  ;;  %v8049_v61 = vrot.slane %v4525_v37, 5  ;;  %v4531_v12 = vrot.slane %v4529_v15, 4  ;;  %v4221_v4 = vld [vmem:[#allocation2 + $0xc0] sm:$0xf]  ;;  %v8051_v51 = vld [vmem:[#allocation2 + $0xbc] sm:$0x1] }
 0x134   : > { %8573 = vst [vmem:[#allocation8_spill] sm:$0xff] %v8051_v51  ;;  %v4542_v8 = vrot.slane %v4540_v34, 4  ;;  %v4543_v54 = vshll.u32 %v4218_v57, 16  ;;  %v4549_v43 = vshll.u32 %v8036_v24, 16  ;;  %v4553_v21 = vshrl.u32 %v8036_v24, 16 }
 0x135   : > { %v8055_v39 = vrot.slane %v4508_v26, 4  ;;  %v8057_v19 = vrot.slane %v4511_v45, 5  ;;  %v8059_v42 = vrot.slane %v4522_v1, 4  ;;  %v4535_v38 = vshll.u32 %v8045_v56, 16  ;;  %v8062_v32 = vld [vmem:[#allocation2 + $0xc4] sm:$0xf] }
 0x136   : > { %8574 = vst [vmem:[#allocation9_spill] sm:$0xff] %v8062_v32  ;;  %v4545_v29 = vrot.slane %v4543_v54, 5  ;;  %v8064_v27 = vrot.slane %v4549_v43, 5  ;;  %v4555_v37 = vrot.slane %v4553_v21, 4  ;;  %v8066_v15 = vld [vmem:[#allocation2 + $0xc8] sm:$0x1]  ;;  %v5767_v20 = vcombine.low %v4480_v14, %v4490_v53 }
 0x137   : > { %8575 = vst [vmem:[#allocation10_spill] sm:$0xff] %v8066_v15  ;;  %v4564_v57 = vshrl.u32 %v4221_v4, 16  ;;  %6247 = vmatmul.mubr.msk.bf16.gmra.mrb[12].mxu0 %vm830_vm4, %v5764_v35  ;;  %v4504_v26 = vsel %vm6970_vm12, %v8043_v17, %v8014_v18  ;;  %v4532_v45 = vor.u32 %v4531_v12, %v8049_v61  ;;  %v4567_v34 = vshll.u32 %v4221_v4, 16  ;;  %v4224_v35 = vld [vmem:[#allocation2 + $0xcc] sm:$0xf] }
 0x138   : > { %6250 = vmatprep.mubr.msk.bf16.mxu0 %vm830_vm4, %v5765_v22  ;;  %v4546_v1 = vor.u32 %v4545_v29, %v4542_v8  ;;  %v4559_v54 = vshll.u32 %v8051_v51, 16  ;;  %v4573_v21 = vshll.u32 %v8062_v32, 16  ;;  %v4556_v14 = vor.u32 %v4555_v37, %v8064_v27  ;;  %v8082_v12 = vld [vmem:[#allocation2 + $0xd0] sm:$0xf]  ;;  %v6646_v8 = vld [vmem:[#allocation2 + $0x48] sm:$0xff]  }
 0x139   : > { %6103 = vmatmul.mubr.msk.bf16.gmra.mrb[4].mxu1 %vm830_vm4, %v6644_v5  ;;  %v4566_v43 = vrot.slane %v4564_v57, 4  ;;  %v4569_v53 = vrot.slane %v4567_v34, 5  ;;  %v4577_v18 = vshrl.u32 %v8062_v32, 16  ;;  %v4583_v17 = vshll.u32 %v8066_v15, 16  ;;  %v8092_v32 = vld [vmem:[#allocation2 + $0xd4] sm:$0x1] }
 0x13a   : > { %6106 = vmatprep.mubr.msk.bf16.mxu1 %vm830_vm4, %v6645_v58  ;;  %v4514_v22 = vsel %vm6970_vm12, %v8055_v39, %v8057_v19  ;;  %v4528_v5 = vsel %vm6970_vm12, %v8059_v42, %v8049_v61  ;;  %v4537_v58 = vrot.slane %v4535_v38, 5  ;;  %v4575_v4 = vrot.slane %v4573_v21, 5  ;;  %v6647_v39 = vld [vmem:[#allocation2 + $0x54] sm:$0xff]  }
 0x13b   : > { %v4533_v29 = vrot.slane %v4532_v45, 4  ;;  %v4570_v37 = vor.u32 %v4569_v53, %v4566_v43  ;;  %v4579_v57 = vrot.slane %v4577_v18, 4  ;;  %v4588_v34 = vshrl.u32 %v4224_v35, 16  ;;  %v4903_v61 = vld [vmem:[#allocation2 + $0x18] sm:$0xe] }
 0x13c   : > { %v4547_v15 = vrot.slane %v4546_v1, 4  ;;  %v4561_v51 = vrot.slane %v4559_v54, 5  ;;  %v4591_v24 = vshll.u32 %v4224_v35, 16  ;;  %v4597_v56 = vshll.u32 %v8082_v12, 16  ;;  %v4904_v18 = vld [vmem:[#allocation2 + $0x24] sm:$0xe] }
 0x13d   : > { %v4557_v19 = vrot.slane %v4556_v14, 4  ;;  %v4580_v62 = vor.u32 %v4579_v57, %v4575_v4  ;;  %v4585_v60 = vrot.slane %v4583_v17, 5  ;;  %v4590_v47 = vrot.slane %v4588_v34, 4  ;;  %v4907_v34 = vld [vmem:[#allocation2 + $0x48] sm:$0xe] }
 0x13e   : > { %v4571_v42 = vrot.slane %v4570_v37, 4  ;;  %v4593_v38 = vrot.slane %v4591_v24, 5  ;;  %v8095_v21 = vrot.slane %v4597_v56, 5  ;;  %v4601_v45 = vshrl.u32 %v8082_v12, 16 }
 0x13f   : > { %6251 = vmatmul.mubr.msk.bf16.gmra.mrb[16].mxu0 %vm830_vm4, %v8038_v36  ;;  %v4538_v1 = vsel %vm6970_vm12, %v4533_v29, %v4537_v58  ;;  %v4581_v54 = vrot.slane %v4580_v62, 4  ;;  %v4607_v43 = vshll.u32 %v8092_v32, 16  ;;  %v4969_v35 = vrot.slane %v7673_v0, 5  ;;  %v4905_v58 = vld [vmem:[#allocation2 + $0x30] sm:$0xe] }
 0x140   : > { %6254 = vmatprep.mubr.msk.bf16.mxu0 %vm830_vm4, %v5767_v20  ;;  %v4594_v24 = vor.u32 %v4593_v38, %v4590_v47  ;;  %v4603_v56 = vrot.slane %v4601_v45, 4  ;;  %v5789_v14 = vrot.slane %v4903_v61, 9  ;;  %v4972_v53 = vrot.slane %v7685_v23, 5 }
 0x141   : > { %6107 = vmatmul.mubr.msk.bf16.gmra.mrb[8].mxu1 %vm830_vm4, %v6646_v8  ;;  %v5768_v17 = vcombine.low %v4504_v26, %v4514_v22  ;;  %v4552_v62 = vsel %vm6970_vm12, %v4547_v15, %v8064_v27  ;;  %v4562_v0 = vsel %vm6970_vm12, %v4557_v19, %v4561_v51  ;;  %v4971_v36 = vrot.slane %v4969_v35, 4  ;;  %v4906_v27 = vld [vmem:[#allocation2 + $0x3c] sm:$0xe]  ;;  %v6648_v15 = vld [vmem:[#allocation2 + $0x60] sm:$0xff]   ;;  %v6649_v19 = vld [vmem:[#allocation2 + $0x6c] sm:$0xff]  }
 0x142   : > { %6110 = vmatprep.mubr.msk.bf16.mxu1 %vm830_vm4, %v6647_v39  ;;  %v4576_v47 = vsel %vm6970_vm12, %v4571_v42, %v4575_v4  ;;  %v4586_v20 = vsel %vm6970_vm12, %v4581_v54, %v4585_v60  ;;  %v4595_v23 = vrot.slane %v4594_v24, 4  ;;  %v4604_v26 = vor.u32 %v4603_v56, %v8095_v21  ;;  %v4908_v54 = vld [vmem:[#allocation2 + $0x54] sm:$0xe]  ;;  %v2654_v24 = vld [vmem:[#allocation2 + $0x6c] sm:$0xf] }
 0x143   : > { %v5769_v22 = vcombine.low %v4528_v5, %v4538_v1  ;;  %v4609_v8 = vrot.slane %v4607_v43, 5  ;;  %v5790_v29 = vrot.slane %v4904_v18, 9  ;;  %v4976_v37 = vrot.slane %v7708_v55, 5 }
 0x144   : > { %v4605_v57 = vrot.slane %v4604_v26, 4  ;;  %v8121_v51 = vsel %vm7135_vm15, %v5789_v14, %v4969_v35  ;;  %v8125_v4 = vsel %vm7135_vm15, %v4971_v36, %v4972_v53  ;;  %v5791_v60 = vrot.slane %v4905_v58, 9  ;;  %v6650_v26 = vld [vmem:[#allocation2 + $0x78] sm:$0xff]  }
 0x145   : > { %v5770_v39 = vcombine.low %v4552_v62, %v4562_v0  ;;  %v5771_v5 = vcombine.low %v4576_v47, %v4586_v20  ;;  %v4979_v61 = vrot.slane %v7724_v3, 5  ;;  %v4983_v55 = vrot.slane %v7754_v13, 5  ;;  %v2657_v47 = vld [vmem:[#allocation2 + $0x78] sm:$0xf] }
 0x146   : > { %v4600_v42 = vsel %vm6970_vm12, %v4595_v23, %v8095_v21  ;;  %v5792_v38 = vrot.slane %v4906_v27, 9  ;;  %v4990_v45 = vrot.slane %v7774_v2, 5  ;;  %v4993_v1 = vrot.slane %v7782_v6, 5  ;;  %v6651_v27 = vld [vmem:[#allocation2 + $0x84] sm:$0xff]  }
 0x147   : > { %6255 = vmatmul.mubr.msk.bf16.gmra.mrb[20].mxu0 %vm830_vm4, %v5768_v17  ;;  %v5805_v43 = vcombine.low %v8121_v51, %v8125_v4  ;;  %v8139_v3 = vsel %vm7135_vm15, %v5790_v29, %v4976_v37  ;;  %v4978_v13 = vrot.slane %v4976_v37, 4  ;;  %v5793_v35 = vrot.slane %v4907_v34, 9  ;;  %v4909_v34 = vld [vmem:[#allocation2 + $0x60] sm:$0xe]  ;;  %v6666_v51 = vld [vmem:[#allocation2 + $0x94] sm:$0xf] }
 0x148   : > { %6258 = vmatprep.mubr.msk.bf16.mxu0 %vm830_vm4, %v5769_v22  ;;  %v4610_v2 = vsel %vm6970_vm12, %v4605_v57, %v4609_v8  ;;  %v8147_v6 = vsel %vm7135_vm15, %v5791_v60, %v4983_v55  ;;  %v8151_v21 = vsel %vm7135_vm15, %v5792_v38, %v4990_v45  ;;  %v4992_v56 = vrot.slane %v4990_v45, 4  ;;  %v6662_v8 = vld [vmem:[#allocation2 + $0x70] sm:$0xf]  ;;  %v4910_v45 = vld [vmem:[#allocation2 + $0x6c] sm:$0xe] }
 0x149   : > { %6111 = vmatmul.mubr.msk.bf16.gmra.mrb[12].mxu1 %vm830_vm4, %v6648_v15  ;;  %v4997_v14 = vrot.slane %v7825_v10, 5  ;;  %v5000_v53 = vrot.slane %v7866_v33, 5  ;;  %v5794_v18 = vrot.slane %v4908_v54, 9  ;;  %v5004_v17 = vrot.slane %v7843_v49, 5 }
 0x14a   : > { %6114 = vmatprep.mubr.msk.bf16.mxu1 %vm830_vm4, %v6649_v19  ;;  %v8159_v62 = vsel %vm7135_vm15, %v4992_v56, %v4993_v1  ;;  %v5007_v0 = vrot.slane %v7870_v9, 5  ;;  %v2871_v36 = vshrl.u32 %v2654_v24, 16  ;;  %v2874_v58 = vshll.u32 %v2654_v24, 16 }
 0x14b   : > { %v4985_v20 = vrot.slane %v4983_v55, 4  ;;  %v5808_v23 = vcombine.low %v8151_v21, %v8159_v62  ;;  %v8166_v10 = vsel %vm7135_vm15, %v5793_v35, %v4997_v14  ;;  %v4999_v33 = vrot.slane %v4997_v14, 4  ;;  %v6663_v35 = vld [vmem:[#allocation2 + $0x74] sm:$0x1] }
 0x14c   : > { %v4986_v49 = vrot.slane %v7772_v52, 5  ;;  %v8171_v22 = vsel %vm7135_vm15, %v5794_v18, %v5004_v17  ;;  %v5006_v9 = vrot.slane %v5004_v17, 4  ;;  %v2880_v29 = vshll.u32 %v6662_v8, 16 }
 0x14d   : > { %v5772_v37 = vcombine.low %v4600_v42, %v4610_v2  ;;  %v8175_v15 = vsel %vm7135_vm15, %v4999_v33, %v5000_v53  ;;  %v2884_v57 = vshrl.u32 %v6662_v8, 16  ;;  %v2895_v60 = vshrl.u32 %v2657_v47, 16  ;;  %v6653_v8 = vld [vmem:[#allocation2 + $0x9c] sm:$0xff]  }
 0x14e   : > { %v5809_v19 = vcombine.low %v8166_v10, %v8175_v15  ;;  %v8181_v52 = vsel %vm7135_vm15, %v5006_v9, %v5007_v0  ;;  %v2873_v55 = vrot.slane %v2871_v36, 4  ;;  %v2876_v38 = vrot.slane %v2874_v58, 5 }
 0x14f   : > { %6259 = vmatmul.mubr.msk.bf16.gmra.mrb[24].mxu0 %vm830_vm4, %v5770_v39  ;;  %v8186_v42 = vsel %vm7135_vm15, %v4978_v13, %v4979_v61  ;;  %v5810_v1 = vcombine.low %v8171_v22, %v8181_v52  ;;  %v8190_v54 = vrot.slane %v2880_v29, 5  ;;  %v2890_v24 = vshll.u32 %v6663_v35, 16  ;;  %v2660_v13 = vld [vmem:[#allocation2 + $0x84] sm:$0xf] }
 0x150   : > { %6262 = vmatprep.mubr.msk.bf16.mxu0 %vm830_vm4, %v5771_v5  ;;  %v2897_v2 = vrot.slane %v2895_v60, 4  ;;  %v2898_v56 = vshll.u32 %v2657_v47, 16  ;;  %v2917_v39 = vsel %vm6970_vm12, %v8025_v41, %v7718_v46  ;;  %v5795_v61 = vrot.slane %v4909_v34, 9 }
 0x151   : > { %6115 = vmatmul.mubr.msk.bf16.gmra.mrb[16].mxu1 %vm830_vm4, %v6650_v26  ;;  %v2886_v14 = vrot.slane %v2884_v57, 4  ;;  %v5011_v53 = vrot.slane %v7879_v44, 5  ;;  %v5014_v18 = vrot.slane %v7886_v30, 5  ;;  %v5796_v17 = vrot.slane %v4910_v45, 9  ;;  %v6652_v44 = vld [vmem:[#allocation2 + $0x90] sm:$0xff]  }
 0x152   : > { %6118 = vmatprep.mubr.msk.bf16.mxu1 %vm830_vm4, %v6651_v27  ;;  %v2877_v0 = vor.u32 %v2876_v38, %v2873_v55  ;;  %v2900_v36 = vrot.slane %v2898_v56, 5  ;;  %v5018_v5 = vrot.slane %v7896_v25, 5  ;;  %v5021_v58 = vrot.slane %v7909_v7, 5  ;;  %v2663_v57 = vld [vmem:[#allocation2 + $0x90] sm:$0xf] }
 0x153   : > { %v8205_v47 = vsel %vm7135_vm15, %v4985_v20, %v4986_v49  ;;  %v8209_v46 = vsel %vm7135_vm15, %v5795_v61, %v5011_v53  ;;  %v5013_v41 = vrot.slane %v5011_v53, 4  ;;  %v2919_v33 = vshrl.u32 %v2660_v13, 16  ;;  %v6664_v49 = vld [vmem:[#allocation2 + $0x88] sm:$0xf] }
 0x154   : > { %v2901_v26 = vor.u32 %v2900_v36, %v2897_v2  ;;  %v8213_v30 = vsel %vm7135_vm15, %v5796_v17, %v5018_v5  ;;  %v5020_v9 = vrot.slane %v5018_v5, 4  ;;  %v2922_v25 = vshll.u32 %v2660_v13, 16  ;;  %v6665_v17 = vld [vmem:[#allocation2 + $0x8c] sm:$0x1]  ;;  %v4911_v36 = vld [vmem:[#allocation2 + $0x78] sm:$0xe] }
 0x155   : > { %v2887_v7 = vor.u32 %v2886_v14, %v8190_v54  ;;  %v8216_v29 = vrot.slane %v2890_v24, 5  ;;  %v8220_v20 = vsel %vm7135_vm15, %v5013_v41, %v5014_v18  ;;  %v2928_v27 = vshll.u32 %v6664_v49, 16 }
 0x156   : > { %v8222_v60 = vrot.slane %v2877_v0, 4  ;;  %v2902_v34 = vrot.slane %v2901_v26, 4  ;;  %v5811_v55 = vcombine.low %v8209_v46, %v8220_v20  ;;  %v8228_v38 = vsel %vm7135_vm15, %v5020_v9, %v5021_v58 }
 0x157   : > { %6263 = vmatmul.mubr.msk.bf16.gmra.mrb[28].mxu0 %vm830_vm4, %v5772_v37  ;;  %v5812_v45 = vcombine.low %v8213_v30, %v8228_v38  ;;  %v2921_v35 = vrot.slane %v2919_v33, 4  ;;  %v2924_v24 = vrot.slane %v2922_v25, 5  ;;  %v2932_v2 = vshrl.u32 %v6664_v49, 16  ;;  %v6654_v33 = vld [vmem:[#allocation2 + $0xa8] sm:$0xff]   ;;  %v4912_v25 = vld [vmem:[#allocation2 + $0x84] sm:$0xe] }
 0x158   : > { %6268 = vmatprep.mubr.msk.bf16.mxu0 %vm830_vm4, %v5805_v43  ;;  %v2907_v56 = vsel %vm6970_vm12, %v2902_v34, %v7553_v48  ;;  %v8241_v61 = vrot.slane %v2928_v27, 5  ;;  %v2943_v37 = vshrl.u32 %v2663_v57, 16  ;;  %v2946_v13 = vshll.u32 %v2663_v57, 16  ;;  %v2666_v57 = vld [vmem:[#allocation2 + $0x9c] sm:$0xf] }
 0x159   : > { %6119 = vmatmul.mubr.msk.bf16.gmra.mrb[20].mxu1 %vm830_vm4, %v6652_v44  ;;  %v2888_v14 = vrot.slane %v2887_v7, 4  ;;  %v8244_v53 = vcombine.low %v2907_v56, %v2917_v39  ;;  %v2934_v18 = vrot.slane %v2932_v2, 4  ;;  %v2938_v0 = vshll.u32 %v6665_v17, 16  ;;  %v6668_v17 = vld [vmem:[#allocation2 + $0xa0] sm:$0xf] }
 0x15a   : > { %6122 = vmatprep.mubr.msk.bf16.mxu1 %vm830_vm4, %v6653_v8  ;;  %v2952_v4 = vshll.u32 %v6666_v51, 16  ;;  %v2956_v43 = vshrl.u32 %v6666_v51, 16  ;;  %v5806_v5 = vcombine.low %v8139_v3, %v8186_v42  ;;  %v5807_v48 = vcombine.low %v8147_v6, %v8205_v47  ;;  %v6655_v8 = vld [vmem:[#allocation2 + $0xb4] sm:$0xff]   ;;  %v4915_v38 = vld [vmem:[#allocation2 + $0xa8] sm:$0xe] }
 0x15b   : > { %v2925_v58 = vor.u32 %v2924_v24, %v2921_v35  ;;  %v2945_v41 = vrot.slane %v2943_v37, 4  ;;  %v2935_v44 = vor.u32 %v2934_v18, %v8241_v61  ;;  %v2948_v39 = vrot.slane %v2946_v13, 5  ;;  %v6667_v24 = vld [vmem:[#allocation2 + $0x98] sm:$0x1] }
 0x15c   : > { %v5797_v26 = vrot.slane %v4911_v36, 9  ;;  %v5025_v9 = vrot.slane %v7917_v63, 5  ;;  %v2883_v7 = vsel %vm6970_vm12, %v8222_v60, %v8190_v54  ;;  %v2893_v3 = vsel %vm6970_vm12, %v2888_v14, %v8216_v29 }
 0x15d   : > { %v2940_v6 = vrot.slane %v2938_v0, 5  ;;  %v5028_v42 = vrot.slane %v7943_v50, 5  ;;  %v8260_v47 = vrot.slane %v2952_v4, 5  ;;  %v2958_v49 = vrot.slane %v2956_v43, 4  ;;  %v2669_v43 = vld [vmem:[#allocation2 + $0xa8] sm:$0xf] }
 0x15e   : > { %v8264_v63 = vsel %vm7135_vm15, %v5797_v26, %v5025_v9  ;;  %v5027_v27 = vrot.slane %v5025_v9, 4  ;;  %v2926_v34 = vrot.slane %v2925_v58, 4  ;;  %v5798_v54 = vrot.slane %v4912_v25, 9 }
 0x15f   : > { %6269 = vmatmul.mubr.msk.bf16.vlgmr.msra.gmra.mrb[0].mxu0 %vm830_vm4, %v5806_v5  ;;  %v5032_v60 = vrot.slane %v7934_v11, 5  ;;  %v5035_v29 = vrot.slane %v7969_v31, 5  ;;  %v2936_v50 = vrot.slane %v2935_v44, 4  ;;  %v2949_v35 = vor.u32 %v2948_v39, %v2945_v41  ;;  %v6656_v5 = vld [vmem:[#allocation2 + $0xc0] sm:$0xff]  }
 0x160   : > { %6272 = vmatprep.mubr.msk.bf16.mxu0 %vm830_vm4, %v5807_v48  ;;  %v2962_v2 = vshll.u32 %v6667_v24, 16  ;;  %v8273_v56 = vsel %vm7135_vm15, %v5027_v27, %v5028_v42  ;;  %v2967_v13 = vshrl.u32 %v2666_v57, 16  ;;  %v2959_v14 = vor.u32 %v2958_v49, %v8260_v47  ;;  %v6670_v49 = vld [vmem:[#allocation2 + $0xac] sm:$0xf] }
 0x161   : > { %6123 = vmatmul.mubr.msk.bf16.gmra.mrb[24].mxu1 %vm830_vm4, %v6654_v33  ;;  %v5813_v37 = vcombine.low %v8264_v63, %v8273_v56  ;;  %v8280_v11 = vsel %vm7135_vm15, %v5798_v54, %v5032_v60  ;;  %v5034_v31 = vrot.slane %v5032_v60, 4  ;;  %v2970_v18 = vshll.u32 %v2666_v57, 16  ;;  %v4913_v54 = vld [vmem:[#allocation2 + $0x90] sm:$0xe] }
 0x162   : > { %6126 = vmatprep.mubr.msk.bf16.mxu1 %vm830_vm4, %v6655_v8  ;;  %v2976_v0 = vshll.u32 %v6668_v17, 16  ;;  %v2980_v36 = vshrl.u32 %v6668_v17, 16  ;;  %v5653_v51 = vcombine.low %v2883_v7, %v2893_v3  ;;  %v2931_v48 = vsel %vm6970_vm12, %v2926_v34, %v8241_v61  ;;  %v4914_v61 = vld [vmem:[#allocation2 + $0x9c] sm:$0xe] }
 0x163   : > { %v8285_v4 = vsel %vm7135_vm15, %v5034_v31, %v5035_v29  ;;  %v2941_v58 = vsel %vm6970_vm12, %v2936_v50, %v2940_v6  ;;  %v8292_v41 = vrot.slane %v2949_v35, 4  ;;  %v2969_v44 = vrot.slane %v2967_v13, 4  ;;  %v6669_v6 = vld [vmem:[#allocation2 + $0xa4] sm:$0x1]  ;;  %v2672_v50 = vld [vmem:[#allocation2 + $0xb4] sm:$0xf] }
 0x164   : > { %v5814_v33 = vcombine.low %v8280_v11, %v8285_v4  ;;  %v2972_v39 = vrot.slane %v2970_v18, 5  ;;  %v8296_v26 = vrot.slane %v2976_v0, 5  ;;  %v2982_v9 = vrot.slane %v2980_v36, 4 }
 0x165   : > { %v8298_v25 = vrot.slane %v2959_v14, 4  ;;  %v8300_v8 = vrot.slane %v2962_v2, 5  ;;  %v2991_v7 = vshrl.u32 %v2669_v43, 16  ;;  %v2994_v3 = vshll.u32 %v2669_v43, 16 }
 0x166   : > { %v2986_v42 = vshll.u32 %v6669_v6, 16  ;;  %v3000_v27 = vshll.u32 %v6670_v49, 16  ;;  %v3004_v57 = vshrl.u32 %v6670_v49, 16  ;;  %v5655_v34 = vcombine.low %v2931_v48, %v2941_v58  ;;  %v8576_v48 = vld [vmem:[#allocation3_spill] sm:$0xff]  ;;  %v6673_v6 = vld [vmem:[#allocation2 + $0xc4] sm:$0xf] }
 0x167   : > { %6273 = vmatmul.mubr.msk.bf16.gmra.mrb[4].mxu0 %vm830_vm4, %v5808_v23  ;;  %v2955_v21 = vsel %vm6970_vm12, %v8292_v41, %v8260_v47  ;;  %v2973_v62 = vor.u32 %v2972_v39, %v2969_v44  ;;  %v2983_v23 = vor.u32 %v2982_v9, %v8296_v26  ;;  %v5800_v60 = vrot.slane %v4914_v61, 9  ;;  %v6671_v47 = vld [vmem:[#allocation2 + $0xb0] sm:$0x1]  ;;  %v6672_v44 = vld [vmem:[#allocation2 + $0xb8] sm:$0xf] }
 0x168   : > { %6276 = vmatprep.mubr.msk.bf16.mxu0 %vm830_vm4, %v5809_v19  ;;  %v2965_v10 = vsel %vm6970_vm12, %v8298_v25, %v8300_v8  ;;  %v2993_v15 = vrot.slane %v2991_v7, 4  ;;  %v2996_v19 = vrot.slane %v2994_v3, 5  ;;  %v5046_v29 = vrot.slane %v7988_v28, 5  ;;  %v2675_v28 = vld [vmem:[#allocation2 + $0xc0] sm:$0xf] }
 0x169   : > { %6127 = vmatmul.mubr.msk.bf16.gmra.mrb[28].mxu1 %vm830_vm4, %v6656_v5  ;;  %v2988_v35 = vrot.slane %v2986_v42, 5  ;;  %v8322_v24 = vrot.slane %v3000_v27, 5  ;;  %v3006_v2 = vrot.slane %v3004_v57, 4  ;;  %v3010_v31 = vshll.u32 %v6671_v47, 16 }
 0x16a   : > { %6148 = vmatprep.mubr.msk.bf16.mxu1 %vm830_vm4, %v5653_v51  ;;  %v5799_v13 = vrot.slane %v4913_v54, 9  ;;  %v8326_v14 = vsel %vm7135_vm15, %v5800_v60, %v5046_v29  ;;  %v5048_v18 = vrot.slane %v5046_v29, 4  ;;  %v5049_v17 = vrot.slane %v8012_v16, 5  ;;  %v8577_v54 = vld [vmem:[#allocation4_spill] sm:$0xff] }
 0x16b   : > { %v2974_v0 = vrot.slane %v2973_v62, 4  ;;  %v2984_v36 = vrot.slane %v2983_v23, 4  ;;  %v3015_v51 = vshrl.u32 %v2672_v50, 16  ;;  %v3018_v43 = vshll.u32 %v2672_v50, 16 }
 0x16c   : > { %v2997_v5 = vor.u32 %v2996_v19, %v2993_v15  ;;  %v5039_v58 = vrot.slane %v8576_v48, 5  ;;  %v8332_v41 = vsel %vm7135_vm15, %v5048_v18, %v5049_v17  ;;  %v3024_v39 = vshll.u32 %v6672_v44, 16 }
 0x16d   : > { %v3007_v16 = vor.u32 %v3006_v2, %v8322_v24  ;;  %v5816_v9 = vcombine.low %v8326_v14, %v8332_v41  ;;  %v3017_v25 = vrot.slane %v3015_v51, 4  ;;  %v3020_v8 = vrot.slane %v3018_v43, 5 }
 0x16e   : > { %v3012_v7 = vrot.slane %v3010_v31, 5  ;;  %v3026_v3 = vrot.slane %v3024_v39, 5  ;;  %v3028_v22 = vshrl.u32 %v6672_v44, 16  ;;  %v3039_v52 = vshrl.u32 %v2675_v28, 16 }
 0x16f   : > { %6277 = vmatmul.mubr.msk.bf16.gmra.mrb[8].mxu0 %vm830_vm4, %v5810_v1  ;;  %v2979_v1 = vsel %vm6970_vm12, %v2974_v0, %v8296_v26  ;;  %v3042_v61 = vshll.u32 %v2675_v28, 16  ;;  %v3048_v42 = vshll.u32 %v6673_v6, 16  ;;  %v3052_v49 = vshrl.u32 %v6673_v6, 16  ;;  %v6675_v0 = vld [vmem:[#allocation2 + $0xc8] sm:$0x1] }
 0x170   : > { %6280 = vmatprep.mubr.msk.bf16.mxu0 %vm830_vm4, %v5811_v55  ;;  %v3021_v46 = vor.u32 %v3020_v8, %v3017_v25  ;;  %v3030_v20 = vrot.slane %v3028_v22, 4  ;;  %v6674_v55 = vld [vmem:[#allocation2 + $0xbc] sm:$0x1]  ;;  %v2998_v57 = vrot.slane %v2997_v5, 4  ;;  %v3008_v62 = vrot.slane %v3007_v16, 4 }
 0x171   : > { %6149 = vmatmul.mubr.msk.bf16.vlgmr.msra.gmra.mrb[16].mxu1 %vm830_vm4, %v8244_v53  ;;  %v2989_v53 = vsel %vm6970_vm12, %v2984_v36, %v2988_v35  ;;  %v3034_v27 = vshll.u32 %v6674_v55, 16  ;;  %v5041_v23 = vrot.slane %v5039_v58, 4  ;;  %v5656_v60 = vcombine.low %v2955_v21, %v2965_v10  ;;  %v8579_v16 = vld [vmem:[#allocation7_spill] sm:$0xff] }
 0x172   : > { %6152 = vmatprep.mubr.msk.bf16.mxu1 %vm830_vm4, %v5655_v34  ;;  %v5042_v34 = vrot.slane %v8577_v54, 5  ;;  %v3031_v15 = vor.u32 %v3030_v20, %v3026_v3  ;;  %v3041_v19 = vrot.slane %v3039_v52, 4  ;;  %v3044_v26 = vrot.slane %v3042_v61, 5  ;;  %v8580_v61 = vld [vmem:[#allocation6_spill] sm:$0xff] }
 0x173   : > { %v5657_v29 = vcombine.low %v2979_v1, %v2989_v53  ;;  %v3050_v50 = vrot.slane %v3048_v42, 5  ;;  %v3054_v2 = vrot.slane %v3052_v49, 4  ;;  %v5040_v47 = vsel %vm7135_vm15, %v5799_v13, %v5039_v58  ;;  %v4916_v1 = vld [vmem:[#allocation2 + $0xb4] sm:$0xe]  ;;  %v8581_v49 = vld [vmem:[#allocation9_spill] sm:$0xff] }
 0x174   : > { %v3022_v35 = vrot.slane %v3021_v46, 4  ;;  %v3032_v31 = vrot.slane %v3031_v15, 4  ;;  %v3036_v18 = vrot.slane %v3034_v27, 5  ;;  %v3003_v21 = vsel %vm6970_vm12, %v2998_v57, %v8322_v24  ;;  %v4918_v24 = vld [vmem:[#allocation2 + $0xcc] sm:$0xe] }
 0x175   : > { %v3013_v10 = vsel %vm6970_vm12, %v3008_v62, %v3012_v7  ;;  %v5043_v17 = vsel %vm7135_vm15, %v5041_v23, %v5042_v34  ;;  %v3058_v13 = vshll.u32 %v6675_v0, 16  ;;  %v3045_v30 = vor.u32 %v3044_v26, %v3041_v19  ;;  %v4917_v46 = vld [vmem:[#allocation2 + $0xc0] sm:$0xe] }
 0x176   : > { %v3055_v51 = vor.u32 %v3054_v2, %v3050_v50  ;;  %v5658_v43 = vcombine.low %v3003_v21, %v3013_v10  ;;  %v5815_v28 = vcombine.low %v5040_v47, %v5043_v17  ;;  %v3027_v5 = vsel %vm6970_vm12, %v3022_v35, %v3026_v3  ;;  %v8582_v62 = vld [vmem:[#allocation8_spill] sm:$0xff] }
 0x177   : > { %6281 = vmatmul.mubr.msk.bf16.gmra.mrb[12].mxu0 %vm830_vm4, %v5812_v45  ;;  %v8578_v45 = vld [vmem:[#allocation5_spill] sm:$0xff]  ;;  %v3037_v48 = vsel %vm6970_vm12, %v3032_v31, %v3036_v18  ;;  %v3060_v58 = vrot.slane %v3058_v13, 5  ;;  %v5801_v63 = vrot.slane %v4915_v38, 9  ;;  %v5804_v56 = vrot.slane %v4918_v24, 9 }
 0x178   : > { %6284 = vmatprep.mubr.msk.bf16.mxu0 %vm830_vm4, %v5813_v37  ;;  %v5053_v36 = vrot.slane %v8578_v45, 5  ;;  %v5074_v37 = vrot.slane %v8082_v12, 5  ;;  %v3046_v44 = vrot.slane %v3045_v30, 4  ;;  %v5056_v25 = vrot.slane %v8579_v16, 5 }
 0x179   : > { %6153 = vmatmul.mubr.msk.bf16.gmra.mrb[20].mxu1 %vm830_vm4, %v5656_v60  ;;  %v5077_v8 = vrot.slane %v8092_v32, 5  ;;  %v5659_v7 = vcombine.low %v3027_v5, %v3037_v48  ;;  %v3056_v22 = vrot.slane %v3055_v51, 4  ;;  %v5060_v6 = vrot.slane %v8580_v61, 5  ;;  %v8583_v60 = vld [vmem:[#allocation10_spill] sm:$0xff] }
 0x17a   : > { %6156 = vmatprep.mubr.msk.bf16.mxu1 %vm830_vm4, %v5657_v29  ;;  %v5055_v39 = vrot.slane %v5053_v36, 4  ;;  %v5075_v52 = vsel %vm7135_vm15, %v5804_v56, %v5074_v37  ;;  %v5076_v3 = vrot.slane %v5074_v37, 4  ;;  %v5054_v32 = vsel %vm7135_vm15, %v5801_v63, %v5053_v36  ;;  %v8432_v36 = vld [vmem:[%s8545_s2] ss:$0 sm:$0xff] }
 0x17b   : > { %v3051_v11 = vsel %vm6970_vm12, %v3046_v44, %v3050_v50  ;;  %v3061_v4 = vsel %vm6970_vm12, %v3056_v22, %v3060_v58  ;;  %v5067_v53 = vrot.slane %v8581_v49, 5  ;;  %v5802_v20 = vrot.slane %v4916_v1, 9 }
 0x17c   : > { %v5078_v12 = vsel %vm7135_vm15, %v5076_v3, %v5077_v8  ;;  %v5660_v55 = vcombine.low %v3051_v11, %v3061_v4  ;;  %v5062_v57 = vrot.slane %v5060_v6, 4  ;;  %v5063_v23 = vrot.slane %v8582_v62, 5 }
 0x17d   : > { %v5820_v42 = vcombine.low %v5075_v52, %v5078_v12  ;;  %v5803_v54 = vrot.slane %v4917_v46, 9  ;;  %v5069_v34 = vrot.slane %v5067_v53, 4  ;;  %v5070_v15 = vrot.slane %v8583_v60, 5 }
 0x17e   : > { %v5061_v59 = vsel %vm7135_vm15, %v5802_v20, %v5060_v6  ;;  %v5064_v19 = vsel %vm7135_vm15, %v5062_v57, %v5063_v23  ;;  %vm5403_vm0 = vcmask 64512  }
 0x17f   : > { %6285 = vmatmul.mubr.msk.bf16.gmra.mrb[16].mxu0 %vm830_vm4, %v5814_v33  ;;  %v5057_v33 = vsel %vm7135_vm15, %v5055_v39, %v5056_v25  ;;  %v5068_v26 = vsel %vm7135_vm15, %v5803_v54, %v5067_v53  ;;  %v5071_v29 = vsel %vm7135_vm15, %v5069_v34, %v5070_v15  ;;  %v5818_v50 = vcombine.low %v5061_v59, %v5064_v19 }
 0x180   : > { %6288 = vmatprep.mubr.msk.bf16.mxu0 %vm830_vm4, %v5815_v28  ;;  %v5817_v27 = vcombine.low %v5054_v32, %v5057_v33  ;;  %v5819_v14 = vcombine.low %v5068_v26, %v5071_v29 }
 0x181   : > { %6157 = vmatmul.mubr.msk.bf16.gmra.mrb[24].mxu1 %vm830_vm4, %v5658_v43 }
 0x182   : > { %6160 = vmatprep.mubr.msk.bf16.mxu1 %vm830_vm4, %v5659_v7 }
 0x187   : > { %6289 = vmatmul.mubr.msk.bf16.gmra.mrb[20].mxu0 %vm830_vm4, %v5816_v9 }
 0x188   : > { %6292 = vmatprep.mubr.msk.bf16.mxu0 %vm830_vm4, %v5817_v27 }
 0x189   : > { %6161 = vmatmul.mubr.msk.bf16.gmra.mrb[28].mxu1 %vm830_vm4, %v5660_v55 }
 0x18f   : > { %6293 = vmatmul.mubr.msk.bf16.gmra.mrb[24].mxu0 %vm830_vm4, %v5818_v50 }
 0x190   : > { %6296 = vmatprep.mubr.msk.bf16.mxu0 %vm830_vm4, %v5819_v14 }
 0x197   : > { %6297 = vmatmul.mubr.msk.bf16.gmra.mrb[28].mxu0 %vm830_vm4, %v5820_v42 }
 0x204   : > { %v6100_v41 = vpop.f32.mrb[0].mxu1 }
 0x205   : > { %v2471_v9 = vpop.f32.mrb[1].mxu1  ;;  %v6302_v24 = vadd.f32 %v6100_v41, %v8432_v36 }
 0x206   : > { %v6101_v2 = vpop.f32.mrb[2].mxu1  ;;  %v6304_v51 = vadd.f32 %v8432_v36, %v2471_v9 }
 0x207   : > { %v2474_v47 = vpop.f32.mrb[3].mxu1  ;;  %v6306_v28 = vadd.f32 %v6101_v2, %v8432_v36 }
 0x208   : > { %v6308_v58 = vadd.f32 %v8432_v36, %v2474_v47 }
 0x20c   : > { %v6104_v35 = vpop.f32.mrb[4].mxu1 }
 0x20d   : > { %v2487_v31 = vpop.f32.mrb[5].mxu1  ;;  %v6310_v22 = vadd.f32 %v6104_v35, %v8432_v36 }
 0x20e   : > { %v6105_v18 = vpop.f32.mrb[6].mxu1  ;;  %v6312_v52 = vadd.f32 %v8432_v36, %v2487_v31 }
 0x20f   : > { %v2490_v21 = vpop.f32.mrb[7].mxu1  ;;  %v6314_v12 = vadd.f32 %v6105_v18, %v8432_v36 }
 0x210   : > { %v6316_v61 = vadd.f32 %v8432_v36, %v2490_v21 }
 0x214   : > { %v6108_v10 = vpop.f32.mrb[8].mxu1 }
 0x215   : > { %v2503_v40 = vpop.f32.mrb[9].mxu1  ;;  %v6318_v55 = vadd.f32 %v6108_v10, %v8432_v36 }
 0x216   : > { %v6109_v17 = vpop.f32.mrb[10].mxu1  ;;  %v6320_v27 = vadd.f32 %v8432_v36, %v2503_v40 }
 0x217   : > { %v2506_v0 = vpop.f32.mrb[11].mxu1  ;;  %v6322_v62 = vadd.f32 %v6109_v17, %v8432_v36 }
 0x218   : > { %v6324_v60 = vadd.f32 %v8432_v36, %v2506_v0 }
 0x21c   : > { %v8421_v13 = vpop.f32.mrb[12].mxu1 }
 0x21d   : > { %v8423_v30 = vpop.f32.mrb[13].mxu1  ;;  %v6326_v31 = vadd.f32 %v8421_v13, %v8432_v36 }
 0x21e   : > { %v8425_v38 = vpop.f32.mrb[14].mxu1  ;;  %v6328_v18 = vadd.f32 %v8432_v36, %v8423_v30 }
 0x21f   : > { %v8427_v45 = vpop.f32.mrb[15].mxu1  ;;  %v6330_v10 = vadd.f32 %v8425_v38, %v8432_v36 }
 0x232   : > { %v6270_v43 = vpop.f32.mrb[0].mxu0 }
 0x233   : > { %v6303_v5 = vadd.f32 %v6302_v24, %v6270_v43  ;;  %v5212_v48 = vpop.f32.mrb[1].mxu0  ;;  %v6332_v24 = vadd.f32 %v8432_v36, %v8427_v45 }
 0x234   : > { %v6305_v63 = vadd.f32 %v6304_v51, %v5212_v48  ;;  %v6271_v56 = vpop.f32.mrb[2].mxu0 }
 0x235   : > { %v5373_v37 = vmax.f32 %v6303_v5, 0.0  ;;  %v6307_v44 = vadd.f32 %v6306_v28, %v6271_v56  ;;  %v5215_v39 = vpop.f32.mrb[3].mxu0 }
 0x236   : > { %v5371_v16 = vmax.f32 %v6305_v63, 0.0  ;;  %v6309_v25 = vadd.f32 %v6308_v58, %v5215_v39 }
 0x237   : > { %5406 = vst.msk [vmem:[%s8442_s18 + $0x10] sm:$0xff] %vm5403_vm0, %v5373_v37  ;;  %v5374_v8 = vmax.f32 %v6307_v44, 0.0 }
 0x238   : > { %5404 = vst.msk [vmem:[%s8442_s18] sm:$0xff] %vm5403_vm0, %v5371_v16  ;;  %v5372_v7 = vmax.f32 %v6309_v25, 0.0 }
 0x239   : > { %5407 = vst.msk [vmem:[%s8442_s18 + $0x18] sm:$0xff] %vm5403_vm0, %v5374_v8 }
 0x23a   : > { %5405 = vst.msk [vmem:[%s8442_s18 + $0x8] sm:$0xff] %vm5403_vm0, %v5372_v7  ;;  %v6274_v3 = vpop.f32.mrb[4].mxu0 }
 0x23b   : > { %v6311_v32 = vadd.f32 %v6310_v22, %v6274_v3  ;;  %v5228_v1 = vpop.f32.mrb[5].mxu0 }
 0x23c   : > { %v6313_v6 = vadd.f32 %v6312_v52, %v5228_v1  ;;  %v6275_v42 = vpop.f32.mrb[6].mxu0 }
 0x23d   : > { %v5377_v11 = vmax.f32 %v6311_v32, 0.0  ;;  %v6315_v4 = vadd.f32 %v6314_v12, %v6275_v42  ;;  %v5231_v33 = vpop.f32.mrb[7].mxu0 }
 0x23e   : > { %v5375_v49 = vmax.f32 %v6313_v6, 0.0  ;;  %v6317_v53 = vadd.f32 %v6316_v61, %v5231_v33 }
 0x23f   : > { %5410 = vst.msk [vmem:[%s8442_s18 + $0x30] sm:$0xff] %vm5403_vm0, %v5377_v11  ;;  %v5378_v46 = vmax.f32 %v6315_v4, 0.0 }
 0x240   : > { %5408 = vst.msk [vmem:[%s8442_s18 + $0x20] sm:$0xff] %vm5403_vm0, %v5375_v49  ;;  %v5376_v20 = vmax.f32 %v6317_v53, 0.0 }
 0x241   : > { %5411 = vst.msk [vmem:[%s8442_s18 + $0x38] sm:$0xff] %vm5403_vm0, %v5378_v46 }
 0x242   : > { %5409 = vst.msk [vmem:[%s8442_s18 + $0x28] sm:$0xff] %vm5403_vm0, %v5376_v20  ;;  %v6278_v57 = vpop.f32.mrb[8].mxu0 }
 0x243   : > { %v6319_v23 = vadd.f32 %v6318_v55, %v6278_v57  ;;  %v5244_v54 = vpop.f32.mrb[9].mxu0 }
 0x244   : > { %v6150_v34 = vpop.f32.mrb[16].mxu1  ;;  %v6321_v15 = vadd.f32 %v6320_v27, %v5244_v54  ;;  %v6279_v59 = vpop.f32.mrb[10].mxu0 }
 0x245   : > { %v3259_v19 = vpop.f32.mrb[17].mxu1  ;;  %v5381_v26 = vmax.f32 %v6319_v23, 0.0  ;;  %v6323_v29 = vadd.f32 %v6322_v62, %v6279_v59  ;;  %v5247_v50 = vpop.f32.mrb[11].mxu0  ;;  %v6334_v45 = vadd.f32 %v6150_v34, %v8432_v36 }
 0x246   : > { %v6151_v14 = vpop.f32.mrb[18].mxu1  ;;  %v5379_v41 = vmax.f32 %v6321_v15, 0.0  ;;  %v6325_v9 = vadd.f32 %v6324_v60, %v5247_v50  ;;  %v6336_v44 = vadd.f32 %v8432_v36, %v3259_v19 }
 0x247   : > { %v3262_v2 = vpop.f32.mrb[19].mxu1  ;;  %5414 = vst.msk [vmem:[%s8442_s18 + $0x50] sm:$0xff] %vm5403_vm0, %v5381_v26  ;;  %v5382_v47 = vmax.f32 %v6323_v29, 0.0  ;;  %v6338_v16 = vadd.f32 %v6151_v14, %v8432_v36 }
 0x248   : > { %5412 = vst.msk [vmem:[%s8442_s18 + $0x40] sm:$0xff] %vm5403_vm0, %v5379_v41  ;;  %v5380_v35 = vmax.f32 %v6325_v9, 0.0  ;;  %v6340_v22 = vadd.f32 %v8432_v36, %v3262_v2 }
 0x249   : > { %5415 = vst.msk [vmem:[%s8442_s18 + $0x58] sm:$0xff] %vm5403_vm0, %v5382_v47 }
 0x24a   : > { %5413 = vst.msk [vmem:[%s8442_s18 + $0x48] sm:$0xff] %vm5403_vm0, %v5380_v35  ;;  %v6282_v21 = vpop.f32.mrb[12].mxu0 }
 0x24b   : > { %v6327_v40 = vadd.f32 %v6326_v31, %v6282_v21  ;;  %v5260_v17 = vpop.f32.mrb[13].mxu0 }
 0x24c   : > { %v6154_v0 = vpop.f32.mrb[20].mxu1  ;;  %v6329_v13 = vadd.f32 %v6328_v18, %v5260_v17  ;;  %v6283_v51 = vpop.f32.mrb[14].mxu0 }
 0x24d   : > { %v3275_v43 = vpop.f32.mrb[21].mxu1  ;;  %v5385_v30 = vmax.f32 %v6327_v40, 0.0  ;;  %v6331_v28 = vadd.f32 %v6330_v10, %v6283_v51  ;;  %v5263_v5 = vpop.f32.mrb[15].mxu0  ;;  %v6342_v53 = vadd.f32 %v6154_v0, %v8432_v36 }
 0x24e   : > { %v6155_v48 = vpop.f32.mrb[22].mxu1  ;;  %v5383_v58 = vmax.f32 %v6329_v13, 0.0  ;;  %v6333_v63 = vadd.f32 %v6332_v24, %v5263_v5  ;;  %v6344_v46 = vadd.f32 %v8432_v36, %v3275_v43 }
 0x24f   : > { %v3278_v56 = vpop.f32.mrb[23].mxu1  ;;  %5418 = vst.msk [vmem:[%s8442_s18 + $0x70] sm:$0xff] %vm5403_vm0, %v5385_v30  ;;  %v5386_v38 = vmax.f32 %v6331_v28, 0.0  ;;  %v6346_v55 = vadd.f32 %v6155_v48, %v8432_v36 }
 0x250   : > { %5416 = vst.msk [vmem:[%s8442_s18 + $0x60] sm:$0xff] %vm5403_vm0, %v5383_v58  ;;  %v5384_v37 = vmax.f32 %v6333_v63, 0.0  ;;  %v6348_v23 = vadd.f32 %v8432_v36, %v3278_v56 }
 0x251   : > { %5419 = vst.msk [vmem:[%s8442_s18 + $0x78] sm:$0xff] %vm5403_vm0, %v5386_v38 }
 0x252   : > { %5417 = vst.msk [vmem:[%s8442_s18 + $0x68] sm:$0xff] %vm5403_vm0, %v5384_v37  ;;  %v6286_v39 = vpop.f32.mrb[16].mxu0 }
 0x253   : > { %v6335_v25 = vadd.f32 %v6334_v45, %v6286_v39  ;;  %v5276_v8 = vpop.f32.mrb[17].mxu0 }
 0x254   : > { %v6158_v7 = vpop.f32.mrb[24].mxu1  ;;  %v6337_v52 = vadd.f32 %v6336_v44, %v5276_v8  ;;  %v6287_v3 = vpop.f32.mrb[18].mxu0 }
 0x255   : > { %v3291_v12 = vpop.f32.mrb[25].mxu1  ;;  %v5389_v32 = vmax.f32 %v6335_v25, 0.0  ;;  %v6339_v1 = vadd.f32 %v6338_v16, %v6287_v3  ;;  %v5279_v61 = vpop.f32.mrb[19].mxu0  ;;  %v6350_v2 = vadd.f32 %v6158_v7, %v8432_v36 }
 0x256   : > { %v6159_v6 = vpop.f32.mrb[26].mxu1  ;;  %v5387_v42 = vmax.f32 %v6337_v52, 0.0  ;;  %v6341_v11 = vadd.f32 %v6340_v22, %v5279_v61  ;;  %v6352_v47 = vadd.f32 %v8432_v36, %v3291_v12 }
 0x257   : > { %v3294_v4 = vpop.f32.mrb[27].mxu1  ;;  %5422 = vst.msk [vmem:[%s8442_s18 + $0x90] sm:$0xff] %vm5403_vm0, %v5389_v32  ;;  %v5390_v33 = vmax.f32 %v6339_v1, 0.0  ;;  %v6354_v31 = vadd.f32 %v6159_v6, %v8432_v36 }
 0x258   : > { %5420 = vst.msk [vmem:[%s8442_s18 + $0x80] sm:$0xff] %vm5403_vm0, %v5387_v42  ;;  %v5388_v49 = vmax.f32 %v6341_v11, 0.0  ;;  %v6356_v10 = vadd.f32 %v8432_v36, %v3294_v4 }
 0x259   : > { %5423 = vst.msk [vmem:[%s8442_s18 + $0x98] sm:$0xff] %vm5403_vm0, %v5390_v33 }
 0x25a   : > { %5421 = vst.msk [vmem:[%s8442_s18 + $0x88] sm:$0xff] %vm5403_vm0, %v5388_v49  ;;  %v6290_v20 = vpop.f32.mrb[20].mxu0 }
 0x25b   : > { %v6343_v27 = vadd.f32 %v6342_v53, %v6290_v20  ;;  %v5292_v57 = vpop.f32.mrb[21].mxu0 }
 0x25c   : > { %v6162_v62 = vpop.f32.mrb[28].mxu1  ;;  %v6345_v54 = vadd.f32 %v6344_v46, %v5292_v57  ;;  %v6291_v34 = vpop.f32.mrb[22].mxu0 }
 0x25d   : > { %v3307_v60 = vpop.f32.mrb[29].mxu1  ;;  %v5393_v15 = vmax.f32 %v6343_v27, 0.0  ;;  %v6347_v59 = vadd.f32 %v6346_v55, %v6291_v34  ;;  %v5295_v19 = vpop.f32.mrb[23].mxu0  ;;  %v6358_v5 = vadd.f32 %v6162_v62, %v8432_v36 }
 0x25e   : > { %v6163_v26 = vpop.f32.mrb[30].mxu1  ;;  %v5391_v29 = vmax.f32 %v6345_v54, 0.0  ;;  %v6349_v50 = vadd.f32 %v6348_v23, %v5295_v19  ;;  %v6360_v48 = vadd.f32 %v8432_v36, %v3307_v60 }
 0x25f   : > { %v3310_v14 = vpop.f32.mrb[31].mxu1  ;;  %5426 = vst.msk [vmem:[%s8442_s18 + $0xb0] sm:$0xff] %vm5403_vm0, %v5393_v15  ;;  %v5394_v41 = vmax.f32 %v6347_v59, 0.0  ;;  %v6362_v63 = vadd.f32 %v6163_v26, %v8432_v36 }
 0x260   : > { %5424 = vst.msk [vmem:[%s8442_s18 + $0xa0] sm:$0xff] %vm5403_vm0, %v5391_v29  ;;  %v5392_v9 = vmax.f32 %v6349_v50, 0.0  ;;  %v6364_v37 = vadd.f32 %v8432_v36, %v3310_v14 }
 0x261   : > { %5427 = vst.msk [vmem:[%s8442_s18 + $0xb8] sm:$0xff] %vm5403_vm0, %v5394_v41 }
 0x262   : > { %5425 = vst.msk [vmem:[%s8442_s18 + $0xa8] sm:$0xff] %vm5403_vm0, %v5392_v9  ;;  %v6294_v35 = vpop.f32.mrb[24].mxu0 }
 0x263   : > { %v6351_v18 = vadd.f32 %v6350_v2, %v6294_v35  ;;  %v5308_v21 = vpop.f32.mrb[25].mxu0 }
 0x264   : > { %v6353_v40 = vadd.f32 %v6352_v47, %v5308_v21  ;;  %v6295_v17 = vpop.f32.mrb[26].mxu0 }
 0x265   : > { %v5397_v0 = vmax.f32 %v6351_v18, 0.0  ;;  %v6355_v24 = vadd.f32 %v6354_v31, %v6295_v17  ;;  %v5311_v13 = vpop.f32.mrb[27].mxu0 }
 0x266   : > { %v5395_v51 = vmax.f32 %v6353_v40, 0.0  ;;  %v6357_v43 = vadd.f32 %v6356_v10, %v5311_v13 }
 0x267   : > { %5430 = vst.msk [vmem:[%s8442_s18 + $0xd0] sm:$0xff] %vm5403_vm0, %v5397_v0  ;;  %v5398_v30 = vmax.f32 %v6355_v24, 0.0 }
 0x268   : > { %5428 = vst.msk [vmem:[%s8442_s18 + $0xc0] sm:$0xff] %vm5403_vm0, %v5395_v51  ;;  %v5396_v28 = vmax.f32 %v6357_v43, 0.0 }
 0x269   : > { %5431 = vst.msk [vmem:[%s8442_s18 + $0xd8] sm:$0xff] %vm5403_vm0, %v5398_v30 }
 0x26a   : > { %5429 = vst.msk [vmem:[%s8442_s18 + $0xc8] sm:$0xff] %vm5403_vm0, %v5396_v28  ;;  %v6298_v58 = vpop.f32.mrb[28].mxu0 }
 0x26b   : > { %v6359_v56 = vadd.f32 %v6358_v5, %v6298_v58  ;;  %v5324_v38 = vpop.f32.mrb[29].mxu0 }
 0x26c   : > { %v6361_v45 = vadd.f32 %v6360_v48, %v5324_v38  ;;  %v6299_v44 = vpop.f32.mrb[30].mxu0 }
 0x26d   : > { %v5401_v39 = vmax.f32 %v6359_v56, 0.0  ;;  %v6363_v16 = vadd.f32 %v6362_v63, %v6299_v44  ;;  %v5327_v25 = vpop.f32.mrb[31].mxu0 }
 0x26e   : > { %v5399_v8 = vmax.f32 %v6361_v45, 0.0  ;;  %v6365_v7 = vadd.f32 %v6364_v37, %v5327_v25 }
 0x26f   : > { %5434 = vst.msk [vmem:[%s8442_s18 + $0xf0] sm:$0xff] %vm5403_vm0, %v5401_v39  ;;  %v5402_v22 = vmax.f32 %v6363_v16, 0.0 }
 0x270   : > { %5432 = vst.msk [vmem:[%s8442_s18 + $0xe0] sm:$0xff] %vm5403_vm0, %v5399_v8  ;;  %v5400_v52 = vmax.f32 %v6365_v7, 0.0 }
 0x271   : > { %5435 = vst.msk [vmem:[%s8442_s18 + $0xf8] sm:$0xff] %vm5403_vm0, %v5402_v22 }
 0x272   : > { %5433 = vst.msk [vmem:[%s8442_s18 + $0xe8] sm:$0xff] %vm5403_vm0, %v5400_v52 }
 0x273 PF: > { %s13_s12 = sadd.s32 1, %s6682_s12  }
 0x274   : > { %p10_p4 = scmp.ge.s32.totalorder %s13_s12, 4  }
 0x276   :  { %12 = sbr.rel (!%p10_p4) target bundleno = 1 (0x1), region = 64 }

</bundles_post_ra>
